<compile_context>
chip_gen: v5e
topology: v5e:2x2
jax: 0.10.0
libtpu: 0.0.40
codegen_flags: <defaults>
</compile_context>

<pallas_src>
import functools

import jax
import jax.numpy as jnp
from jax.experimental import pallas as pl
from jax.experimental.pallas import tpu as pltpu


# ----------------------------------------------------------------------------
# Kernel 1: fused backbone stand-in
#   (Nb, H, W, Cin) -> stem 1x1 + ReLU -> depthwise 3x3 + ReLU
#   -> pointwise 1x1 (MXU, bf16) + ReLU -> global average pool -> (Nb, F)
# ----------------------------------------------------------------------------
def _backbone_kernel(x_ref, sw_ref, sb_ref, dw_ref, pw_ref, pb_ref,
                     o_ref, pad_ref, *, H, W, C):
    nb = x_ref.shape[0]
    c_mid = sw_ref.shape[1]

    # ---- stem 1x1 conv over the C (=3) input channels: VPU taps, ReLU ----
    x = x_ref[...].astype(jnp.float32)                    # (nb, H, W, C)
    sw = sw_ref[...]                                      # (C, c_mid)
    h1 = jnp.zeros((nb, H, W, c_mid), jnp.float32)
    for c in range(C):                                    # C is small & static
        h1 = h1 + x[:, :, :, c:c + 1] * sw[c:c + 1, :]
    h1 = jnp.maximum(h1 + sb_ref[...], 0.0)               # (nb, H, W, c_mid)

    # ---- depthwise 3x3 'same' conv + ReLU; halo kept in VMEM scratch ----
    pad_ref[...] = jnp.zeros_like(pad_ref)                # zero halo every step
    pad_ref[:, 1:H + 1, 1:W + 1, :] = h1
    dw = dw_ref[...]                                      # (3, 3, c_mid)
    h2 = jnp.zeros((nb, H, W, c_mid), jnp.float32)
    for ky in range(3):
        for kx in range(3):
            tap = pad_ref[:, ky:ky + H, kx:kx + W, :]     # (nb, H, W, c_mid)
            h2 = h2 + tap * dw[ky, kx:kx + 1, :]
    h2 = jnp.maximum(h2, 0.0)

    # ---- pointwise 1x1 conv (MXU, bf16 in / f32 acc) + ReLU + global pool ----
    h2m = h2.reshape(nb * H * W, c_mid).astype(jnp.bfloat16)
    h3 = jnp.dot(h2m, pw_ref[...], preferred_element_type=jnp.float32)
    h3 = jnp.maximum(h3 + pb_ref[...], 0.0)               # (nb*H*W, F)
    feat_dim = h3.shape[-1]
    feats = jnp.mean(h3.reshape(nb, H * W, feat_dim), axis=1)   # (nb, F)
    o_ref[0] = feats.astype(o_ref.dtype)


def backbone_fused(x_nhwc, stem_w, stem_b, dw_w, pw_w, pw_b, *, nb=4):
    """x_nhwc: (N, H, W, Cin) f32 -> (N, feature_dim) f32."""
    N, H, W, C = x_nhwc.shape
    c_mid = stem_w.shape[1]
    feat_dim = pw_w.shape[1]
    while N % nb:
        nb //= 2
    G = N // nb

    out = pl.pallas_call(
        functools.partial(_backbone_kernel, H=H, W=W, C=C),
        out_shape=jax.ShapeDtypeStruct((G, nb, feat_dim), jnp.float32),
        grid=(G,),
        in_specs=[
            pl.BlockSpec((nb, H, W, C), lambda n: (n, 0, 0, 0)),
            pl.BlockSpec((C, c_mid), lambda n: (0, 0)),
            pl.BlockSpec((1, c_mid), lambda n: (0, 0)),
            pl.BlockSpec((3, 3, c_mid), lambda n: (0, 0, 0)),
            pl.BlockSpec((c_mid, feat_dim), lambda n: (0, 0)),
            pl.BlockSpec((1, feat_dim), lambda n: (0, 0)),
        ],
        out_specs=pl.BlockSpec((1, nb, feat_dim), lambda n: (n, 0, 0)),
        scratch_shapes=[pltpu.VMEM((nb, H + 2, W + 2, c_mid), jnp.float32)],
        compiler_params=pltpu.CompilerParams(
            dimension_semantics=("parallel",)),
    )(x_nhwc, stem_w, stem_b, dw_w, pw_w, pw_b)
    return out.reshape(N, feat_dim)


# ----------------------------------------------------------------------------
# Kernel 2: fused LayerNorm(feature_dim) + Linear(feature_dim -> num_class_pad)
# ----------------------------------------------------------------------------
def _ln_head_kernel(f_ref, g_ref, b_ref, w_ref, hb_ref, o_ref, *, eps):
    x = f_ref[...].astype(jnp.float32)                        # (tn, F)
    mu = jnp.mean(x, axis=-1, keepdims=True)
    var = jnp.mean(jnp.square(x - mu), axis=-1, keepdims=True)  # biased (PyTorch LN)
    xn = (x - mu) * jax.lax.rsqrt(var + eps)
    xn = xn * g_ref[...] + b_ref[...]                         # elementwise affine (f32)
    out = jnp.dot(xn.astype(jnp.bfloat16), w_ref[...],
                  preferred_element_type=jnp.float32) + hb_ref[...]
    o_ref[...] = out.astype(o_ref.dtype)


def layernorm_head(feats, gamma, beta, w_pad, b_pad, *, eps=1e-5, tn=256):
    """feats: (N, F); w_pad: (F, NCp) bf16 (lane-padded); -> (N, NCp) f32."""
    N, F = feats.shape
    ncp = w_pad.shape[1]
    tn = min(tn, N)                 # tn == N (full) or a multiple of 8 (256)
    grid = (pl.cdiv(N, tn),)
    return pl.pallas_call(
        functools.partial(_ln_head_kernel, eps=eps),
        out_shape=jax.ShapeDtypeStruct((N, ncp), jnp.float32),
        grid=grid,
        in_specs=[
            pl.BlockSpec((tn, F), lambda i: (i, 0)),
            pl.BlockSpec((1, F), lambda i: (0, 0)),
            pl.BlockSpec((1, F), lambda i: (0, 0)),
            pl.BlockSpec((F, ncp), lambda i: (0, 0)),
            pl.BlockSpec((1, ncp), lambda i: (0, 0)),
        ],
        out_specs=pl.BlockSpec((tn, ncp), lambda i: (i, 0)),
        compiler_params=pltpu.CompilerParams(
            dimension_semantics=("parallel",)),
    )(feats, gamma, beta, w_pad, b_pad)


# ----------------------------------------------------------------------------
# Full forward pass (mirrors Xception.forward)
# ----------------------------------------------------------------------------
def xception_forward(x, params, *, num_class):
    """x: (B, T, C, H, W) float32 (NCHW frames, PyTorch convention)."""
    B, T, C, H, W = x.shape
    N = B * T

    # x.flatten(0, 1); NCHW -> NHWC so channels sit in the lane dim for the kernels.
    # This transpose touches only the tiny Cin(=3)-channel input; all wide
    # intermediates stay inside the fused backbone kernel (VMEM only).
    x = x.reshape(N, C, H, W).transpose(0, 2, 3, 1)           # (N, H, W, C)

    # --- backbone stand-in (fused Pallas kernel) ---
    feats = backbone_fused(x, params["stem_w"], params["stem_b"], params["dw_w"],
                           params["pw_w"], params["pw_b"])    # (N, feature_dim)

    # --- self.normal (LayerNorm) + self.header (Linear), fused ---
    logits = layernorm_head(feats, params["ln_g"], params["ln_b"],
                            params["head_w"], params["head_b"])   # (N, NC_pad)

    # output.view(B, T, -1)  (drop the lane padding of the class dim)
    return logits[:, :num_class].reshape(B, T, num_class)


def init_params(key, *, in_ch, c_mid, feature_dim, num_class):
    assert c_mid % 128 == 0, "c_mid must be lane-aligned (multiple of 128)"
    assert feature_dim % 128 == 0, "feature_dim must be lane-aligned (multiple of 128)"
    ncp = ((num_class + 127) // 128) * 128        # lane-dense head output
    ks = jax.random.split(key, 4)
    head_w = jax.random.normal(ks[3], (feature_dim, num_class), jnp.float32) * 0.1
    head_w_pad = jnp.zeros((feature_dim, ncp), jnp.float32).at[:, :num_class].set(head_w)
    return {
        "stem_w": jax.random.normal(ks[0], (in_ch, c_mid), jnp.float32) * 0.1,
        "stem_b": jnp.zeros((1, c_mid), jnp.float32),
        "dw_w":   jax.random.normal(ks[1], (3, 3, c_mid), jnp.float32) * 0.1,
        "pw_w":   (jax.random.normal(ks[2], (c_mid, feature_dim), jnp.float32)
                   * 0.1).astype(jnp.bfloat16),       # MXU weight -> bf16 storage
        "pw_b":   jnp.zeros((1, feature_dim), jnp.float32),
        "ln_g":   jnp.ones((1, feature_dim), jnp.float32),
        "ln_b":   jnp.zeros((1, feature_dim), jnp.float32),
        "head_w": head_w_pad.astype(jnp.bfloat16),    # MXU weight -> bf16 storage
        "head_b": jnp.zeros((1, ncp), jnp.float32),
    }


if __name__ == "__main__":
    B, T, C, H, W = 2, 4, 3, 16, 16
    c_mid, feature_dim, num_class = 128, 128, 2

    key = jax.random.PRNGKey(0)
    k_x, k_p = jax.random.split(key)
    x = jax.random.normal(k_x, (B, T, C, H, W), jnp.float32)
    params = init_params(k_p, in_ch=C, c_mid=c_mid,
                         feature_dim=feature_dim, num_class=num_class)

    fwd = jax.jit(functools.partial(xception_forward, num_class=num_class))
    out = jax.block_until_ready(fwd(x, params))
    assert out.shape == (B, T, num_class), out.shape
    assert bool(jnp.all(jnp.isfinite(out)))
    print("KERNEL_OK")
</pallas_src>

<mosaic_0001>
module attributes {stable_mosaic.version = 11 : i64} {
  func.func @_backbone_kernel(%arg0: i32, %arg1: memref<4x16x16x3xf32, #tpu.memory_space<vmem>>, %arg2: memref<3x128xf32, #tpu.memory_space<vmem>>, %arg3: memref<1x128xf32, #tpu.memory_space<vmem>>, %arg4: memref<3x3x128xf32, #tpu.memory_space<vmem>>, %arg5: memref<128x128xbf16, #tpu.memory_space<vmem>>, %arg6: memref<1x128xf32, #tpu.memory_space<vmem>>, %arg7: memref<1x4x128xf32, #tpu.memory_space<vmem>>, %arg8: memref<4x18x18x128xf32, #tpu.memory_space<vmem>>) attributes {dimension_semantics = [#tpu.dimension_semantics<parallel>], iteration_bounds = array<i64: 2>, scalar_prefetch = 0 : i64, scratch_operands = 1 : i64, tpu.core_type = #tpu.core_type<tc>, window_params = [{transform_indices = @transform_0, window_bounds = array<i64: 4, 16, 16, 3>}, {pipeline_mode = #tpu.pipeline_mode<synchronous>, transform_indices = @transform_1, window_bounds = array<i64: 3, 128>}, {pipeline_mode = #tpu.pipeline_mode<synchronous>, transform_indices = @transform_2, window_bounds = array<i64: 1, 128>}, {pipeline_mode = #tpu.pipeline_mode<synchronous>, transform_indices = @transform_3, window_bounds = array<i64: 3, 3, 128>}, {pipeline_mode = #tpu.pipeline_mode<synchronous>, transform_indices = @transform_4, window_bounds = array<i64: 128, 128>}, {pipeline_mode = #tpu.pipeline_mode<synchronous>, transform_indices = @transform_5, window_bounds = array<i64: 1, 128>}, {transform_indices = @transform_6, window_bounds = array<i64: 1, 4, 128>}]} {
    %c0 = arith.constant 0 : index
    %c0_0 = arith.constant 0 : index
    %c0_1 = arith.constant 0 : index
    %c0_2 = arith.constant 0 : index
    %0 = vector.load %arg1[%c0, %c0_0, %c0_1, %c0_2] : memref<4x16x16x3xf32, #tpu.memory_space<vmem>>, vector<4x16x16x3xf32>
    %c0_3 = arith.constant 0 : index
    %c0_4 = arith.constant 0 : index
    %1 = vector.load %arg2[%c0_3, %c0_4] : memref<3x128xf32, #tpu.memory_space<vmem>>, vector<3x128xf32>
    %cst = arith.constant 0.000000e+00 : f32
    %2 = vector.broadcast %cst : f32 to vector<4x16x16x128xf32>
    %3 = vector.extract_strided_slice %0 {offsets = [0, 0, 0, 0], sizes = [4, 16, 16, 1], strides = [1, 1, 1, 1]} : vector<4x16x16x3xf32> to vector<4x16x16x1xf32>
    %4 = vector.extract_strided_slice %1 {offsets = [0, 0], sizes = [1, 128], strides = [1, 1]} : vector<3x128xf32> to vector<1x128xf32>
    %5 = vector.shape_cast %4 : vector<1x128xf32> to vector<1x1x1x128xf32>
    %6 = vector.broadcast %3 : vector<4x16x16x1xf32> to vector<4x16x16x128xf32>
    %7 = vector.broadcast %5 : vector<1x1x1x128xf32> to vector<4x16x16x128xf32>
    %8 = arith.mulf %6, %7 : vector<4x16x16x128xf32>
    %9 = arith.addf %2, %8 : vector<4x16x16x128xf32>
    %10 = vector.extract_strided_slice %0 {offsets = [0, 0, 0, 1], sizes = [4, 16, 16, 1], strides = [1, 1, 1, 1]} : vector<4x16x16x3xf32> to vector<4x16x16x1xf32>
    %11 = vector.extract_strided_slice %1 {offsets = [1, 0], sizes = [1, 128], strides = [1, 1]} : vector<3x128xf32> to vector<1x128xf32>
    %12 = vector.shape_cast %11 : vector<1x128xf32> to vector<1x1x1x128xf32>
    %13 = vector.broadcast %10 : vector<4x16x16x1xf32> to vector<4x16x16x128xf32>
    %14 = vector.broadcast %12 : vector<1x1x1x128xf32> to vector<4x16x16x128xf32>
    %15 = arith.mulf %13, %14 : vector<4x16x16x128xf32>
    %16 = arith.addf %9, %15 : vector<4x16x16x128xf32>
    %17 = vector.extract_strided_slice %0 {offsets = [0, 0, 0, 2], sizes = [4, 16, 16, 1], strides = [1, 1, 1, 1]} : vector<4x16x16x3xf32> to vector<4x16x16x1xf32>
    %18 = vector.extract_strided_slice %1 {offsets = [2, 0], sizes = [1, 128], strides = [1, 1]} : vector<3x128xf32> to vector<1x128xf32>
    %19 = vector.shape_cast %18 : vector<1x128xf32> to vector<1x1x1x128xf32>
    %20 = vector.broadcast %17 : vector<4x16x16x1xf32> to vector<4x16x16x128xf32>
    %21 = vector.broadcast %19 : vector<1x1x1x128xf32> to vector<4x16x16x128xf32>
    %22 = arith.mulf %20, %21 : vector<4x16x16x128xf32>
    %23 = arith.addf %16, %22 : vector<4x16x16x128xf32>
    %c0_5 = arith.constant 0 : index
    %c0_6 = arith.constant 0 : index
    %24 = vector.load %arg3[%c0_5, %c0_6] : memref<1x128xf32, #tpu.memory_space<vmem>>, vector<1x128xf32>
    %25 = vector.shape_cast %24 : vector<1x128xf32> to vector<1x1x1x128xf32>
    %26 = vector.broadcast %25 : vector<1x1x1x128xf32> to vector<4x16x16x128xf32>
    %27 = arith.addf %23, %26 : vector<4x16x16x128xf32>
    %cst_7 = arith.constant 0.000000e+00 : f32
    %28 = vector.broadcast %cst_7 : f32 to vector<4x16x16x128xf32>
    %29 = arith.maximumf %27, %28 : vector<4x16x16x128xf32>
    %cst_8 = arith.constant 0.000000e+00 : f32
    %30 = vector.broadcast %cst_8 : f32 to vector<4x18x18x128xf32>
    %c0_9 = arith.constant 0 : index
    %c0_10 = arith.constant 0 : index
    %c0_11 = arith.constant 0 : index
    %c0_12 = arith.constant 0 : index
    %31 = vector.load %arg8[%c0_9, %c0_10, %c0_11, %c0_12] : memref<4x18x18x128xf32, #tpu.memory_space<vmem>>, vector<4x18x18x128xf32>
    tpu.vector_store %arg8[%c0_9, %c0_10, %c0_11, %c0_12], %30 {strides = array<i32>} : memref<4x18x18x128xf32, #tpu.memory_space<vmem>>, vector<4x18x18x128xf32>,
    %c0_13 = arith.constant 0 : index
    %c1 = arith.constant 1 : index
    %c1_14 = arith.constant 1 : index
    %c0_15 = arith.constant 0 : index
    %32 = vector.load %arg8[%c0_13, %c1, %c1_14, %c0_15] : memref<4x18x18x128xf32, #tpu.memory_space<vmem>>, vector<4x16x16x128xf32>
    tpu.vector_store %arg8[%c0_13, %c1, %c1_14, %c0_15], %29 {strides = array<i32>} : memref<4x18x18x128xf32, #tpu.memory_space<vmem>>, vector<4x16x16x128xf32>,
    %c0_16 = arith.constant 0 : index
    %c0_17 = arith.constant 0 : index
    %c0_18 = arith.constant 0 : index
    %33 = vector.load %arg4[%c0_16, %c0_17, %c0_18] : memref<3x3x128xf32, #tpu.memory_space<vmem>>, vector<3x3x128xf32>
    %cst_19 = arith.constant 0.000000e+00 : f32
    %34 = vector.broadcast %cst_19 : f32 to vector<4x16x16x128xf32>
    %c0_20 = arith.constant 0 : index
    %c0_21 = arith.constant 0 : index
    %c0_22 = arith.constant 0 : index
    %c0_23 = arith.constant 0 : index
    %35 = vector.load %arg8[%c0_20, %c0_21, %c0_22, %c0_23] : memref<4x18x18x128xf32, #tpu.memory_space<vmem>>, vector<4x16x16x128xf32>
    %36 = vector.extract_strided_slice %33 {offsets = [0, 0, 0], sizes = [1, 1, 128], strides = [1, 1, 1]} : vector<3x3x128xf32> to vector<1x1x128xf32>
    %37 = vector.shape_cast %36 : vector<1x1x128xf32> to vector<1x128xf32>
    %38 = vector.shape_cast %37 : vector<1x128xf32> to vector<1x1x1x128xf32>
    %39 = vector.broadcast %38 : vector<1x1x1x128xf32> to vector<4x16x16x128xf32>
    %40 = arith.mulf %35, %39 : vector<4x16x16x128xf32>
    %41 = arith.addf %34, %40 : vector<4x16x16x128xf32>
    %c0_24 = arith.constant 0 : index
    %c0_25 = arith.constant 0 : index
    %c1_26 = arith.constant 1 : index
    %c0_27 = arith.constant 0 : index
    %42 = vector.load %arg8[%c0_24, %c0_25, %c1_26, %c0_27] : memref<4x18x18x128xf32, #tpu.memory_space<vmem>>, vector<4x16x16x128xf32>
    %43 = vector.extract_strided_slice %33 {offsets = [0, 1, 0], sizes = [1, 1, 128], strides = [1, 1, 1]} : vector<3x3x128xf32> to vector<1x1x128xf32>
    %44 = vector.shape_cast %43 : vector<1x1x128xf32> to vector<1x128xf32>
    %45 = vector.shape_cast %44 : vector<1x128xf32> to vector<1x1x1x128xf32>
    %46 = vector.broadcast %45 : vector<1x1x1x128xf32> to vector<4x16x16x128xf32>
    %47 = arith.mulf %42, %46 : vector<4x16x16x128xf32>
    %48 = arith.addf %41, %47 : vector<4x16x16x128xf32>
    %c0_28 = arith.constant 0 : index
    %c0_29 = arith.constant 0 : index
    %c2 = arith.constant 2 : index
    %c0_30 = arith.constant 0 : index
    %49 = vector.load %arg8[%c0_28, %c0_29, %c2, %c0_30] : memref<4x18x18x128xf32, #tpu.memory_space<vmem>>, vector<4x16x16x128xf32>
    %50 = vector.extract_strided_slice %33 {offsets = [0, 2, 0], sizes = [1, 1, 128], strides = [1, 1, 1]} : vector<3x3x128xf32> to vector<1x1x128xf32>
    %51 = vector.shape_cast %50 : vector<1x1x128xf32> to vector<1x128xf32>
    %52 = vector.shape_cast %51 : vector<1x128xf32> to vector<1x1x1x128xf32>
    %53 = vector.broadcast %52 : vector<1x1x1x128xf32> to vector<4x16x16x128xf32>
    %54 = arith.mulf %49, %53 : vector<4x16x16x128xf32>
    %55 = arith.addf %48, %54 : vector<4x16x16x128xf32>
    %c0_31 = arith.constant 0 : index
    %c1_32 = arith.constant 1 : index
    %c0_33 = arith.constant 0 : index
    %c0_34 = arith.constant 0 : index
    %56 = vector.load %arg8[%c0_31, %c1_32, %c0_33, %c0_34] : memref<4x18x18x128xf32, #tpu.memory_space<vmem>>, vector<4x16x16x128xf32>
    %57 = vector.extract_strided_slice %33 {offsets = [1, 0, 0], sizes = [1, 1, 128], strides = [1, 1, 1]} : vector<3x3x128xf32> to vector<1x1x128xf32>
    %58 = vector.shape_cast %57 : vector<1x1x128xf32> to vector<1x128xf32>
    %59 = vector.shape_cast %58 : vector<1x128xf32> to vector<1x1x1x128xf32>
    %60 = vector.broadcast %59 : vector<1x1x1x128xf32> to vector<4x16x16x128xf32>
    %61 = arith.mulf %56, %60 : vector<4x16x16x128xf32>
    %62 = arith.addf %55, %61 : vector<4x16x16x128xf32>
    %c0_35 = arith.constant 0 : index
    %c1_36 = arith.constant 1 : index
    %c1_37 = arith.constant 1 : index
    %c0_38 = arith.constant 0 : index
    %63 = vector.load %arg8[%c0_35, %c1_36, %c1_37, %c0_38] : memref<4x18x18x128xf32, #tpu.memory_space<vmem>>, vector<4x16x16x128xf32>
    %64 = vector.extract_strided_slice %33 {offsets = [1, 1, 0], sizes = [1, 1, 128], strides = [1, 1, 1]} : vector<3x3x128xf32> to vector<1x1x128xf32>
    %65 = vector.shape_cast %64 : vector<1x1x128xf32> to vector<1x128xf32>
    %66 = vector.shape_cast %65 : vector<1x128xf32> to vector<1x1x1x128xf32>
    %67 = vector.broadcast %66 : vector<1x1x1x128xf32> to vector<4x16x16x128xf32>
    %68 = arith.mulf %63, %67 : vector<4x16x16x128xf32>
    %69 = arith.addf %62, %68 : vector<4x16x16x128xf32>
    %c0_39 = arith.constant 0 : index
    %c1_40 = arith.constant 1 : index
    %c2_41 = arith.constant 2 : index
    %c0_42 = arith.constant 0 : index
    %70 = vector.load %arg8[%c0_39, %c1_40, %c2_41, %c0_42] : memref<4x18x18x128xf32, #tpu.memory_space<vmem>>, vector<4x16x16x128xf32>
    %71 = vector.extract_strided_slice %33 {offsets = [1, 2, 0], sizes = [1, 1, 128], strides = [1, 1, 1]} : vector<3x3x128xf32> to vector<1x1x128xf32>
    %72 = vector.shape_cast %71 : vector<1x1x128xf32> to vector<1x128xf32>
    %73 = vector.shape_cast %72 : vector<1x128xf32> to vector<1x1x1x128xf32>
    %74 = vector.broadcast %73 : vector<1x1x1x128xf32> to vector<4x16x16x128xf32>
    %75 = arith.mulf %70, %74 : vector<4x16x16x128xf32>
    %76 = arith.addf %69, %75 : vector<4x16x16x128xf32>
    %c0_43 = arith.constant 0 : index
    %c2_44 = arith.constant 2 : index
    %c0_45 = arith.constant 0 : index
    %c0_46 = arith.constant 0 : index
    %77 = vector.load %arg8[%c0_43, %c2_44, %c0_45, %c0_46] : memref<4x18x18x128xf32, #tpu.memory_space<vmem>>, vector<4x16x16x128xf32>
    %78 = vector.extract_strided_slice %33 {offsets = [2, 0, 0], sizes = [1, 1, 128], strides = [1, 1, 1]} : vector<3x3x128xf32> to vector<1x1x128xf32>
    %79 = vector.shape_cast %78 : vector<1x1x128xf32> to vector<1x128xf32>
    %80 = vector.shape_cast %79 : vector<1x128xf32> to vector<1x1x1x128xf32>
    %81 = vector.broadcast %80 : vector<1x1x1x128xf32> to vector<4x16x16x128xf32>
    %82 = arith.mulf %77, %81 : vector<4x16x16x128xf32>
    %83 = arith.addf %76, %82 : vector<4x16x16x128xf32>
    %c0_47 = arith.constant 0 : index
    %c2_48 = arith.constant 2 : index
    %c1_49 = arith.constant 1 : index
    %c0_50 = arith.constant 0 : index
    %84 = vector.load %arg8[%c0_47, %c2_48, %c1_49, %c0_50] : memref<4x18x18x128xf32, #tpu.memory_space<vmem>>, vector<4x16x16x128xf32>
    %85 = vector.extract_strided_slice %33 {offsets = [2, 1, 0], sizes = [1, 1, 128], strides = [1, 1, 1]} : vector<3x3x128xf32> to vector<1x1x128xf32>
    %86 = vector.shape_cast %85 : vector<1x1x128xf32> to vector<1x128xf32>
    %87 = vector.shape_cast %86 : vector<1x128xf32> to vector<1x1x1x128xf32>
    %88 = vector.broadcast %87 : vector<1x1x1x128xf32> to vector<4x16x16x128xf32>
    %89 = arith.mulf %84, %88 : vector<4x16x16x128xf32>
    %90 = arith.addf %83, %89 : vector<4x16x16x128xf32>
    %c0_51 = arith.constant 0 : index
    %c2_52 = arith.constant 2 : index
    %c2_53 = arith.constant 2 : index
    %c0_54 = arith.constant 0 : index
    %91 = vector.load %arg8[%c0_51, %c2_52, %c2_53, %c0_54] : memref<4x18x18x128xf32, #tpu.memory_space<vmem>>, vector<4x16x16x128xf32>
    %92 = vector.extract_strided_slice %33 {offsets = [2, 2, 0], sizes = [1, 1, 128], strides = [1, 1, 1]} : vector<3x3x128xf32> to vector<1x1x128xf32>
    %93 = vector.shape_cast %92 : vector<1x1x128xf32> to vector<1x128xf32>
    %94 = vector.shape_cast %93 : vector<1x128xf32> to vector<1x1x1x128xf32>
    %95 = vector.broadcast %94 : vector<1x1x1x128xf32> to vector<4x16x16x128xf32>
    %96 = arith.mulf %91, %95 : vector<4x16x16x128xf32>
    %97 = arith.addf %90, %96 : vector<4x16x16x128xf32>
    %cst_55 = arith.constant 0.000000e+00 : f32
    %98 = vector.broadcast %cst_55 : f32 to vector<4x16x16x128xf32>
    %99 = arith.maximumf %97, %98 : vector<4x16x16x128xf32>
    %100 = vector.shape_cast %99 : vector<4x16x16x128xf32> to vector<1024x128xf32>
    %101 = arith.truncf %100 : vector<1024x128xf32> to vector<1024x128xbf16>
    %c0_56 = arith.constant 0 : index
    %c0_57 = arith.constant 0 : index
    %102 = vector.load %arg5[%c0_56, %c0_57] : memref<128x128xbf16, #tpu.memory_space<vmem>>, vector<128x128xbf16>
    %cst_58 = arith.constant dense<0.000000e+00> : vector<1024x128xf32>
    %103 = tpu.matmul %101, %102, %cst_58 {dimension_numbers = #tpu.dot_dimension_numbers<[1], [0], [0], [1], [0, 0, 1, 1], [], []>} : vector<1024x128xbf16>, vector<128x128xbf16>, vector<1024x128xf32> -> vector<1024x128xf32>
    %c0_59 = arith.constant 0 : index
    %c0_60 = arith.constant 0 : index
    %104 = vector.load %arg6[%c0_59, %c0_60] : memref<1x128xf32, #tpu.memory_space<vmem>>, vector<1x128xf32>
    %105 = vector.broadcast %104 : vector<1x128xf32> to vector<1024x128xf32>
    %106 = arith.addf %103, %105 : vector<1024x128xf32>
    %cst_61 = arith.constant 0.000000e+00 : f32
    %107 = vector.broadcast %cst_61 : f32 to vector<1024x128xf32>
    %108 = arith.maximumf %106, %107 : vector<1024x128xf32>
    %109 = vector.shape_cast %108 : vector<1024x128xf32> to vector<4x256x128xf32>
    %cst_62 = arith.constant dense<0.000000e+00> : vector<4x128xf32>
    %110 = vector.multi_reduction <add>, %109, %cst_62 [1] : vector<4x256x128xf32> to vector<4x128xf32>
    %cst_63 = arith.constant 2.560000e+02 : f32
    %111 = vector.broadcast %cst_63 : f32 to vector<4x128xf32>
    %112 = arith.divf %110, %111 : vector<4x128xf32>
    %c0_64 = arith.constant 0 : index
    %c0_65 = arith.constant 0 : index
    %c0_66 = arith.constant 0 : index
    %113 = vector.load %arg7[%c0_64, %c0_65, %c0_66] : memref<1x4x128xf32, #tpu.memory_space<vmem>>, vector<1x4x128xf32>
    %114 = vector.shape_cast %113 : vector<1x4x128xf32> to vector<4x128xf32>
    %115 = vector.shape_cast %112 : vector<4x128xf32> to vector<1x4x128xf32>
    tpu.vector_store %arg7[%c0_64, %c0_65, %c0_66], %115 {strides = array<i32>} : memref<1x4x128xf32, #tpu.memory_space<vmem>>, vector<1x4x128xf32>,
    return
  }
  func.func @transform_0(%arg0: i32) -> (i32, i32, i32, i32) {
    %c0_i32 = arith.constant 0 : i32
    %c0_i32_0 = arith.constant 0 : i32
    %c0_i32_1 = arith.constant 0 : i32
    %c0_i32_2 = arith.constant 0 : i32
    return %arg0, %c0_i32, %c0_i32_0, %c0_i32_1 : i32, i32, i32, i32
  }
  func.func @transform_1(%arg0: i32) -> (i32, i32) {
    %c0_i32 = arith.constant 0 : i32
    %c0_i32_0 = arith.constant 0 : i32
    %c0_i32_1 = arith.constant 0 : i32
    return %c0_i32, %c0_i32_0 : i32, i32
  }
  func.func @transform_2(%arg0: i32) -> (i32, i32) {
    %c0_i32 = arith.constant 0 : i32
    %c0_i32_0 = arith.constant 0 : i32
    %c0_i32_1 = arith.constant 0 : i32
    return %c0_i32, %c0_i32_0 : i32, i32
  }
  func.func @transform_3(%arg0: i32) -> (i32, i32, i32) {
    %c0_i32 = arith.constant 0 : i32
    %c0_i32_0 = arith.constant 0 : i32
    %c0_i32_1 = arith.constant 0 : i32
    %c0_i32_2 = arith.constant 0 : i32
    return %c0_i32, %c0_i32_0, %c0_i32_1 : i32, i32, i32
  }
  func.func @transform_4(%arg0: i32) -> (i32, i32) {
    %c0_i32 = arith.constant 0 : i32
    %c0_i32_0 = arith.constant 0 : i32
    %c0_i32_1 = arith.constant 0 : i32
    return %c0_i32, %c0_i32_0 : i32, i32
  }
  func.func @transform_5(%arg0: i32) -> (i32, i32) {
    %c0_i32 = arith.constant 0 : i32
    %c0_i32_0 = arith.constant 0 : i32
    %c0_i32_1 = arith.constant 0 : i32
    return %c0_i32, %c0_i32_0 : i32, i32
  }
  func.func @transform_6(%arg0: i32) -> (i32, i32, i32) {
    %c0_i32 = arith.constant 0 : i32
    %c0_i32_0 = arith.constant 0 : i32
    %c0_i32_1 = arith.constant 0 : i32
    return %arg0, %c0_i32, %c0_i32_0 : i32, i32, i32
  }
}

module attributes {stable_mosaic.version = 11 : i64} {
  func.func @_ln_head_kernel(%arg0: i32, %arg1: memref<8x128xf32, #tpu.memory_space<vmem>>, %arg2: memref<1x128xf32, #tpu.memory_space<vmem>>, %arg3: memref<1x128xf32, #tpu.memory_space<vmem>>, %arg4: memref<128x128xbf16, #tpu.memory_space<vmem>>, %arg5: memref<1x128xf32, #tpu.memory_space<vmem>>, %arg6: memref<8x128xf32, #tpu.memory_space<vmem>>) attributes {dimension_semantics = [#tpu.dimension_semantics<parallel>], iteration_bounds = array<i64: 1>, scalar_prefetch = 0 : i64, scratch_operands = 0 : i64, tpu.core_type = #tpu.core_type<tc>, window_params = [{transform_indices = @transform_0, window_bounds = array<i64: 8, 128>}, {pipeline_mode = #tpu.pipeline_mode<synchronous>, transform_indices = @transform_1, window_bounds = array<i64: 1, 128>}, {pipeline_mode = #tpu.pipeline_mode<synchronous>, transform_indices = @transform_2, window_bounds = array<i64: 1, 128>}, {pipeline_mode = #tpu.pipeline_mode<synchronous>, transform_indices = @transform_3, window_bounds = array<i64: 128, 128>}, {pipeline_mode = #tpu.pipeline_mode<synchronous>, transform_indices = @transform_4, window_bounds = array<i64: 1, 128>}, {transform_indices = @transform_5, window_bounds = array<i64: 8, 128>}]} {
    %c0 = arith.constant 0 : index
    %c0_0 = arith.constant 0 : index
    %0 = vector.load %arg1[%c0, %c0_0] : memref<8x128xf32, #tpu.memory_space<vmem>>, vector<8x128xf32>
    %cst = arith.constant dense<0.000000e+00> : vector<8xf32>
    %1 = vector.multi_reduction <add>, %0, %cst [1] : vector<8x128xf32> to vector<8xf32>
    %2 = vector.shape_cast %1 : vector<8xf32> to vector<8x1xf32>
    %cst_1 = arith.constant 1.280000e+02 : f32
    %3 = vector.broadcast %cst_1 : f32 to vector<8x1xf32>
    %4 = arith.divf %2, %3 : vector<8x1xf32>
    %5 = vector.broadcast %4 : vector<8x1xf32> to vector<8x128xf32>
    %6 = arith.subf %0, %5 : vector<8x128xf32>
    %7 = arith.mulf %6, %6 : vector<8x128xf32>
    %cst_2 = arith.constant dense<0.000000e+00> : vector<8xf32>
    %8 = vector.multi_reduction <add>, %7, %cst_2 [1] : vector<8x128xf32> to vector<8xf32>
    %9 = vector.shape_cast %8 : vector<8xf32> to vector<8x1xf32>
    %cst_3 = arith.constant 1.280000e+02 : f32
    %10 = vector.broadcast %cst_3 : f32 to vector<8x1xf32>
    %11 = arith.divf %9, %10 : vector<8x1xf32>
    %12 = vector.broadcast %4 : vector<8x1xf32> to vector<8x128xf32>
    %13 = arith.subf %0, %12 : vector<8x128xf32>
    %cst_4 = arith.constant 9.99999974E-6 : f32
    %14 = vector.broadcast %cst_4 : f32 to vector<8x1xf32>
    %15 = arith.addf %11, %14 : vector<8x1xf32>
    %16 = math.rsqrt %15 : vector<8x1xf32>
    %17 = vector.broadcast %16 : vector<8x1xf32> to vector<8x128xf32>
    %18 = arith.mulf %13, %17 : vector<8x128xf32>
    %c0_5 = arith.constant 0 : index
    %c0_6 = arith.constant 0 : index
    %19 = vector.load %arg2[%c0_5, %c0_6] : memref<1x128xf32, #tpu.memory_space<vmem>>, vector<1x128xf32>
    %20 = vector.broadcast %19 : vector<1x128xf32> to vector<8x128xf32>
    %21 = arith.mulf %18, %20 : vector<8x128xf32>
    %c0_7 = arith.constant 0 : index
    %c0_8 = arith.constant 0 : index
    %22 = vector.load %arg3[%c0_7, %c0_8] : memref<1x128xf32, #tpu.memory_space<vmem>>, vector<1x128xf32>
    %23 = vector.broadcast %22 : vector<1x128xf32> to vector<8x128xf32>
    %24 = arith.addf %21, %23 : vector<8x128xf32>
    %25 = arith.truncf %24 : vector<8x128xf32> to vector<8x128xbf16>
    %c0_9 = arith.constant 0 : index
    %c0_10 = arith.constant 0 : index
    %26 = vector.load %arg4[%c0_9, %c0_10] : memref<128x128xbf16, #tpu.memory_space<vmem>>, vector<128x128xbf16>
    %cst_11 = arith.constant dense<0.000000e+00> : vector<8x128xf32>
    %27 = tpu.matmul %25, %26, %cst_11 {dimension_numbers = #tpu.dot_dimension_numbers<[1], [0], [0], [1], [0, 0, 1, 1], [], []>} : vector<8x128xbf16>, vector<128x128xbf16>, vector<8x128xf32> -> vector<8x128xf32>
    %c0_12 = arith.constant 0 : index
    %c0_13 = arith.constant 0 : index
    %28 = vector.load %arg5[%c0_12, %c0_13] : memref<1x128xf32, #tpu.memory_space<vmem>>, vector<1x128xf32>
    %29 = vector.broadcast %28 : vector<1x128xf32> to vector<8x128xf32>
    %30 = arith.addf %27, %29 : vector<8x128xf32>
    %c0_14 = arith.constant 0 : index
    %c0_15 = arith.constant 0 : index
    %31 = vector.load %arg6[%c0_14, %c0_15] : memref<8x128xf32, #tpu.memory_space<vmem>>, vector<8x128xf32>
    tpu.vector_store %arg6[%c0_14, %c0_15], %30 {strides = array<i32>} : memref<8x128xf32, #tpu.memory_space<vmem>>, vector<8x128xf32>,
    return
  }
  func.func @transform_0(%arg0: i32) -> (i32, i32) {
    %c0_i32 = arith.constant 0 : i32
    %c0_i32_0 = arith.constant 0 : i32
    return %arg0, %c0_i32 : i32, i32
  }
  func.func @transform_1(%arg0: i32) -> (i32, i32) {
    %c0_i32 = arith.constant 0 : i32
    %c0_i32_0 = arith.constant 0 : i32
    %c0_i32_1 = arith.constant 0 : i32
    return %c0_i32, %c0_i32_0 : i32, i32
  }
  func.func @transform_2(%arg0: i32) -> (i32, i32) {
    %c0_i32 = arith.constant 0 : i32
    %c0_i32_0 = arith.constant 0 : i32
    %c0_i32_1 = arith.constant 0 : i32
    return %c0_i32, %c0_i32_0 : i32, i32
  }
  func.func @transform_3(%arg0: i32) -> (i32, i32) {
    %c0_i32 = arith.constant 0 : i32
    %c0_i32_0 = arith.constant 0 : i32
    %c0_i32_1 = arith.constant 0 : i32
    return %c0_i32, %c0_i32_0 : i32, i32
  }
  func.func @transform_4(%arg0: i32) -> (i32, i32) {
    %c0_i32 = arith.constant 0 : i32
    %c0_i32_0 = arith.constant 0 : i32
    %c0_i32_1 = arith.constant 0 : i32
    return %c0_i32, %c0_i32_0 : i32, i32
  }
  func.func @transform_5(%arg0: i32) -> (i32, i32) {
    %c0_i32 = arith.constant 0 : i32
    %c0_i32_0 = arith.constant 0 : i32
    return %arg0, %c0_i32 : i32, i32
  }
}

</mosaic_0001>

<bundles_post_ra>
// kernel: xception_forward.3
= control target key start
LH: loop header
LB: loop body
LE: loop exit
PB: predicated region body
PF: predicated region fallthrough
CT: control target
= control target key end

     0   :  { %v193_v1 = vmov 128.0   ;;  %s263_s0 = inlined_call_operand.vmem [shape: f32[8,128], index: 0, kind: input, shape index: {}]   ;;  %s264_s3 = inlined_call_operand.vmem [shape: bf16[128,128], index: 3, kind: input, shape index: {}]   ;;  %s265_s1 = inlined_call_operand.vmem [shape: f32[1,128], index: 1, kind: input, shape index: {}]   ;;  %s266_s2 = inlined_call_operand.vmem [shape: f32[1,128], index: 2, kind: input, shape index: {}]   ;;  %s267_s4 = inlined_call_operand.vmem [shape: f32[1,128], index: 4, kind: input, shape index: {}]   ;;  %s268_s5 = inlined_call_operand.vmem [shape: f32[8,128], index: 5, kind: output, shape index: {}]  }
   0x1   :  { %v20_v0 = vld [vmem:[%s263_s0] sm:$0xff]  ;;  %189 = vrcp.f32 %v193_v1  ;;  %v184_v2 = vld [vmem:[%s264_s3 + $0x38] sm:$0xff]  ;;  %v183_v13 = vld [vmem:[%s264_s3 + $0x30] sm:$0xff] }
   0x2   :  { %21 = vadd.xlane.f32.xlu0 %v20_v0  ;;  %127 = vmatpush.bf16.msra.mxu0 %v184_v2  ;;  %v182_v14 = vld [vmem:[%s264_s3 + $0x28] sm:$0xff]  ;;  %v181_v15 = vld [vmem:[%s264_s3 + $0x20] sm:$0xff]  ;;  %v180_v16 = vld [vmem:[%s264_s3 + $0x18] sm:$0xff] }
   0x3   :  { %v179_v17 = vld [vmem:[%s264_s3 + $0x10] sm:$0xff]  ;;  %v178_v18 = vld [vmem:[%s264_s3 + $0x8] sm:$0xff]  ;;  %v177_v19 = vld [vmem:[%s264_s3] sm:$0xff] }
   0x4   :  { %v186_v29 = vld [vmem:[%s265_s1] ss:$0 sm:$0xff] }
   0x5   :  { %v187_v32 = vld [vmem:[%s266_s2] ss:$0 sm:$0xff] }
   0x6   :  { %128 = vmatpush.bf16.msra.mxu0 %v183_v13  ;;  %v188_v36 = vld [vmem:[%s267_s4] ss:$0 sm:$0xff] }
   0x7   :  { %v190_v3 = vpop.eup %189 }
   0x8   :  { %v24_v4 = vmul.f32 128.0, %v190_v3  ;;  %vm28_vm0 = vweird.f32 %v190_v3 }
   0xa   :  { %v25_v5 = vsub.f32 1.0, %v24_v4  ;;  %129 = vmatpush.bf16.msra.mxu0 %v182_v14 }
   0xc   :  { %v26_v6 = vmul.f32 %v190_v3, %v25_v5 }
   0xe   :  { %v27_v7 = vadd.f32 %v190_v3, %v26_v6  ;;  %130 = vmatpush.bf16.msra.mxu0 %v181_v15 }
  0x10   :  { %v29_v8 = vsel %vm28_vm0, %v190_v3, %v27_v7 }
  0x12   :  { %131 = vmatpush.bf16.msra.mxu0 %v180_v16 }
  0x16   :  { %132 = vmatpush.bf16.msra.mxu0 %v179_v17 }
  0x1a   :  { %133 = vmatpush.bf16.msra.mxu0 %v178_v18 }
  0x1e   :  { %134 = vmatpush.bf16.msra.mxu0 %v177_v19 }
  0x75   :  { %v22_v9 = vpop.xlane.xlu0 %21 }
  0x76   :  { %v30_v10 = vmul.f32 %v29_v8, %v22_v9 }
  0x78   :  { %v31_v11 = vsub.f32 %v20_v0, %v30_v10 }
  0x7a   :  { %v32_v12 = vmul.f32 %v31_v11, %v31_v11 }
  0x7c   :  { %33 = vadd.xlane.f32.xlu0 %v32_v12 }
  0xef   :  { %v34_v20 = vpop.xlane.xlu0 %33 }
  0xf0   :  { %v35_v21 = vmul.f32 %v34_v20, %v29_v8 }
  0xf2   :  { %v36_v22 = vadd.f32 1e-05, %v35_v21 }
  0xf4   :  { %191 = vrsqrt.f32 %v36_v22  ;;  %vm43_vm2 = vweird.f32 %v36_v22 }
  0xfa   :  { %v192_v23 = vpop.eup %191 }
  0xfb   :  { %v38_v24 = vmul.f32 %v192_v23, %v36_v22  ;;  %vm44_vm1 = vweird.f32 %v192_v23 }
  0xfc   :  { %vm45_vm3 = vmor %vm43_vm2, %vm44_vm1 }
  0xfd   :  { %v39_v25 = vmul.f32 %v192_v23, %v38_v24 }
  0xff   :  { %v40_v26 = vmul.f32 0.5, %v39_v25 }
 0x101   :  { %v41_v27 = vsub.f32 1.5, %v40_v26 }
 0x103   :  { %v42_v28 = vmul.f32 %v192_v23, %v41_v27 }
 0x105   :  { %v46_v30 = vsel %vm45_vm3, %v192_v23, %v42_v28 }
 0x106   :  { %v47_v31 = vmul.f32 %v46_v30, %v31_v11 }
 0x108   :  { %v52_v33 = vmul.f32 %v186_v29, %v47_v31 }
 0x10a   :  { %v57_v34 = vadd.f32 %v187_v32, %v52_v33 }
 0x10c   :  { %v58_v35 = vpack.c.bf16 %v57_v34, %v57_v34 }
 0x10e   :  { %135 = vmatmul.bf16.vlgmr.msra.gmra.mxu0 %v58_v35 }
 0x18b   :  { %v136_v37 = vpop.f32.mrf.mxu0 }
 0x18c   :  { %v137_v38 = vadd.f32 %v188_v36, %v136_v37 }
 0x18e   :  { %140 = vst [vmem:[%s268_s5] sm:$0xff] %v137_v38 }
 0x193   :  { %v138_v39 = vpop.f32.mrf.mxu0 }

// kernel: xception_forward.2
= control target key start
LH: loop header
LB: loop body
LE: loop exit
PB: predicated region body
PF: predicated region fallthrough
CT: control target
= control target key end

     0   :  { %s8129_s21 = smov 0   ;;  %s14843_s0 = inlined_call_operand.vmem [shape: f32[8,16,16,3], index: 0, kind: input, shape index: {}]   ;;  %s14844_s1 = inlined_call_operand.vmem [shape: f32[3,128], index: 1, kind: input, shape index: {}]   ;;  %s14845_s2 = inlined_call_operand.vmem [shape: f32[1,128], index: 2, kind: input, shape index: {}]   ;;  %s14846_s3 = inlined_call_operand.vmem [shape: f32[3,3,128], index: 3, kind: input, shape index: {}]   ;;  %s14847_s4 = inlined_call_operand.vmem [shape: bf16[128,128], index: 4, kind: input, shape index: {}]   ;;  %s14848_s5 = inlined_call_operand.vmem [shape: f32[1,128], index: 5, kind: input, shape index: {}]   ;;  %s14849_s6 = inlined_call_operand.vmem [shape: f32[2,4,128], index: 6, kind: output, shape index: {}]  }
   0x1 LB: > { %s8135_s22 = sadd.s32 4294967295, %s8087_s21   ;;  %p7838_p0 = scmp.ge.s32.totalorder %s8087_s21, 1  ;;  %s8087_s21 = sphi %s8129_s21, %s16_s21  }
   0x2   : > { %p214_p1 = scmp.lt.s32.totalorder %s8087_s21, 3 }
   0x4   : > { %p215_p2 = pnand %p7838_p0, %p214_p1 }
   0x6   : > { %218 = sbr.rel (%p215_p2) target bundleno = 2157 (0x86d), region = 44 }
   0xb   : > { %s7839_s23 = sshll.u32 %s8135_s22, 2  ;;  %v8089_v0 = vmov 0   ;;  %vm7773_vm1 = vcmask 1041409   ;;  %vm7775_vm2 = vcmask 1042434   ;;  %p251_p4 = scmp.lt.s32.totalorder %s8135_s22, 1  ;;  %vm7777_vm3 = vcmask 1043459  }
   0xc   : > { %7925 = vset.pattern.permute.xlu2 %v8089_v0  ;;  %7924 = vset.pattern.permute.xlu1 %v8089_v0  ;;  %p245_p3 = scmp.lt.s32.totalorder %s7839_s23, 7 }
   0xd   : > { %7923 = vset.pattern.permute.xlu0 %v8089_v0  ;;  %s16696_s22 = smov (!%p251_p4, %s8135_s22), 1 }
   0xe   : > { %s16694_s23 = smov (!%p245_p3, %s7839_s23), 7  ;;  %s7842_s12 = sshll.u32 %s16696_s22, 2 }
   0xf   : > { %s7877_s24 = sshll.u32 %s16694_s23, 8  ;;  %s254_s15 = scalar_lea.vmem %s14849_s6, %s7842_s12 }
  0x10   : > { %s8143_s27 = scalar_lea.vmem %s14843_s0, %s7877_s24 }
  0x11   : > { %v8146_v1 = vld [vmem:[%s8143_s27 + $0x20] sm:$0xff]  ;;  %v8149_v2 = vld [vmem:[%s8143_s27 + $0x10] sm:$0xff]  ;;  %v8158_v4 = vld [vmem:[%s8143_s27 + $0x28] sm:$0xff] }
  0x12   : > { %v8152_v3 = vld [vmem:[%s8143_s27] sm:$0xff]  ;;  %406 = vperm.xlu2 %7925, %v8146_v1   ;;  %396 = vperm.xlu1 %7924, %v8149_v2   ;;  %v8161_v5 = vld [vmem:[%s8143_s27 + $0x18] sm:$0xff]  ;;  %v8164_v6 = vld [vmem:[%s8143_s27 + $0x8] sm:$0xff] }
  0x13   : > { %386 = vperm.xlu0 %7923, %v8152_v3   ;;  %v8170_v7 = vld [vmem:[%s8143_s27 + $0x40] sm:$0xff]  ;;  %v8173_v8 = vld [vmem:[%s8143_s27 + $0x38] sm:$0xff]  ;;  %v8176_v9 = vld [vmem:[%s8143_s27 + $0x30] sm:$0xff] }
  0x14   : > { %v8182_v10 = vld [vmem:[%s8143_s27 + $0x58] sm:$0xff]  ;;  %v8185_v11 = vld [vmem:[%s8143_s27 + $0x50] sm:$0xff]  ;;  %v8188_v12 = vld [vmem:[%s8143_s27 + $0x48] sm:$0xff] }
  0x15   : > { %v8194_v13 = vld [vmem:[%s8143_s27 + $0x70] sm:$0xff]  ;;  %v8197_v14 = vld [vmem:[%s8143_s27 + $0x68] sm:$0xff]  ;;  %v8200_v15 = vld [vmem:[%s8143_s27 + $0x60] sm:$0xff] }
  0x16   : > { %v8206_v16 = vld [vmem:[%s8143_s27 + $0x88] sm:$0xff]  ;;  %v8209_v17 = vld [vmem:[%s8143_s27 + $0x80] sm:$0xff]  ;;  %v8212_v18 = vld [vmem:[%s8143_s27 + $0x78] sm:$0xff] }
  0x17   : > { %v8218_v19 = vld [vmem:[%s8143_s27 + $0xa0] sm:$0xff]  ;;  %v8221_v20 = vld [vmem:[%s8143_s27 + $0x98] sm:$0xff]  ;;  %v8224_v21 = vld [vmem:[%s8143_s27 + $0x90] sm:$0xff] }
  0x18   : > { %v8230_v22 = vld [vmem:[%s8143_s27 + $0xb8] sm:$0xff]  ;;  %v8233_v23 = vld [vmem:[%s8143_s27 + $0xb0] sm:$0xff]  ;;  %v8236_v24 = vld [vmem:[%s8143_s27 + $0xa8] sm:$0xff] }
  0x19   : > { %v8242_v25 = vld [vmem:[%s8143_s27 + $0xd0] sm:$0xff]  ;;  %v8245_v26 = vld [vmem:[%s8143_s27 + $0xc8] sm:$0xff]  ;;  %v8248_v27 = vld [vmem:[%s8143_s27 + $0xc0] sm:$0xff] }
  0x1a   : > { %411 = vperm.xlu2 %7925, %v8158_v4   ;;  %401 = vperm.xlu1 %7924, %v8161_v5   ;;  %v8254_v28 = vld [vmem:[%s8143_s27 + $0xe8] sm:$0xff]  ;;  %v8257_v29 = vld [vmem:[%s8143_s27 + $0xe0] sm:$0xff]  ;;  %v8260_v30 = vld [vmem:[%s8143_s27 + $0xd8] sm:$0xff] }
  0x1b   : > { %391 = vperm.xlu0 %7923, %v8164_v6   ;;  %v8266_v31 = vld [vmem:[%s8143_s27 + $0x100] sm:$0xff]  ;;  %v8269_v32 = vld [vmem:[%s8143_s27 + $0xf8] sm:$0xff]  ;;  %v8272_v33 = vld [vmem:[%s8143_s27 + $0xf0] sm:$0xff] }
  0x1c   : > { %v8278_v34 = vld [vmem:[%s8143_s27 + $0x118] sm:$0xff]  ;;  %v8281_v35 = vld [vmem:[%s8143_s27 + $0x110] sm:$0xff]  ;;  %v8284_v36 = vld [vmem:[%s8143_s27 + $0x108] sm:$0xff] }
  0x1d   : > { %v8292_v38 = vld [vmem:[%s8143_s27 + $0x130] sm:$0xff]  ;;  %v8295_v39 = vld [vmem:[%s8143_s27 + $0x128] sm:$0xff]  ;;  %v8298_v40 = vld [vmem:[%s8143_s27 + $0x120] sm:$0xff] }
  0x1e   : > { %v8306_v42 = vld [vmem:[%s8143_s27 + $0x148] sm:$0xff]  ;;  %v8309_v43 = vld [vmem:[%s8143_s27 + $0x140] sm:$0xff]  ;;  %v8312_v44 = vld [vmem:[%s8143_s27 + $0x138] sm:$0xff] }
  0x1f   : > { %v8320_v46 = vld [vmem:[%s8143_s27 + $0x160] sm:$0xff]  ;;  %v8323_v47 = vld [vmem:[%s8143_s27 + $0x158] sm:$0xff]  ;;  %v8326_v48 = vld [vmem:[%s8143_s27 + $0x150] sm:$0xff] }
  0x20   : > { %v8338_v52 = vld [vmem:[%s8143_s27 + $0x178] sm:$0xff]  ;;  %v8341_v53 = vld [vmem:[%s8143_s27 + $0x170] sm:$0xff]  ;;  %v8344_v54 = vld [vmem:[%s8143_s27 + $0x168] sm:$0xff] }
  0x21   : > { %v8356_v58 = vld [vmem:[%s8143_s27 + $0x190] sm:$0xff]  ;;  %v8359_v59 = vld [vmem:[%s8143_s27 + $0x188] sm:$0xff]  ;;  %v8362_v60 = vld [vmem:[%s8143_s27 + $0x180] sm:$0xff] }
  0x22   : > { %426 = vperm.xlu2 %7925, %v8170_v7   ;;  %421 = vperm.xlu1 %7924, %v8173_v8   ;;  %v8374_v0 = vld [vmem:[%s8143_s27 + $0x1a8] sm:$0xff] }
  0x23   : > { %416 = vperm.xlu0 %7923, %v8176_v9  }
  0x2a   : > { %441 = vperm.xlu2 %7925, %v8182_v10   ;;  %436 = vperm.xlu1 %7924, %v8185_v11  }
  0x2b   : > { %431 = vperm.xlu0 %7923, %v8188_v12  }
  0x32   : > { %456 = vperm.xlu2 %7925, %v8194_v13   ;;  %451 = vperm.xlu1 %7924, %v8197_v14  }
  0x33   : > { %446 = vperm.xlu0 %7923, %v8200_v15  }
  0x3a   : > { %471 = vperm.xlu2 %7925, %v8206_v16   ;;  %466 = vperm.xlu1 %7924, %v8209_v17  }
  0x3b   : > { %461 = vperm.xlu0 %7923, %v8212_v18  }
  0x42   : > { %486 = vperm.xlu2 %7925, %v8218_v19   ;;  %481 = vperm.xlu1 %7924, %v8221_v20  }
  0x43   : > { %476 = vperm.xlu0 %7923, %v8224_v21  }
  0x4a   : > { %501 = vperm.xlu2 %7925, %v8230_v22   ;;  %496 = vperm.xlu1 %7924, %v8233_v23  }
  0x4b   : > { %491 = vperm.xlu0 %7923, %v8236_v24  }
  0x52   : > { %516 = vperm.xlu2 %7925, %v8242_v25   ;;  %511 = vperm.xlu1 %7924, %v8245_v26  }
  0x53   : > { %506 = vperm.xlu0 %7923, %v8248_v27  }
  0x5a   : > { %531 = vperm.xlu2 %7925, %v8254_v28   ;;  %526 = vperm.xlu1 %7924, %v8257_v29  }
  0x5b   : > { %521 = vperm.xlu0 %7923, %v8260_v30  }
  0x62   : > { %546 = vperm.xlu2 %7925, %v8266_v31   ;;  %541 = vperm.xlu1 %7924, %v8269_v32  }
  0x63   : > { %536 = vperm.xlu0 %7923, %v8272_v33  }
  0x6a   : > { %561 = vperm.xlu2 %7925, %v8278_v34   ;;  %556 = vperm.xlu1 %7924, %v8281_v35  }
  0x6b   : > { %551 = vperm.xlu0 %7923, %v8284_v36  }
  0x6c   : > { %v8289_v37 = vpop.permute.xlu2 %406 }
  0x6d   : > { %15255 = vst [vmem:[#allocation3_spill] sm:$0xff] %v8289_v37  ;;  %v8416_v37 = vld [vmem:[%s8143_s27 + $0x1c8] sm:$0xff] }
  0x6e   : > { %15278 = vst [vmem:[#allocation26_spill] sm:$0xff] %v8416_v37 }
  0x72   : > { %576 = vperm.xlu2 %7925, %v8292_v38   ;;  %571 = vperm.xlu1 %7924, %v8295_v39  }
  0x73   : > { %566 = vperm.xlu0 %7923, %v8298_v40  }
  0x74   : > { %v8303_v41 = vpop.permute.xlu2 %411 }
  0x75   : > { %15256 = vst [vmem:[#allocation4_spill] sm:$0xff] %v8303_v41  ;;  %v8413_v41 = vld [vmem:[%s8143_s27 + $0x1d0] sm:$0xff] }
  0x76   : > { %15277 = vst [vmem:[#allocation25_spill] sm:$0xff] %v8413_v41 }
  0x7a   : > { %591 = vperm.xlu2 %7925, %v8306_v42   ;;  %586 = vperm.xlu1 %7924, %v8309_v43  }
  0x7b   : > { %581 = vperm.xlu0 %7923, %v8312_v44  }
  0x7c   : > { %v8317_v45 = vpop.permute.xlu2 %426 }
  0x7d   : > { %15257 = vst [vmem:[#allocation5_spill] sm:$0xff] %v8317_v45  ;;  %v8410_v45 = vld [vmem:[%s8143_s27 + $0x1d8] sm:$0xff] }
  0x7e   : > { %15276 = vst [vmem:[#allocation24_spill] sm:$0xff] %v8410_v45 }
  0x82   : > { %606 = vperm.xlu2 %7925, %v8320_v46   ;;  %601 = vperm.xlu1 %7924, %v8323_v47  }
  0x83   : > { %596 = vperm.xlu0 %7923, %v8326_v48  }
  0x84   : > { %v8331_v49 = vpop.permute.xlu2 %441  ;;  %v8333_v50 = vpop.permute.xlu1 %396 }
  0x85   : > { %15258 = vst [vmem:[#allocation6_spill] sm:$0xff] %v8331_v49  ;;  %v8335_v51 = vpop.permute.xlu0 %386  ;;  %v8398_v49 = vld [vmem:[%s8143_s27 + $0x1b0] sm:$0xff] }
  0x86   : > { %15259 = vst [vmem:[#allocation7_spill] sm:$0xff] %v8333_v50  ;;  %v8395_v50 = vld [vmem:[%s8143_s27 + $0x1b8] sm:$0xff] }
  0x87   : > { %15260 = vst [vmem:[#allocation8_spill] sm:$0xff] %v8335_v51  ;;  %v8428_v51 = vld [vmem:[%s8143_s27 + $0x1f0] sm:$0xff] }
  0x88   : > { %15271 = vst [vmem:[#allocation19_spill] sm:$0xff] %v8395_v50 }
  0x89   : > { %15272 = vst [vmem:[#allocation20_spill] sm:$0xff] %v8398_v49 }
  0x8a   : > { %621 = vperm.xlu2 %7925, %v8338_v52   ;;  %616 = vperm.xlu1 %7924, %v8341_v53   ;;  %15282 = vst [vmem:[#allocation30_spill] sm:$0xff] %v8428_v51 }
  0x8b   : > { %611 = vperm.xlu0 %7923, %v8344_v54  }
  0x8c   : > { %v8349_v55 = vpop.permute.xlu2 %456  ;;  %v8351_v56 = vpop.permute.xlu1 %401 }
  0x8d   : > { %15261 = vst [vmem:[#allocation9_spill] sm:$0xff] %v8349_v55  ;;  %v8353_v57 = vpop.permute.xlu0 %391  ;;  %v8392_v55 = vld [vmem:[%s8143_s27 + $0x1c0] sm:$0xff] }
  0x8e   : > { %15262 = vst [vmem:[#allocation10_spill] sm:$0xff] %v8351_v56  ;;  %v8380_v56 = vld [vmem:[%s8143_s27 + $0x198] sm:$0xff] }
  0x8f   : > { %15263 = vst [vmem:[#allocation11_spill] sm:$0xff] %v8353_v57  ;;  %v8377_v57 = vld [vmem:[%s8143_s27 + $0x1a0] sm:$0xff] }
  0x90   : > { %15270 = vst [vmem:[#allocation18_spill] sm:$0xff] %v8392_v55 }
  0x92   : > { %636 = vperm.xlu2 %7925, %v8356_v58   ;;  %631 = vperm.xlu1 %7924, %v8359_v59  }
  0x93   : > { %626 = vperm.xlu0 %7923, %v8362_v60  }
  0x94   : > { %v8367_v61 = vpop.permute.xlu2 %471  ;;  %v8369_v62 = vpop.permute.xlu1 %421 }
  0x95   : > { %15264 = vst [vmem:[#allocation12_spill] sm:$0xff] %v8367_v61  ;;  %v8371_v63 = vpop.permute.xlu0 %416 }
  0x96   : > { %15265 = vst [vmem:[#allocation13_spill] sm:$0xff] %v8369_v62 }
  0x97   : > { %15266 = vst [vmem:[#allocation14_spill] sm:$0xff] %v8371_v63 }
  0x9a   : > { %651 = vperm.xlu2 %7925, %v8374_v0   ;;  %646 = vperm.xlu1 %7924, %v8377_v57  }
  0x9b   : > { %641 = vperm.xlu0 %7923, %v8380_v56  }
  0x9c   : > { %v8385_v61 = vpop.permute.xlu2 %486  ;;  %v8387_v62 = vpop.permute.xlu1 %436 }
  0x9d   : > { %15267 = vst [vmem:[#allocation15_spill] sm:$0xff] %v8385_v61  ;;  %v8389_v63 = vpop.permute.xlu0 %431 }
  0x9e   : > { %15268 = vst [vmem:[#allocation16_spill] sm:$0xff] %v8387_v62 }
  0x9f   : > { %15269 = vst [vmem:[#allocation17_spill] sm:$0xff] %v8389_v63 }
  0xa2   : > { %666 = vperm.xlu2 %7925, %v8392_v55   ;;  %661 = vperm.xlu1 %7924, %v8395_v50   ;;  %v8431_v55 = vld [vmem:[%s8143_s27 + $0x1e8] sm:$0xff]  ;;  %v8434_v50 = vld [vmem:[%s8143_s27 + $0x1e0] sm:$0xff] }
  0xa3   : > { %656 = vperm.xlu0 %7923, %v8398_v49   ;;  %15283 = vst [vmem:[#allocation31_spill] sm:$0xff] %v8431_v55  ;;  %v8090_v49 = vmov 1  }
  0xa4   : > { %v8403_v61 = vpop.permute.xlu2 %501  ;;  %v8405_v62 = vpop.permute.xlu1 %451  ;;  %15284 = vst [vmem:[#allocation32_spill] sm:$0xff] %v8434_v50 }
  0xa5   : > { %15273 = vst [vmem:[#allocation21_spill] sm:$0xff] %v8403_v61  ;;  %v8407_v63 = vpop.permute.xlu0 %446 }
  0xa6   : > { %15274 = vst [vmem:[#allocation22_spill] sm:$0xff] %v8405_v62 }
  0xa7   : > { %15275 = vst [vmem:[#allocation23_spill] sm:$0xff] %v8407_v63 }
  0xaa   : > { %681 = vperm.xlu2 %7925, %v8410_v45   ;;  %676 = vperm.xlu1 %7924, %v8413_v41   ;;  %v8446_v45 = vld [vmem:[%s8143_s27 + $0x208] sm:$0xff]  ;;  %v8449_v41 = vld [vmem:[%s8143_s27 + $0x200] sm:$0xff] }
  0xab   : > { %671 = vperm.xlu0 %7923, %v8416_v37   ;;  %15288 = vst [vmem:[#allocation36_spill] sm:$0xff] %v8446_v45  ;;  %v8452_v37 = vld [vmem:[%s8143_s27 + $0x1f8] sm:$0xff] }
  0xac   : > { %v8421_v61 = vpop.permute.xlu2 %516  ;;  %v8423_v62 = vpop.permute.xlu1 %466  ;;  %15289 = vst [vmem:[#allocation37_spill] sm:$0xff] %v8449_v41 }
  0xad   : > { %15279 = vst [vmem:[#allocation27_spill] sm:$0xff] %v8421_v61  ;;  %v8425_v63 = vpop.permute.xlu0 %461 }
  0xae   : > { %15280 = vst [vmem:[#allocation28_spill] sm:$0xff] %v8423_v62 }
  0xaf   : > { %15281 = vst [vmem:[#allocation29_spill] sm:$0xff] %v8425_v63 }
  0xb0   : > { %15290 = vst [vmem:[#allocation38_spill] sm:$0xff] %v8452_v37 }
  0xb2   : > { %696 = vperm.xlu2 %7925, %v8428_v51   ;;  %691 = vperm.xlu1 %7924, %v8431_v55   ;;  %v8464_v51 = vld [vmem:[%s8143_s27 + $0x220] sm:$0xff]  ;;  %v8467_v55 = vld [vmem:[%s8143_s27 + $0x218] sm:$0xff] }
  0xb3   : > { %686 = vperm.xlu0 %7923, %v8434_v50   ;;  %15294 = vst [vmem:[#allocation42_spill] sm:$0xff] %v8464_v51  ;;  %v8470_v50 = vld [vmem:[%s8143_s27 + $0x210] sm:$0xff] }
  0xb4   : > { %v8439_v61 = vpop.permute.xlu2 %531  ;;  %v8441_v62 = vpop.permute.xlu1 %481  ;;  %15295 = vst [vmem:[#allocation43_spill] sm:$0xff] %v8467_v55 }
  0xb5   : > { %15285 = vst [vmem:[#allocation33_spill] sm:$0xff] %v8439_v61  ;;  %v8443_v63 = vpop.permute.xlu0 %476 }
  0xb6   : > { %15286 = vst [vmem:[#allocation34_spill] sm:$0xff] %v8441_v62 }
  0xb7   : > { %15287 = vst [vmem:[#allocation35_spill] sm:$0xff] %v8443_v63 }
  0xb8   : > { %15296 = vst [vmem:[#allocation44_spill] sm:$0xff] %v8470_v50 }
  0xba   : > { %711 = vperm.xlu2 %7925, %v8446_v45   ;;  %706 = vperm.xlu1 %7924, %v8449_v41   ;;  %v8482_v45 = vld [vmem:[%s8143_s27 + $0x238] sm:$0xff]  ;;  %v8485_v41 = vld [vmem:[%s8143_s27 + $0x230] sm:$0xff] }
  0xbb   : > { %701 = vperm.xlu0 %7923, %v8452_v37   ;;  %15300 = vst [vmem:[#allocation48_spill] sm:$0xff] %v8482_v45  ;;  %v8488_v37 = vld [vmem:[%s8143_s27 + $0x228] sm:$0xff] }
  0xbc   : > { %v8457_v61 = vpop.permute.xlu2 %546  ;;  %v8459_v62 = vpop.permute.xlu1 %496  ;;  %15301 = vst [vmem:[#allocation49_spill] sm:$0xff] %v8485_v41 }
  0xbd   : > { %15291 = vst [vmem:[#allocation39_spill] sm:$0xff] %v8457_v61  ;;  %v8461_v63 = vpop.permute.xlu0 %491 }
  0xbe   : > { %15292 = vst [vmem:[#allocation40_spill] sm:$0xff] %v8459_v62 }
  0xbf   : > { %15293 = vst [vmem:[#allocation41_spill] sm:$0xff] %v8461_v63 }
  0xc0   : > { %15302 = vst [vmem:[#allocation50_spill] sm:$0xff] %v8488_v37 }
  0xc2   : > { %726 = vperm.xlu2 %7925, %v8464_v51   ;;  %721 = vperm.xlu1 %7924, %v8467_v55   ;;  %v8500_v51 = vld [vmem:[%s8143_s27 + $0x250] sm:$0xff]  ;;  %v8503_v55 = vld [vmem:[%s8143_s27 + $0x248] sm:$0xff] }
  0xc3   : > { %716 = vperm.xlu0 %7923, %v8470_v50   ;;  %15306 = vst [vmem:[#allocation54_spill] sm:$0xff] %v8500_v51  ;;  %v8506_v50 = vld [vmem:[%s8143_s27 + $0x240] sm:$0xff] }
  0xc4   : > { %v8475_v61 = vpop.permute.xlu2 %561  ;;  %v8477_v62 = vpop.permute.xlu1 %511  ;;  %15307 = vst [vmem:[#allocation55_spill] sm:$0xff] %v8503_v55 }
  0xc5   : > { %15297 = vst [vmem:[#allocation45_spill] sm:$0xff] %v8475_v61  ;;  %v8479_v63 = vpop.permute.xlu0 %506 }
  0xc6   : > { %15298 = vst [vmem:[#allocation46_spill] sm:$0xff] %v8477_v62 }
  0xc7   : > { %15299 = vst [vmem:[#allocation47_spill] sm:$0xff] %v8479_v63 }
  0xc8   : > { %15308 = vst [vmem:[#allocation56_spill] sm:$0xff] %v8506_v50 }
  0xca   : > { %741 = vperm.xlu2 %7925, %v8482_v45   ;;  %736 = vperm.xlu1 %7924, %v8485_v41   ;;  %v8518_v45 = vld [vmem:[%s8143_s27 + $0x268] sm:$0xff]  ;;  %v8521_v41 = vld [vmem:[%s8143_s27 + $0x260] sm:$0xff] }
  0xcb   : > { %731 = vperm.xlu0 %7923, %v8488_v37   ;;  %15312 = vst [vmem:[#allocation60_spill] sm:$0xff] %v8518_v45  ;;  %v8524_v37 = vld [vmem:[%s8143_s27 + $0x258] sm:$0xff] }
  0xcc   : > { %v8493_v61 = vpop.permute.xlu2 %576  ;;  %v8495_v62 = vpop.permute.xlu1 %526  ;;  %15313 = vst [vmem:[#allocation61_spill] sm:$0xff] %v8521_v41 }
  0xcd   : > { %15303 = vst [vmem:[#allocation51_spill] sm:$0xff] %v8493_v61  ;;  %v8497_v63 = vpop.permute.xlu0 %521 }
  0xce   : > { %15304 = vst [vmem:[#allocation52_spill] sm:$0xff] %v8495_v62 }
  0xcf   : > { %15305 = vst [vmem:[#allocation53_spill] sm:$0xff] %v8497_v63 }
  0xd0   : > { %15314 = vst [vmem:[#allocation62_spill] sm:$0xff] %v8524_v37 }
  0xd2   : > { %756 = vperm.xlu2 %7925, %v8500_v51   ;;  %751 = vperm.xlu1 %7924, %v8503_v55   ;;  %v8536_v51 = vld [vmem:[%s8143_s27 + $0x280] sm:$0xff]  ;;  %v8539_v55 = vld [vmem:[%s8143_s27 + $0x278] sm:$0xff] }
  0xd3   : > { %746 = vperm.xlu0 %7923, %v8506_v50   ;;  %15318 = vst [vmem:[#allocation66_spill] sm:$0xff] %v8536_v51  ;;  %v8542_v50 = vld [vmem:[%s8143_s27 + $0x270] sm:$0xff] }
  0xd4   : > { %v8511_v61 = vpop.permute.xlu2 %591  ;;  %v8513_v62 = vpop.permute.xlu1 %541  ;;  %15319 = vst [vmem:[#allocation67_spill] sm:$0xff] %v8539_v55 }
  0xd5   : > { %15309 = vst [vmem:[#allocation57_spill] sm:$0xff] %v8511_v61  ;;  %v8515_v63 = vpop.permute.xlu0 %536 }
  0xd6   : > { %15310 = vst [vmem:[#allocation58_spill] sm:$0xff] %v8513_v62 }
  0xd7   : > { %15311 = vst [vmem:[#allocation59_spill] sm:$0xff] %v8515_v63 }
  0xd8   : > { %15320 = vst [vmem:[#allocation68_spill] sm:$0xff] %v8542_v50 }
  0xda   : > { %771 = vperm.xlu2 %7925, %v8518_v45   ;;  %766 = vperm.xlu1 %7924, %v8521_v41   ;;  %v8554_v45 = vld [vmem:[%s8143_s27 + $0x298] sm:$0xff]  ;;  %v8557_v41 = vld [vmem:[%s8143_s27 + $0x290] sm:$0xff] }
  0xdb   : > { %761 = vperm.xlu0 %7923, %v8524_v37   ;;  %15324 = vst [vmem:[#allocation72_spill] sm:$0xff] %v8554_v45  ;;  %v8560_v37 = vld [vmem:[%s8143_s27 + $0x288] sm:$0xff] }
  0xdc   : > { %v8529_v61 = vpop.permute.xlu2 %606  ;;  %v8531_v62 = vpop.permute.xlu1 %556  ;;  %15325 = vst [vmem:[#allocation73_spill] sm:$0xff] %v8557_v41 }
  0xdd   : > { %15315 = vst [vmem:[#allocation63_spill] sm:$0xff] %v8529_v61  ;;  %v8533_v63 = vpop.permute.xlu0 %551 }
  0xde   : > { %15316 = vst [vmem:[#allocation64_spill] sm:$0xff] %v8531_v62 }
  0xdf   : > { %15317 = vst [vmem:[#allocation65_spill] sm:$0xff] %v8533_v63 }
  0xe0   : > { %15326 = vst [vmem:[#allocation74_spill] sm:$0xff] %v8560_v37 }
  0xe2   : > { %786 = vperm.xlu2 %7925, %v8536_v51   ;;  %781 = vperm.xlu1 %7924, %v8539_v55   ;;  %v8572_v51 = vld [vmem:[%s8143_s27 + $0x2b0] sm:$0xff]  ;;  %v8575_v55 = vld [vmem:[%s8143_s27 + $0x2a8] sm:$0xff] }
  0xe3   : > { %776 = vperm.xlu0 %7923, %v8542_v50   ;;  %15330 = vst [vmem:[#allocation78_spill] sm:$0xff] %v8572_v51  ;;  %v8578_v50 = vld [vmem:[%s8143_s27 + $0x2a0] sm:$0xff] }
  0xe4   : > { %v8547_v61 = vpop.permute.xlu2 %621  ;;  %v8549_v62 = vpop.permute.xlu1 %571  ;;  %15331 = vst [vmem:[#allocation79_spill] sm:$0xff] %v8575_v55 }
  0xe5   : > { %15321 = vst [vmem:[#allocation69_spill] sm:$0xff] %v8547_v61  ;;  %v8551_v63 = vpop.permute.xlu0 %566 }
  0xe6   : > { %15322 = vst [vmem:[#allocation70_spill] sm:$0xff] %v8549_v62 }
  0xe7   : > { %15323 = vst [vmem:[#allocation71_spill] sm:$0xff] %v8551_v63 }
  0xe8   : > { %15332 = vst [vmem:[#allocation80_spill] sm:$0xff] %v8578_v50 }
  0xea   : > { %801 = vperm.xlu2 %7925, %v8554_v45   ;;  %796 = vperm.xlu1 %7924, %v8557_v41   ;;  %v8590_v45 = vld [vmem:[%s8143_s27 + $0x2c8] sm:$0xff]  ;;  %v8593_v41 = vld [vmem:[%s8143_s27 + $0x2c0] sm:$0xff] }
  0xeb   : > { %791 = vperm.xlu0 %7923, %v8560_v37   ;;  %15336 = vst [vmem:[#allocation84_spill] sm:$0xff] %v8590_v45  ;;  %v8596_v37 = vld [vmem:[%s8143_s27 + $0x2b8] sm:$0xff] }
  0xec   : > { %v8565_v61 = vpop.permute.xlu2 %636  ;;  %v8567_v62 = vpop.permute.xlu1 %586  ;;  %15337 = vst [vmem:[#allocation85_spill] sm:$0xff] %v8593_v41 }
  0xed   : > { %15327 = vst [vmem:[#allocation75_spill] sm:$0xff] %v8565_v61  ;;  %v8569_v63 = vpop.permute.xlu0 %581 }
  0xee   : > { %15328 = vst [vmem:[#allocation76_spill] sm:$0xff] %v8567_v62 }
  0xef   : > { %15329 = vst [vmem:[#allocation77_spill] sm:$0xff] %v8569_v63 }
  0xf0   : > { %15338 = vst [vmem:[#allocation86_spill] sm:$0xff] %v8596_v37 }
  0xf2   : > { %816 = vperm.xlu2 %7925, %v8572_v51   ;;  %811 = vperm.xlu1 %7924, %v8575_v55   ;;  %v8608_v51 = vld [vmem:[%s8143_s27 + $0x2e0] sm:$0xff]  ;;  %v8611_v55 = vld [vmem:[%s8143_s27 + $0x2d8] sm:$0xff] }
  0xf3   : > { %806 = vperm.xlu0 %7923, %v8578_v50   ;;  %15342 = vst [vmem:[#allocation90_spill] sm:$0xff] %v8608_v51  ;;  %v8614_v50 = vld [vmem:[%s8143_s27 + $0x2d0] sm:$0xff] }
  0xf4   : > { %v8583_v61 = vpop.permute.xlu2 %651  ;;  %v8585_v62 = vpop.permute.xlu1 %601  ;;  %15343 = vst [vmem:[#allocation91_spill] sm:$0xff] %v8611_v55 }
  0xf5   : > { %15333 = vst [vmem:[#allocation81_spill] sm:$0xff] %v8583_v61  ;;  %v8587_v63 = vpop.permute.xlu0 %596 }
  0xf6   : > { %15334 = vst [vmem:[#allocation82_spill] sm:$0xff] %v8585_v62 }
  0xf7   : > { %15335 = vst [vmem:[#allocation83_spill] sm:$0xff] %v8587_v63 }
  0xf8   : > { %15344 = vst [vmem:[#allocation92_spill] sm:$0xff] %v8614_v50 }
  0xfa   : > { %831 = vperm.xlu2 %7925, %v8590_v45   ;;  %826 = vperm.xlu1 %7924, %v8593_v41   ;;  %v8630_v41 = vld [vmem:[%s8143_s27 + $0x2e8] sm:$0xff] }
  0xfb   : > { %821 = vperm.xlu0 %7923, %v8596_v37   ;;  %15349 = vst [vmem:[#allocation97_spill] sm:$0xff] %v8630_v41 }
  0xfc   : > { %v8601_v61 = vpop.permute.xlu2 %666  ;;  %v8603_v62 = vpop.permute.xlu1 %616 }
  0xfd   : > { %15339 = vst [vmem:[#allocation87_spill] sm:$0xff] %v8601_v61  ;;  %v8605_v63 = vpop.permute.xlu0 %611 }
  0xfe   : > { %15340 = vst [vmem:[#allocation88_spill] sm:$0xff] %v8603_v62  ;;  %v8622_v62 = vld [vmem:[%s8143_s27 + $0x2f8] sm:$0xff] }
  0xff   : > { %15341 = vst [vmem:[#allocation89_spill] sm:$0xff] %v8605_v63  ;;  %v8625_v63 = vld [vmem:[%s8143_s27 + $0x2f0] sm:$0xff] }
 0x100   : > { %15346 = vst [vmem:[#allocation94_spill] sm:$0xff] %v8622_v62 }
 0x101   : > { %15347 = vst [vmem:[#allocation95_spill] sm:$0xff] %v8625_v63 }
 0x102   : > { %846 = vperm.xlu2 %7925, %v8608_v51   ;;  %841 = vperm.xlu1 %7924, %v8611_v55   ;;  %v8640_v51 = vld [vmem:[%s8143_s27 + $0x310] sm:$0xff]  ;;  %v8643_v55 = vld [vmem:[%s8143_s27 + $0x308] sm:$0xff] }
 0x103   : > { %836 = vperm.xlu0 %7923, %v8614_v50   ;;  %15352 = vst [vmem:[#allocation100_spill] sm:$0xff] %v8640_v51 }
 0x104   : > { %v8619_v61 = vpop.permute.xlu2 %681  ;;  %v8627_v45 = vpop.permute.xlu1 %631  ;;  %15353 = vst [vmem:[#allocation101_spill] sm:$0xff] %v8643_v55 }
 0x105   : > { %15345 = vst [vmem:[#allocation93_spill] sm:$0xff] %v8619_v61  ;;  %v8632_v37 = vpop.permute.xlu0 %626 }
 0x106   : > { %15348 = vst [vmem:[#allocation96_spill] sm:$0xff] %v8627_v45  ;;  %v8646_v45 = vld [vmem:[%s8143_s27 + $0x300] sm:$0xff] }
 0x107   : > { %15350 = vst [vmem:[#allocation98_spill] sm:$0xff] %v8632_v37 }
 0x108   : > { %15354 = vst [vmem:[#allocation102_spill] sm:$0xff] %v8646_v45 }
 0x10a   : > { %861 = vperm.xlu2 %7925, %v8622_v62   ;;  %856 = vperm.xlu1 %7924, %v8625_v63   ;;  %v8658_v62 = vld [vmem:[%s8143_s27 + $0x328] sm:$0xff]  ;;  %v8661_v63 = vld [vmem:[%s8143_s27 + $0x320] sm:$0xff] }
 0x10b   : > { %851 = vperm.xlu0 %7923, %v8630_v41   ;;  %15358 = vst [vmem:[#allocation106_spill] sm:$0xff] %v8658_v62  ;;  %v8664_v41 = vld [vmem:[%s8143_s27 + $0x318] sm:$0xff] }
 0x10c   : > { %v8637_v61 = vpop.permute.xlu2 %696  ;;  %v8648_v50 = vpop.permute.xlu1 %646  ;;  %15359 = vst [vmem:[#allocation107_spill] sm:$0xff] %v8661_v63 }
 0x10d   : > { %15351 = vst [vmem:[#allocation99_spill] sm:$0xff] %v8637_v61  ;;  %v8652_v37 = vpop.permute.xlu0 %641 }
 0x10e   : > { %15355 = vst [vmem:[#allocation103_spill] sm:$0xff] %v8648_v50 }
 0x10f   : > { %15356 = vst [vmem:[#allocation104_spill] sm:$0xff] %v8652_v37 }
 0x110   : > { %15360 = vst [vmem:[#allocation108_spill] sm:$0xff] %v8664_v41 }
 0x112   : > { %876 = vperm.xlu2 %7925, %v8640_v51   ;;  %871 = vperm.xlu1 %7924, %v8643_v55   ;;  %v8676_v51 = vld [vmem:[%s8143_s27 + $0x340] sm:$0xff]  ;;  %v8679_v55 = vld [vmem:[%s8143_s27 + $0x338] sm:$0xff] }
 0x113   : > { %866 = vperm.xlu0 %7923, %v8646_v45   ;;  %15364 = vst [vmem:[#allocation112_spill] sm:$0xff] %v8676_v51  ;;  %v8682_v45 = vld [vmem:[%s8143_s27 + $0x330] sm:$0xff] }
 0x114   : > { %v8655_v61 = vpop.permute.xlu2 %711  ;;  %v8669_v37 = vpop.permute.xlu1 %661  ;;  %15365 = vst [vmem:[#allocation113_spill] sm:$0xff] %v8679_v55 }
 0x115   : > { %15357 = vst [vmem:[#allocation105_spill] sm:$0xff] %v8655_v61  ;;  %v8673_v61 = vpop.permute.xlu0 %656 }
 0x116   : > { %15361 = vst [vmem:[#allocation109_spill] sm:$0xff] %v8669_v37 }
 0x117   : > { %15363 = vst [vmem:[#allocation111_spill] sm:$0xff] %v8673_v61 }
 0x118   : > { %15366 = vst [vmem:[#allocation114_spill] sm:$0xff] %v8682_v45 }
 0x11a   : > { %891 = vperm.xlu2 %7925, %v8658_v62   ;;  %886 = vperm.xlu1 %7924, %v8661_v63   ;;  %v8694_v62 = vld [vmem:[%s8143_s27 + $0x358] sm:$0xff]  ;;  %v8697_v63 = vld [vmem:[%s8143_s27 + $0x350] sm:$0xff] }
 0x11b   : > { %881 = vperm.xlu0 %7923, %v8664_v41   ;;  %15370 = vst [vmem:[#allocation118_spill] sm:$0xff] %v8694_v62  ;;  %v8700_v41 = vld [vmem:[%s8143_s27 + $0x348] sm:$0xff] }
 0x11c   : > { %v8671_v50 = vpop.permute.xlu2 %726  ;;  %15371 = vst [vmem:[#allocation119_spill] sm:$0xff] %v8697_v63 }
 0x11d   : > { %15362 = vst [vmem:[#allocation110_spill] sm:$0xff] %v8671_v50  ;;  %v8689_v50 = vpop.permute.xlu1 %676  ;;  %v8691_v61 = vpop.permute.xlu0 %671 }
 0x11e   : > { %15368 = vst [vmem:[#allocation116_spill] sm:$0xff] %v8689_v50  ;;  %v8708_v50 = vld [vmem:[%s8143_s27 + $0x370] sm:$0xff] }
 0x11f   : > { %15369 = vst [vmem:[#allocation117_spill] sm:$0xff] %v8691_v61  ;;  %v8711_v61 = vld [vmem:[%s8143_s27 + $0x368] sm:$0xff] }
 0x120   : > { %15372 = vst [vmem:[#allocation120_spill] sm:$0xff] %v8700_v41 }
 0x121   : > { %15374 = vst [vmem:[#allocation122_spill] sm:$0xff] %v8708_v50 }
 0x122   : > { %906 = vperm.xlu2 %7925, %v8676_v51   ;;  %901 = vperm.xlu1 %7924, %v8679_v55   ;;  %15375 = vst [vmem:[#allocation123_spill] sm:$0xff] %v8711_v61  ;;  %v8716_v55 = vld [vmem:[%s8143_s27 + $0x360] sm:$0xff] }
 0x123   : > { %896 = vperm.xlu0 %7923, %v8682_v45   ;;  %15377 = vst [vmem:[#allocation125_spill] sm:$0xff] %v8716_v55 }
 0x124   : > { %v8687_v37 = vpop.permute.xlu2 %741 }
 0x125   : > { %15367 = vst [vmem:[#allocation115_spill] sm:$0xff] %v8687_v37  ;;  %v8713_v51 = vpop.permute.xlu1 %691  ;;  %v8718_v45 = vpop.permute.xlu0 %686 }
 0x126   : > { %15376 = vst [vmem:[#allocation124_spill] sm:$0xff] %v8713_v51  ;;  %v8732_v51 = vld [vmem:[%s8143_s27 + $0x378] sm:$0xff] }
 0x127   : > { %15378 = vst [vmem:[#allocation126_spill] sm:$0xff] %v8718_v45 }
 0x128   : > { %15382 = vst [vmem:[#allocation130_spill] sm:$0xff] %v8732_v51 }
 0x12a   : > { %921 = vperm.xlu2 %7925, %v8694_v62   ;;  %916 = vperm.xlu1 %7924, %v8697_v63   ;;  %v8726_v62 = vld [vmem:[%s8143_s27 + $0x388] sm:$0xff]  ;;  %v8729_v63 = vld [vmem:[%s8143_s27 + $0x380] sm:$0xff] }
 0x12b   : > { %911 = vperm.xlu0 %7923, %v8700_v41   ;;  %15380 = vst [vmem:[#allocation128_spill] sm:$0xff] %v8726_v62 }
 0x12c   : > { %v8705_v37 = vpop.permute.xlu2 %756  ;;  %15381 = vst [vmem:[#allocation129_spill] sm:$0xff] %v8729_v63 }
 0x12d   : > { %15373 = vst [vmem:[#allocation121_spill] sm:$0xff] %v8705_v37  ;;  %v8734_v41 = vpop.permute.xlu1 %706  ;;  %v8738_v45 = vpop.permute.xlu0 %701 }
 0x12e   : > { %15383 = vst [vmem:[#allocation131_spill] sm:$0xff] %v8734_v41 }
 0x12f   : > { %15384 = vst [vmem:[#allocation132_spill] sm:$0xff] %v8738_v45 }
 0x132   : > { %936 = vperm.xlu2 %7925, %v8708_v50   ;;  %931 = vperm.xlu1 %7924, %v8711_v61   ;;  %v8744_v50 = vld [vmem:[%s8143_s27 + $0x3a0] sm:$0xff]  ;;  %v8747_v61 = vld [vmem:[%s8143_s27 + $0x398] sm:$0xff] }
 0x133   : > { %926 = vperm.xlu0 %7923, %v8716_v55   ;;  %15386 = vst [vmem:[#allocation134_spill] sm:$0xff] %v8744_v50  ;;  %v8750_v55 = vld [vmem:[%s8143_s27 + $0x390] sm:$0xff] }
 0x134   : > { %v8723_v37 = vpop.permute.xlu2 %771  ;;  %15387 = vst [vmem:[#allocation135_spill] sm:$0xff] %v8747_v61 }
 0x135   : > { %15379 = vst [vmem:[#allocation127_spill] sm:$0xff] %v8723_v37  ;;  %v8755_v45 = vpop.permute.xlu1 %721 }
 0x136   : > { %15388 = vst [vmem:[#allocation136_spill] sm:$0xff] %v8750_v55 }
 0x137   : > { %15389 = vst [vmem:[#allocation137_spill] sm:$0xff] %v8755_v45 }
 0x13a   : > { %951 = vperm.xlu2 %7925, %v8726_v62   ;;  %946 = vperm.xlu1 %7924, %v8729_v63   ;;  %v8762_v62 = vld [vmem:[%s8143_s27 + $0x3b8] sm:$0xff]  ;;  %v8765_v63 = vld [vmem:[%s8143_s27 + $0x3b0] sm:$0xff] }
 0x13b   : > { %941 = vperm.xlu0 %7923, %v8732_v51   ;;  %15392 = vst [vmem:[#allocation140_spill] sm:$0xff] %v8762_v62  ;;  %v8768_v51 = vld [vmem:[%s8143_s27 + $0x3a8] sm:$0xff] }
 0x13c   : > { %v8741_v37 = vpop.permute.xlu2 %786  ;;  %15393 = vst [vmem:[#allocation141_spill] sm:$0xff] %v8765_v63 }
 0x13d   : > { %15385 = vst [vmem:[#allocation133_spill] sm:$0xff] %v8741_v37  ;;  %v8759_v37 = vpop.permute.xlu0 %716 }
 0x13e   : > { %15391 = vst [vmem:[#allocation139_spill] sm:$0xff] %v8759_v37 }
 0x13f   : > { %15394 = vst [vmem:[#allocation142_spill] sm:$0xff] %v8768_v51 }
 0x142   : > { %966 = vperm.xlu2 %7925, %v8744_v50   ;;  %961 = vperm.xlu1 %7924, %v8747_v61   ;;  %v8780_v50 = vld [vmem:[%s8143_s27 + $0x3d0] sm:$0xff]  ;;  %v8783_v61 = vld [vmem:[%s8143_s27 + $0x3c8] sm:$0xff] }
 0x143   : > { %956 = vperm.xlu0 %7923, %v8750_v55   ;;  %15398 = vst [vmem:[#allocation146_spill] sm:$0xff] %v8780_v50  ;;  %v8786_v55 = vld [vmem:[%s8143_s27 + $0x3c0] sm:$0xff] }
 0x144   : > { %v8757_v41 = vpop.permute.xlu2 %801  ;;  %15399 = vst [vmem:[#allocation147_spill] sm:$0xff] %v8783_v61 }
 0x145   : > { %15390 = vst [vmem:[#allocation138_spill] sm:$0xff] %v8757_v41  ;;  %v8775_v41 = vpop.permute.xlu1 %736  ;;  %v8777_v37 = vpop.permute.xlu0 %731 }
 0x146   : > { %15396 = vst [vmem:[#allocation144_spill] sm:$0xff] %v8775_v41  ;;  %v8797_v41 = vld [vmem:[%s8143_s27 + $0x3e0] sm:$0xff] }
 0x147   : > { %15397 = vst [vmem:[#allocation145_spill] sm:$0xff] %v8777_v37 }
 0x148   : > { %15400 = vst [vmem:[#allocation148_spill] sm:$0xff] %v8786_v55 }
 0x14a   : > { %981 = vperm.xlu2 %7925, %v8762_v62   ;;  %976 = vperm.xlu1 %7924, %v8765_v63   ;;  %v8802_v63 = vld [vmem:[%s8143_s27 + $0x3d8] sm:$0xff] }
 0x14b   : > { %971 = vperm.xlu0 %7923, %v8768_v51  }
 0x14c   : > { %v8773_v45 = vpop.permute.xlu2 %816 }
 0x14d   : > { %15395 = vst [vmem:[#allocation143_spill] sm:$0xff] %v8773_v45  ;;  %v8794_v45 = vld [vmem:[%s8143_s27 + $0x3e8] sm:$0xff]  ;;  %v8799_v37 = vpop.permute.xlu1 %751  ;;  %v8804_v51 = vpop.permute.xlu0 %746 }
 0x14e   : > { %15402 = vst [vmem:[#allocation150_spill] sm:$0xff] %v8799_v37 }
 0x14f   : > { %15403 = vst [vmem:[#allocation151_spill] sm:$0xff] %v8804_v51 }
 0x152   : > { %996 = vperm.xlu2 %7925, %v8780_v50   ;;  %991 = vperm.xlu1 %7924, %v8783_v61   ;;  %v8812_v61 = vld [vmem:[%s8143_s27 + $0x3f8] sm:$0xff] }
 0x153   : > { %986 = vperm.xlu0 %7923, %v8786_v55   ;;  %15405 = vst [vmem:[#allocation153_spill] sm:$0xff] %v8812_v61 }
 0x154   : > { %v8791_v62 = vpop.permute.xlu2 %831 }
 0x155   : > { %15401 = vst [vmem:[#allocation149_spill] sm:$0xff] %v8791_v62  ;;  %v8815_v62 = vld [vmem:[%s8143_s27 + $0x3f0] sm:$0xff]  ;;  %v8817_v55 = vpop.permute.xlu1 %766  ;;  %v8820_v37 = vpop.permute.xlu0 %761 }
 0x156   : > { %15406 = vst [vmem:[#allocation154_spill] sm:$0xff] %v8817_v55 }
 0x15a   : > { %1011 = vperm.xlu2 %7925, %v8794_v45   ;;  %1006 = vperm.xlu1 %7924, %v8797_v41  }
 0x15b   : > { %1001 = vperm.xlu0 %7923, %v8802_v63  }
 0x15c   : > { %v8809_v50 = vpop.permute.xlu2 %846 }
 0x15d   : > { %15404 = vst [vmem:[#allocation152_spill] sm:$0xff] %v8809_v50  ;;  %v8827_v50 = vpop.permute.xlu1 %781 }
 0x162   : > { %7926 = vset.pattern.permute.xlu2 %v8090_v49  ;;  %1021 = vperm.xlu1 %7924, %v8812_v61   ;;  %v8833_v61 = vpop.permute.xlu0 %776 }
 0x163   : > { %1016 = vperm.xlu0 %7923, %v8815_v62   ;;  %1282 = vperm.xlu2 %7926, %v8152_v3  }
 0x164   : > { %v8824_v51 = vpop.permute.xlu2 %861 }
 0x16a   : > { %7928 = vset.pattern.permute.xlu1 %v8090_v49 }
 0x16b   : > { %7927 = vset.pattern.permute.xlu0 %v8090_v49  ;;  %1290 = vperm.xlu1 %7928, %v8149_v2   ;;  %v8840_v49 = vpop.permute.xlu1 %796  ;;  %v8842_v2 = vpop.permute.xlu0 %791 }
 0x16c   : > { %1294 = vperm.xlu2 %7926, %v8161_v5   ;;  %1286 = vperm.xlu0 %7927, %v8164_v6   ;;  %v8831_v55 = vpop.permute.xlu2 %876 }
 0x173   : > { %1298 = vperm.xlu1 %7928, %v8146_v1   ;;  %v8849_v6 = vpop.permute.xlu1 %811  ;;  %v8851_v1 = vpop.permute.xlu0 %806 }
 0x174   : > { %1302 = vperm.xlu2 %7926, %v8158_v4   ;;  %1306 = vperm.xlu0 %7927, %v8176_v9   ;;  %v8838_v3 = vpop.permute.xlu2 %891 }
 0x17b   : > { %1310 = vperm.xlu1 %7928, %v8173_v8   ;;  %v8858_v9 = vpop.permute.xlu1 %826  ;;  %v8860_v8 = vpop.permute.xlu0 %821 }
 0x17c   : > { %1314 = vperm.xlu2 %7926, %v8170_v7   ;;  %1318 = vperm.xlu0 %7927, %v8188_v12   ;;  %v8847_v5 = vpop.permute.xlu2 %906 }
 0x183   : > { %1322 = vperm.xlu1 %7928, %v8185_v11   ;;  %v8868_v11 = vpop.permute.xlu1 %841  ;;  %v8874_v12 = vpop.permute.xlu0 %836 }
 0x184   : > { %1326 = vperm.xlu2 %7926, %v8182_v10   ;;  %1330 = vperm.xlu0 %7927, %v8200_v15   ;;  %v8856_v4 = vpop.permute.xlu2 %921 }
 0x18b   : > { %1334 = vperm.xlu1 %7928, %v8197_v14   ;;  %v8881_v14 = vpop.permute.xlu1 %856  ;;  %v8883_v15 = vpop.permute.xlu0 %851 }
 0x18c   : > { %1338 = vperm.xlu2 %7926, %v8194_v13   ;;  %1342 = vperm.xlu0 %7927, %v8212_v18   ;;  %v8865_v7 = vpop.permute.xlu2 %936 }
 0x193   : > { %1346 = vperm.xlu1 %7928, %v8209_v17   ;;  %v8890_v17 = vpop.permute.xlu1 %871  ;;  %v8892_v18 = vpop.permute.xlu0 %866 }
 0x194   : > { %1350 = vperm.xlu2 %7926, %v8206_v16   ;;  %1354 = vperm.xlu0 %7927, %v8224_v21   ;;  %v8872_v10 = vpop.permute.xlu2 %951 }
 0x19b   : > { %1358 = vperm.xlu1 %7928, %v8221_v20   ;;  %v8899_v20 = vpop.permute.xlu1 %886  ;;  %v8901_v21 = vpop.permute.xlu0 %881 }
 0x19c   : > { %1362 = vperm.xlu2 %7926, %v8218_v19   ;;  %1366 = vperm.xlu0 %7927, %v8236_v24   ;;  %v8879_v13 = vpop.permute.xlu2 %966 }
 0x1a3   : > { %1370 = vperm.xlu1 %7928, %v8233_v23   ;;  %v8909_v23 = vpop.permute.xlu1 %901  ;;  %v8913_v24 = vpop.permute.xlu0 %896 }
 0x1a4   : > { %1374 = vperm.xlu2 %7926, %v8230_v22   ;;  %1378 = vperm.xlu0 %7927, %v8248_v27   ;;  %v8888_v16 = vpop.permute.xlu2 %981 }
 0x1ab   : > { %1382 = vperm.xlu1 %7928, %v8245_v26   ;;  %v8922_v27 = vpop.permute.xlu1 %916 }
 0x1ac   : > { %1386 = vperm.xlu2 %7926, %v8242_v25   ;;  %1390 = vperm.xlu0 %7927, %v8260_v30   ;;  %v8897_v19 = vpop.permute.xlu2 %996 }
 0x1b3   : > { %1394 = vperm.xlu1 %7928, %v8257_v29   ;;  %v8931_v30 = vpop.permute.xlu1 %931 }
 0x1b4   : > { %1398 = vperm.xlu2 %7926, %v8254_v28   ;;  %1402 = vperm.xlu0 %7927, %v8272_v33   ;;  %v8906_v22 = vpop.permute.xlu2 %1011  ;;  %v8924_v28 = vpop.permute.xlu0 %911 }
 0x1bb   : > { %1406 = vperm.xlu1 %7928, %v8269_v32   ;;  %v8940_v33 = vpop.permute.xlu1 %946 }
 0x1bc   : > { %1410 = vperm.xlu2 %7926, %v8266_v31   ;;  %1414 = vperm.xlu0 %7927, %v8284_v36   ;;  %v8933_v31 = vpop.permute.xlu0 %926 }
 0x1bd   : > { %v8915_v25 = vpop.permute.xlu2 %1282 }
 0x1c3   : > { %1418 = vperm.xlu1 %7928, %v8281_v35   ;;  %v8952_v36 = vpop.permute.xlu1 %961 }
 0x1c4   : > { %1422 = vperm.xlu2 %7926, %v8278_v34   ;;  %1426 = vperm.xlu0 %7927, %v8298_v40   ;;  %v8942_v34 = vpop.permute.xlu0 %941 }
 0x1c6   : > { %v8920_v26 = vpop.permute.xlu2 %1294 }
 0x1cb   : > { %1430 = vperm.xlu1 %7928, %v8295_v39  }
 0x1cc   : > { %1434 = vperm.xlu2 %7926, %v8292_v38   ;;  %1438 = vperm.xlu0 %7927, %v8312_v44   ;;  %v8954_v38 = vpop.permute.xlu0 %956  ;;  %v15410_v44 = vld [vmem:[#allocation20_spill] sm:$0xff] }
 0x1ce   : > { %v8929_v29 = vpop.permute.xlu2 %1302 }
 0x1d3   : > { %1442 = vperm.xlu1 %7928, %v8309_v43  }
 0x1d4   : > { %1446 = vperm.xlu2 %7926, %v8306_v42   ;;  %1450 = vperm.xlu0 %7927, %v8326_v48   ;;  %v8963_v42 = vpop.permute.xlu1 %976  ;;  %v8965_v43 = vpop.permute.xlu0 %971 }
 0x1d5   : > { %15408 = vst [vmem:[#allocation156_spill] sm:$0xff] %v8963_v42  ;;  %v15495_v42 = vld [vmem:[#allocation106_spill] sm:$0xff] }
 0x1d6   : > { %v8938_v32 = vpop.permute.xlu2 %1314  ;;  %15409 = vst [vmem:[#allocation157_spill] sm:$0xff] %v8965_v43  ;;  %v15448_v43 = vld [vmem:[#allocation61_spill] sm:$0xff] }
 0x1db   : > { %1454 = vperm.xlu1 %7928, %v8323_v47  }
 0x1dc   : > { %1458 = vperm.xlu2 %7926, %v8320_v46   ;;  %1462 = vperm.xlu0 %7927, %v8344_v54   ;;  %v8972_v47 = vpop.permute.xlu1 %991  ;;  %v8974_v48 = vpop.permute.xlu0 %986  ;;  %v15416_v54 = vld [vmem:[#allocation26_spill] sm:$0xff] }
 0x1dd   : > { %15412 = vst [vmem:[#allocation158_spill] sm:$0xff] %v8972_v47 }
 0x1de   : > { %v8947_v35 = vpop.permute.xlu2 %1326  ;;  %15413 = vst [vmem:[#allocation159_spill] sm:$0xff] %v8974_v48 }
 0x1e3   : > { %1466 = vperm.xlu1 %7928, %v8341_v53   ;;  %v15415_v53 = vld [vmem:[#allocation18_spill] sm:$0xff] }
 0x1e4   : > { %1470 = vperm.xlu2 %7926, %v8338_v52   ;;  %1474 = vperm.xlu0 %7927, %v8362_v60   ;;  %v15414_v52 = vld [vmem:[#allocation19_spill] sm:$0xff]  ;;  %v15421_v60 = vld [vmem:[#allocation24_spill] sm:$0xff] }
 0x1e6   : > { %v8956_v39 = vpop.permute.xlu2 %1338 }
 0x1eb   : > { %1478 = vperm.xlu1 %7928, %v8359_v59   ;;  %v15420_v59 = vld [vmem:[#allocation25_spill] sm:$0xff] }
 0x1ec   : > { %1482 = vperm.xlu2 %7926, %v8356_v58   ;;  %1486 = vperm.xlu0 %7927, %v8380_v56   ;;  %v8981_v58 = vpop.permute.xlu1 %1006 }
 0x1ed   : > { %15418 = vst [vmem:[#allocation18_spill] sm:$0xff] %v8981_v58 }
 0x1ee   : > { %v8961_v40 = vpop.permute.xlu2 %1350 }
 0x1ef   : > { %15407 = vst [vmem:[#allocation155_spill] sm:$0xff] %v8961_v40 }
 0x1f3   : > { %1490 = vperm.xlu1 %7928, %v8377_v57   ;;  %v8983_v57 = vpop.permute.xlu0 %1001 }
 0x1f4   : > { %1494 = vperm.xlu2 %7926, %v8374_v0   ;;  %1498 = vperm.xlu0 %7927, %v15410_v44   ;;  %15419 = vst [vmem:[#allocation26_spill] sm:$0xff] %v8983_v57  ;;  %v15422_v0 = vld [vmem:[#allocation32_spill] sm:$0xff]  ;;  %v15430_v57 = vld [vmem:[#allocation37_spill] sm:$0xff] }
 0x1f6   : > { %v8970_v46 = vpop.permute.xlu2 %1362 }
 0x1f7   : > { %15411 = vst [vmem:[#allocation20_spill] sm:$0xff] %v8970_v46  ;;  %v15424_v46 = vld [vmem:[#allocation31_spill] sm:$0xff] }
 0x1fb   : > { %1502 = vperm.xlu1 %7928, %v15414_v52   ;;  %v15425_v52 = vld [vmem:[#allocation30_spill] sm:$0xff] }
 0x1fc   : > { %1506 = vperm.xlu2 %7926, %v15415_v53   ;;  %1510 = vperm.xlu0 %7927, %v15416_v54   ;;  %v15426_v53 = vld [vmem:[#allocation38_spill] sm:$0xff]  ;;  %v8993_v54 = vpop.permute.xlu1 %1021 }
 0x1fd   : > { %15427 = vst [vmem:[#allocation24_spill] sm:$0xff] %v8993_v54  ;;  %v15436_v54 = vld [vmem:[#allocation50_spill] sm:$0xff] }
 0x1fe   : > { %v8979_v56 = vpop.permute.xlu2 %1374 }
 0x1ff   : > { %15417 = vst [vmem:[#allocation19_spill] sm:$0xff] %v8979_v56  ;;  %v8995_v56 = vpop.permute.xlu0 %1016 }
 0x200   : > { %15428 = vst [vmem:[#allocation32_spill] sm:$0xff] %v8995_v56 }
 0x203   : > { %1514 = vperm.xlu1 %7928, %v15420_v59   ;;  %v15431_v59 = vld [vmem:[#allocation36_spill] sm:$0xff] }
 0x204   : > { %1518 = vperm.xlu2 %7926, %v15421_v60   ;;  %1522 = vperm.xlu0 %7927, %v15422_v0   ;;  %v15432_v60 = vld [vmem:[#allocation44_spill] sm:$0xff] }
 0x206   : > { %v8988_v44 = vpop.permute.xlu2 %1386 }
 0x207   : > { %15423 = vst [vmem:[#allocation25_spill] sm:$0xff] %v8988_v44  ;;  %v9004_v44 = vpop.permute.xlu1 %1290 }
 0x20b   : > { %1526 = vperm.xlu1 %7928, %v15424_v46   ;;  %v9006_v46 = vpop.permute.xlu0 %1286 }
 0x20c   : > { %1530 = vperm.xlu2 %7926, %v15425_v52   ;;  %1534 = vperm.xlu0 %7927, %v15426_v53   ;;  %v15434_v52 = vld [vmem:[#allocation43_spill] sm:$0xff]  ;;  %v15435_v53 = vld [vmem:[#allocation42_spill] sm:$0xff] }
 0x20e   : > { %v8997_v40 = vpop.permute.xlu2 %1398 }
 0x20f   : > { %15429 = vst [vmem:[#allocation31_spill] sm:$0xff] %v8997_v40  ;;  %v9013_v40 = vpop.permute.xlu1 %1298 }
 0x213   : > { %1538 = vperm.xlu1 %7928, %v15430_v57   ;;  %v9015_v57 = vpop.permute.xlu0 %1306 }
 0x214   : > { %1542 = vperm.xlu2 %7926, %v15431_v59   ;;  %1546 = vperm.xlu0 %7927, %v15432_v60   ;;  %v15438_v59 = vld [vmem:[#allocation49_spill] sm:$0xff]  ;;  %v15439_v60 = vld [vmem:[#allocation48_spill] sm:$0xff] }
 0x216   : > { %v9002_v0 = vpop.permute.xlu2 %1410 }
 0x217   : > { %15433 = vst [vmem:[#allocation30_spill] sm:$0xff] %v9002_v0  ;;  %v15440_v0 = vld [vmem:[#allocation56_spill] sm:$0xff]  ;;  %v9022_v48 = vpop.permute.xlu1 %1310 }
 0x218   : > { %15442 = vst [vmem:[#allocation36_spill] sm:$0xff] %v9022_v48 }
 0x21b   : > { %1550 = vperm.xlu1 %7928, %v15434_v52   ;;  %v9024_v52 = vpop.permute.xlu0 %1318 }
 0x21c   : > { %1554 = vperm.xlu2 %7926, %v15435_v53   ;;  %1558 = vperm.xlu0 %7927, %v15436_v54   ;;  %15443 = vst [vmem:[#allocation44_spill] sm:$0xff] %v9024_v52  ;;  %v15444_v53 = vld [vmem:[#allocation55_spill] sm:$0xff]  ;;  %v15445_v54 = vld [vmem:[#allocation54_spill] sm:$0xff] }
 0x21d   : > { %v15454_v52 = vld [vmem:[#allocation67_spill] sm:$0xff] }
 0x21e   : > { %v9011_v56 = vpop.permute.xlu2 %1422 }
 0x21f   : > { %15437 = vst [vmem:[#allocation38_spill] sm:$0xff] %v9011_v56  ;;  %v15446_v56 = vld [vmem:[#allocation62_spill] sm:$0xff] }
 0x223   : > { %1562 = vperm.xlu1 %7928, %v15438_v59   ;;  %v15449_v59 = vld [vmem:[#allocation60_spill] sm:$0xff] }
 0x224   : > { %1566 = vperm.xlu2 %7926, %v15439_v60   ;;  %1570 = vperm.xlu0 %7927, %v15440_v0   ;;  %v15450_v60 = vld [vmem:[#allocation68_spill] sm:$0xff]  ;;  %v9034_v0 = vpop.permute.xlu1 %1322 }
 0x225   : > { %15451 = vst [vmem:[#allocation42_spill] sm:$0xff] %v9034_v0  ;;  %v15462_v0 = vld [vmem:[#allocation80_spill] sm:$0xff] }
 0x226   : > { %v9020_v58 = vpop.permute.xlu2 %1434 }
 0x227   : > { %15441 = vst [vmem:[#allocation37_spill] sm:$0xff] %v9020_v58  ;;  %v9036_v58 = vpop.permute.xlu0 %1330 }
 0x228   : > { %15452 = vst [vmem:[#allocation50_spill] sm:$0xff] %v9036_v58 }
 0x22b   : > { %1574 = vperm.xlu1 %7928, %v15444_v53   ;;  %v15455_v53 = vld [vmem:[#allocation66_spill] sm:$0xff] }
 0x22c   : > { %1578 = vperm.xlu2 %7926, %v15445_v54   ;;  %1582 = vperm.xlu0 %7927, %v15446_v56   ;;  %v15456_v54 = vld [vmem:[#allocation74_spill] sm:$0xff] }
 0x22e   : > { %v9029_v47 = vpop.permute.xlu2 %1446 }
 0x22f   : > { %15447 = vst [vmem:[#allocation43_spill] sm:$0xff] %v9029_v47  ;;  %v9045_v47 = vpop.permute.xlu1 %1334 }
 0x230   : > { %15458 = vst [vmem:[#allocation56_spill] sm:$0xff] %v9045_v47 }
 0x233   : > { %1586 = vperm.xlu1 %7928, %v15448_v43   ;;  %v9047_v43 = vpop.permute.xlu0 %1342 }
 0x234   : > { %1590 = vperm.xlu2 %7926, %v15449_v59   ;;  %1594 = vperm.xlu0 %7927, %v15450_v60   ;;  %15459 = vst [vmem:[#allocation55_spill] sm:$0xff] %v9047_v43  ;;  %v15460_v59 = vld [vmem:[#allocation73_spill] sm:$0xff]  ;;  %v15461_v60 = vld [vmem:[#allocation72_spill] sm:$0xff] }
 0x236   : > { %v9038_v48 = vpop.permute.xlu2 %1458 }
 0x237   : > { %15453 = vst [vmem:[#allocation49_spill] sm:$0xff] %v9038_v48  ;;  %v9054_v48 = vpop.permute.xlu1 %1346 }
 0x238   : > { %15464 = vst [vmem:[#allocation62_spill] sm:$0xff] %v9054_v48 }
 0x23b   : > { %1598 = vperm.xlu1 %7928, %v15454_v52   ;;  %v9056_v52 = vpop.permute.xlu0 %1354 }
 0x23c   : > { %1602 = vperm.xlu2 %7926, %v15455_v53   ;;  %1606 = vperm.xlu0 %7927, %v15456_v54   ;;  %15465 = vst [vmem:[#allocation61_spill] sm:$0xff] %v9056_v52  ;;  %v15466_v53 = vld [vmem:[#allocation79_spill] sm:$0xff]  ;;  %v15467_v54 = vld [vmem:[#allocation78_spill] sm:$0xff] }
 0x23d   : > { %v15476_v52 = vld [vmem:[#allocation91_spill] sm:$0xff] }
 0x23e   : > { %v9043_v56 = vpop.permute.xlu2 %1470 }
 0x23f   : > { %15457 = vst [vmem:[#allocation48_spill] sm:$0xff] %v9043_v56  ;;  %v15468_v56 = vld [vmem:[#allocation86_spill] sm:$0xff]  ;;  %v9063_v43 = vpop.permute.xlu1 %1358 }
 0x240   : > { %15470 = vst [vmem:[#allocation68_spill] sm:$0xff] %v9063_v43 }
 0x243   : > { %1610 = vperm.xlu1 %7928, %v15460_v59   ;;  %v9065_v59 = vpop.permute.xlu0 %1366 }
 0x244   : > { %1614 = vperm.xlu2 %7926, %v15461_v60   ;;  %1618 = vperm.xlu0 %7927, %v15462_v0   ;;  %15471 = vst [vmem:[#allocation67_spill] sm:$0xff] %v9065_v59  ;;  %v15472_v60 = vld [vmem:[#allocation85_spill] sm:$0xff]  ;;  %v15473_v0 = vld [vmem:[#allocation84_spill] sm:$0xff]  ;;  %v15482_v59 = vld [vmem:[#allocation95_spill] sm:$0xff] }
 0x246   : > { %v9052_v58 = vpop.permute.xlu2 %1482 }
 0x247   : > { %15463 = vst [vmem:[#allocation54_spill] sm:$0xff] %v9052_v58  ;;  %v15474_v58 = vld [vmem:[#allocation92_spill] sm:$0xff] }
 0x24b   : > { %1622 = vperm.xlu1 %7928, %v15466_v53   ;;  %v15477_v53 = vld [vmem:[#allocation90_spill] sm:$0xff] }
 0x24c   : > { %1626 = vperm.xlu2 %7926, %v15467_v54   ;;  %1630 = vperm.xlu0 %7927, %v15468_v56   ;;  %v15478_v54 = vld [vmem:[#allocation97_spill] sm:$0xff]  ;;  %v9075_v56 = vpop.permute.xlu1 %1370 }
 0x24d   : > { %15479 = vst [vmem:[#allocation74_spill] sm:$0xff] %v9075_v56  ;;  %v15490_v56 = vld [vmem:[#allocation108_spill] sm:$0xff] }
 0x24e   : > { %v9061_v47 = vpop.permute.xlu2 %1494 }
 0x24f   : > { %15469 = vst [vmem:[#allocation60_spill] sm:$0xff] %v9061_v47  ;;  %v9077_v47 = vpop.permute.xlu0 %1378 }
 0x250   : > { %15480 = vst [vmem:[#allocation73_spill] sm:$0xff] %v9077_v47 }
 0x253   : > { %1634 = vperm.xlu1 %7928, %v15472_v60   ;;  %v15483_v60 = vld [vmem:[#allocation94_spill] sm:$0xff] }
 0x254   : > { %1638 = vperm.xlu2 %7926, %v15473_v0   ;;  %1642 = vperm.xlu0 %7927, %v15474_v58   ;;  %v15484_v0 = vld [vmem:[#allocation102_spill] sm:$0xff] }
 0x256   : > { %v9070_v48 = vpop.permute.xlu2 %1506 }
 0x257   : > { %15475 = vst [vmem:[#allocation66_spill] sm:$0xff] %v9070_v48  ;;  %v9086_v48 = vpop.permute.xlu1 %1382 }
 0x258   : > { %15486 = vst [vmem:[#allocation79_spill] sm:$0xff] %v9086_v48 }
 0x25b   : > { %1646 = vperm.xlu1 %7928, %v15476_v52   ;;  %v9088_v52 = vpop.permute.xlu0 %1390 }
 0x25c   : > { %1650 = vperm.xlu2 %7926, %v15477_v53   ;;  %1654 = vperm.xlu0 %7927, %v15478_v54   ;;  %15487 = vst [vmem:[#allocation78_spill] sm:$0xff] %v9088_v52  ;;  %v15488_v53 = vld [vmem:[#allocation101_spill] sm:$0xff]  ;;  %v15489_v54 = vld [vmem:[#allocation100_spill] sm:$0xff] }
 0x25e   : > { %v9079_v43 = vpop.permute.xlu2 %1518 }
 0x25f   : > { %15481 = vst [vmem:[#allocation72_spill] sm:$0xff] %v9079_v43  ;;  %v9095_v43 = vpop.permute.xlu1 %1394 }
 0x260   : > { %15492 = vst [vmem:[#allocation85_spill] sm:$0xff] %v9095_v43 }
 0x263   : > { %1658 = vperm.xlu1 %7928, %v15482_v59   ;;  %v9097_v59 = vpop.permute.xlu0 %1402 }
 0x264   : > { %1662 = vperm.xlu2 %7926, %v15483_v60   ;;  %1666 = vperm.xlu0 %7927, %v15484_v0   ;;  %15493 = vst [vmem:[#allocation84_spill] sm:$0xff] %v9097_v59  ;;  %v15494_v60 = vld [vmem:[#allocation107_spill] sm:$0xff] }
 0x265   : > { %v15504_v59 = vld [vmem:[#allocation119_spill] sm:$0xff] }
 0x266   : > { %v9084_v58 = vpop.permute.xlu2 %1530 }
 0x267   : > { %15485 = vst [vmem:[#allocation80_spill] sm:$0xff] %v9084_v58  ;;  %v15496_v58 = vld [vmem:[#allocation114_spill] sm:$0xff]  ;;  %v9104_v52 = vpop.permute.xlu1 %1406 }
 0x268   : > { %15498 = vst [vmem:[#allocation91_spill] sm:$0xff] %v9104_v52 }
 0x26b   : > { %1670 = vperm.xlu1 %7928, %v15488_v53   ;;  %v9106_v53 = vpop.permute.xlu0 %1414 }
 0x26c   : > { %1674 = vperm.xlu2 %7926, %v15489_v54   ;;  %1678 = vperm.xlu0 %7927, %v15490_v56   ;;  %15499 = vst [vmem:[#allocation90_spill] sm:$0xff] %v9106_v53  ;;  %v15500_v54 = vld [vmem:[#allocation113_spill] sm:$0xff]  ;;  %v15501_v56 = vld [vmem:[#allocation112_spill] sm:$0xff]  ;;  %v15510_v53 = vld [vmem:[#allocation123_spill] sm:$0xff] }
 0x26e   : > { %v9093_v47 = vpop.permute.xlu2 %1542 }
 0x26f   : > { %15491 = vst [vmem:[#allocation86_spill] sm:$0xff] %v9093_v47  ;;  %v15502_v47 = vld [vmem:[#allocation120_spill] sm:$0xff] }
 0x273   : > { %1682 = vperm.xlu1 %7928, %v15494_v60   ;;  %v15505_v60 = vld [vmem:[#allocation118_spill] sm:$0xff] }
 0x274   : > { %1686 = vperm.xlu2 %7926, %v15495_v42   ;;  %1690 = vperm.xlu0 %7927, %v15496_v58   ;;  %v15506_v42 = vld [vmem:[#allocation125_spill] sm:$0xff]  ;;  %v9116_v58 = vpop.permute.xlu1 %1418 }
 0x275   : > { %15507 = vst [vmem:[#allocation95_spill] sm:$0xff] %v9116_v58  ;;  %v15518_v58 = vld [vmem:[#allocation136_spill] sm:$0xff] }
 0x276   : > { %v9102_v48 = vpop.permute.xlu2 %1554 }
 0x277   : > { %15497 = vst [vmem:[#allocation92_spill] sm:$0xff] %v9102_v48  ;;  %v9118_v48 = vpop.permute.xlu0 %1426 }
 0x278   : > { %15508 = vst [vmem:[#allocation94_spill] sm:$0xff] %v9118_v48 }
 0x27b   : > { %1694 = vperm.xlu1 %7928, %v15500_v54   ;;  %v15511_v54 = vld [vmem:[#allocation122_spill] sm:$0xff] }
 0x27c   : > { %1698 = vperm.xlu2 %7926, %v15501_v56   ;;  %1702 = vperm.xlu0 %7927, %v15502_v47   ;;  %v15512_v56 = vld [vmem:[#allocation130_spill] sm:$0xff] }
 0x27e   : > { %v9111_v43 = vpop.permute.xlu2 %1566 }
 0x27f   : > { %15503 = vst [vmem:[#allocation97_spill] sm:$0xff] %v9111_v43  ;;  %v9127_v43 = vpop.permute.xlu1 %1430 }
 0x280   : > { %15514 = vst [vmem:[#allocation100_spill] sm:$0xff] %v9127_v43 }
 0x283   : > { %1706 = vperm.xlu1 %7928, %v15504_v59   ;;  %v9129_v59 = vpop.permute.xlu0 %1438 }
 0x284   : > { %1710 = vperm.xlu2 %7926, %v15505_v60   ;;  %1714 = vperm.xlu0 %7927, %v15506_v42   ;;  %15515 = vst [vmem:[#allocation108_spill] sm:$0xff] %v9129_v59  ;;  %v15516_v60 = vld [vmem:[#allocation129_spill] sm:$0xff]  ;;  %v15517_v42 = vld [vmem:[#allocation128_spill] sm:$0xff] }
 0x286   : > { %v9120_v52 = vpop.permute.xlu2 %1578 }
 0x287   : > { %15509 = vst [vmem:[#allocation102_spill] sm:$0xff] %v9120_v52  ;;  %v9136_v52 = vpop.permute.xlu1 %1442 }
 0x288   : > { %15520 = vst [vmem:[#allocation106_spill] sm:$0xff] %v9136_v52 }
 0x28b   : > { %1718 = vperm.xlu1 %7928, %v15510_v53   ;;  %v9138_v53 = vpop.permute.xlu0 %1450 }
 0x28c   : > { %1722 = vperm.xlu2 %7926, %v15511_v54   ;;  %1726 = vperm.xlu0 %7927, %v15512_v56   ;;  %15521 = vst [vmem:[#allocation114_spill] sm:$0xff] %v9138_v53  ;;  %v15522_v54 = vld [vmem:[#allocation135_spill] sm:$0xff]  ;;  %v15523_v56 = vld [vmem:[#allocation134_spill] sm:$0xff] }
 0x28d   : > { %v15532_v53 = vld [vmem:[#allocation147_spill] sm:$0xff] }
 0x28e   : > { %v9125_v47 = vpop.permute.xlu2 %1590 }
 0x28f   : > { %15513 = vst [vmem:[#allocation101_spill] sm:$0xff] %v9125_v47  ;;  %v15524_v47 = vld [vmem:[#allocation142_spill] sm:$0xff]  ;;  %v9145_v59 = vpop.permute.xlu1 %1454 }
 0x290   : > { %15526 = vst [vmem:[#allocation112_spill] sm:$0xff] %v9145_v59  ;;  %v15598_v59 = vld [vmem:[#allocation11_spill] sm:$0xff] }
 0x293   : > { %1730 = vperm.xlu1 %7928, %v15516_v60   ;;  %v9147_v60 = vpop.permute.xlu0 %1462 }
 0x294   : > { %1734 = vperm.xlu2 %7926, %v15517_v42   ;;  %1738 = vperm.xlu0 %7927, %v15518_v58   ;;  %15527 = vst [vmem:[#allocation120_spill] sm:$0xff] %v9147_v60  ;;  %v15528_v42 = vld [vmem:[#allocation141_spill] sm:$0xff]  ;;  %v15529_v58 = vld [vmem:[#allocation140_spill] sm:$0xff] }
 0x295   : > { %v7996_v60 = vld [vmem:[%s8143_s27 + $0x330] sm:$0xff] }
 0x296   : > { %v9134_v48 = vpop.permute.xlu2 %1602 }
 0x297   : > { %15519 = vst [vmem:[#allocation107_spill] sm:$0xff] %v9134_v48  ;;  %v15530_v48 = vld [vmem:[#allocation148_spill] sm:$0xff] }
 0x29b   : > { %1742 = vperm.xlu1 %7928, %v15522_v54   ;;  %v15533_v54 = vld [vmem:[#allocation146_spill] sm:$0xff] }
 0x29c   : > { %1746 = vperm.xlu2 %7926, %v15523_v56   ;;  %1750 = vperm.xlu0 %7927, %v15524_v47   ;;  %v9157_v47 = vpop.permute.xlu1 %1466  ;;  %v9159_v56 = vpop.permute.xlu0 %1474 }
 0x29d   : > { %15534 = vst [vmem:[#allocation118_spill] sm:$0xff] %v9157_v47  ;;  %v15597_v47 = vld [vmem:[#allocation10_spill] sm:$0xff] }
 0x29e   : > { %v9143_v43 = vpop.permute.xlu2 %1614  ;;  %15535 = vst [vmem:[#allocation125_spill] sm:$0xff] %v9159_v56 }
 0x29f   : > { %15525 = vst [vmem:[#allocation113_spill] sm:$0xff] %v9143_v43 }
 0x2a3   : > { %1754 = vperm.xlu1 %7928, %v15528_v42   ;;  %v15540_v42 = vld [vmem:[#allocation153_spill] sm:$0xff] }
 0x2a4   : > { %1758 = vperm.xlu2 %7926, %v15529_v58   ;;  %1762 = vperm.xlu0 %7927, %v15530_v48   ;;  %v8091_v58 = vmov 2  }
 0x2a6   : > { %v9152_v52 = vpop.permute.xlu2 %1626 }
 0x2a7   : > { %15531 = vst [vmem:[#allocation119_spill] sm:$0xff] %v9152_v52  ;;  %v7940_v52 = vld [vmem:[%s8143_s27 + $0x30] sm:$0xff] }
 0x2ab   : > { %1766 = vperm.xlu1 %7928, %v15532_v53   ;;  %v9168_v53 = vpop.permute.xlu1 %1478 }
 0x2ac   : > { %1770 = vperm.xlu2 %7926, %v15533_v54   ;;  %1774 = vperm.xlu0 %7927, %v8802_v63   ;;  %15538 = vst [vmem:[#allocation130_spill] sm:$0xff] %v9168_v53  ;;  %v9170_v63 = vpop.permute.xlu0 %1486  ;;  %v7936_v54 = vld [vmem:[%s8143_s27] sm:$0xff] }
 0x2ad   : > { %15539 = vst [vmem:[#allocation129_spill] sm:$0xff] %v9170_v63 }
 0x2ae   : > { %v9161_v43 = vpop.permute.xlu2 %1638 }
 0x2af   : > { %15536 = vst [vmem:[#allocation123_spill] sm:$0xff] %v9161_v43  ;;  %v7938_v43 = vld [vmem:[%s8143_s27 + $0x10] sm:$0xff] }
 0x2b3   : > { %1778 = vperm.xlu1 %7928, %v8797_v41   ;;  %v7937_v41 = vld [vmem:[%s8143_s27 + $0x8] sm:$0xff] }
 0x2b4   : > { %1782 = vperm.xlu2 %7926, %v8794_v45   ;;  %1786 = vperm.xlu0 %7927, %v8815_v62   ;;  %v9177_v62 = vpop.permute.xlu1 %1490 }
 0x2b5   : > { %15542 = vst [vmem:[#allocation136_spill] sm:$0xff] %v9177_v62  ;;  %v7941_v62 = vld [vmem:[%s8143_s27 + $0x20] sm:$0xff] }
 0x2b6   : > { %v9166_v48 = vpop.permute.xlu2 %1650 }
 0x2b7   : > { %15537 = vst [vmem:[#allocation122_spill] sm:$0xff] %v9166_v48  ;;  %v9179_v48 = vpop.permute.xlu0 %1498 }
 0x2b8   : > { %15543 = vst [vmem:[#allocation135_spill] sm:$0xff] %v9179_v48  ;;  %v7942_v48 = vld [vmem:[%s8143_s27 + $0x28] sm:$0xff] }
 0x2bb   : > { %1790 = vperm.xlu1 %7928, %v15540_v42   ;;  %v7939_v42 = vld [vmem:[%s8143_s27 + $0x18] sm:$0xff] }
 0x2bc   : > { %7929 = vset.pattern.permute.xlu2 %v8091_v58  ;;  %7930 = vset.pattern.permute.xlu0 %v8091_v58 }
 0x2bd   : > { %2051 = vperm.xlu2 %7929, %v7936_v54   ;;  %2055 = vperm.xlu0 %7930, %v7937_v41   ;;  %v9186_v41 = vpop.permute.xlu1 %1502 }
 0x2be   : > { %v9175_v45 = vpop.permute.xlu2 %1662  ;;  %15545 = vst [vmem:[#allocation142_spill] sm:$0xff] %v9186_v41  ;;  %v7945_v41 = vld [vmem:[%s8143_s27 + $0x40] sm:$0xff] }
 0x2bf   : > { %15541 = vst [vmem:[#allocation128_spill] sm:$0xff] %v9175_v45  ;;  %v9188_v45 = vpop.permute.xlu0 %1510 }
 0x2c0   : > { %15546 = vst [vmem:[#allocation141_spill] sm:$0xff] %v9188_v45  ;;  %v7946_v45 = vld [vmem:[%s8143_s27 + $0x60] sm:$0xff] }
 0x2c3   : > { %7931 = vset.pattern.permute.xlu1 %v8091_v58  ;;  %v7943_v58 = vld [vmem:[%s8143_s27 + $0x48] sm:$0xff] }
 0x2c4   : > { %2059 = vperm.xlu1 %7931, %v7938_v43  }
 0x2c5   : > { %2063 = vperm.xlu2 %7929, %v7939_v42   ;;  %2075 = vperm.xlu0 %7930, %v7940_v52   ;;  %v7944_v42 = vld [vmem:[%s8143_s27 + $0x38] sm:$0xff]  ;;  %v9196_v52 = vpop.permute.xlu1 %1514 }
 0x2c6   : > { %v9184_v54 = vpop.permute.xlu2 %1674  ;;  %15548 = vst [vmem:[#allocation148_spill] sm:$0xff] %v9196_v52 }
 0x2c7   : > { %15544 = vst [vmem:[#allocation134_spill] sm:$0xff] %v9184_v54  ;;  %v9198_v54 = vpop.permute.xlu0 %1522 }
 0x2c8   : > { %15549 = vst [vmem:[#allocation147_spill] sm:$0xff] %v9198_v54 }
 0x2cc   : > { %2067 = vperm.xlu1 %7931, %v7941_v62  }
 0x2cd   : > { %2071 = vperm.xlu2 %7929, %v7942_v48   ;;  %2087 = vperm.xlu0 %7930, %v7943_v58   ;;  %v7947_v48 = vld [vmem:[%s8143_s27 + $0x50] sm:$0xff]  ;;  %v7948_v58 = vld [vmem:[%s8143_s27 + $0x58] sm:$0xff]  ;;  %v9209_v54 = vpop.permute.xlu1 %1526 }
 0x2ce   : > { %v9193_v43 = vpop.permute.xlu2 %1686  ;;  %15552 = vst [vmem:[#allocation160_spill] sm:$0xff] %v9209_v54  ;;  %v7954_v54 = vld [vmem:[%s8143_s27 + $0x88] sm:$0xff] }
 0x2cf   : > { %15547 = vst [vmem:[#allocation140_spill] sm:$0xff] %v9193_v43  ;;  %v7949_v43 = vld [vmem:[%s8143_s27 + $0x78] sm:$0xff]  ;;  %v9211_v52 = vpop.permute.xlu0 %1534 }
 0x2d0   : > { %15553 = vst [vmem:[#allocation161_spill] sm:$0xff] %v9211_v52  ;;  %v7955_v52 = vld [vmem:[%s8143_s27 + $0xa8] sm:$0xff] }
 0x2d4   : > { %2079 = vperm.xlu1 %7931, %v7944_v42  }
 0x2d5   : > { %2083 = vperm.xlu2 %7929, %v7945_v41   ;;  %2099 = vperm.xlu0 %7930, %v7946_v45   ;;  %v7950_v41 = vld [vmem:[%s8143_s27 + $0x68] sm:$0xff]  ;;  %v7951_v45 = vld [vmem:[%s8143_s27 + $0x70] sm:$0xff] }
 0x2d6   : > { %v9202_v62 = vpop.permute.xlu2 %1698 }
 0x2d7   : > { %15550 = vst [vmem:[#allocation146_spill] sm:$0xff] %v9202_v62  ;;  %v7952_v62 = vld [vmem:[%s8143_s27 + $0x90] sm:$0xff] }
 0x2dc   : > { %2091 = vperm.xlu1 %7931, %v7947_v48  }
 0x2dd   : > { %2095 = vperm.xlu2 %7929, %v7948_v58   ;;  %2111 = vperm.xlu0 %7930, %v7949_v43   ;;  %v9218_v58 = vpop.permute.xlu1 %1538  ;;  %v9220_v43 = vpop.permute.xlu0 %1546 }
 0x2de   : > { %v9207_v42 = vpop.permute.xlu2 %1710  ;;  %15555 = vst [vmem:[#allocation163_spill] sm:$0xff] %v9218_v58  ;;  %v15573_v58 = vld [vmem:[#allocation8_spill] sm:$0xff] }
 0x2df   : > { %15551 = vst [vmem:[#allocation153_spill] sm:$0xff] %v9207_v42  ;;  %v7953_v42 = vld [vmem:[%s8143_s27 + $0x80] sm:$0xff] }
 0x2e0   : > { %15556 = vst [vmem:[#allocation164_spill] sm:$0xff] %v9220_v43  ;;  %v7958_v43 = vld [vmem:[%s8143_s27 + $0xc0] sm:$0xff] }
 0x2e4   : > { %2103 = vperm.xlu1 %7931, %v7950_v41  }
 0x2e5   : > { %2107 = vperm.xlu2 %7929, %v7951_v45   ;;  %2123 = vperm.xlu0 %7930, %v7952_v62   ;;  %v9227_v45 = vpop.permute.xlu1 %1550  ;;  %v9229_v63 = vpop.permute.xlu0 %1558  ;;  %v7956_v62 = vld [vmem:[%s8143_s27 + $0x98] sm:$0xff] }
 0x2e6   : > { %v9216_v48 = vpop.permute.xlu2 %1722  ;;  %15558 = vst [vmem:[#allocation166_spill] sm:$0xff] %v9227_v45 }
 0x2e7   : > { %15554 = vst [vmem:[#allocation162_spill] sm:$0xff] %v9216_v48  ;;  %v7957_v48 = vld [vmem:[%s8143_s27 + $0xa0] sm:$0xff] }
 0x2e8   : > { %15559 = vst [vmem:[#allocation167_spill] sm:$0xff] %v9229_v63  ;;  %v7968_v63 = vld [vmem:[%s8143_s27 + $0xf8] sm:$0xff] }
 0x2ec   : > { %2115 = vperm.xlu1 %7931, %v7953_v42  }
 0x2ed   : > { %2119 = vperm.xlu2 %7929, %v7954_v54   ;;  %2135 = vperm.xlu0 %7930, %v7955_v52   ;;  %v14923_v54 = vmov 0.0   ;;  %v7959_v52 = vld [vmem:[%s8143_s27 + $0xb0] sm:$0xff] }
 0x2ee   : > { %v9225_v41 = vpop.permute.xlu2 %1734  ;;  %3082 = vst [vmem:[#allocation2 + $0x18] sm:$0xff] %v14923_v54 }
 0x2ef   : > { %15557 = vst [vmem:[#allocation165_spill] sm:$0xff] %v9225_v41  ;;  %v9240_v41 = vpop.permute.xlu1 %1562 }
 0x2f0   : > { %3083 = vst [vmem:[#allocation2 + $0x20] sm:$0xff] %v14923_v54 }
 0x2f1   : > { %3079 = vst [vmem:[#allocation2] sm:$0xff] %v14923_v54 }
 0x2f2   : > { %15561 = vst [vmem:[#allocation169_spill] sm:$0xff] %v9240_v41 }
 0x2f3   : > { %3080 = vst [vmem:[#allocation2 + $0x8] sm:$0xff] %v14923_v54 }
 0x2f4   : > { %2127 = vperm.xlu1 %7931, %v7956_v62   ;;  %v9242_v62 = vpop.permute.xlu0 %1570  ;;  %3081 = vst [vmem:[#allocation2 + $0x10] sm:$0x3] %v14923_v54 }
 0x2f5   : > { %2131 = vperm.xlu2 %7929, %v7957_v48   ;;  %2147 = vperm.xlu0 %7930, %v7958_v43   ;;  %15562 = vst [vmem:[#allocation170_spill] sm:$0xff] %v9242_v62  ;;  %v7960_v48 = vld [vmem:[%s8143_s27 + $0xb8] sm:$0xff] }
 0x2f6   : > { %v9234_v42 = vpop.permute.xlu2 %1746  ;;  %v7961_v43 = vld [vmem:[%s8143_s27 + $0xd8] sm:$0xff]  ;;  %3084 = vst [vmem:[#allocation2 + $0x28] sm:$0x3] %v14923_v54 }
 0x2f7   : > { %15560 = vst [vmem:[#allocation168_spill] sm:$0xff] %v9234_v42  ;;  %v9263_v62 = vpop.permute.xlu1 %1574 }
 0x2f8   : > { %3085 = vst [vmem:[#allocation2 + $0x30] sm:$0xff] %v14923_v54 }
 0x2f9   : > { %3086 = vst [vmem:[#allocation2 + $0x38] sm:$0xff] %v14923_v54 }
 0x2fa   : > { %3087 = vst [vmem:[#allocation2 + $0x40] sm:$0x3] %v14923_v54 }
 0x2fb   : > { %3088 = vst [vmem:[#allocation2 + $0x48] sm:$0xff] %v14923_v54 }
 0x2fc   : > { %2139 = vperm.xlu1 %7931, %v7959_v52   ;;  %v7962_v52 = vld [vmem:[%s8143_s27 + $0xc8] sm:$0xff]  ;;  %3089 = vst [vmem:[#allocation2 + $0x50] sm:$0xff] %v14923_v54  ;;  %v9265_v41 = vpop.permute.xlu0 %1582 }
 0x2fd   : > { %2143 = vperm.xlu2 %7929, %v7960_v48   ;;  %2159 = vperm.xlu0 %7930, %v7961_v43   ;;  %v7963_v48 = vld [vmem:[%s8143_s27 + $0xd0] sm:$0xff]  ;;  %3090 = vst [vmem:[#allocation2 + $0x58] sm:$0x3] %v14923_v54 }
 0x2fe   : > { %v9247_v42 = vpop.permute.xlu2 %1758  ;;  %v7964_v43 = vld [vmem:[%s8143_s27 + $0xf0] sm:$0xff]  ;;  %3091 = vst [vmem:[#allocation2 + $0x60] sm:$0xff] %v14923_v54 }
 0x2ff   : > { %15563 = vst [vmem:[#allocation171_spill] sm:$0xff] %v9247_v42 }
 0x300   : > { %15565 = vst [vmem:[#allocation173_spill] sm:$0xff] %v9263_v62 }
 0x301   : > { %15566 = vst [vmem:[#allocation174_spill] sm:$0xff] %v9265_v41  ;;  %v383_v41 = vld [vmem:[%s14844_s1] sm:$0x7] }
 0x302   : > { %3092 = vst [vmem:[#allocation2 + $0x68] sm:$0xff] %v14923_v54  ;;  %v9299_v45 = vperm.slane %v383_v41, 2 }
 0x303   : > { %3093 = vst [vmem:[#allocation2 + $0x70] sm:$0x3] %v14923_v54 }
 0x304   : > { %2151 = vperm.xlu1 %7931, %v7962_v52   ;;  %3094 = vst [vmem:[#allocation2 + $0x78] sm:$0xff] %v14923_v54  ;;  %v7965_v52 = vld [vmem:[%s8143_s27 + $0xe0] sm:$0xff] }
 0x305   : > { %2155 = vperm.xlu2 %7929, %v7963_v48   ;;  %2171 = vperm.xlu0 %7930, %v7964_v43   ;;  %3095 = vst [vmem:[#allocation2 + $0x80] sm:$0xff] %v14923_v54  ;;  %v7966_v48 = vld [vmem:[%s8143_s27 + $0xe8] sm:$0xff] }
 0x306   : > { %v9260_v42 = vpop.permute.xlu2 %1770  ;;  %3096 = vst [vmem:[#allocation2 + $0x88] sm:$0x3] %v14923_v54  ;;  %v7967_v43 = vld [vmem:[%s8143_s27 + $0x108] sm:$0xff] }
 0x307   : > { %15564 = vst [vmem:[#allocation172_spill] sm:$0xff] %v9260_v42 }
 0x308   : > { %3097 = vst [vmem:[#allocation2 + $0x90] sm:$0xff] %v14923_v54 }
 0x309   : > { %3098 = vst [vmem:[#allocation2 + $0x98] sm:$0xff] %v14923_v54 }
 0x30a   : > { %3099 = vst [vmem:[#allocation2 + $0xa0] sm:$0x3] %v14923_v54 }
 0x30b   : > { %3100 = vst [vmem:[#allocation2 + $0xa8] sm:$0xff] %v14923_v54 }
 0x30c   : > { %2163 = vperm.xlu1 %7931, %v7965_v52   ;;  %v9284_v52 = vperm.slane %v383_v41, 1  ;;  %3101 = vst [vmem:[#allocation2 + $0xb0] sm:$0xff] %v14923_v54 }
 0x30d   : > { %2167 = vperm.xlu2 %7929, %v7966_v48   ;;  %2183 = vperm.xlu0 %7930, %v7967_v43   ;;  %v9287_v48 = vpop.permute.xlu1 %1586  ;;  %v9289_v43 = vpop.permute.xlu0 %1594  ;;  %3102 = vst [vmem:[#allocation2 + $0xb8] sm:$0x3] %v14923_v54 }
 0x30e   : > { %v9277_v42 = vpop.permute.xlu2 %1782  ;;  %15568 = vst [vmem:[#allocation176_spill] sm:$0xff] %v9284_v52  ;;  %v1794_v62 = vmul.f32 %v9284_v52, %v8915_v25 }
 0x30f   : > { %15567 = vst [vmem:[#allocation175_spill] sm:$0xff] %v9277_v42  ;;  %v9294_v42 = vperm.slane %v383_v41, 0 }
 0x310   : > { %15569 = vst [vmem:[#allocation177_spill] sm:$0xff] %v9287_v48  ;;  %v7969_v48 = vld [vmem:[%s8143_s27 + $0x100] sm:$0xff] }
 0x311   : > { %15570 = vst [vmem:[#allocation178_spill] sm:$0xff] %v9289_v43  ;;  %v7970_v43 = vld [vmem:[%s8143_s27 + $0x120] sm:$0xff]  ;;  %v1025_v53 = vmul.f32 %v9294_v42, %v15573_v58 }
 0x312   : > { %3103 = vst [vmem:[#allocation2 + $0xc0] sm:$0xff] %v14923_v54 }
 0x313   : > { %3104 = vst [vmem:[#allocation2 + $0xc8] sm:$0xff] %v14923_v54  ;;  %v1922_v25 = vadd.f32 %v1794_v62, %v1025_v53  ;;  %v7971_v62 = vld [vmem:[%s8143_s27 + $0x110] sm:$0xff] }
 0x314   : > { %15571 = vst [vmem:[#allocation179_spill] sm:$0xff] %v9294_v42  ;;  %2175 = vperm.xlu1 %7931, %v7968_v63   ;;  %v7932_v63 = vld [vmem:[%s14845_s2] ss:$0 sm:$0xff] }
 0x315   : > { %15572 = vst [vmem:[#allocation180_spill] sm:$0xff] %v9299_v45  ;;  %2179 = vperm.xlu2 %7929, %v7969_v48   ;;  %2195 = vperm.xlu0 %7930, %v7970_v43   ;;  %v9316_v48 = vpop.permute.xlu1 %1598  ;;  %v9318_v43 = vpop.permute.xlu0 %1606 }
 0x316   : > { %3105 = vst [vmem:[#allocation2 + $0xd0] sm:$0x3] %v14923_v54 }
 0x317   : > { %3106 = vst [vmem:[#allocation2 + $0xd8] sm:$0xff] %v14923_v54  ;;  %v2052_v56 = vpop.permute.xlu2 %2051 }
 0x318   : > { %3107 = vst [vmem:[#allocation2 + $0xe0] sm:$0xff] %v14923_v54  ;;  %v2563_v41 = vmul.f32 %v9299_v45, %v2052_v56  ;;  %v7972_v56 = vld [vmem:[%s8143_s27 + $0x118] sm:$0xff] }
 0x319   : > { %3108 = vst [vmem:[#allocation2 + $0xe8] sm:$0x3] %v14923_v54 }
 0x31a   : > { %3109 = vst [vmem:[#allocation2 + $0xf0] sm:$0xff] %v14923_v54  ;;  %v2691_v58 = vadd.f32 %v2563_v41, %v1922_v25  ;;  %v7973_v25 = vld [vmem:[%s8143_s27 + $0x138] sm:$0xff] }
 0x31b   : > { %3110 = vst [vmem:[#allocation2 + $0xf8] sm:$0xff] %v14923_v54 }
 0x31c   : > { %3111 = vst [vmem:[#allocation2 + $0x100] sm:$0x3] %v14923_v54  ;;  %v2823_v53 = vadd.f32 %v7932_v63, %v2691_v58  ;;  %2187 = vperm.xlu1 %7931, %v7971_v62   ;;  %v7974_v63 = vld [vmem:[%s8143_s27 + $0x128] sm:$0xff] }
 0x31d   : > { %15574 = vst [vmem:[#allocation8_spill] sm:$0xff] %v9316_v48  ;;  %2191 = vperm.xlu2 %7929, %v7972_v56   ;;  %2207 = vperm.xlu0 %7930, %v7973_v25   ;;  %v9333_v58 = vpop.permute.xlu1 %1610  ;;  %v9335_v62 = vpop.permute.xlu0 %1618  ;;  %v7976_v56 = vld [vmem:[%s8143_s27 + $0x150] sm:$0xff]  ;;  %v7977_v25 = vld [vmem:[%s8143_s27 + $0x140] sm:$0xff] }
 0x31e   : > { %15575 = vst [vmem:[#allocation181_spill] sm:$0xff] %v9318_v43  ;;  %v2951_v41 = vmax.f32 %v2823_v53, 0.0  ;;  %v7975_v53 = vld [vmem:[%s8143_s27 + $0x130] sm:$0xff] }
 0x31f   : > { %3112 = vst [vmem:[#allocation2 + $0x108] sm:$0xff] %v14923_v54  ;;  %v15595_v48 = vld [vmem:[#allocation9_spill] sm:$0xff] }
 0x320   : > { %3113 = vst [vmem:[#allocation2 + $0x110] sm:$0xff] %v14923_v54 }
 0x321   : > { %3114 = vst [vmem:[#allocation2 + $0x118] sm:$0x3] %v14923_v54 }
 0x322   : > { %3115 = vst [vmem:[#allocation2 + $0x120] sm:$0xff] %v14923_v54 }
 0x323   : > { %3116 = vst [vmem:[#allocation2 + $0x128] sm:$0xff] %v14923_v54 }
 0x324   : > { %3296 = vst [vmem:[#allocation2 + $0x19] sm:$0xff] %v2951_v41  ;;  %2199 = vperm.xlu1 %7931, %v7974_v63   ;;  %v7978_v41 = vld [vmem:[%s8143_s27 + $0x148] sm:$0xff] }
 0x325   : > { %3117 = vst [vmem:[#allocation2 + $0x130] sm:$0x3] %v14923_v54  ;;  %2203 = vperm.xlu2 %7929, %v7975_v53   ;;  %2219 = vperm.xlu0 %7930, %v7976_v56   ;;  %v7979_v63 = vld [vmem:[%s8143_s27 + $0x168] sm:$0xff]  ;;  %v9352_v53 = vpop.permute.xlu1 %1622  ;;  %v9354_v56 = vpop.permute.xlu0 %1630 }
 0x326   : > { %3118 = vst [vmem:[#allocation2 + $0x138] sm:$0xff] %v14923_v54 }
 0x327   : > { %3119 = vst [vmem:[#allocation2 + $0x140] sm:$0xff] %v14923_v54 }
 0x328   : > { %3120 = vst [vmem:[#allocation2 + $0x148] sm:$0x3] %v14923_v54 }
 0x329   : > { %15576 = vst [vmem:[#allocation182_spill] sm:$0xff] %v9333_v58  ;;  %v7994_v58 = vld [vmem:[%s8143_s27 + $0x228] sm:$0xff] }
 0x32a   : > { %15577 = vst [vmem:[#allocation183_spill] sm:$0xff] %v9335_v62 }
 0x32b   : > { %3121 = vst [vmem:[#allocation2 + $0x150] sm:$0xff] %v14923_v54 }
 0x32c   : > { %3122 = vst [vmem:[#allocation2 + $0x158] sm:$0xff] %v14923_v54  ;;  %2211 = vperm.xlu1 %7931, %v7977_v25   ;;  %v7980_v25 = vld [vmem:[%s8143_s27 + $0x158] sm:$0xff] }
 0x32d   : > { %3123 = vst [vmem:[#allocation2 + $0x160] sm:$0x3] %v14923_v54  ;;  %2215 = vperm.xlu2 %7929, %v7978_v41   ;;  %2231 = vperm.xlu0 %7930, %v7979_v63   ;;  %v7981_v41 = vld [vmem:[%s8143_s27 + $0x160] sm:$0xff]  ;;  %v9369_v45 = vpop.permute.xlu1 %1634 }
 0x32e   : > { %3124 = vst [vmem:[#allocation2 + $0x168] sm:$0xff] %v14923_v54  ;;  %v7982_v63 = vld [vmem:[%s8143_s27 + $0x180] sm:$0xff] }
 0x32f   : > { %3125 = vst [vmem:[#allocation2 + $0x170] sm:$0xff] %v14923_v54 }
 0x330   : > { %3126 = vst [vmem:[#allocation2 + $0x178] sm:$0x3] %v14923_v54 }
 0x331   : > { %3127 = vst [vmem:[#allocation2 + $0x180] sm:$0xff] %v14923_v54 }
 0x332   : > { %3128 = vst [vmem:[#allocation2 + $0x188] sm:$0xff] %v14923_v54 }
 0x333   : > { %3129 = vst [vmem:[#allocation2 + $0x190] sm:$0x3] %v14923_v54 }
 0x334   : > { %3130 = vst [vmem:[#allocation2 + $0x198] sm:$0xff] %v14923_v54  ;;  %2223 = vperm.xlu1 %7931, %v7980_v25   ;;  %v7983_v25 = vld [vmem:[%s8143_s27 + $0x170] sm:$0xff] }
 0x335   : > { %15578 = vst [vmem:[#allocation184_spill] sm:$0xff] %v9352_v53  ;;  %2227 = vperm.xlu2 %7929, %v7981_v41   ;;  %2243 = vperm.xlu0 %7930, %v7982_v63   ;;  %v7984_v41 = vld [vmem:[%s8143_s27 + $0x178] sm:$0xff]  ;;  %v9386_v63 = vpop.permute.xlu1 %1646 }
 0x336   : > { %15579 = vst [vmem:[#allocation185_spill] sm:$0xff] %v9354_v56  ;;  %v9371_v56 = vpop.permute.xlu0 %1642  ;;  %v15592_v53 = vld [vmem:[#allocation6_spill] sm:$0xff] }
 0x337   : > { %3131 = vst [vmem:[#allocation2 + $0x1a0] sm:$0xff] %v14923_v54  ;;  %v9446_v62 = vmul.f32 %v9294_v42, %v15592_v53  ;;  %v7995_v53 = vld [vmem:[%s8143_s27 + $0x320] sm:$0xff] }
 0x338   : > { %3132 = vst [vmem:[#allocation2 + $0x1a8] sm:$0x3] %v14923_v54 }
 0x339   : > { %3133 = vst [vmem:[#allocation2 + $0x1b0] sm:$0xff] %v14923_v54 }
 0x33a   : > { %3134 = vst [vmem:[#allocation2 + $0x1b8] sm:$0xff] %v14923_v54 }
 0x33b   : > { %3135 = vst [vmem:[#allocation2 + $0x1c0] sm:$0x3] %v14923_v54 }
 0x33c   : > { %3136 = vst [vmem:[#allocation2 + $0x1c8] sm:$0xff] %v14923_v54  ;;  %2235 = vperm.xlu1 %7931, %v7983_v25  }
 0x33d   : > { %3137 = vst [vmem:[#allocation2 + $0x1d0] sm:$0xff] %v14923_v54  ;;  %2239 = vperm.xlu2 %7929, %v7984_v41   ;;  %2435 = vperm.xlu0 %7930, %v15484_v0   ;;  %v7985_v0 = vld [vmem:[%s8143_s27 + $0x200] sm:$0xff]  ;;  %v7986_v41 = vld [vmem:[%s8143_s27 + $0x208] sm:$0xff] }
 0x33e   : > { %3138 = vst [vmem:[#allocation2 + $0x1d8] sm:$0x3] %v14923_v54  ;;  %v9388_v25 = vpop.permute.xlu0 %1654 }
 0x33f   : > { %3139 = vst [vmem:[#allocation2 + $0x1e0] sm:$0xff] %v14923_v54 }
 0x340   : > { %3140 = vst [vmem:[#allocation2 + $0x1e8] sm:$0xff] %v14923_v54 }
 0x341   : > { %15580 = vst [vmem:[#allocation186_spill] sm:$0xff] %v9369_v45 }
 0x342   : > { %15581 = vst [vmem:[#allocation187_spill] sm:$0xff] %v9371_v56  ;;  %v7987_v56 = vld [vmem:[%s8143_s27 + $0x218] sm:$0xff] }
 0x343   : > { %3141 = vst [vmem:[#allocation2 + $0x1f0] sm:$0x3] %v14923_v54 }
 0x344   : > { %3142 = vst [vmem:[#allocation2 + $0x1f8] sm:$0xff] %v14923_v54  ;;  %2307 = vperm.xlu1 %7931, %v7985_v0   ;;  %v7988_v0 = vld [vmem:[%s8143_s27 + $0x308] sm:$0xff] }
 0x345   : > { %3143 = vst [vmem:[#allocation2 + $0x200] sm:$0xff] %v14923_v54  ;;  %2311 = vperm.xlu2 %7929, %v7986_v41   ;;  %2319 = vperm.xlu0 %7930, %v7987_v56   ;;  %v9404_v41 = vpop.permute.xlu1 %1658 }
 0x346   : > { %3144 = vst [vmem:[#allocation2 + $0x208] sm:$0x3] %v14923_v54  ;;  %v9406_v56 = vpop.permute.xlu0 %1666 }
 0x347   : > { %3145 = vst [vmem:[#allocation2 + $0x210] sm:$0xff] %v14923_v54 }
 0x348   : > { %3146 = vst [vmem:[#allocation2 + $0x218] sm:$0xff] %v14923_v54 }
 0x349   : > { %3147 = vst [vmem:[#allocation2 + $0x220] sm:$0x3] %v14923_v54 }
 0x34a   : > { %3148 = vst [vmem:[#allocation2 + $0x228] sm:$0xff] %v14923_v54 }
 0x34b   : > { %3149 = vst [vmem:[#allocation2 + $0x230] sm:$0xff] %v14923_v54 }
 0x34c   : > { %3150 = vst [vmem:[#allocation2 + $0x238] sm:$0x3] %v14923_v54  ;;  %2439 = vperm.xlu1 %7931, %v7988_v0   ;;  %v7991_v0 = vld [vmem:[%s8143_s27 + $0x310] sm:$0xff] }
 0x34d   : > { %15582 = vst [vmem:[#allocation188_spill] sm:$0xff] %v9386_v63  ;;  %v7990_v63 = vld [vmem:[%s8143_s27 + $0x220] sm:$0xff] }
 0x34e   : > { %15583 = vst [vmem:[#allocation189_spill] sm:$0xff] %v9388_v25  ;;  %v7989_v25 = vld [vmem:[%s8143_s27 + $0x210] sm:$0xff]  ;;  %2323 = vperm.xlu0 %7930, %v7990_v63   ;;  %v7993_v63 = vld [vmem:[%s8143_s27 + $0x328] sm:$0xff] }
 0x34f   : > { %3151 = vst [vmem:[#allocation2 + $0x240] sm:$0xff] %v14923_v54  ;;  %2315 = vperm.xlu2 %7929, %v7989_v25   ;;  %v7992_v25 = vld [vmem:[%s8143_s27 + $0x318] sm:$0xff] }
 0x350   : > { %3152 = vst [vmem:[#allocation2 + $0x248] sm:$0xff] %v14923_v54 }
 0x351   : > { %3153 = vst [vmem:[#allocation2 + $0x250] sm:$0x3] %v14923_v54 }
 0x352   : > { %3154 = vst [vmem:[#allocation2 + $0x258] sm:$0xff] %v14923_v54 }
 0x353   : > { %3155 = vst [vmem:[#allocation2 + $0x260] sm:$0xff] %v14923_v54 }
 0x354   : > { %3156 = vst [vmem:[#allocation2 + $0x268] sm:$0x3] %v14923_v54  ;;  %2443 = vperm.xlu1 %7931, %v7991_v0   ;;  %v15588_v0 = vld [vmem:[#allocation3_spill] sm:$0xff] }
 0x355   : > { %3157 = vst [vmem:[#allocation2 + $0x270] sm:$0xff] %v14923_v54 }
 0x356   : > { %3158 = vst [vmem:[#allocation2 + $0x278] sm:$0xff] %v14923_v54  ;;  %2455 = vperm.xlu0 %7930, %v7993_v63   ;;  %v15590_v63 = vld [vmem:[#allocation4_spill] sm:$0xff] }
 0x357   : > { %3159 = vst [vmem:[#allocation2 + $0x280] sm:$0x3] %v14923_v54  ;;  %2447 = vperm.xlu2 %7929, %v7992_v25   ;;  %v9433_v25 = vmul.f32 %v9294_v42, %v15588_v0  ;;  %v15594_v0 = vld [vmem:[#allocation7_spill] sm:$0xff] }
 0x358   : > { %3160 = vst [vmem:[#allocation2 + $0x288] sm:$0xff] %v14923_v54  ;;  %v9452_v43 = vmul.f32 %v9294_v42, %v15594_v0  ;;  %v15600_v0 = vld [vmem:[#allocation12_spill] sm:$0xff] }
 0x359   : > { %15584 = vst [vmem:[#allocation190_spill] sm:$0xff] %v9404_v41  ;;  %v9425_v41 = vpop.permute.xlu0 %1678 }
 0x35a   : > { %15585 = vst [vmem:[#allocation191_spill] sm:$0xff] %v9406_v56  ;;  %v9423_v56 = vpop.permute.xlu1 %1670 }
 0x35b   : > { %3161 = vst [vmem:[#allocation2 + $0x290] sm:$0xff] %v14923_v54 }
 0x35c   : > { %3162 = vst [vmem:[#allocation2 + $0x298] sm:$0x3] %v14923_v54  ;;  %2327 = vperm.xlu1 %7931, %v7994_v58   ;;  %v9467_v58 = vmul.f32 %v9294_v42, %v15598_v59  ;;  %v15608_v59 = vld [vmem:[#allocation16_spill] sm:$0xff] }
 0x35d   : > { %3163 = vst [vmem:[#allocation2 + $0x2a0] sm:$0xff] %v14923_v54 }
 0x35e   : > { %3164 = vst [vmem:[#allocation2 + $0x2a8] sm:$0xff] %v14923_v54  ;;  %2459 = vperm.xlu0 %7930, %v7996_v60  }
 0x35f   : > { %3165 = vst [vmem:[#allocation2 + $0x2b0] sm:$0x3] %v14923_v54  ;;  %2451 = vperm.xlu2 %7929, %v7995_v53   ;;  %v15606_v53 = vld [vmem:[#allocation15_spill] sm:$0xff] }
 0x360   : > { %3166 = vst [vmem:[#allocation2 + $0x2b8] sm:$0xff] %v14923_v54  ;;  %v9484_v60 = vmul.f32 %v9294_v42, %v15606_v53  ;;  %v15616_v53 = vld [vmem:[#allocation23_spill] sm:$0xff] }
 0x361   : > { %3167 = vst [vmem:[#allocation2 + $0x2c0] sm:$0xff] %v14923_v54 }
 0x362   : > { %3168 = vst [vmem:[#allocation2 + $0x2c8] sm:$0x3] %v14923_v54 }
 0x363   : > { %3169 = vst [vmem:[#allocation2 + $0x2d0] sm:$0xff] %v14923_v54 }
 0x364   : > { %3170 = vst [vmem:[#allocation2 + $0x2d8] sm:$0xff] %v14923_v54 }
 0x365   : > { %15586 = vst [vmem:[#allocation192_spill] sm:$0xff] %v9423_v56  ;;  %v9438_v56 = vmul.f32 %v9294_v42, %v15590_v63  ;;  %v9456_v63 = vmul.f32 %v9294_v42, %v15595_v48  ;;  %v15602_v48 = vld [vmem:[#allocation13_spill] sm:$0xff] }
 0x366   : > { %15587 = vst [vmem:[#allocation193_spill] sm:$0xff] %v9425_v41  ;;  %v15591_v41 = vld [vmem:[#allocation5_spill] sm:$0xff] }
 0x367   : > { %3171 = vst [vmem:[#allocation2 + $0x2e0] sm:$0x3] %v14923_v54  ;;  %v9442_v45 = vmul.f32 %v9294_v42, %v15591_v41  ;;  %v9460_v41 = vmul.f32 %v9294_v42, %v15597_v47  ;;  %v15604_v47 = vld [vmem:[#allocation14_spill] sm:$0xff] }
 0x368   : > { %3172 = vst [vmem:[#allocation2 + $0x2e8] sm:$0xff] %v14923_v54 }
 0x369   : > { %3173 = vst [vmem:[#allocation2 + $0x2f0] sm:$0xff] %v14923_v54 }
 0x36a   : > { %3174 = vst [vmem:[#allocation2 + $0x2f8] sm:$0x3] %v14923_v54 }
 0x36b   : > { %15589 = vst [vmem:[#allocation3_spill] sm:$0xff] %v9433_v25  ;;  %v9471_v25 = vmul.f32 %v9294_v42, %v15600_v0  ;;  %v15610_v0 = vld [vmem:[#allocation17_spill] sm:$0xff] }
 0x36c   : > { %3175 = vst [vmem:[#allocation2 + $0x300] sm:$0xff] %v14923_v54 }
 0x36d   : > { %15593 = vst [vmem:[#allocation4_spill] sm:$0xff] %v9446_v62  ;;  %v9479_v62 = vmul.f32 %v9294_v42, %v15604_v47  ;;  %v15614_v47 = vld [vmem:[#allocation22_spill] sm:$0xff] }
 0x36e   : > { %3176 = vst [vmem:[#allocation2 + $0x308] sm:$0xff] %v14923_v54 }
 0x36f   : > { %15596 = vst [vmem:[#allocation5_spill] sm:$0xff] %v9456_v63  ;;  %v9475_v63 = vmul.f32 %v9294_v42, %v15602_v48  ;;  %v15612_v48 = vld [vmem:[#allocation21_spill] sm:$0xff] }
 0x370   : > { %3177 = vst [vmem:[#allocation2 + $0x310] sm:$0x3] %v14923_v54 }
 0x371   : > { %15599 = vst [vmem:[#allocation6_spill] sm:$0xff] %v9467_v58  ;;  %v9488_v58 = vmul.f32 %v9294_v42, %v15608_v59  ;;  %v15618_v59 = vld [vmem:[#allocation27_spill] sm:$0xff] }
 0x372   : > { %15601 = vst [vmem:[#allocation7_spill] sm:$0xff] %v9471_v25  ;;  %v9492_v25 = vmul.f32 %v9294_v42, %v15610_v0  ;;  %v15620_v0 = vld [vmem:[#allocation28_spill] sm:$0xff] }
 0x373   : > { %15603 = vst [vmem:[#allocation9_spill] sm:$0xff] %v9475_v63  ;;  %v9496_v63 = vmul.f32 %v9294_v42, %v15612_v48  ;;  %v15622_v48 = vld [vmem:[#allocation29_spill] sm:$0xff] }
 0x374   : > { %15605 = vst [vmem:[#allocation10_spill] sm:$0xff] %v9479_v62  ;;  %v9501_v62 = vmul.f32 %v9294_v42, %v15614_v47  ;;  %v15624_v47 = vld [vmem:[#allocation33_spill] sm:$0xff] }
 0x375   : > { %3178 = vst [vmem:[#allocation2 + $0x318] sm:$0xff] %v14923_v54 }
 0x376   : > { %15607 = vst [vmem:[#allocation11_spill] sm:$0xff] %v9484_v60  ;;  %v9505_v60 = vmul.f32 %v9294_v42, %v15616_v53  ;;  %v15626_v53 = vld [vmem:[#allocation34_spill] sm:$0xff] }
 0x377   : > { %15609 = vst [vmem:[#allocation12_spill] sm:$0xff] %v9488_v58  ;;  %v9509_v58 = vmul.f32 %v9294_v42, %v15618_v59  ;;  %v15628_v59 = vld [vmem:[#allocation35_spill] sm:$0xff] }
 0x378   : > { %15611 = vst [vmem:[#allocation13_spill] sm:$0xff] %v9492_v25  ;;  %v9513_v25 = vmul.f32 %v9294_v42, %v15620_v0  ;;  %v9532_v0 = vpop.permute.xlu1 %1682 }
 0x379   : > { %15613 = vst [vmem:[#allocation14_spill] sm:$0xff] %v9496_v63  ;;  %v9518_v63 = vmul.f32 %v9294_v42, %v15622_v48  ;;  %v15632_v48 = vld [vmem:[#allocation39_spill] sm:$0xff] }
 0x37a   : > { %3179 = vst [vmem:[#allocation2 + $0x320] sm:$0xff] %v14923_v54 }
 0x37b   : > { %15615 = vst [vmem:[#allocation15_spill] sm:$0xff] %v9501_v62  ;;  %v9522_v62 = vmul.f32 %v9294_v42, %v15624_v47  ;;  %v15634_v47 = vld [vmem:[#allocation40_spill] sm:$0xff] }
 0x37c   : > { %15617 = vst [vmem:[#allocation16_spill] sm:$0xff] %v9505_v60  ;;  %v9526_v60 = vmul.f32 %v9294_v42, %v15626_v53  ;;  %v15636_v53 = vld [vmem:[#allocation41_spill] sm:$0xff] }
 0x37d   : > { %15619 = vst [vmem:[#allocation17_spill] sm:$0xff] %v9509_v58  ;;  %v9530_v58 = vmul.f32 %v9294_v42, %v15628_v59  ;;  %v15638_v59 = vld [vmem:[#allocation45_spill] sm:$0xff] }
 0x37e   : > { %15621 = vst [vmem:[#allocation21_spill] sm:$0xff] %v9513_v25  ;;  %v9534_v25 = vpop.permute.xlu0 %1690 }
 0x37f   : > { %3180 = vst [vmem:[#allocation2 + $0x328] sm:$0x3] %v14923_v54 }
 0x380   : > { %15623 = vst [vmem:[#allocation22_spill] sm:$0xff] %v9518_v63  ;;  %v9539_v63 = vmul.f32 %v9294_v42, %v15632_v48  ;;  %v15642_v48 = vld [vmem:[#allocation47_spill] sm:$0xff] }
 0x381   : > { %15625 = vst [vmem:[#allocation23_spill] sm:$0xff] %v9522_v62  ;;  %v9543_v62 = vmul.f32 %v9294_v42, %v15634_v47  ;;  %v15644_v47 = vld [vmem:[#allocation51_spill] sm:$0xff] }
 0x382   : > { %15627 = vst [vmem:[#allocation27_spill] sm:$0xff] %v9526_v60  ;;  %v9547_v60 = vmul.f32 %v9294_v42, %v15636_v53  ;;  %v9564_v53 = vmul.f32 %v9294_v42, %v15644_v47  ;;  %v7997_v47 = vld [vmem:[%s8143_s27 + $0x230] sm:$0xff] }
 0x383   : > { %15629 = vst [vmem:[#allocation28_spill] sm:$0xff] %v9530_v58  ;;  %2331 = vperm.xlu1 %7931, %v7997_v47  }
 0x384   : > { %15630 = vst [vmem:[#allocation29_spill] sm:$0xff] %v9532_v0  ;;  %v9551_v0 = vmul.f32 %v9294_v42, %v15638_v59 }
 0x385   : > { %15631 = vst [vmem:[#allocation33_spill] sm:$0xff] %v9534_v25  ;;  %v15640_v25 = vld [vmem:[#allocation46_spill] sm:$0xff] }
 0x386   : > { %3181 = vst [vmem:[#allocation2 + $0x330] sm:$0xff] %v14923_v54  ;;  %v9556_v58 = vmul.f32 %v9294_v42, %v15640_v25  ;;  %v15650_v25 = vld [vmem:[#allocation57_spill] sm:$0xff] }
 0x387   : > { %15633 = vst [vmem:[#allocation34_spill] sm:$0xff] %v9539_v63  ;;  %v9560_v63 = vmul.f32 %v9294_v42, %v15642_v48  ;;  %v15652_v48 = vld [vmem:[#allocation58_spill] sm:$0xff] }
 0x388   : > { %15635 = vst [vmem:[#allocation35_spill] sm:$0xff] %v9543_v62  ;;  %v15646_v62 = vld [vmem:[#allocation52_spill] sm:$0xff] }
 0x389   : > { %15637 = vst [vmem:[#allocation39_spill] sm:$0xff] %v9547_v60  ;;  %v9568_v59 = vmul.f32 %v9294_v42, %v15646_v62  ;;  %v15654_v62 = vld [vmem:[#allocation59_spill] sm:$0xff] }
 0x38a   : > { %15639 = vst [vmem:[#allocation40_spill] sm:$0xff] %v9551_v0  ;;  %v15648_v0 = vld [vmem:[#allocation53_spill] sm:$0xff] }
 0x38b   : > { %3182 = vst [vmem:[#allocation2 + $0x338] sm:$0xff] %v14923_v54  ;;  %v9573_v60 = vmul.f32 %v9294_v42, %v15648_v0 }
 0x38c   : > { %15641 = vst [vmem:[#allocation41_spill] sm:$0xff] %v9556_v58  ;;  %v9577_v58 = vmul.f32 %v9294_v42, %v15650_v25 }
 0x38d   : > { %15643 = vst [vmem:[#allocation45_spill] sm:$0xff] %v9560_v63  ;;  %v9581_v63 = vmul.f32 %v9294_v42, %v15652_v48  ;;  %v7998_v48 = vld [vmem:[%s8143_s27 + $0x238] sm:$0xff] }
 0x38e   : > { %15645 = vst [vmem:[#allocation46_spill] sm:$0xff] %v9564_v53  ;;  %v9587_v53 = vmul.f32 %v9294_v42, %v15654_v62  ;;  %2335 = vperm.xlu2 %7929, %v7998_v48   ;;  %v15662_v62 = vld [vmem:[#allocation69_spill] sm:$0xff]  ;;  %v15668_v48 = vld [vmem:[#allocation75_spill] sm:$0xff] }
 0x38f   : > { %15647 = vst [vmem:[#allocation47_spill] sm:$0xff] %v9568_v59  ;;  %v15656_v59 = vld [vmem:[#allocation63_spill] sm:$0xff] }
 0x390   : > { %3183 = vst [vmem:[#allocation2 + $0x340] sm:$0x3] %v14923_v54  ;;  %v9591_v0 = vmul.f32 %v9294_v42, %v15656_v59  ;;  %v15664_v59 = vld [vmem:[#allocation70_spill] sm:$0xff] }
 0x391   : > { %15649 = vst [vmem:[#allocation51_spill] sm:$0xff] %v9573_v60  ;;  %v15658_v60 = vld [vmem:[#allocation64_spill] sm:$0xff] }
 0x392   : > { %15651 = vst [vmem:[#allocation52_spill] sm:$0xff] %v9577_v58  ;;  %v9595_v25 = vmul.f32 %v9294_v42, %v15658_v60  ;;  %v7999_v58 = vld [vmem:[%s8143_s27 + $0x248] sm:$0xff]  ;;  %v15666_v60 = vld [vmem:[#allocation71_spill] sm:$0xff] }
 0x393   : > { %15653 = vst [vmem:[#allocation53_spill] sm:$0xff] %v9581_v63  ;;  %2343 = vperm.xlu0 %7930, %v7999_v58   ;;  %v15660_v63 = vld [vmem:[#allocation65_spill] sm:$0xff]  ;;  %v9619_v58 = vmul.f32 %v9294_v42, %v15668_v48  ;;  %v15678_v48 = vld [vmem:[#allocation83_spill] sm:$0xff] }
 0x394   : > { %3184 = vst [vmem:[#allocation2 + $0x348] sm:$0xff] %v14923_v54  ;;  %v9602_v47 = vmul.f32 %v9294_v42, %v15660_v63  ;;  %v15670_v63 = vld [vmem:[#allocation76_spill] sm:$0xff] }
 0x395   : > { %15655 = vst [vmem:[#allocation57_spill] sm:$0xff] %v9587_v53  ;;  %v9606_v53 = vmul.f32 %v9294_v42, %v15662_v62  ;;  %v15672_v62 = vld [vmem:[#allocation77_spill] sm:$0xff] }
 0x396   : > { %15657 = vst [vmem:[#allocation58_spill] sm:$0xff] %v9591_v0  ;;  %v9610_v0 = vmul.f32 %v9294_v42, %v15664_v59  ;;  %v15674_v59 = vld [vmem:[#allocation81_spill] sm:$0xff] }
 0x397   : > { %15659 = vst [vmem:[#allocation59_spill] sm:$0xff] %v9595_v25  ;;  %v9614_v25 = vmul.f32 %v9294_v42, %v15666_v60  ;;  %v15676_v60 = vld [vmem:[#allocation82_spill] sm:$0xff] }
 0x398   : > { %3185 = vst [vmem:[#allocation2 + $0x350] sm:$0xff] %v14923_v54 }
 0x399   : > { %15661 = vst [vmem:[#allocation63_spill] sm:$0xff] %v9602_v47  ;;  %v9623_v47 = vmul.f32 %v9294_v42, %v15670_v63  ;;  %v15680_v63 = vld [vmem:[#allocation87_spill] sm:$0xff] }
 0x39a   : > { %15663 = vst [vmem:[#allocation64_spill] sm:$0xff] %v9606_v53  ;;  %v9627_v53 = vmul.f32 %v9294_v42, %v15672_v62  ;;  %v15682_v62 = vld [vmem:[#allocation88_spill] sm:$0xff] }
 0x39b   : > { %15665 = vst [vmem:[#allocation65_spill] sm:$0xff] %v9610_v0  ;;  %v9631_v0 = vmul.f32 %v9294_v42, %v15674_v59  ;;  %v15684_v59 = vld [vmem:[#allocation89_spill] sm:$0xff] }
 0x39c   : > { %15667 = vst [vmem:[#allocation69_spill] sm:$0xff] %v9614_v25  ;;  %v9636_v25 = vmul.f32 %v9294_v42, %v15676_v60  ;;  %v15686_v60 = vld [vmem:[#allocation93_spill] sm:$0xff] }
 0x39d   : > { %3186 = vst [vmem:[#allocation2 + $0x358] sm:$0x3] %v14923_v54 }
 0x39e   : > { %15669 = vst [vmem:[#allocation70_spill] sm:$0xff] %v9619_v58  ;;  %v9640_v58 = vmul.f32 %v9294_v42, %v15678_v48  ;;  %v15688_v48 = vld [vmem:[#allocation96_spill] sm:$0xff] }
 0x39f   : > { %15671 = vst [vmem:[#allocation71_spill] sm:$0xff] %v9623_v47  ;;  %v9644_v47 = vmul.f32 %v9294_v42, %v15680_v63  ;;  %v15690_v63 = vld [vmem:[#allocation98_spill] sm:$0xff] }
 0x3a0   : > { %15673 = vst [vmem:[#allocation75_spill] sm:$0xff] %v9627_v53  ;;  %v9648_v53 = vmul.f32 %v9294_v42, %v15682_v62  ;;  %v15692_v62 = vld [vmem:[#allocation99_spill] sm:$0xff] }
 0x3a1   : > { %15675 = vst [vmem:[#allocation76_spill] sm:$0xff] %v9631_v0  ;;  %v9653_v0 = vmul.f32 %v9294_v42, %v15684_v59  ;;  %v15694_v59 = vld [vmem:[#allocation103_spill] sm:$0xff] }
 0x3a2   : > { %3187 = vst [vmem:[#allocation2 + $0x360] sm:$0xff] %v14923_v54 }
 0x3a3   : > { %15677 = vst [vmem:[#allocation77_spill] sm:$0xff] %v9636_v25  ;;  %v9657_v25 = vmul.f32 %v9294_v42, %v15686_v60  ;;  %v15696_v60 = vld [vmem:[#allocation104_spill] sm:$0xff] }
 0x3a4   : > { %15679 = vst [vmem:[#allocation81_spill] sm:$0xff] %v9640_v58  ;;  %v9661_v58 = vmul.f32 %v9294_v42, %v15688_v48  ;;  %v15698_v48 = vld [vmem:[#allocation105_spill] sm:$0xff] }
 0x3a5   : > { %15681 = vst [vmem:[#allocation82_spill] sm:$0xff] %v9644_v47  ;;  %v9665_v47 = vmul.f32 %v9294_v42, %v15690_v63  ;;  %v15700_v63 = vld [vmem:[#allocation109_spill] sm:$0xff] }
 0x3a6   : > { %15683 = vst [vmem:[#allocation83_spill] sm:$0xff] %v9648_v53  ;;  %v9670_v53 = vmul.f32 %v9294_v42, %v15692_v62  ;;  %v15702_v62 = vld [vmem:[#allocation111_spill] sm:$0xff] }
 0x3a7   : > { %3188 = vst [vmem:[#allocation2 + $0x368] sm:$0xff] %v14923_v54 }
 0x3a8   : > { %15685 = vst [vmem:[#allocation87_spill] sm:$0xff] %v9653_v0  ;;  %v9674_v0 = vmul.f32 %v9294_v42, %v15694_v59  ;;  %v15704_v59 = vld [vmem:[#allocation110_spill] sm:$0xff] }
 0x3a9   : > { %15687 = vst [vmem:[#allocation88_spill] sm:$0xff] %v9657_v25  ;;  %v9678_v25 = vmul.f32 %v9294_v42, %v15696_v60  ;;  %v15706_v60 = vld [vmem:[#allocation116_spill] sm:$0xff] }
 0x3aa   : > { %15689 = vst [vmem:[#allocation89_spill] sm:$0xff] %v9661_v58  ;;  %v9682_v58 = vmul.f32 %v9294_v42, %v15698_v48  ;;  %v9701_v48 = vpop.permute.xlu1 %1694 }
 0x3ab   : > { %15691 = vst [vmem:[#allocation93_spill] sm:$0xff] %v9665_v47  ;;  %v9687_v47 = vmul.f32 %v9294_v42, %v15700_v63  ;;  %v15710_v63 = vmov 0.0  }
 0x3ac   : > { %3189 = vst [vmem:[#allocation2 + $0x370] sm:$0x3] %v14923_v54 }
 0x3ad   : > { %15693 = vst [vmem:[#allocation96_spill] sm:$0xff] %v9670_v53  ;;  %v9691_v53 = vmul.f32 %v9294_v42, %v15702_v62 }
 0x3ae   : > { %15695 = vst [vmem:[#allocation98_spill] sm:$0xff] %v9674_v0  ;;  %v9695_v0 = vmul.f32 %v9294_v42, %v15704_v59  ;;  %v15715_v59 = vld [vmem:[#allocation124_spill] sm:$0xff] }
 0x3af   : > { %15697 = vst [vmem:[#allocation99_spill] sm:$0xff] %v9678_v25  ;;  %v9699_v25 = vmul.f32 %v9294_v42, %v15706_v60  ;;  %v8000_v60 = vld [vmem:[%s8143_s27 + $0x338] sm:$0xff] }
 0x3b0   : > { %15699 = vst [vmem:[#allocation103_spill] sm:$0xff] %v9682_v58  ;;  %v15711_v58 = vld [vmem:[#allocation117_spill] sm:$0xff]  ;;  %2463 = vperm.xlu1 %7931, %v8000_v60  }
 0x3b1   : > { %3190 = vst [vmem:[#allocation2 + $0x378] sm:$0xff] %v14923_v54  ;;  %v9703_v54 = vpop.permute.xlu0 %1702  ;;  %v9708_v62 = vmul.f32 %v9294_v42, %v15711_v58 }
 0x3b2   : > { %15701 = vst [vmem:[#allocation104_spill] sm:$0xff] %v9687_v47  ;;  %v15713_v47 = vld [vmem:[#allocation115_spill] sm:$0xff] }
 0x3b3   : > { %15703 = vst [vmem:[#allocation105_spill] sm:$0xff] %v9691_v53  ;;  %v9712_v53 = vmul.f32 %v9294_v42, %v15713_v47 }
 0x3b4   : > { %15705 = vst [vmem:[#allocation109_spill] sm:$0xff] %v9695_v0  ;;  %v9716_v0 = vmul.f32 %v9294_v42, %v15715_v59  ;;  %v8001_v59 = vld [vmem:[%s8143_s27 + $0x240] sm:$0xff] }
 0x3b5   : > { %15707 = vst [vmem:[#allocation111_spill] sm:$0xff] %v9699_v25  ;;  %v15719_v25 = vld [vmem:[#allocation121_spill] sm:$0xff]  ;;  %2339 = vperm.xlu2 %7929, %v8001_v59   ;;  %v15731_v59 = vld [vmem:[#allocation144_spill] sm:$0xff] }
 0x3b6   : > { %15708 = vst [vmem:[#allocation110_spill] sm:$0xff] %v9701_v48  ;;  %v15717_v48 = vld [vmem:[#allocation126_spill] sm:$0xff]  ;;  %v9726_v58 = vmul.f32 %v9294_v42, %v15719_v25  ;;  %v15727_v25 = vld [vmem:[#allocation139_spill] sm:$0xff] }
 0x3b7   : > { %15709 = vst [vmem:[#allocation116_spill] sm:$0xff] %v9703_v54  ;;  %v9722_v54 = vmul.f32 %v9294_v42, %v15717_v48  ;;  %v15725_v48 = vld [vmem:[#allocation137_spill] sm:$0xff] }
 0x3b8   : > { %3191 = vst [vmem:[#allocation2 + $0x380] sm:$0xff] %v15710_v63 }
 0x3b9   : > { %15712 = vst [vmem:[#allocation117_spill] sm:$0xff] %v9708_v62  ;;  %v15721_v62 = vld [vmem:[#allocation131_spill] sm:$0xff] }
 0x3ba   : > { %15714 = vst [vmem:[#allocation115_spill] sm:$0xff] %v9712_v53  ;;  %v9730_v47 = vmul.f32 %v9294_v42, %v15721_v62  ;;  %v15723_v53 = vld [vmem:[#allocation127_spill] sm:$0xff]  ;;  %v15729_v62 = vld [vmem:[#allocation133_spill] sm:$0xff] }
 0x3bb   : > { %15716 = vst [vmem:[#allocation124_spill] sm:$0xff] %v9716_v0  ;;  %v8002_v0 = vld [vmem:[%s8143_s27 + $0x250] sm:$0xff]  ;;  %v9737_v60 = vmul.f32 %v9294_v42, %v15723_v53 }
 0x3bc   : > { %3192 = vst [vmem:[#allocation2 + $0x388] sm:$0x3] %v15710_v63  ;;  %2347 = vperm.xlu0 %7930, %v8002_v0   ;;  %v9754_v0 = vmul.f32 %v9294_v42, %v15731_v59  ;;  %v15733_v53 = vld [vmem:[#allocation145_spill] sm:$0xff]  ;;  %v15739_v59 = vld [vmem:[#allocation143_spill] sm:$0xff] }
 0x3bd   : > { %15718 = vst [vmem:[#allocation126_spill] sm:$0xff] %v9722_v54  ;;  %v9741_v54 = vmul.f32 %v9294_v42, %v15725_v48  ;;  %v15735_v48 = vld [vmem:[#allocation138_spill] sm:$0xff] }
 0x3be   : > { %15720 = vst [vmem:[#allocation121_spill] sm:$0xff] %v9726_v58  ;;  %v9745_v58 = vmul.f32 %v9294_v42, %v15727_v25  ;;  %v15737_v25 = vld [vmem:[#allocation150_spill] sm:$0xff] }
 0x3bf   : > { %15722 = vst [vmem:[#allocation131_spill] sm:$0xff] %v9730_v47  ;;  %v9749_v47 = vmul.f32 %v9294_v42, %v15729_v62  ;;  %v15738_v62 = vld [vmem:[#allocation151_spill] sm:$0xff] }
 0x3c0   : > { %3193 = vst [vmem:[#allocation2 + $0x390] sm:$0xff] %v15710_v63 }
 0x3c1   : > { %15724 = vst [vmem:[#allocation127_spill] sm:$0xff] %v9737_v60  ;;  %v9758_v60 = vmul.f32 %v9294_v42, %v15733_v53  ;;  %v15741_v53 = vld [vmem:[#allocation154_spill] sm:$0xff] }
 0x3c2   : > { %15726 = vst [vmem:[#allocation137_spill] sm:$0xff] %v9741_v54  ;;  %v9762_v54 = vmul.f32 %v9294_v42, %v15735_v48  ;;  %v9783_v48 = vmul.f32 %v9294_v42, %v8820_v37  ;;  %v9805_v37 = vmul.f32 %v9294_v42, %v8840_v49  ;;  %v9826_v49 = vmul.f32 %v9294_v42, %v8831_v55 }
 0x3c3   : > { %15728 = vst [vmem:[#allocation139_spill] sm:$0xff] %v9745_v58  ;;  %v9766_v58 = vmul.f32 %v9294_v42, %v15737_v25  ;;  %v15742_v25 = vld [vmem:[#allocation149_spill] sm:$0xff]  ;;  %v9843_v55 = vmul.f32 %v9294_v42, %v8868_v11  ;;  %v9861_v11 = vmul.f32 %v9294_v42, %v8883_v15  ;;  %v9880_v15 = vmul.f32 %v9294_v42, %v8892_v18 }
 0x3c4   : > { %15730 = vst [vmem:[#allocation133_spill] sm:$0xff] %v9749_v47  ;;  %v9771_v47 = vmul.f32 %v9294_v42, %v15738_v62  ;;  %v9792_v62 = vmul.f32 %v9294_v42, %v8827_v50  ;;  %v9813_v50 = vmul.f32 %v9294_v42, %v8824_v51  ;;  %v9834_v51 = vmul.f32 %v9294_v42, %v8860_v8 }
 0x3c5   : > { %3194 = vst [vmem:[#allocation2 + $0x398] sm:$0xff] %v15710_v63  ;;  %v9853_v8 = vmul.f32 %v9294_v42, %v8847_v5  ;;  %v9872_v5 = vmul.f32 %v9294_v42, %v8856_v4  ;;  %v9893_v4 = vmul.f32 %v9294_v42, %v8901_v21  ;;  %v9901_v18 = vmul.f32 %v9294_v42, %v8909_v23 }
 0x3c6   : > { %15732 = vst [vmem:[#allocation144_spill] sm:$0xff] %v9754_v0  ;;  %v9775_v0 = vmul.f32 %v9294_v42, %v15739_v59  ;;  %v9796_v59 = vmul.f32 %v9294_v42, %v8833_v61  ;;  %v9817_v61 = vmul.f32 %v9294_v42, %v8849_v6  ;;  %v9839_v6 = vmul.f32 %v9294_v42, %v8838_v3 }
 0x3c7   : > { %15734 = vst [vmem:[#allocation145_spill] sm:$0xff] %v9758_v60  ;;  %v9779_v60 = vmul.f32 %v9294_v42, %v15741_v53  ;;  %v15743_v53 = vld [vmem:[#allocation152_spill] sm:$0xff]  ;;  %v9857_v3 = vmul.f32 %v9294_v42, %v8881_v14  ;;  %v9876_v14 = vmul.f32 %v9294_v42, %v8890_v17  ;;  %v9897_v17 = vmul.f32 %v9294_v42, %v8872_v10 }
 0x3c8   : > { %15736 = vst [vmem:[#allocation138_spill] sm:$0xff] %v9762_v54  ;;  %v9788_v54 = vmul.f32 %v9294_v42, %v15742_v25  ;;  %v9809_v25 = vmul.f32 %v9294_v42, %v8842_v2  ;;  %v9830_v2 = vmul.f32 %v9294_v42, %v8858_v9  ;;  %v8003_v9 = vld [vmem:[%s8143_s27 + $0x340] sm:$0xff]  ;;  %v9914_v21 = vmul.f32 %v9294_v42, %v8922_v27 }
 0x3c9   : > { %3195 = vst [vmem:[#allocation2 + $0x3a0] sm:$0x3] %v15710_v63  ;;  %2467 = vperm.xlu1 %7931, %v8003_v9   ;;  %v8005_v9 = vld [vmem:[%s8143_s27 + $0x358] sm:$0xff]  ;;  %v9918_v10 = vmul.f32 %v9294_v42, %v8924_v28  ;;  %v9923_v23 = vmul.f32 %v9294_v42, %v8888_v16  ;;  %v9935_v27 = vmul.f32 %v9294_v42, %v8897_v19 }
 0x3ca   : > { %15740 = vst [vmem:[#allocation150_spill] sm:$0xff] %v9775_v0  ;;  %v9800_v0 = vmul.f32 %v9294_v42, %v15743_v53  ;;  %v9822_v53 = vmul.f32 %v9294_v42, %v8851_v1  ;;  %v9847_v1 = vmul.f32 %v9294_v42, %v8874_v12  ;;  %v9865_v12 = vpop.permute.xlu0 %1714  ;;  %2479 = vperm.xlu0 %7930, %v8005_v9  }
 0x3cb   : > { %3196 = vst [vmem:[#allocation2 + $0x3a8] sm:$0xff] %v15710_v63  ;;  %v9940_v28 = vmul.f32 %v9294_v42, %v8940_v33  ;;  %v9944_v16 = vmul.f32 %v9294_v42, %v8942_v34  ;;  %v9957_v19 = vmul.f32 %v9294_v42, %v8954_v38  ;;  %v1797_v33 = vmul.f32 %v9284_v52, %v8920_v26  ;;  %v8006_v26 = vld [vmem:[%s8143_s27 + $0x258] sm:$0xff] }
 0x3cc   : > { %3197 = vst [vmem:[#allocation2 + $0x3b0] sm:$0xff] %v15710_v63  ;;  %v1799_v34 = vmul.f32 %v9284_v52, %v8929_v29  ;;  %v1805_v9 = vmul.f32 %v9284_v52, %v8947_v35  ;;  %v1795_v38 = vmul.f32 %v9284_v52, %v9006_v46  ;;  %v1798_v29 = vmul.f32 %v9284_v52, %v9013_v40  ;;  %v8008_v35 = vld [vmem:[%s8143_s27 + $0x360] sm:$0xff]  ;;  %v15757_v46 = vld [vmem:[#allocation156_spill] sm:$0xff]  ;;  %v15761_v40 = vld [vmem:[#allocation158_spill] sm:$0xff] }
 0x3cd   : > { %3198 = vst [vmem:[#allocation2 + $0x3b8] sm:$0x3] %v15710_v63 }
 0x3ce   : > { %3199 = vst [vmem:[#allocation2 + $0x3c0] sm:$0xff] %v15710_v63 }
 0x3cf   : > { %15744 = vst [vmem:[#allocation151_spill] sm:$0xff] %v9839_v6  ;;  %v9863_v6 = vpop.permute.xlu1 %1706 }
 0x3d0   : > { %15745 = vst [vmem:[#allocation143_spill] sm:$0xff] %v9843_v55  ;;  %v8004_v55 = vld [vmem:[%s8143_s27 + $0x348] sm:$0xff] }
 0x3d1   : > { %3200 = vst [vmem:[#allocation2 + $0x3c8] sm:$0xff] %v15710_v63  ;;  %2471 = vperm.xlu2 %7929, %v8004_v55   ;;  %v9889_v55 = vmul.f32 %v9294_v42, %v8899_v20  ;;  %v9910_v20 = vmul.f32 %v9294_v42, %v8879_v13  ;;  %v9931_v13 = vmul.f32 %v9294_v42, %v8933_v31 }
 0x3d2   : > { %15746 = vst [vmem:[#allocation154_spill] sm:$0xff] %v9865_v12  ;;  %v9884_v12 = vmul.f32 %v9294_v42, %v8865_v7  ;;  %v9906_v7 = vmul.f32 %v9294_v42, %v8913_v24  ;;  %v9927_v24 = vmul.f32 %v9294_v42, %v8931_v30  ;;  %v9948_v30 = vmul.f32 %v9294_v42, %v8906_v22 }
 0x3d3   : > { %3201 = vst [vmem:[#allocation2 + $0x3d0] sm:$0x3] %v15710_v63  ;;  %v9952_v31 = vmul.f32 %v9294_v42, %v8952_v36  ;;  %v1802_v22 = vmul.f32 %v9284_v52, %v8938_v32  ;;  %v1796_v36 = vmul.f32 %v9284_v52, %v9004_v44  ;;  %2351 = vperm.xlu1 %7931, %v8006_v26   ;;  %v8007_v44 = vld [vmem:[%s8143_s27 + $0x350] sm:$0xff] }
 0x3d4   : > { %3202 = vst [vmem:[#allocation2 + $0x3d8] sm:$0xff] %v15710_v63  ;;  %v1808_v32 = vmul.f32 %v9284_v52, %v8956_v39  ;;  %2483 = vperm.xlu0 %7930, %v8008_v35   ;;  %v15759_v26 = vld [vmem:[#allocation157_spill] sm:$0xff]  ;;  %v9993_v39 = vmul.f32 %v9294_v42, %v15761_v40  ;;  %v15766_v35 = vld [vmem:[#allocation18_spill] sm:$0xff]  ;;  %v10012_v40 = vadd.f32 %v1799_v34, %v9438_v56 }
 0x3d5   : > { %3203 = vst [vmem:[#allocation2 + $0x3e0] sm:$0xff] %v15710_v63  ;;  %v15777_v56 = vld [vmem:[#allocation6_spill] sm:$0xff] }
 0x3d6   : > { %15747 = vst [vmem:[#allocation149_spill] sm:$0xff] %v9910_v20  ;;  %v10034_v34 = vadd.f32 %v1795_v38, %v15777_v56  ;;  %v15787_v38 = vld [vmem:[#allocation44_spill] sm:$0xff] }
 0x3d7   : > { %3204 = vst [vmem:[#allocation2 + $0x3e8] sm:$0x3] %v15710_v63  ;;  %v15791_v56 = vld [vmem:[#allocation56_spill] sm:$0xff] }
 0x3d8   : > { %15748 = vst [vmem:[#allocation152_spill] sm:$0xff] %v9923_v23  ;;  %v15804_v23 = vld [vmem:[#allocation74_spill] sm:$0xff] }
 0x3d9   : > { %15749 = vst [vmem:[#allocation194_spill] sm:$0xff] %v9927_v24  ;;  %2475 = vperm.xlu2 %7929, %v8007_v44   ;;  %v10001_v44 = vadd.f32 %v1797_v33, %v9460_v41  ;;  %v10024_v33 = vadd.f32 %v1802_v22, %v9442_v45 }
 0x3da   : > { %15750 = vst [vmem:[#allocation195_spill] sm:$0xff] %v9931_v13 }
 0x3db   : > { %15751 = vst [vmem:[#allocation196_spill] sm:$0xff] %v9935_v27  ;;  %v15763_v27 = vld [vmem:[#allocation159_spill] sm:$0xff] }
 0x3dc   : > { %3205 = vst [vmem:[#allocation2 + $0x3f0] sm:$0xff] %v15710_v63 }
 0x3dd   : > { %15752 = vst [vmem:[#allocation197_spill] sm:$0xff] %v9940_v28  ;;  %v15801_v28 = vld [vmem:[#allocation7_spill] sm:$0xff] }
 0x3de   : > { %15753 = vst [vmem:[#allocation198_spill] sm:$0xff] %v9944_v16  ;;  %v15803_v16 = vld [vmem:[#allocation67_spill] sm:$0xff] }
 0x3df   : > { %15754 = vst [vmem:[#allocation199_spill] sm:$0xff] %v9948_v30  ;;  %v1800_v30 = vmul.f32 %v9284_v52, %v9015_v57  ;;  %v9997_v57 = vmul.f32 %v9294_v42, %v15763_v27  ;;  %v10016_v27 = vpop.permute.xlu0 %1726 }
 0x3e0   : > { %15755 = vst [vmem:[#allocation200_spill] sm:$0xff] %v9952_v31  ;;  %v9985_v31 = vmul.f32 %v9294_v42, %v15757_v46  ;;  %v10005_v46 = vmul.f32 %v9294_v42, %v15766_v35  ;;  %v10027_v35 = vadd.f32 %v1796_v36, %v9452_v43  ;;  %v15785_v43 = vld [vmem:[#allocation36_spill] sm:$0xff]  ;;  %v15786_v36 = vld [vmem:[#allocation155_spill] sm:$0xff] }
 0x3e1   : > { %3206 = vst [vmem:[#allocation2 + $0x3f8] sm:$0xff] %v15710_v63  ;;  %v1801_v22 = vmul.f32 %v9284_v52, %v15785_v43  ;;  %v1807_v43 = vmul.f32 %v9284_v52, %v15791_v56 }
 0x3e2   : > { %15756 = vst [vmem:[#allocation201_spill] sm:$0xff] %v9957_v19  ;;  %v9989_v19 = vmul.f32 %v9294_v42, %v15759_v26 }
 0x3e3   : > { %3207 = vst [vmem:[#allocation2 + $0x400] sm:$0x3] %v15710_v63 }
 0x3e4   : > { %3208 = vst [vmem:[#allocation2 + $0x408] sm:$0xff] %v15710_v63 }
 0x3e5   : > { %3209 = vst [vmem:[#allocation2 + $0x410] sm:$0xff] %v15710_v63 }
 0x3e6   : > { %15758 = vst [vmem:[#allocation156_spill] sm:$0xff] %v9985_v31  ;;  %v15768_v31 = vld [vmem:[#allocation26_spill] sm:$0xff] }
 0x3e7   : > { %15760 = vst [vmem:[#allocation157_spill] sm:$0xff] %v9989_v19  ;;  %v10009_v26 = vmul.f32 %v9294_v42, %v15768_v31  ;;  %v15775_v31 = vld [vmem:[#allocation4_spill] sm:$0xff]  ;;  %v15781_v19 = vld [vmem:[#allocation5_spill] sm:$0xff] }
 0x3e8   : > { %15762 = vst [vmem:[#allocation158_spill] sm:$0xff] %v9993_v39  ;;  %v10014_v39 = vpop.permute.xlu1 %1718 }
 0x3e9   : > { %15764 = vst [vmem:[#allocation159_spill] sm:$0xff] %v9997_v57  ;;  %v15771_v57 = vld [vmem:[#allocation24_spill] sm:$0xff] }
 0x3ea   : > { %3210 = vst [vmem:[#allocation2 + $0x418] sm:$0x3] %v15710_v63  ;;  %v10021_v41 = vmul.f32 %v9294_v42, %v15771_v57  ;;  %v10040_v57 = vadd.f32 %v1808_v32, %v15781_v19  ;;  %v15783_v42 = vld [vmem:[#allocation10_spill] sm:$0xff]  ;;  %v15789_v19 = vld [vmem:[#allocation20_spill] sm:$0xff] }
 0x3eb   : > { %15765 = vst [vmem:[#allocation202_spill] sm:$0xff] %v10001_v44  ;;  %v10043_v45 = vadd.f32 %v1800_v30, %v15783_v42  ;;  %v1814_v42 = vmul.f32 %v9284_v52, %v15789_v19  ;;  %v15790_v30 = vld [vmem:[#allocation50_spill] sm:$0xff] }
 0x3ec   : > { %15767 = vst [vmem:[#allocation18_spill] sm:$0xff] %v10005_v46  ;;  %v10030_v46 = vadd.f32 %v1805_v9, %v15775_v31  ;;  %v1811_v9 = vmul.f32 %v9284_v52, %v15786_v36  ;;  %v1803_v31 = vmul.f32 %v9284_v52, %v15787_v38  ;;  %v1806_v32 = vmul.f32 %v9284_v52, %v15790_v30  ;;  %v15792_v36 = vld [vmem:[#allocation19_spill] sm:$0xff] }
 0x3ed   : > { %15769 = vst [vmem:[#allocation26_spill] sm:$0xff] %v10009_v26  ;;  %v15779_v26 = vld [vmem:[#allocation3_spill] sm:$0xff] }
 0x3ee   : > { %15770 = vst [vmem:[#allocation203_spill] sm:$0xff] %v10012_v40  ;;  %v10037_v40 = vadd.f32 %v1798_v29, %v15779_v26  ;;  %v15788_v29 = vld [vmem:[#allocation42_spill] sm:$0xff]  ;;  %v15793_v38 = vld [vmem:[#allocation55_spill] sm:$0xff] }
 0x3ef   : > { %3211 = vst [vmem:[#allocation2 + $0x420] sm:$0xff] %v15710_v63  ;;  %v1804_v26 = vmul.f32 %v9284_v52, %v15788_v29  ;;  %v1809_v29 = vmul.f32 %v9284_v52, %v15793_v38  ;;  %v8009_v30 = vld [vmem:[%s8143_s27 + $0x260] sm:$0xff]  ;;  %v8010_v38 = vld [vmem:[%s8143_s27 + $0x268] sm:$0xff] }
 0x3f0   : > { %15772 = vst [vmem:[#allocation24_spill] sm:$0xff] %v10021_v41  ;;  %v1817_v41 = vmul.f32 %v9284_v52, %v15792_v36  ;;  %2355 = vperm.xlu1 %7931, %v8009_v30   ;;  %2359 = vperm.xlu2 %7929, %v8010_v38   ;;  %v10085_v30 = vadd.f32 %v1811_v9, %v15801_v28  ;;  %v15807_v38 = vld [vmem:[#allocation12_spill] sm:$0xff] }
 0x3f1   : > { %15773 = vst [vmem:[#allocation204_spill] sm:$0xff] %v10024_v33  ;;  %v15798_v33 = vld [vmem:[#allocation31_spill] sm:$0xff]  ;;  %v10096_v13 = vadd.f32 %v1804_v26, %v15807_v38 }
 0x3f2   : > { %15774 = vst [vmem:[#allocation205_spill] sm:$0xff] %v10027_v35  ;;  %v15797_v35 = vld [vmem:[#allocation68_spill] sm:$0xff] }
 0x3f3   : > { %15776 = vst [vmem:[#allocation4_spill] sm:$0xff] %v10030_v46  ;;  %v15795_v46 = vld [vmem:[#allocation25_spill] sm:$0xff]  ;;  %v1813_v36 = vmul.f32 %v9284_v52, %v15797_v35  ;;  %v1816_v35 = vmul.f32 %v9284_v52, %v15804_v23  ;;  %v15815_v23 = vld [vmem:[#allocation14_spill] sm:$0xff] }
 0x3f4   : > { %3212 = vst [vmem:[#allocation2 + $0x428] sm:$0xff] %v15710_v63  ;;  %v1820_v19 = vmul.f32 %v9284_v52, %v15795_v46  ;;  %v15799_v46 = vld [vmem:[#allocation9_spill] sm:$0xff] }
 0x3f5   : > { %15778 = vst [vmem:[#allocation6_spill] sm:$0xff] %v10034_v34  ;;  %v1823_v34 = vmul.f32 %v9284_v52, %v15798_v33  ;;  %v10082_v44 = vadd.f32 %v1801_v22, %v15799_v46  ;;  %v15805_v33 = vld [vmem:[#allocation13_spill] sm:$0xff]  ;;  %v15811_v46 = vld [vmem:[#allocation16_spill] sm:$0xff] }
 0x3f6   : > { %15780 = vst [vmem:[#allocation3_spill] sm:$0xff] %v10037_v40  ;;  %v10093_v24 = vadd.f32 %v1803_v31, %v15805_v33  ;;  %v10102_v28 = vadd.f32 %v1806_v32, %v15811_v46  ;;  %v15819_v33 = vld [vmem:[#allocation21_spill] sm:$0xff]  ;;  %v15823_v32 = vld [vmem:[#allocation28_spill] sm:$0xff]  ;;  %v15825_v46 = vld [vmem:[#allocation27_spill] sm:$0xff] }
 0x3f7   : > { %15782 = vst [vmem:[#allocation5_spill] sm:$0xff] %v10040_v57  ;;  %v15794_v57 = vld [vmem:[#allocation62_spill] sm:$0xff] }
 0x3f8   : > { %15784 = vst [vmem:[#allocation10_spill] sm:$0xff] %v10043_v45  ;;  %v1810_v40 = vmul.f32 %v9284_v52, %v15794_v57  ;;  %v15796_v45 = vld [vmem:[#allocation61_spill] sm:$0xff]  ;;  %v8011_v57 = vld [vmem:[%s8143_s27 + $0x278] sm:$0xff] }
 0x3f9   : > { %3213 = vst [vmem:[#allocation2 + $0x430] sm:$0x3] %v15710_v63  ;;  %v1812_v56 = vmul.f32 %v9284_v52, %v15796_v45  ;;  %2367 = vperm.xlu0 %7930, %v8011_v57   ;;  %v1815_v45 = vmul.f32 %v9284_v52, %v15803_v16  ;;  %v15809_v57 = vld [vmem:[#allocation11_spill] sm:$0xff] }
 0x3fa   : > { %3214 = vst [vmem:[#allocation2 + $0x438] sm:$0xff] %v15710_v63  ;;  %v10099_v22 = vadd.f32 %v1814_v42, %v15809_v57  ;;  %v15813_v16 = vld [vmem:[#allocation15_spill] sm:$0xff]  ;;  %v10115_v26 = vadd.f32 %v1810_v40, %v15819_v33  ;;  %v15821_v42 = vld [vmem:[#allocation17_spill] sm:$0xff] }
 0x3fb   : > { %3215 = vst [vmem:[#allocation2 + $0x440] sm:$0xff] %v15710_v63  ;;  %v10106_v9 = vadd.f32 %v1807_v43, %v15813_v16  ;;  %v10119_v38 = vadd.f32 %v1820_v19, %v15821_v42  ;;  %v10122_v57 = vadd.f32 %v1812_v56, %v15823_v32  ;;  %v10125_v43 = vadd.f32 %v1813_v36, %v15825_v46  ;;  %v15827_v16 = vld [vmem:[#allocation23_spill] sm:$0xff]  ;;  %v15834_v56 = vld [vmem:[#allocation30_spill] sm:$0xff]  ;;  %v15835_v42 = vld [vmem:[#allocation73_spill] sm:$0xff] }
 0x3fc   : > { %3216 = vst [vmem:[#allocation2 + $0x448] sm:$0x3] %v15710_v63  ;;  %v15830_v40 = vld [vmem:[#allocation39_spill] sm:$0xff]  ;;  %v1826_v36 = vmul.f32 %v9284_v52, %v15834_v56  ;;  %v15840_v56 = vld [vmem:[#allocation37_spill] sm:$0xff] }
 0x3fd   : > { %3217 = vst [vmem:[#allocation2 + $0x450] sm:$0xff] %v15710_v63  ;;  %v15832_v19 = vld [vmem:[#allocation35_spill] sm:$0xff] }
 0x3fe   : > { %15800 = vst [vmem:[#allocation36_spill] sm:$0xff] %v10082_v44  ;;  %v15817_v44 = vld [vmem:[#allocation22_spill] sm:$0xff]  ;;  %v10139_v33 = vadd.f32 %v1816_v35, %v15832_v19  ;;  %v15836_v32 = vld [vmem:[#allocation79_spill] sm:$0xff] }
 0x3ff   : > { %15802 = vst [vmem:[#allocation155_spill] sm:$0xff] %v10085_v30  ;;  %v10109_v30 = vadd.f32 %v1817_v41, %v15815_v23  ;;  %v10112_v31 = vadd.f32 %v1809_v29, %v15817_v44  ;;  %v10128_v41 = vadd.f32 %v1823_v34, %v15827_v16  ;;  %v10130_v23 = vpop.permute.xlu1 %1730  ;;  %v10132_v44 = vpop.permute.xlu0 %1738  ;;  %v10136_v29 = vadd.f32 %v1815_v45, %v15830_v40  ;;  %v15837_v16 = vld [vmem:[#allocation38_spill] sm:$0xff]  ;;  %v15839_v40 = vld [vmem:[#allocation85_spill] sm:$0xff] }
 0x400   : > { %3218 = vst [vmem:[#allocation2 + $0x458] sm:$0xff] %v15710_v63  ;;  %v1818_v34 = vmul.f32 %v9284_v52, %v15835_v42  ;;  %v1819_v46 = vmul.f32 %v9284_v52, %v15836_v32  ;;  %v15838_v45 = vld [vmem:[#allocation78_spill] sm:$0xff]  ;;  %v1822_v19 = vmul.f32 %v9284_v52, %v15839_v40  ;;  %v1832_v42 = vmul.f32 %v9284_v52, %v15840_v56  ;;  %v8013_v56 = vld [vmem:[%s8143_s27 + $0x270] sm:$0xff] }
 0x401   : > { %15806 = vst [vmem:[#allocation44_spill] sm:$0xff] %v10093_v24  ;;  %v1821_v35 = vmul.f32 %v9284_v52, %v15838_v45  ;;  %2363 = vperm.xlu2 %7929, %v8013_v56   ;;  %v15853_v56 = vld [vmem:[#allocation41_spill] sm:$0xff] }
 0x402   : > { %15808 = vst [vmem:[#allocation42_spill] sm:$0xff] %v10096_v13  ;;  %v15850_v13 = vld [vmem:[#allocation100_spill] sm:$0xff]  ;;  %v10186_v24 = vadd.f32 %v1819_v46, %v15853_v56 }
 0x403   : > { %15810 = vst [vmem:[#allocation20_spill] sm:$0xff] %v10099_v22  ;;  %v15848_v22 = vld [vmem:[#allocation49_spill] sm:$0xff] }
 0x404   : > { %15812 = vst [vmem:[#allocation50_spill] sm:$0xff] %v10102_v28 }
 0x405   : > { %3219 = vst [vmem:[#allocation2 + $0x460] sm:$0x3] %v15710_v63 }
 0x406   : > { %15814 = vst [vmem:[#allocation56_spill] sm:$0xff] %v10106_v9 }
 0x407   : > { %15816 = vst [vmem:[#allocation19_spill] sm:$0xff] %v10109_v30  ;;  %v15845_v30 = vld [vmem:[#allocation95_spill] sm:$0xff] }
 0x408   : > { %15818 = vst [vmem:[#allocation55_spill] sm:$0xff] %v10112_v31  ;;  %v15849_v31 = vld [vmem:[#allocation94_spill] sm:$0xff] }
 0x409   : > { %15820 = vst [vmem:[#allocation62_spill] sm:$0xff] %v10115_v26  ;;  %v15844_v26 = vld [vmem:[#allocation90_spill] sm:$0xff] }
 0x40a   : > { %3220 = vst [vmem:[#allocation2 + $0x468] sm:$0xff] %v15710_v63  ;;  %v1827_v40 = vmul.f32 %v9284_v52, %v15844_v26  ;;  %v1831_v26 = vmul.f32 %v9284_v52, %v15850_v13  ;;  %v15860_v13 = vld [vmem:[#allocation47_spill] sm:$0xff] }
 0x40b   : > { %15822 = vst [vmem:[#allocation25_spill] sm:$0xff] %v10119_v38  ;;  %v15842_v38 = vld [vmem:[#allocation91_spill] sm:$0xff]  ;;  %v10198_v20 = vadd.f32 %v1822_v19, %v15860_v13 }
 0x40c   : > { %15824 = vst [vmem:[#allocation61_spill] sm:$0xff] %v10122_v57  ;;  %v1825_v32 = vmul.f32 %v9284_v52, %v15842_v38  ;;  %v1828_v57 = vmul.f32 %v9284_v52, %v15845_v30  ;;  %v15846_v38 = vld [vmem:[#allocation34_spill] sm:$0xff]  ;;  %v15851_v30 = vld [vmem:[#allocation45_spill] sm:$0xff] }
 0x40d   : > { %15826 = vst [vmem:[#allocation68_spill] sm:$0xff] %v10125_v43  ;;  %v10173_v9 = vadd.f32 %v1826_v36, %v15846_v38  ;;  %v10183_v28 = vadd.f32 %v1818_v34, %v15851_v30  ;;  %v15857_v38 = vld [vmem:[#allocation48_spill] sm:$0xff]  ;;  %v15864_v30 = vld [vmem:[#allocation57_spill] sm:$0xff] }
 0x40e   : > { %15828 = vst [vmem:[#allocation31_spill] sm:$0xff] %v10128_v41  ;;  %v1829_v41 = vmul.f32 %v9284_v52, %v15837_v16  ;;  %v8012_v16 = vld [vmem:[%s8143_s27 + $0x368] sm:$0xff] }
 0x40f   : > { %15829 = vst [vmem:[#allocation9_spill] sm:$0xff] %v10132_v44  ;;  %2487 = vperm.xlu1 %7931, %v8012_v16   ;;  %v1838_v16 = vmul.f32 %v9284_v52, %v15848_v22  ;;  %v1841_v22 = vmul.f32 %v9284_v52, %v15857_v38  ;;  %v15862_v44 = vld [vmem:[#allocation46_spill] sm:$0xff] }
 0x410   : > { %3221 = vst [vmem:[#allocation2 + $0x470] sm:$0xff] %v15710_v63  ;;  %v10201_v34 = vadd.f32 %v1832_v42, %v15862_v44  ;;  %v15874_v44 = vld [vmem:[#allocation58_spill] sm:$0xff] }
 0x411   : > { %15831 = vst [vmem:[#allocation7_spill] sm:$0xff] %v10136_v29  ;;  %v15843_v29 = vld [vmem:[#allocation43_spill] sm:$0xff]  ;;  %v10221_v42 = vadd.f32 %v1838_v16, %v15874_v44  ;;  %v15884_v16 = vld [vmem:[#allocation54_spill] sm:$0xff] }
 0x412   : > { %15833 = vst [vmem:[#allocation67_spill] sm:$0xff] %v10139_v33  ;;  %v15841_v33 = vld [vmem:[#allocation84_spill] sm:$0xff]  ;;  %v1835_v45 = vmul.f32 %v9284_v52, %v15843_v29  ;;  %v1830_v29 = vmul.f32 %v9284_v52, %v15849_v31  ;;  %v15858_v31 = vld [vmem:[#allocation51_spill] sm:$0xff] }
 0x413   : > { %3222 = vst [vmem:[#allocation2 + $0x478] sm:$0x3] %v15710_v63  ;;  %v1824_v43 = vmul.f32 %v9284_v52, %v15841_v33  ;;  %v8014_v33 = vld [vmem:[%s8143_s27 + $0x280] sm:$0xff] }
 0x414   : > { %3223 = vst [vmem:[#allocation2 + $0x480] sm:$0xff] %v15710_v63  ;;  %2371 = vperm.xlu0 %7930, %v8014_v33   ;;  %v15855_v33 = vld [vmem:[#allocation40_spill] sm:$0xff] }
 0x415   : > { %3224 = vst [vmem:[#allocation2 + $0x488] sm:$0xff] %v15710_v63  ;;  %v10189_v36 = vadd.f32 %v1829_v41, %v15855_v33  ;;  %v10204_v46 = vadd.f32 %v1824_v43, %v15864_v30  ;;  %v15866_v41 = vld [vmem:[#allocation53_spill] sm:$0xff]  ;;  %v15868_v33 = vld [vmem:[#allocation52_spill] sm:$0xff] }
 0x416   : > { %3225 = vst [vmem:[#allocation2 + $0x490] sm:$0x3] %v15710_v63  ;;  %v10208_v56 = vadd.f32 %v1825_v32, %v15866_v41  ;;  %v10211_v38 = vadd.f32 %v1835_v45, %v15868_v33  ;;  %v15876_v43 = vld [vmem:[#allocation69_spill] sm:$0xff]  ;;  %v15880_v45 = vld [vmem:[#allocation108_spill] sm:$0xff] }
 0x417   : > { %15847 = vst [vmem:[#allocation74_spill] sm:$0xff] %v10173_v9  ;;  %v10195_v9 = vadd.f32 %v1821_v35, %v15858_v31  ;;  %v15872_v31 = vld [vmem:[#allocation59_spill] sm:$0xff]  ;;  %v10224_v13 = vadd.f32 %v1830_v29, %v15876_v43  ;;  %v15878_v32 = vld [vmem:[#allocation65_spill] sm:$0xff]  ;;  %v1833_v41 = vmul.f32 %v9284_v52, %v15880_v45  ;;  %v15885_v29 = vld [vmem:[#allocation114_spill] sm:$0xff]  ;;  %v10243_v43 = vpop.permute.xlu0 %1750 }
 0x418   : > { %3226 = vst [vmem:[#allocation2 + $0x498] sm:$0xff] %v15710_v63  ;;  %v10217_v19 = vadd.f32 %v1828_v57, %v15872_v31  ;;  %v10227_v30 = vadd.f32 %v1831_v26, %v15878_v32  ;;  %v1844_v31 = vmul.f32 %v9284_v52, %v15884_v16  ;;  %v1836_v44 = vmul.f32 %v9284_v52, %v15885_v29  ;;  %v10241_v26 = vpop.permute.xlu1 %1742  ;;  %v15888_v32 = vld [vmem:[#allocation112_spill] sm:$0xff]  ;;  %v8015_v16 = vld [vmem:[%s8143_s27 + $0x370] sm:$0xff]  ;;  %v15891_v29 = vld [vmem:[#allocation118_spill] sm:$0xff] }
 0x419   : > { %15852 = vst [vmem:[#allocation13_spill] sm:$0xff] %v10183_v28  ;;  %v15889_v45 = vld [vmem:[#allocation60_spill] sm:$0xff]  ;;  %2491 = vperm.xlu1 %7931, %v8015_v16  }
 0x41a   : > { %15854 = vst [vmem:[#allocation12_spill] sm:$0xff] %v10186_v24 }
 0x41b   : > { %15856 = vst [vmem:[#allocation11_spill] sm:$0xff] %v10189_v36  ;;  %v15870_v36 = vld [vmem:[#allocation63_spill] sm:$0xff] }
 0x41c   : > { %3227 = vst [vmem:[#allocation2 + $0x4a0] sm:$0xff] %v15710_v63  ;;  %v10214_v35 = vadd.f32 %v1827_v40, %v15870_v36  ;;  %v15881_v40 = vld [vmem:[#allocation64_spill] sm:$0xff]  ;;  %v15883_v36 = vld [vmem:[#allocation106_spill] sm:$0xff] }
 0x41d   : > { %15859 = vst [vmem:[#allocation16_spill] sm:$0xff] %v10195_v9  ;;  %v10233_v57 = vadd.f32 %v1841_v22, %v15881_v40  ;;  %v1834_v33 = vmul.f32 %v9284_v52, %v15883_v36  ;;  %v1837_v22 = vmul.f32 %v9284_v52, %v15888_v32  ;;  %v1847_v40 = vmul.f32 %v9284_v52, %v15889_v45  ;;  %v15890_v36 = vld [vmem:[#allocation120_spill] sm:$0xff]  ;;  %v8016_v32 = vld [vmem:[%s8143_s27 + $0x378] sm:$0xff]  ;;  %v15903_v9 = vld [vmem:[#allocation135_spill] sm:$0xff] }
 0x41e   : > { %15861 = vst [vmem:[#allocation15_spill] sm:$0xff] %v10198_v20  ;;  %2495 = vperm.xlu2 %7929, %v8016_v32   ;;  %v8017_v45 = vld [vmem:[%s8143_s27 + $0x388] sm:$0xff]  ;;  %v15900_v32 = vld [vmem:[#allocation71_spill] sm:$0xff] }
 0x41f   : > { %15863 = vst [vmem:[#allocation14_spill] sm:$0xff] %v10201_v34  ;;  %2503 = vperm.xlu0 %7930, %v8017_v45   ;;  %v15895_v34 = vld [vmem:[#allocation72_spill] sm:$0xff]  ;;  %v10276_v24 = vadd.f32 %v1834_v33, %v15900_v32  ;;  %v15912_v32 = vld [vmem:[#allocation87_spill] sm:$0xff] }
 0x420   : > { %15865 = vst [vmem:[#allocation22_spill] sm:$0xff] %v10204_v46  ;;  %v1853_v16 = vmul.f32 %v9284_v52, %v15895_v34  ;;  %v15897_v20 = vld [vmem:[#allocation136_spill] sm:$0xff]  ;;  %v1848_v34 = vmul.f32 %v9284_v52, %v15903_v9  ;;  %v15914_v9 = vld [vmem:[#allocation83_spill] sm:$0xff] }
 0x421   : > { %3228 = vst [vmem:[#allocation2 + $0x4a8] sm:$0x3] %v15710_v63  ;;  %v15902_v45 = vld [vmem:[#allocation80_spill] sm:$0xff] }
 0x422   : > { %15867 = vst [vmem:[#allocation21_spill] sm:$0xff] %v10208_v56 }
 0x423   : > { %15869 = vst [vmem:[#allocation17_spill] sm:$0xff] %v10211_v38  ;;  %v15893_v38 = vld [vmem:[#allocation125_spill] sm:$0xff] }
 0x424   : > { %15871 = vst [vmem:[#allocation28_spill] sm:$0xff] %v10214_v35  ;;  %v15896_v35 = vld [vmem:[#allocation129_spill] sm:$0xff] }
 0x425   : > { %15873 = vst [vmem:[#allocation27_spill] sm:$0xff] %v10217_v19 }
 0x426   : > { %3229 = vst [vmem:[#allocation2 + $0x4b0] sm:$0xff] %v15710_v63 }
 0x427   : > { %15875 = vst [vmem:[#allocation23_spill] sm:$0xff] %v10221_v42  ;;  %v15892_v42 = vld [vmem:[#allocation66_spill] sm:$0xff] }
 0x428   : > { %15877 = vst [vmem:[#allocation39_spill] sm:$0xff] %v10224_v13  ;;  %v1850_v19 = vmul.f32 %v9284_v52, %v15892_v42  ;;  %v1842_v13 = vmul.f32 %v9284_v52, %v15893_v38  ;;  %v1846_v42 = vmul.f32 %v9284_v52, %v15897_v20  ;;  %v15898_v38 = vld [vmem:[#allocation75_spill] sm:$0xff]  ;;  %v15906_v20 = vld [vmem:[#allocation81_spill] sm:$0xff] }
 0x429   : > { %15879 = vst [vmem:[#allocation35_spill] sm:$0xff] %v10227_v30  ;;  %v1840_v30 = vmul.f32 %v9284_v52, %v15891_v29  ;;  %v1845_v29 = vmul.f32 %v9284_v52, %v15896_v35  ;;  %v10273_v46 = vadd.f32 %v1833_v41, %v15898_v38  ;;  %v15904_v35 = vld [vmem:[#allocation70_spill] sm:$0xff]  ;;  %v15910_v38 = vld [vmem:[#allocation76_spill] sm:$0xff] }
 0x42a   : > { %3230 = vst [vmem:[#allocation2 + $0x4b8] sm:$0xff] %v15710_v63  ;;  %v10284_v28 = vadd.f32 %v1844_v31, %v15904_v35  ;;  %v10293_v33 = vadd.f32 %v1847_v40, %v15910_v38  ;;  %v15918_v35 = vld [vmem:[#allocation93_spill] sm:$0xff]  ;;  %v15922_v40 = vld [vmem:[#allocation88_spill] sm:$0xff] }
 0x42b   : > { %15882 = vst [vmem:[#allocation30_spill] sm:$0xff] %v10233_v57  ;;  %v1839_v57 = vmul.f32 %v9284_v52, %v15890_v36  ;;  %v15894_v36 = vld [vmem:[#allocation130_spill] sm:$0xff] }
 0x42c   : > { %15886 = vst [vmem:[#allocation73_spill] sm:$0xff] %v10241_v26  ;;  %v1843_v56 = vmul.f32 %v9284_v52, %v15894_v36  ;;  %v1856_v36 = vmul.f32 %v9284_v52, %v15902_v45  ;;  %v15908_v26 = vld [vmem:[#allocation77_spill] sm:$0xff] }
 0x42d   : > { %15887 = vst [vmem:[#allocation79_spill] sm:$0xff] %v10243_v43  ;;  %v10287_v43 = vadd.f32 %v1836_v44, %v15906_v20  ;;  %v10290_v41 = vadd.f32 %v1837_v22, %v15908_v26  ;;  %v10297_v45 = vadd.f32 %v1839_v57, %v15912_v32  ;;  %v10306_v44 = vadd.f32 %v1842_v13, %v15918_v35  ;;  %v15920_v26 = vld [vmem:[#allocation89_spill] sm:$0xff]  ;;  %v15924_v57 = vld [vmem:[#allocation99_spill] sm:$0xff]  ;;  %v15932_v35 = vld [vmem:[#allocation142_spill] sm:$0xff] }
 0x42e   : > { %3231 = vst [vmem:[#allocation2 + $0x4c0] sm:$0x3] %v15710_v63  ;;  %v10310_v22 = vadd.f32 %v1843_v56, %v15920_v26  ;;  %v10313_v20 = vadd.f32 %v1853_v16, %v15922_v40  ;;  %v10316_v38 = vadd.f32 %v1845_v29, %v15924_v57  ;;  %v15930_v13 = vld [vmem:[#allocation105_spill] sm:$0xff]  ;;  %v1849_v56 = vmul.f32 %v9284_v52, %v15932_v35  ;;  %v15933_v26 = vld [vmem:[#allocation86_spill] sm:$0xff]  ;;  %v15935_v40 = vld [vmem:[#allocation148_spill] sm:$0xff] }
 0x42f   : > { %3232 = vst [vmem:[#allocation2 + $0x4c8] sm:$0xff] %v15710_v63  ;;  %v1859_v16 = vmul.f32 %v9284_v52, %v15933_v26  ;;  %v15934_v29 = vld [vmem:[#allocation141_spill] sm:$0xff]  ;;  %v15936_v57 = vld [vmem:[#allocation92_spill] sm:$0xff] }
 0x430   : > { %3233 = vst [vmem:[#allocation2 + $0x4d0] sm:$0xff] %v15710_v63  ;;  %v15938_v35 = vld [vmem:[#allocation97_spill] sm:$0xff] }
 0x431   : > { %3234 = vst [vmem:[#allocation2 + $0x4d8] sm:$0x3] %v15710_v63  ;;  %v1865_v26 = vmul.f32 %v9284_v52, %v15938_v35 }
 0x432   : > { %15899 = vst [vmem:[#allocation38_spill] sm:$0xff] %v10273_v46  ;;  %v15916_v46 = vld [vmem:[#allocation82_spill] sm:$0xff] }
 0x433   : > { %15901 = vst [vmem:[#allocation78_spill] sm:$0xff] %v10276_v24  ;;  %v10300_v24 = vadd.f32 %v1840_v30, %v15914_v9  ;;  %v10303_v31 = vadd.f32 %v1850_v19, %v15916_v46  ;;  %v15926_v30 = vld [vmem:[#allocation98_spill] sm:$0xff]  ;;  %v15928_v46 = vld [vmem:[#allocation96_spill] sm:$0xff]  ;;  %v10326_v9 = vadd.f32 %v1848_v34, %v15930_v13  ;;  %v1862_v34 = vmul.f32 %v9284_v52, %v15936_v57 }
 0x434   : > { %3235 = vst [vmem:[#allocation2 + $0x4e0] sm:$0xff] %v15710_v63  ;;  %v10319_v32 = vadd.f32 %v1846_v42, %v15926_v30  ;;  %v10323_v19 = vadd.f32 %v1856_v36, %v15928_v46  ;;  %v1851_v42 = vmul.f32 %v9284_v52, %v15934_v29  ;;  %v1852_v36 = vmul.f32 %v9284_v52, %v15935_v40  ;;  %v8018_v30 = vld [vmem:[%s8143_s27 + $0x288] sm:$0xff]  ;;  %v15937_v46 = vld [vmem:[#allocation147_spill] sm:$0xff]  ;;  %v10347_v29 = vpop.permute.xlu1 %1754  ;;  %v8021_v57 = vld [vmem:[%s8143_s27 + $0x298] sm:$0xff] }
 0x435   : > { %15905 = vst [vmem:[#allocation85_spill] sm:$0xff] %v10284_v28  ;;  %2375 = vperm.xlu1 %7931, %v8018_v30   ;;  %v1854_v13 = vmul.f32 %v9284_v52, %v15937_v46  ;;  %v10351_v40 = vld [vmem:[#allocation2] sm:$0xff]  ;;  %2383 = vperm.xlu0 %7930, %v8021_v57   ;;  %v15940_v30 = vld [vmem:[#allocation102_spill] sm:$0xff]  ;;  %v15944_v28 = vld [vmem:[#allocation104_spill] sm:$0xff] }
 0x436   : > { %15907 = vst [vmem:[#allocation37_spill] sm:$0xff] %v10287_v43  ;;  %v1868_v46 = vmul.f32 %v9284_v52, %v15940_v30  ;;  %v15948_v57 = vld [vmem:[#allocation167_spill] sm:$0xff]  ;;  %v15954_v43 = vld [vmem:[#allocation109_spill] sm:$0xff] }
 0x437   : > { %15909 = vst [vmem:[#allocation84_spill] sm:$0xff] %v10290_v41  ;;  %v1863_v30 = vmul.f32 %v9284_v52, %v15948_v57 }
 0x438   : > { %15911 = vst [vmem:[#allocation91_spill] sm:$0xff] %v10293_v33  ;;  %v15942_v33 = vld [vmem:[#allocation166_spill] sm:$0xff] }
 0x439   : > { %3236 = vst [vmem:[#allocation2 + $0x4e8] sm:$0xff] %v15710_v63 }
 0x43a   : > { %15913 = vst [vmem:[#allocation43_spill] sm:$0xff] %v10297_v45 }
 0x43b   : > { %15915 = vst [vmem:[#allocation90_spill] sm:$0xff] %v10300_v24 }
 0x43c   : > { %15917 = vst [vmem:[#allocation95_spill] sm:$0xff] %v10303_v31  ;;  %v10349_v31 = vpop.permute.xlu0 %1762 }
 0x43d   : > { %15919 = vst [vmem:[#allocation34_spill] sm:$0xff] %v10306_v44  ;;  %v15949_v44 = vld [vmem:[#allocation169_spill] sm:$0xff] }
 0x43e   : > { %3237 = vst [vmem:[#allocation2 + $0x4f0] sm:$0x3] %v15710_v63 }
 0x43f   : > { %15921 = vst [vmem:[#allocation49_spill] sm:$0xff] %v10310_v22  ;;  %v10366_v22 = vadd.f32 %v1849_v56, %v15944_v28  ;;  %v10383_v28 = vadd.f32 %v1862_v34, %v15954_v43  ;;  %v15956_v56 = vld [vmem:[#allocation107_spill] sm:$0xff]  ;;  %v15965_v43 = vld [vmem:[#allocation121_spill] sm:$0xff] }
 0x440   : > { %15923 = vst [vmem:[#allocation94_spill] sm:$0xff] %v10313_v20  ;;  %v10403_v34 = vadd.f32 %v1868_v46, %v15965_v43  ;;  %v15977_v46 = vld [vmem:[#allocation170_spill] sm:$0xff]  ;;  %v15978_v43 = vld [vmem:[#allocation173_spill] sm:$0xff] }
 0x441   : > { %15925 = vst [vmem:[#allocation100_spill] sm:$0xff] %v10316_v38 }
 0x442   : > { %15927 = vst [vmem:[#allocation45_spill] sm:$0xff] %v10319_v32  ;;  %v15943_v32 = vld [vmem:[#allocation101_spill] sm:$0xff] }
 0x443   : > { %3238 = vst [vmem:[#allocation2 + $0x4f8] sm:$0xff] %v15710_v63  ;;  %v1871_v38 = vmul.f32 %v9284_v52, %v15943_v32  ;;  %v15952_v32 = vld [vmem:[#allocation111_spill] sm:$0xff] }
 0x444   : > { %15929 = vst [vmem:[#allocation41_spill] sm:$0xff] %v10323_v19  ;;  %v15939_v19 = vld [vmem:[#allocation163_spill] sm:$0xff]  ;;  %v10380_v45 = vadd.f32 %v1852_v36, %v15952_v32 }
 0x445   : > { %15931 = vst [vmem:[#allocation40_spill] sm:$0xff] %v10326_v9  ;;  %v1858_v20 = vmul.f32 %v9284_v52, %v15939_v19  ;;  %v15941_v9 = vld [vmem:[#allocation164_spill] sm:$0xff]  ;;  %v1861_v19 = vmul.f32 %v9284_v52, %v15942_v33  ;;  %v15950_v33 = vld [vmem:[#allocation117_spill] sm:$0xff]  ;;  %v15963_v36 = vld [vmem:[#allocation131_spill] sm:$0xff] }
 0x446   : > { %3239 = vst [vmem:[#allocation2 + $0x500] sm:$0xff] %v15710_v63  ;;  %v1860_v35 = vmul.f32 %v9284_v52, %v15941_v9  ;;  %v1864_v9 = vmul.f32 %v9284_v52, %v15949_v44  ;;  %v10377_v41 = vadd.f32 %v1851_v42, %v15950_v33  ;;  %v15959_v44 = vld [vmem:[#allocation160_spill] sm:$0xff]  ;;  %v15961_v42 = vld [vmem:[#allocation115_spill] sm:$0xff] }
 0x447   : > { %3240 = vst [vmem:[#allocation2 + $0x508] sm:$0x3] %v15710_v63  ;;  %v8020_v63 = vld [vmem:[%s8143_s27 + $0x380] sm:$0xff]  ;;  %v10396_v33 = vadd.f32 %v1865_v26, %v15961_v42  ;;  %v10399_v32 = vadd.f32 %v1858_v20, %v15963_v36  ;;  %v15973_v26 = vld [vmem:[#allocation145_spill] sm:$0xff]  ;;  %v15975_v42 = vld [vmem:[#allocation144_spill] sm:$0xff] }
 0x448   : > { %3241 = vst [vmem:[#allocation2 + $0x510] sm:$0xff] %v10351_v40  ;;  %2499 = vperm.xlu2 %7929, %v8020_v63   ;;  %v15946_v63 = vld [vmem:[#allocation103_spill] sm:$0xff]  ;;  %v10416_v20 = vadd.f32 %v1863_v30, %v15973_v26  ;;  %v10419_v36 = vadd.f32 %v1864_v9, %v15975_v42  ;;  %v15982_v30 = vld [vmem:[#allocation174_spill] sm:$0xff]  ;;  %v8022_v9 = vld [vmem:[%s8143_s27 + $0x188] sm:$0xff] }
 0x449   : > { %3242 = vst [vmem:[#allocation2 + $0x518] sm:$0xff] %v10351_v40  ;;  %v10369_v24 = vadd.f32 %v1859_v16, %v15946_v63  ;;  %v1874_v16 = vmul.f32 %v9284_v52, %v15956_v56  ;;  %v15957_v63 = vld [vmem:[#allocation126_spill] sm:$0xff]  ;;  %v15967_v56 = vld [vmem:[#allocation139_spill] sm:$0xff]  ;;  %v1869_v26 = vmul.f32 %v9284_v52, %v15982_v30  ;;  %2247 = vperm.xlu1 %7931, %v8022_v9   ;;  %v15983_v42 = vld [vmem:[#allocation177_spill] sm:$0xff] }
 0x44a   : > { %15945 = vst [vmem:[#allocation48_spill] sm:$0xff] %v10366_v22  ;;  %v10389_v57 = vadd.f32 %v1854_v13, %v15957_v63  ;;  %v10393_v22 = vmul.f32 %v9284_v52, %v15959_v44  ;;  %v15969_v13 = vld [vmem:[#allocation137_spill] sm:$0xff]  ;;  %v15971_v44 = vld [vmem:[#allocation127_spill] sm:$0xff]  ;;  %v15986_v30 = vld [vmem:[#allocation8_spill] sm:$0xff] }
 0x44b   : > { %15947 = vst [vmem:[#allocation51_spill] sm:$0xff] %v10369_v24  ;;  %v10409_v63 = vadd.f32 %v1861_v19, %v15969_v13  ;;  %v1867_v19 = vmul.f32 %v9284_v52, %v15978_v43  ;;  %v15981_v13 = vld [vmem:[#allocation113_spill] sm:$0xff] }
 0x44c   : > { %3243 = vst [vmem:[#allocation2 + $0x520] sm:$0x3] %v10351_v40 }
 0x44d   : > { %15951 = vst [vmem:[#allocation47_spill] sm:$0xff] %v10377_v41  ;;  %v15985_v41 = vld [vmem:[#allocation178_spill] sm:$0xff] }
 0x44e   : > { %15953 = vst [vmem:[#allocation46_spill] sm:$0xff] %v10380_v45  ;;  %v10406_v45 = vadd.f32 %v1860_v35, %v15967_v56  ;;  %v1866_v35 = vmul.f32 %v9284_v52, %v15977_v46  ;;  %v1870_v46 = vmul.f32 %v9284_v52, %v15983_v42 }
 0x44f   : > { %15955 = vst [vmem:[#allocation57_spill] sm:$0xff] %v10383_v28  ;;  %v10466_v28 = vpop.permute.xlu0 %1774 }
 0x450   : > { %3244 = vst [vmem:[#allocation2 + $0x528] sm:$0xff] %v10351_v40 }
 0x451   : > { %15958 = vst [vmem:[#allocation53_spill] sm:$0xff] %v10389_v57  ;;  %v15984_v57 = vld [vmem:[#allocation119_spill] sm:$0xff] }
 0x452   : > { %15960 = vst [vmem:[#allocation52_spill] sm:$0xff] %v10393_v22  ;;  %v10412_v22 = vadd.f32 %v1871_v38, %v15971_v44  ;;  %v15979_v38 = vld [vmem:[#allocation133_spill] sm:$0xff]  ;;  %v1877_v44 = vmul.f32 %v9284_v52, %v15981_v13  ;;  %v1880_v43 = vmul.f32 %v9284_v52, %v15984_v57 }
 0x453   : > { %15962 = vst [vmem:[#allocation63_spill] sm:$0xff] %v10396_v33  ;;  %v10427_v56 = vadd.f32 %v1874_v16, %v15979_v38  ;;  %v1872_v16 = vmul.f32 %v9284_v52, %v15985_v41  ;;  %v8023_v38 = vld [vmem:[%s8143_s27 + $0x290] sm:$0xff]  ;;  %v10454_v41 = vadd.f32 %v1866_v35, %v9771_v47  ;;  %v15996_v47 = vld [vmem:[#allocation184_spill] sm:$0xff] }
 0x454   : > { %15964 = vst [vmem:[#allocation59_spill] sm:$0xff] %v10399_v32  ;;  %2379 = vperm.xlu2 %7929, %v8023_v38   ;;  %v8024_v13 = vld [vmem:[%s8143_s27 + $0x190] sm:$0xff]  ;;  %v10457_v38 = vadd.f32 %v1867_v19, %v9766_v58  ;;  %v1879_v35 = vmul.f32 %v9284_v52, %v15996_v47  ;;  %v15997_v58 = vld [vmem:[#allocation128_spill] sm:$0xff] }
 0x455   : > { %3245 = vst [vmem:[#allocation2 + $0x530] sm:$0xff] %v10351_v40  ;;  %2251 = vperm.xlu0 %7930, %v8024_v13   ;;  %v15992_v13 = vld [vmem:[#allocation122_spill] sm:$0xff]  ;;  %v1889_v19 = vmul.f32 %v9284_v52, %v15997_v58  ;;  %v10490_v47 = vadd.f32 %v1872_v16, %v9796_v59 }
 0x456   : > { %15966 = vst [vmem:[#allocation58_spill] sm:$0xff] %v10403_v34  ;;  %v15987_v34 = vld [vmem:[#allocation123_spill] sm:$0xff] }
 0x457   : > { %15968 = vst [vmem:[#allocation69_spill] sm:$0xff] %v10406_v45  ;;  %v1883_v9 = vmul.f32 %v9284_v52, %v15987_v34 }
 0x458   : > { %15970 = vst [vmem:[#allocation65_spill] sm:$0xff] %v10409_v63  ;;  %v10484_v63 = vadd.f32 %v1870_v46, %v9779_v60  ;;  %v10521_v46 = vadd.f32 %v1889_v19, %v9813_v50  ;;  %v8026_v50 = vld [vmem:[%s8143_s27 + $0x398] sm:$0xff] }
 0x459   : > { %15972 = vst [vmem:[#allocation108_spill] sm:$0xff] %v10412_v22  ;;  %v15988_v22 = vld [vmem:[#allocation181_spill] sm:$0xff]  ;;  %v10497_v58 = vadd.f32 %v1883_v9, %v9788_v54  ;;  %v16016_v9 = vld [vmem:[#allocation188_spill] sm:$0xff] }
 0x45a   : > { %3246 = vst [vmem:[#allocation2 + $0x538] sm:$0x3] %v10351_v40  ;;  %v1875_v42 = vmul.f32 %v9284_v52, %v15988_v22  ;;  %v10464_v22 = vpop.permute.xlu1 %1766 }
 0x45b   : > { %15974 = vst [vmem:[#allocation64_spill] sm:$0xff] %v10416_v20  ;;  %v15993_v20 = vld [vmem:[#allocation183_spill] sm:$0xff] }
 0x45c   : > { %15976 = vst [vmem:[#allocation106_spill] sm:$0xff] %v10419_v36  ;;  %v15989_v36 = vld [vmem:[#allocation182_spill] sm:$0xff]  ;;  %v1878_v34 = vmul.f32 %v9284_v52, %v15993_v20  ;;  %v10478_v20 = vpop.permute.xlu2 %2063  ;;  %2511 = vperm.xlu2 %7929, %v8026_v50   ;;  %v16025_v50 = vld [vmem:[#allocation153_spill] sm:$0xff] }
 0x45d   : > { %3247 = vst [vmem:[#allocation2 + $0x540] sm:$0xff] %v10351_v40  ;;  %v1876_v57 = vmul.f32 %v9284_v52, %v15989_v36  ;;  %v15994_v36 = vld [vmem:[#allocation138_spill] sm:$0xff] }
 0x45e   : > { %15980 = vst [vmem:[#allocation54_spill] sm:$0xff] %v10427_v56  ;;  %v1873_v56 = vmul.f32 %v9284_v52, %v15986_v30  ;;  %v1886_v30 = vmul.f32 %v9284_v52, %v15992_v13  ;;  %v10469_v33 = vadd.f32 %v1877_v44, %v15994_v36  ;;  %v16001_v44 = vld [vmem:[#allocation150_spill] sm:$0xff] }
 0x45f   : > { %3248 = vst [vmem:[#allocation2 + $0x548] sm:$0xff] %v10351_v40  ;;  %v10487_v36 = vadd.f32 %v1880_v43, %v16001_v44  ;;  %v10503_v60 = vadd.f32 %v1876_v57, %v9805_v37  ;;  %v10518_v37 = vadd.f32 %v1879_v35, %v9817_v61  ;;  %v16015_v43 = vld [vmem:[#allocation187_spill] sm:$0xff]  ;;  %v16017_v57 = vld [vmem:[#allocation140_spill] sm:$0xff]  ;;  %v16019_v35 = vld [vmem:[#allocation190_spill] sm:$0xff] }
 0x460   : > { %3249 = vst [vmem:[#allocation2 + $0x550] sm:$0x3] %v10351_v40  ;;  %v10507_v59 = vadd.f32 %v1886_v30, %v9800_v0  ;;  %v1884_v16 = vmul.f32 %v9284_v52, %v16015_v43  ;;  %v1895_v61 = vmul.f32 %v9284_v52, %v16017_v57  ;;  %v8027_v30 = vld [vmem:[%s8143_s27 + $0x2a8] sm:$0xff]  ;;  %v1888_v19 = vmul.f32 %v9284_v52, %v16019_v35 }
 0x461   : > { %3250 = vst [vmem:[#allocation2 + $0x558] sm:$0xff] %v10351_v40  ;;  %2391 = vperm.xlu0 %7930, %v8027_v30   ;;  %v1901_v30 = vmul.f32 %v9284_v52, %v16025_v50 }
 0x462   : > { %15990 = vst [vmem:[#allocation114_spill] sm:$0xff] %v10454_v41  ;;  %v10481_v41 = vadd.f32 %v1869_v26, %v9783_v48  ;;  %v10500_v48 = vadd.f32 %v1875_v42, %v9809_v25  ;;  %v10510_v26 = vadd.f32 %v1878_v34, %v9822_v53  ;;  %v8025_v53 = vld [vmem:[%s8143_s27 + $0x390] sm:$0xff]  ;;  %v1885_v42 = vmul.f32 %v9284_v52, %v16016_v9  ;;  %v16024_v9 = vld [vmem:[#allocation192_spill] sm:$0xff] }
 0x463   : > { %15991 = vst [vmem:[#allocation112_spill] sm:$0xff] %v10457_v38  ;;  %v15998_v38 = vld [vmem:[#allocation185_spill] sm:$0xff]  ;;  %2507 = vperm.xlu1 %7931, %v8025_v53   ;;  %v1891_v57 = vmul.f32 %v9284_v52, %v16024_v9  ;;  %v16031_v9 = vld [vmem:[#allocation143_spill] sm:$0xff] }
 0x464   : > { %3251 = vst [vmem:[#allocation2 + $0x560] sm:$0xff] %v10351_v40  ;;  %v1881_v13 = vmul.f32 %v9284_v52, %v15998_v38  ;;  %v10494_v38 = vadd.f32 %v1873_v56, %v9792_v62  ;;  %v16010_v62 = vld [vmem:[#allocation186_spill] sm:$0xff]  ;;  %v10570_v50 = vadd.f32 %v1885_v42, %v16031_v9  ;;  %v10595_v42 = vpop.permute.xlu2 %2071  ;;  %v8030_v9 = vld [vmem:[%s8143_s27 + $0x1a0] sm:$0xff] }
 0x465   : > { %15995 = vst [vmem:[#allocation60_spill] sm:$0xff] %v10469_v33  ;;  %v1882_v54 = vmul.f32 %v9284_v52, %v16010_v62  ;;  %v16011_v56 = vld [vmem:[#allocation134_spill] sm:$0xff]  ;;  %v16021_v62 = vld [vmem:[#allocation191_spill] sm:$0xff] }
 0x466   : > { %3252 = vst [vmem:[#allocation2 + $0x568] sm:$0x3] %v10351_v40  ;;  %v1892_v25 = vmul.f32 %v9284_v52, %v16011_v56  ;;  %v10524_v0 = vadd.f32 %v1881_v13, %v9834_v51  ;;  %v16018_v51 = vld [vmem:[#allocation189_spill] sm:$0xff]  ;;  %v16020_v13 = vld [vmem:[#allocation146_spill] sm:$0xff]  ;;  %v1890_v56 = vmul.f32 %v9284_v52, %v16021_v62 }
 0x467   : > { %15999 = vst [vmem:[#allocation120_spill] sm:$0xff] %v10481_v41  ;;  %v1887_v34 = vmul.f32 %v9284_v52, %v16018_v51  ;;  %v1898_v44 = vmul.f32 %v9284_v52, %v16020_v13  ;;  %v10547_v53 = vadd.f32 %v1882_v54, %v9830_v2  ;;  %v16026_v51 = vld [vmem:[#allocation193_spill] sm:$0xff] }
 0x468   : > { %16000 = vst [vmem:[#allocation118_spill] sm:$0xff] %v10484_v63  ;;  %v10550_v43 = vadd.f32 %v1892_v25, %v9826_v49  ;;  %v1893_v35 = vmul.f32 %v9284_v52, %v16026_v51  ;;  %v16027_v13 = vld [vmem:[#allocation29_spill] sm:$0xff]  ;;  %v10567_v25 = vadd.f32 %v1884_v16, %v9847_v1  ;;  %v16035_v51 = vld [vmem:[#allocation110_spill] sm:$0xff]  ;;  %v10586_v1 = vadd.f32 %v1888_v19, %v9857_v3 }
 0x469   : > { %16002 = vst [vmem:[#allocation66_spill] sm:$0xff] %v10487_v36  ;;  %v1894_v62 = vmul.f32 %v9284_v52, %v16027_v13  ;;  %v16029_v54 = vld [vmem:[#allocation33_spill] sm:$0xff]  ;;  %v1897_v13 = vmul.f32 %v9284_v52, %v16035_v51  ;;  %v10589_v16 = vadd.f32 %v1898_v44, %v9853_v8  ;;  %v16044_v8 = vld [vmem:[#allocation116_spill] sm:$0xff]  ;;  %2259 = vperm.xlu0 %7930, %v8030_v9  }
 0x46a   : > { %16003 = vst [vmem:[#allocation125_spill] sm:$0xff] %v10490_v47  ;;  %v1896_v49 = vmul.f32 %v9284_v52, %v16029_v54  ;;  %v10583_v54 = vadd.f32 %v1887_v34, %v9861_v11  ;;  %v10601_v11 = vadd.f32 %v1901_v30, %v9872_v5  ;;  %v16043_v3 = vld [vmem:[#allocation165_spill] sm:$0xff]  ;;  %v1899_v19 = vmul.f32 %v9284_v52, %v16044_v8 }
 0x46b   : > { %3253 = vst [vmem:[#allocation2 + $0x570] sm:$0xff] %v10351_v40  ;;  %v1907_v34 = vmul.f32 %v9284_v52, %v16043_v3  ;;  %v10612_v44 = vadd.f32 %v1894_v62, %v9889_v55  ;;  %v8028_v55 = vld [vmem:[%s8143_s27 + $0x198] sm:$0xff]  ;;  %v1903_v62 = vmul.f32 %v9284_v52, %v10014_v39  ;;  %v1906_v8 = vmul.f32 %v9284_v52, %v10130_v23 }
 0x46c   : > { %16004 = vst [vmem:[#allocation130_spill] sm:$0xff] %v10494_v38  ;;  %v10618_v5 = vadd.f32 %v1896_v49, %v9906_v7  ;;  %2255 = vperm.xlu1 %7931, %v8028_v55   ;;  %v16051_v7 = vld [vmem:[#allocation154_spill] sm:$0xff]  ;;  %v3424_v49 = vld [vmem:[%s14846_s3] sm:$0x7]  ;;  %v10649_v39 = vadd.f32 %v1899_v19, %v9918_v10  ;;  %v16058_v19 = vld [vmem:[#allocation9_spill] sm:$0xff] }
 0x46d   : > { %16005 = vst [vmem:[#allocation72_spill] sm:$0xff] %v10497_v58  ;;  %v10646_v51 = vadd.f32 %v1907_v34, %v9897_v17  ;;  %v10654_v3 = vperm.slane %v3424_v49, 0  ;;  %v16056_v17 = vld [vmem:[#allocation180_spill] sm:$0xff]  ;;  %v10674_v9 = vperm.slane %v3424_v49, 1 }
 0x46e   : > { %16006 = vst [vmem:[#allocation129_spill] sm:$0xff] %v10500_v48  ;;  %v2566_v34 = vmul.f32 %v16056_v17, %v10478_v20  ;;  %v3812_v10 = vld [vmem:[#allocation2 + $0x1] sm:$0xff]  ;;  %v16060_v20 = vld [vmem:[#allocation149_spill] sm:$0xff] }
 0x46f   : > { %16007 = vst [vmem:[#allocation136_spill] sm:$0xff] %v10503_v60  ;;  %v16084_v48 = vld [vmem:[#allocation157_spill] sm:$0xff] }
 0x470   : > { %3254 = vst [vmem:[#allocation2 + $0x578] sm:$0xff] %v10351_v40 }
 0x471   : > { %16008 = vst [vmem:[#allocation75_spill] sm:$0xff] %v10507_v59  ;;  %v16033_v59 = vld [vmem:[#allocation151_spill] sm:$0xff] }
 0x472   : > { %16009 = vst [vmem:[#allocation71_spill] sm:$0xff] %v10510_v26  ;;  %v10573_v58 = vadd.f32 %v1895_v61, %v16033_v59  ;;  %v10592_v59 = vadd.f32 %v1890_v56, %v9880_v15  ;;  %v10598_v61 = vadd.f32 %v1891_v57, %v9876_v14  ;;  %v10609_v15 = vadd.f32 %v1893_v35, %v9893_v4  ;;  %v16050_v4 = vld [vmem:[#allocation168_spill] sm:$0xff] }
 0x473   : > { %3255 = vst [vmem:[#allocation2 + $0x580] sm:$0x3] %v10351_v40  ;;  %v10622_v56 = vadd.f32 %v1897_v13, %v9901_v18  ;;  %v1900_v57 = vmul.f32 %v9284_v52, %v9863_v6  ;;  %v1910_v30 = vmul.f32 %v9284_v52, %v16050_v4  ;;  %v1902_v35 = vmul.f32 %v9284_v52, %v16051_v7  ;;  %v16052_v18 = vld [vmem:[#allocation171_spill] sm:$0xff]  ;;  %v7885_v6 = vld [vmem:[%s14847_s4 + $0x38] sm:$0xff]  ;;  %v16055_v4 = vld [vmem:[#allocation172_spill] sm:$0xff] }
 0x474   : > { %16012 = vst [vmem:[#allocation80_spill] sm:$0xff] %v10518_v37  ;;  %v1905_v13 = vmul.f32 %v9284_v52, %v10016_v27  ;;  %v1916_v55 = vmul.f32 %v9284_v52, %v16055_v4  ;;  %7153 = vmatpush.bf16.msra.mxu0 %v7885_v6  ;;  %7886 = vmatpush.bf16.msra.mxu1 %v7885_v6 }
 0x475   : > { %16013 = vst [vmem:[#allocation135_spill] sm:$0xff] %v10521_v46  ;;  %v16028_v46 = vld [vmem:[#allocation162_spill] sm:$0xff]  ;;  %v10664_v27 = vadd.f32 %v1900_v57, %v9914_v21  ;;  %7887 = vmatpush.bf16.msra.mxu2 %v7885_v6  ;;  %7888 = vmatpush.bf16.msra.mxu3 %v7885_v6  ;;  %v10677_v4 = vadd.f32 %v1910_v30, %v16060_v20  ;;  %v16062_v21 = vld [vmem:[#allocation195_spill] sm:$0xff]  ;;  %v16072_v6 = vld [vmem:[#allocation196_spill] sm:$0xff] }
 0x476   : > { %16014 = vst [vmem:[#allocation70_spill] sm:$0xff] %v10524_v0  ;;  %v1904_v2 = vmul.f32 %v9284_v52, %v16028_v46  ;;  %v10578_v46 = vpop.permute.xlu1 %1778  ;;  %v10580_v0 = vpop.permute.xlu0 %1786  ;;  %v10680_v57 = vadd.f32 %v1902_v35, %v16062_v21  ;;  %v10697_v30 = vmul.f32 %v10351_v40, %v10654_v3  ;;  %v3941_v35 = vmul.f32 %v10674_v9, %v3812_v10  ;;  %v7883_v21 = vld [vmem:[%s14847_s4 + $0x28] sm:$0xff] }
 0x477   : > { %3256 = vst [vmem:[#allocation2 + $0x588] sm:$0xff] %v10351_v40  ;;  %v10706_v20 = vadd.f32 %v1916_v55, %v16072_v6  ;;  %v4197_v10 = vld [vmem:[#allocation2 + $0x2] sm:$0xff] }
 0x478   : > { %3257 = vst [vmem:[#allocation2 + $0x590] sm:$0xff] %v10351_v40  ;;  %v10615_v14 = vadd.f32 %v1904_v2, %v9884_v12  ;;  %v8029_v12 = vld [vmem:[%s8143_s27 + $0x2a0] sm:$0xff]  ;;  %v1913_v2 = vmul.f32 %v9284_v52, %v16052_v18  ;;  %v7884_v18 = vld [vmem:[%s14847_s4 + $0x30] sm:$0xff] }
 0x479   : > { %3258 = vst [vmem:[#allocation2 + $0x598] sm:$0x3] %v10351_v40  ;;  %2387 = vperm.xlu2 %7929, %v8029_v12   ;;  %v1908_v12 = vmul.f32 %v9284_v52, %v16058_v19  ;;  %v16064_v19 = vld [vmem:[#allocation194_spill] sm:$0xff]  ;;  %7154 = vmatpush.bf16.msra.mxu0 %v7884_v18  ;;  %v16078_v55 = vld [vmem:[#allocation175_spill] sm:$0xff] }
 0x47a   : > { %16022 = vst [vmem:[#allocation81_spill] sm:$0xff] %v10547_v53  ;;  %7889 = vmatpush.bf16.msra.mxu1 %v7884_v18  ;;  %v1919_v6 = vmul.f32 %v9284_v52, %v16078_v55  ;;  %7890 = vmatpush.bf16.msra.mxu2 %v7884_v18  ;;  %v1914_v55 = vmul.f32 %v9284_v52, %v10349_v31  ;;  %v10752_v31 = vld [vmem:[%s14845_s2] ss:$0 sm:$0xff] }
 0x47b   : > { %16023 = vst [vmem:[#allocation77_spill] sm:$0xff] %v10550_v43  ;;  %7891 = vmatpush.bf16.msra.mxu3 %v7884_v18  ;;  %v7882_v18 = vld [vmem:[%s14847_s4 + $0x20] sm:$0xff] }
 0x47c   : > { %3259 = vst [vmem:[#allocation2 + $0x5a0] sm:$0xff] %v10351_v40 }
 0x47d   : > { %3260 = vst [vmem:[#allocation2 + $0x5a8] sm:$0xff] %v10351_v40  ;;  %7155 = vmatpush.bf16.msra.mxu0 %v7883_v21 }
 0x47e   : > { %16030 = vst [vmem:[#allocation76_spill] sm:$0xff] %v10567_v25  ;;  %v10669_v23 = vpop.permute.xlu1 %1790  ;;  %v2056_v7 = vpop.permute.xlu0 %2055  ;;  %v16068_v25 = vld [vmem:[#allocation198_spill] sm:$0xff]  ;;  %7892 = vmatpush.bf16.msra.mxu1 %v7883_v21  ;;  %7893 = vmatpush.bf16.msra.mxu2 %v7883_v21 }
 0x47f   : > { %16032 = vst [vmem:[#allocation87_spill] sm:$0xff] %v10570_v50  ;;  %v10689_v50 = vpop.permute.xlu2 %2083  ;;  %v10692_v53 = vadd.f32 %v1905_v13, %v16068_v25  ;;  %v16074_v25 = vld [vmem:[#allocation202_spill] sm:$0xff]  ;;  %7894 = vmatpush.bf16.msra.mxu3 %v7883_v21 }
 0x480   : > { %16034 = vst [vmem:[#allocation83_spill] sm:$0xff] %v10573_v58  ;;  %v2694_v13 = vadd.f32 %v2566_v34, %v16074_v25  ;;  %v8031_v34 = vld [vmem:[%s8143_s27 + $0x3a0] sm:$0xff]  ;;  %v8032_v25 = vld [vmem:[%s8143_s27 + $0x3a8] sm:$0xff] }
 0x481   : > { %3261 = vst [vmem:[#allocation2 + $0x5b0] sm:$0x3] %v10351_v40  ;;  %2515 = vperm.xlu1 %7931, %v8031_v34   ;;  %2519 = vperm.xlu2 %7929, %v8032_v25   ;;  %v1917_v25 = vmul.f32 %v9284_v52, %v10466_v28  ;;  %v2564_v28 = vmul.f32 %v16056_v17, %v2056_v7 }
 0x482   : > { %16036 = vst [vmem:[#allocation82_spill] sm:$0xff] %v10580_v0  ;;  %v10683_v0 = vadd.f32 %v1903_v62, %v16064_v19  ;;  %v10700_v62 = vperm.slane %v3424_v49, 2  ;;  %v16075_v49 = vld [vmem:[#allocation201_spill] sm:$0xff]  ;;  %7156 = vmatpush.bf16.msra.mxu0 %v7882_v18  ;;  %7895 = vmatpush.bf16.msra.mxu1 %v7882_v18 }
 0x483   : > { %16037 = vst [vmem:[#allocation93_spill] sm:$0xff] %v10583_v54  ;;  %v16066_v54 = vld [vmem:[#allocation152_spill] sm:$0xff]  ;;  %v10714_v19 = vadd.f32 %v1908_v12, %v16075_v49  ;;  %v2568_v12 = vmul.f32 %v16056_v17, %v10595_v42  ;;  %v10733_v49 = vld [vmem:[%s14846_s3 + $0x4] sm:$0x7]  ;;  %v1915_v42 = vmul.f32 %v9284_v52, %v10464_v22  ;;  %7896 = vmatpush.bf16.msra.mxu2 %v7882_v18 }
 0x484   : > { %16038 = vst [vmem:[#allocation89_spill] sm:$0xff] %v10586_v1  ;;  %v10686_v1 = vadd.f32 %v1913_v2, %v16066_v54  ;;  %v16070_v54 = vld [vmem:[#allocation197_spill] sm:$0xff]  ;;  %v10742_v34 = vperm.slane %v10733_v49, 0  ;;  %v16082_v22 = vld [vmem:[#allocation199_spill] sm:$0xff]  ;;  %v10772_v26 = vperm.slane %v10733_v49, 1  ;;  %7897 = vmatpush.bf16.msra.mxu3 %v7882_v18 }
 0x485   : > { %16039 = vst [vmem:[#allocation88_spill] sm:$0xff] %v10589_v16  ;;  %v10703_v2 = vadd.f32 %v1906_v8, %v16070_v54  ;;  %v16077_v8 = vld [vmem:[#allocation73_spill] sm:$0xff]  ;;  %v10762_v36 = vadd.f32 %v1919_v6, %v16082_v22  ;;  %v16088_v22 = vld [vmem:[#allocation203_spill] sm:$0xff] }
 0x486   : > { %16040 = vst [vmem:[#allocation99_spill] sm:$0xff] %v10592_v59  ;;  %v1909_v54 = vmul.f32 %v9284_v52, %v16077_v8  ;;  %v8033_v8 = vld [vmem:[%s8143_s27 + $0x2b8] sm:$0xff]  ;;  %v2076_v33 = vpop.permute.xlu0 %2075  ;;  %v2696_v7 = vadd.f32 %v2568_v12, %v16088_v22  ;;  %v8037_v22 = vld [vmem:[%s8143_s27 + $0x2b0] sm:$0xff]  ;;  %v8046_v59 = vld [vmem:[%s8143_s27 + $0x3c8] sm:$0xff] }
 0x487   : > { %3262 = vst [vmem:[#allocation2 + $0x5b8] sm:$0xff] %v10351_v40  ;;  %2399 = vperm.xlu0 %7930, %v8033_v8   ;;  %v16080_v8 = vld [vmem:[#allocation200_spill] sm:$0xff] }
 0x488   : > { %16041 = vst [vmem:[#allocation98_spill] sm:$0xff] %v10598_v61  ;;  %v10759_v37 = vadd.f32 %v1909_v54, %v16080_v8  ;;  %v16086_v8 = vld [vmem:[#allocation156_spill] sm:$0xff] }
 0x489   : > { %16042 = vst [vmem:[#allocation96_spill] sm:$0xff] %v10601_v11  ;;  %2395 = vperm.xlu2 %7929, %v8037_v22   ;;  %v16099_v22 = vld [vmem:[#allocation205_spill] sm:$0xff] }
 0x48a   : > { %3263 = vst [vmem:[#allocation2 + $0x5c0] sm:$0xff] %v10351_v40 }
 0x48b   : > { %16045 = vst [vmem:[#allocation105_spill] sm:$0xff] %v10609_v15 }
 0x48c   : > { %16046 = vst [vmem:[#allocation142_spill] sm:$0xff] %v10612_v44 }
 0x48d   : > { %16047 = vst [vmem:[#allocation86_spill] sm:$0xff] %v10615_v14 }
 0x48e   : > { %16048 = vst [vmem:[#allocation141_spill] sm:$0xff] %v10618_v5  ;;  %v2088_v18 = vpop.permute.xlu0 %2087  ;;  %v16114_v5 = vld [vmem:[#allocation20_spill] sm:$0xff] }
 0x48f   : > { %3264 = vst [vmem:[#allocation2 + $0x5c8] sm:$0x3] %v10351_v40 }
 0x490   : > { %16049 = vst [vmem:[#allocation148_spill] sm:$0xff] %v10622_v56 }
 0x491   : > { %3265 = vst [vmem:[#allocation2 + $0x5d0] sm:$0xff] %v10351_v40 }
 0x492   : > { %3266 = vst [vmem:[#allocation2 + $0x5d8] sm:$0xff] %v10351_v40 }
 0x493   : > { %16053 = vst [vmem:[#allocation92_spill] sm:$0xff] %v10646_v51  ;;  %v16089_v51 = vld [vmem:[#allocation159_spill] sm:$0xff] }
 0x494   : > { %16054 = vst [vmem:[#allocation147_spill] sm:$0xff] %v10649_v39 }
 0x495   : > { %3267 = vst [vmem:[#allocation2 + $0x5e0] sm:$0x3] %v10351_v40 }
 0x496   : > { %3268 = vst [vmem:[#allocation2 + $0x5e8] sm:$0xff] %v10351_v40 }
 0x497   : > { %16057 = vst [vmem:[#allocation97_spill] sm:$0xff] %v10664_v27 }
 0x498   : > { %3269 = vst [vmem:[#allocation2 + $0x5f0] sm:$0xff] %v10351_v40 }
 0x499   : > { %16059 = vst [vmem:[#allocation163_spill] sm:$0xff] %v10674_v9 }
 0x49a   : > { %16061 = vst [vmem:[#allocation102_spill] sm:$0xff] %v10677_v4 }
 0x49b   : > { %16063 = vst [vmem:[#allocation164_spill] sm:$0xff] %v10680_v57 }
 0x49c   : > { %16065 = vst [vmem:[#allocation166_spill] sm:$0xff] %v10683_v0 }
 0x49d   : > { %16067 = vst [vmem:[#allocation101_spill] sm:$0xff] %v10686_v1  ;;  %v1912_v1 = vmul.f32 %v9284_v52, %v10347_v29  ;;  %v4069_v29 = vadd.f32 %v3941_v35, %v10697_v30  ;;  %v2826_v35 = vadd.f32 %v10752_v31, %v2694_v13  ;;  %v10769_v13 = vld [vmem:[%s14846_s3 + $0x8] sm:$0x7] }
 0x49e   : > { %3270 = vst [vmem:[#allocation2 + $0x5f8] sm:$0x3] %v10351_v40  ;;  %v10802_v21 = vperm.slane %v10769_v13, 1 }
 0x49f   : > { %16069 = vst [vmem:[#allocation104_spill] sm:$0xff] %v10692_v53  ;;  %v10778_v6 = vadd.f32 %v1912_v1, %v16086_v8  ;;  %v10794_v8 = vmax.f32 %v2826_v35, 0.0  ;;  %v8036_v35 = vld [vmem:[%s8143_s27 + $0x1a8] sm:$0xff]  ;;  %v16108_v53 = vld [vmem:[#allocation50_spill] sm:$0xff] }
 0x4a0   : > { %3271 = vst [vmem:[#allocation2 + $0x600] sm:$0xff] %v10351_v40  ;;  %2263 = vperm.xlu1 %7931, %v8036_v35  }
 0x4a1   : > { %16071 = vst [vmem:[#allocation103_spill] sm:$0xff] %v10703_v2 }
 0x4a2   : > { %16073 = vst [vmem:[#allocation167_spill] sm:$0xff] %v10706_v20  ;;  %v16079_v20 = vld [vmem:[#allocation79_spill] sm:$0xff] }
 0x4a3   : > { %3272 = vst [vmem:[#allocation2 + $0x608] sm:$0xff] %v10351_v40  ;;  %v1911_v4 = vmul.f32 %v9284_v52, %v16079_v20  ;;  %v4326_v20 = vmul.f32 %v10700_v62, %v4197_v10  ;;  %v4582_v10 = vld [vmem:[#allocation2 + $0x18] sm:$0xff] }
 0x4a4   : > { %16076 = vst [vmem:[#allocation169_spill] sm:$0xff] %v10714_v19  ;;  %v2060_v19 = vpop.permute.xlu1 %2059  ;;  %v4711_v60 = vmul.f32 %v10742_v34, %v4582_v10 }
 0x4a5   : > { %3273 = vst [vmem:[#allocation2 + $0x610] sm:$0x3] %v10351_v40  ;;  %v10775_v54 = vadd.f32 %v1911_v4, %v16084_v48  ;;  %v4454_v14 = vadd.f32 %v4326_v20, %v4069_v29  ;;  %v16091_v48 = vld [vmem:[#allocation158_spill] sm:$0xff] }
 0x4a6   : > { %3274 = vst [vmem:[#allocation2 + $0x618] sm:$0xff] %v10351_v40  ;;  %v10789_v1 = vadd.f32 %v1915_v42, %v16091_v48  ;;  %v16093_v4 = vld [vmem:[#allocation26_spill] sm:$0xff]  ;;  %v2828_v48 = vadd.f32 %v10752_v31, %v2696_v7  ;;  %v10822_v7 = vmul.f32 %v9284_v52, %v10578_v46 }
 0x4a7   : > { %3275 = vst [vmem:[#allocation2 + $0x620] sm:$0xff] %v10351_v40  ;;  %v10792_v12 = vadd.f32 %v1917_v25, %v16093_v4  ;;  %v16096_v29 = vld [vmem:[#allocation6_spill] sm:$0xff]  ;;  %v2565_v4 = vmul.f32 %v16056_v17, %v2060_v19 }
 0x4a8   : > { %3276 = vst [vmem:[#allocation2 + $0x628] sm:$0x3] %v10351_v40  ;;  %v2692_v20 = vadd.f32 %v2564_v28, %v16096_v29  ;;  %v8035_v42 = vld [vmem:[#allocation2 + $0x19] sm:$0xff]  ;;  %v4839_v28 = vadd.f32 %v4711_v60, %v4454_v14  ;;  %v16098_v60 = vld [vmem:[#allocation204_spill] sm:$0xff]  ;;  %v10848_v35 = vmax.f32 %v2828_v48, 0.0  ;;  %v2572_v48 = vmul.f32 %v16056_v17, %v2088_v18 }
 0x4a9   : > { %16081 = vst [vmem:[#allocation117_spill] sm:$0xff] %v10759_v37  ;;  %v10783_v37 = vadd.f32 %v1914_v55, %v16089_v51  ;;  %v10799_v51 = vld [vmem:[%s14847_s4 + $0x18] sm:$0xff]  ;;  %v2571_v55 = vmul.f32 %v16056_v17, %v10689_v50  ;;  %v5096_v25 = vmul.f32 %v8035_v42, %v10772_v26  ;;  %v2569_v50 = vmul.f32 %v16056_v17, %v2076_v33 }
 0x4aa   : > { %16083 = vst [vmem:[#allocation111_spill] sm:$0xff] %v10762_v36  ;;  %v2096_v36 = vpop.permute.xlu2 %2095  ;;  %v3943_v29 = vmul.f32 %v8035_v42, %v10674_v9  ;;  %7157 = vmatpush.bf16.msra.mxu0 %v10799_v51  ;;  %v10833_v33 = vmul.f32 %v10802_v21, %v10794_v8  ;;  %7898 = vmatpush.bf16.msra.mxu1 %v10799_v51 }
 0x4ab   : > { %3277 = vst [vmem:[#allocation2 + $0x630] sm:$0xff] %v10351_v40  ;;  %v2574_v19 = vmul.f32 %v16056_v17, %v2096_v36  ;;  %v2699_v46 = vadd.f32 %v2571_v55, %v16098_v60  ;;  %v2824_v14 = vadd.f32 %v10752_v31, %v2692_v20  ;;  %v10845_v42 = vmul.f32 %v10674_v9, %v10794_v8  ;;  %v3813_v20 = vld [vmem:[#allocation2 + $0x9] sm:$0xff] }
 0x4ac   : > { %16085 = vst [vmem:[#allocation109_spill] sm:$0xff] %v10775_v54  ;;  %v2068_v36 = vpop.permute.xlu1 %2067  ;;  %7899 = vmatpush.bf16.msra.mxu2 %v10799_v51  ;;  %v10859_v38 = vadd.f32 %v5096_v25, %v4839_v28  ;;  %v8039_v28 = vld [vmem:[%s8143_s27 + $0x3b0] sm:$0xff]  ;;  %7900 = vmatpush.bf16.msra.mxu3 %v10799_v51 }
 0x4ad   : > { %16087 = vst [vmem:[#allocation107_spill] sm:$0xff] %v10778_v6  ;;  %v2567_v55 = vmul.f32 %v16056_v17, %v2068_v36  ;;  %v16103_v36 = vld [vmem:[#allocation3_spill] sm:$0xff]  ;;  %v10877_v25 = vadd.f32 %v10752_v31, %v2699_v46  ;;  %2523 = vperm.xlu1 %7931, %v8039_v28   ;;  %v10890_v46 = vmul.f32 %v10772_v26, %v10848_v35 }
 0x4ae   : > { %3278 = vst [vmem:[#allocation2 + $0x638] sm:$0xff] %v10351_v40 }
 0x4af   : > { %16090 = vst [vmem:[#allocation126_spill] sm:$0xff] %v10783_v37  ;;  %v3558_v37 = vmul.f32 %v4582_v10, %v10654_v3  ;;  %v10829_v10 = vld [vmem:[%s14847_s4 + $0x10] sm:$0xff] }
 0x4b0   : > { %3279 = vst [vmem:[#allocation2 + $0x640] sm:$0x3] %v10351_v40  ;;  %7158 = vmatpush.bf16.msra.mxu0 %v10829_v10  ;;  %7901 = vmatpush.bf16.msra.mxu1 %v10829_v10 }
 0x4b1   : > { %3280 = vst [vmem:[#allocation2 + $0x648] sm:$0xff] %v10351_v40  ;;  %v10852_v6 = vadd.f32 %v3943_v29, %v3558_v37  ;;  %v10864_v37 = vmul.f32 %v9284_v52, %v10669_v23  ;;  %v2952_v23 = vmax.f32 %v2824_v14, 0.0  ;;  %v8041_v14 = vld [vmem:[%s8143_s27 + $0x2c8] sm:$0xff]  ;;  %7902 = vmatpush.bf16.msra.mxu2 %v10829_v10  ;;  %7903 = vmatpush.bf16.msra.mxu3 %v10829_v10 }
 0x4b2   : > { %16092 = vst [vmem:[#allocation160_spill] sm:$0xff] %v10789_v1  ;;  %v2108_v60 = vpop.permute.xlu2 %2107  ;;  %v16100_v1 = vld [vmem:[#allocation10_spill] sm:$0xff] }
 0x4b3   : > { %16094 = vst [vmem:[#allocation115_spill] sm:$0xff] %v10792_v12  ;;  %v8038_v12 = vld [vmem:[%s8143_s27 + $0x1b0] sm:$0xff]  ;;  %v2697_v54 = vadd.f32 %v2569_v50, %v16100_v1  ;;  %v2577_v0 = vmul.f32 %v16056_v17, %v2108_v60  ;;  %v10872_v1 = vld [vmem:[%s14847_s4 + $0x8] sm:$0xff]  ;;  %v3942_v50 = vmul.f32 %v10674_v9, %v3813_v20  ;;  %v10886_v60 = vmul.f32 %v10802_v21, %v10848_v35 }
 0x4b4   : > { %16095 = vst [vmem:[#allocation131_spill] sm:$0xff] %v10802_v21  ;;  %2267 = vperm.xlu0 %7930, %v8038_v12   ;;  %v10841_v12 = vmul.f32 %v10772_v26, %v10794_v8  ;;  %7159 = vmatpush.bf16.msra.mxu0 %v10872_v1  ;;  %v2080_v51 = vpop.permute.xlu1 %2079  ;;  %v10927_v57 = vmul.f32 %v10674_v9, %v2952_v23 }
 0x4b5   : > { %3281 = vst [vmem:[#allocation2 + $0x650] sm:$0xff] %v10351_v40  ;;  %v2829_v20 = vadd.f32 %v10752_v31, %v2697_v54  ;;  %v10909_v54 = vld [vmem:[%s14847_s4] sm:$0xff]  ;;  %7904 = vmatpush.bf16.msra.mxu1 %v10872_v1  ;;  %7905 = vmatpush.bf16.msra.mxu2 %v10872_v1 }
 0x4b6   : > { %3282 = vst [vmem:[#allocation2 + $0x658] sm:$0x3] %v10351_v40  ;;  %7906 = vmatpush.bf16.msra.mxu3 %v10872_v1 }
 0x4b7   : > { %3283 = vst [vmem:[#allocation2 + $0x660] sm:$0xff] %v10351_v40 }
 0x4b8   : > { %3284 = vst [vmem:[#allocation2 + $0x668] sm:$0xff] %v10351_v40  ;;  %7160 = vmatpush.bf16.msra.mxu0 %v10909_v54 }
 0x4b9   : > { %16097 = vst [vmem:[#allocation121_spill] sm:$0xff] %v10822_v7  ;;  %v2693_v7 = vadd.f32 %v2565_v4, %v16099_v22  ;;  %v16102_v4 = vld [vmem:[#allocation4_spill] sm:$0xff]  ;;  %v2695_v22 = vadd.f32 %v2567_v55, %v16103_v36  ;;  %7907 = vmatpush.bf16.msra.mxu1 %v10909_v54  ;;  %7908 = vmatpush.bf16.msra.mxu2 %v10909_v54 }
 0x4ba   : > { %3285 = vst [vmem:[#allocation2 + $0x670] sm:$0x3] %v10351_v40  ;;  %v2702_v29 = vadd.f32 %v2574_v19, %v16102_v4  ;;  %v8040_v19 = vld [vmem:[%s8143_s27 + $0x3b8] sm:$0xff]  ;;  %v4198_v55 = vld [vmem:[#allocation2 + $0xa] sm:$0xff]  ;;  %v2120_v2 = vpop.permute.xlu2 %2119  ;;  %7909 = vmatpush.bf16.msra.mxu3 %v10909_v54 }
 0x4bb   : > { %3286 = vst [vmem:[#allocation2 + $0x678] sm:$0xff] %v10351_v40  ;;  %2527 = vperm.xlu2 %7929, %v8040_v19   ;;  %v2825_v18 = vadd.f32 %v10752_v31, %v2693_v7  ;;  %v16104_v4 = vld [vmem:[#allocation5_spill] sm:$0xff]  ;;  %v16105_v7 = vld [vmem:[#allocation44_spill] sm:$0xff]  ;;  %v10899_v19 = vperm.slane %v10733_v49, 2  ;;  %v2959_v49 = vmax.f32 %v10877_v25, 0.0 }
 0x4bc   : > { %3287 = vst [vmem:[#allocation2 + $0x680] sm:$0xff] %v10351_v40  ;;  %2407 = vperm.xlu0 %7930, %v8041_v14   ;;  %v2705_v36 = vadd.f32 %v2577_v0, %v16104_v4  ;;  %v2700_v28 = vadd.f32 %v2572_v48, %v16105_v7  ;;  %v2834_v52 = vadd.f32 %v10752_v31, %v2702_v29  ;;  %v2100_v48 = vpop.permute.xlu0 %2099 }
 0x4bd   : > { %3288 = vst [vmem:[#allocation2 + $0x688] sm:$0x3] %v10351_v40  ;;  %v2827_v14 = vadd.f32 %v10752_v31, %v2695_v22  ;;  %v10913_v0 = vmul.f32 %v10674_v9, %v10848_v35  ;;  %v4070_v29 = vadd.f32 %v3942_v50, %v10697_v30  ;;  %v4327_v22 = vmul.f32 %v10700_v62, %v4198_v55 }
 0x4be   : > { %16101 = vst [vmem:[#allocation139_spill] sm:$0xff] %v10864_v37  ;;  %v10921_v4 = vmul.f32 %v10772_v26, %v2952_v23  ;;  %v2953_v7 = vmax.f32 %v2825_v18, 0.0  ;;  %v2570_v37 = vmul.f32 %v16056_v17, %v2080_v51  ;;  %v2575_v63 = vmul.f32 %v16056_v17, %v2100_v48  ;;  %v16107_v51 = vld [vmem:[#allocation36_spill] sm:$0xff] }
 0x4bf   : > { %3289 = vst [vmem:[#allocation2 + $0x690] sm:$0xff] %v10351_v40  ;;  %v10931_v30 = vmax.f32 %v2829_v20, 0.0  ;;  %v2837_v25 = vadd.f32 %v10752_v31, %v2705_v36  ;;  %v2580_v50 = vmul.f32 %v16056_v17, %v2120_v2  ;;  %v2962_v18 = vmax.f32 %v2834_v52, 0.0 }
 0x4c0   : > { %3290 = vst [vmem:[#allocation2 + $0x698] sm:$0xff] %v10351_v40  ;;  %v2955_v55 = vmax.f32 %v2827_v14, 0.0  ;;  %v2698_v48 = vadd.f32 %v2570_v37, %v16107_v51  ;;  %v2703_v41 = vadd.f32 %v2575_v63, %v16108_v53  ;;  %v10942_v36 = vadd.f32 %v4327_v22, %v4070_v29  ;;  %v8043_v37 = vld [vmem:[%s8143_s27 + $0x2c0] sm:$0xff] }
 0x4c1   : > { %3291 = vst [vmem:[#allocation2 + $0x6a0] sm:$0x3] %v10351_v40  ;;  %v10945_v2 = vperm.slane %v10769_v13, 0  ;;  %v10948_v52 = vperm.slane %v10769_v13, 2  ;;  %v8044_v14 = vld [vmem:[%s8143_s27 + $0x1c0] sm:$0xff]  ;;  %v2965_v29 = vmax.f32 %v2837_v25, 0.0  ;;  %v10961_v22 = vmul.f32 %v10772_v26, %v2953_v7 }
 0x4c2   : > { %3292 = vst [vmem:[#allocation2 + $0x6a8] sm:$0xff] %v10351_v40  ;;  %v2830_v63 = vadd.f32 %v10752_v31, %v2698_v48  ;;  %v2835_v53 = vadd.f32 %v10752_v31, %v2703_v41  ;;  %v10974_v51 = vmul.f32 %v10802_v21, %v10931_v30  ;;  %v10977_v25 = vmul.f32 %v10802_v21, %v2959_v49 }
 0x4c3   : > { %3293 = vst [vmem:[#allocation2 + $0x6b0] sm:$0xff] %v10351_v40  ;;  %2403 = vperm.xlu2 %7929, %v8043_v37   ;;  %v10983_v10 = vmul.f32 %v10772_v26, %v2955_v55  ;;  %v2132_v37 = vpop.permute.xlu2 %2131 }
 0x4c4   : > { %3294 = vst [vmem:[#allocation2 + $0x6b8] sm:$0x3] %v10351_v40  ;;  %v2832_v40 = vadd.f32 %v10752_v31, %v2700_v28  ;;  %v10955_v28 = vmul.f32 %v10802_v21, %v2953_v7  ;;  %2275 = vperm.xlu0 %7930, %v8044_v14   ;;  %v10980_v48 = vmax.f32 %v2830_v63, 0.0  ;;  %v2583_v11 = vmul.f32 %v16056_v17, %v2132_v37 }
 0x4c5   : > { %3299 = vst [vmem:[#allocation2 + $0x39] sm:$0xff] %v10794_v8  ;;  %v16109_v8 = vld [vmem:[#allocation155_spill] sm:$0xff] }
 0x4c6   : > { %16106 = vst [vmem:[#allocation137_spill] sm:$0xff] %v10931_v30  ;;  %v2708_v20 = vadd.f32 %v2580_v50, %v16109_v8  ;;  %v10967_v41 = vmax.f32 %v2832_v40, 0.0  ;;  %v10970_v50 = vmul.f32 %v10802_v21, %v2955_v55  ;;  %v2112_v8 = vpop.permute.xlu0 %2111  ;;  %v10986_v40 = vmul.f32 %v10674_v9, %v2955_v55 }
 0x4c7   : > { %3301 = vst [vmem:[#allocation2 + $0x51] sm:$0xff] %v10848_v35  ;;  %v8042_v35 = vld [vmem:[%s8143_s27 + $0x1b8] sm:$0xff]  ;;  %v2578_v63 = vmul.f32 %v16056_v17, %v2112_v8  ;;  %v2711_v39 = vadd.f32 %v2583_v11, %v16114_v5 }
 0x4c8   : > { %3304 = vst [vmem:[#allocation2 + $0x79] sm:$0xff] %v2959_v49  ;;  %2271 = vperm.xlu1 %7931, %v8042_v35   ;;  %v2840_v13 = vadd.f32 %v10752_v31, %v2708_v20  ;;  %v2963_v49 = vmax.f32 %v2835_v53, 0.0  ;;  %v16111_v53 = vld [vmem:[#allocation42_spill] sm:$0xff] }
 0x4c9   : > { %3297 = vst [vmem:[#allocation2 + $0x21] sm:$0xff] %v2952_v23  ;;  %v10964_v23 = vmul.f32 %v10674_v9, %v2953_v7  ;;  %v2843_v15 = vadd.f32 %v10752_v31, %v2711_v39  ;;  %v8045_v39 = vld [vmem:[%s8143_s27 + $0x3c0] sm:$0xff] }
 0x4ca   : > { %3298 = vst [vmem:[#allocation2 + $0x31] sm:$0xff] %v2953_v7  ;;  %v2092_v7 = vpop.permute.xlu1 %2091  ;;  %v2968_v20 = vmax.f32 %v2840_v13, 0.0 }
 0x4cb   : > { %3307 = vst [vmem:[#allocation2 + $0x99] sm:$0xff] %v2962_v18  ;;  %v10990_v18 = vmul.f32 %v10772_v26, %v10931_v30  ;;  %v2573_v35 = vmul.f32 %v16056_v17, %v2092_v7  ;;  %v16112_v7 = vld [vmem:[#allocation55_spill] sm:$0xff]  ;;  %2535 = vperm.xlu2 %7929, %v8046_v59  }
 0x4cc   : > { %16110 = vst [vmem:[#allocation127_spill] sm:$0xff] %v10977_v25  ;;  %v6509_v14 = vld [vmem:[#allocation2 + $0x3a] sm:$0xff]  ;;  %v2706_v8 = vadd.f32 %v2578_v63, %v16112_v7 }
 0x4cd   : > { %3302 = vst [vmem:[#allocation2 + $0x61] sm:$0xff] %v10931_v30  ;;  %v10996_v47 = vmul.f32 %v10948_v52, %v6509_v14  ;;  %v10999_v16 = vmul.f32 %v6509_v14, %v10899_v19  ;;  %v2701_v13 = vadd.f32 %v2573_v35, %v16111_v53  ;;  %v11019_v35 = vmul.f32 %v10802_v21, %v10980_v48 }
 0x4ce   : > { %3300 = vst [vmem:[#allocation2 + $0x49] sm:$0xff] %v2955_v55  ;;  %v6511_v56 = vld [vmem:[#allocation2 + $0x52] sm:$0xff]  ;;  %v11002_v55 = vmul.f32 %v6509_v14, %v10700_v62  ;;  %v2838_v11 = vadd.f32 %v10752_v31, %v2706_v8  ;;  %v2124_v30 = vpop.permute.xlu0 %2123 }
 0x4cf   : > { %3310 = vst [vmem:[#allocation2 + $0xc1] sm:$0xff] %v2965_v29  ;;  %v11008_v29 = vmul.f32 %v10948_v52, %v6511_v56  ;;  %v11011_v37 = vmul.f32 %v6511_v56, %v10899_v19  ;;  %v11013_v27 = vld [vmem:[#allocation2 + $0x78] sm:$0xff]  ;;  %v11022_v63 = vmul.f32 %v6511_v56, %v10700_v62  ;;  %v11029_v7 = vadd.f32 %v10752_v31, %v2701_v13 }
 0x4d0   : > { %3305 = vst [vmem:[#allocation2 + $0x81] sm:$0xff] %v10967_v41  ;;  %v4583_v14 = vld [vmem:[#allocation2 + $0x20] sm:$0xff]  ;;  %v11026_v53 = vmul.f32 %v10945_v2, %v11013_v27  ;;  %v2966_v45 = vmax.f32 %v2838_v11, 0.0  ;;  %2531 = vperm.xlu1 %7931, %v8045_v39   ;;  %v8047_v11 = vld [vmem:[%s8143_s27 + $0x2d8] sm:$0xff] }
 0x4d1   : > { %16113 = vst [vmem:[#allocation145_spill] sm:$0xff] %v11013_v27  ;;  %v5352_v58 = vld [vmem:[#allocation2 + $0x1a] sm:$0xff]  ;;  %v5353_v43 = vld [vmem:[#allocation2 + $0x22] sm:$0xff]  ;;  %v4712_v5 = vmul.f32 %v10742_v34, %v4583_v14  ;;  %v11034_v44 = vld [vmem:[#allocation2 + $0x30] sm:$0xff]  ;;  %2415 = vperm.xlu0 %7930, %v8047_v11  }
 0x4d2   : > { %3303 = vst [vmem:[#allocation2 + $0x69] sm:$0xff] %v10980_v48  ;;  %v5481_v61 = vmul.f32 %v10899_v19, %v5352_v58  ;;  %v11036_v32 = vld [vmem:[#allocation2 + $0x38] sm:$0xff]  ;;  %v5867_v13 = vmul.f32 %v10945_v2, %v11034_v44  ;;  %v2104_v9 = vpop.permute.xlu1 %2103  ;;  %v4328_v21 = vmul.f32 %v5352_v58, %v10700_v62  ;;  %v4329_v59 = vmul.f32 %v5353_v43, %v10700_v62 }
 0x4d3   : > { %16115 = vst [vmem:[#allocation144_spill] sm:$0xff] %v11026_v53  ;;  %v11038_v56 = vld [vmem:[#allocation2 + $0x32] sm:$0xff]  ;;  %v5868_v8 = vmul.f32 %v10945_v2, %v11036_v32  ;;  %v4840_v24 = vadd.f32 %v4712_v5, %v10942_v36  ;;  %v3559_v53 = vmul.f32 %v4583_v14, %v10654_v3  ;;  %v2144_v36 = vpop.permute.xlu2 %2143  ;;  %v2581_v5 = vmul.f32 %v16056_v17, %v2124_v30 }
 0x4d4   : > { %3313 = vst [vmem:[#allocation2 + $0xe1] sm:$0xff] %v2968_v20  ;;  %v5482_v20 = vmul.f32 %v10899_v19, %v5353_v43  ;;  %v5609_v27 = vadd.f32 %v5481_v61, %v10859_v38  ;;  %v6637_v25 = vmul.f32 %v10948_v52, %v11038_v56  ;;  %v16117_v38 = vmax.f32 %v11029_v7, 0.0 }
 0x4d5   : > { %16116 = vst [vmem:[#allocation170_spill] sm:$0xff] %v11029_v7  ;;  %v5225_v61 = vadd.f32 %v10921_v4, %v4840_v24  ;;  %v2586_v14 = vmul.f32 %v16056_v17, %v2144_v36  ;;  %v4072_v58 = vadd.f32 %v10927_v57, %v3559_v53  ;;  %v4456_v39 = vadd.f32 %v4328_v21, %v10852_v6  ;;  %v16118_v24 = vld [vmem:[#allocation56_spill] sm:$0xff]  ;;  %v16119_v4 = vld [vmem:[#allocation61_spill] sm:$0xff] }
 0x4d6   : > { %3308 = vst [vmem:[#allocation2 + $0xa9] sm:$0xff] %v2963_v49  ;;  %v2971_v49 = vmax.f32 %v2843_v15, 0.0  ;;  %v5995_v1 = vadd.f32 %v5867_v13, %v5609_v27  ;;  %v2576_v15 = vmul.f32 %v16056_v17, %v2104_v9  ;;  %v2709_v9 = vadd.f32 %v2581_v5, %v16119_v4  ;;  %v16120_v13 = vld [vmem:[#allocation19_spill] sm:$0xff]  ;;  %v11088_v5 = vld [vmem:[#allocation2 + $0x4a] sm:$0xff] }
 0x4d7   : > { %3306 = vst [vmem:[#allocation2 + $0x91] sm:$0xff] %v16117_v38  ;;  %v5610_v11 = vadd.f32 %v5482_v20, %v5225_v61  ;;  %v2714_v7 = vadd.f32 %v2586_v14, %v16120_v13  ;;  %v4457_v30 = vadd.f32 %v4329_v59, %v4072_v58  ;;  %v4714_v57 = vmul.f32 %v11036_v32, %v10742_v34  ;;  %v8048_v14 = vld [vmem:[%s8143_s27 + $0x1c8] sm:$0xff]  ;;  %v2136_v59 = vpop.permute.xlu0 %2135 }
 0x4d8   : > { %3316 = vst [vmem:[#allocation2 + $0x109] sm:$0xff] %v2971_v49  ;;  %v6380_v38 = vadd.f32 %v10955_v28, %v5995_v1  ;;  %v2704_v27 = vadd.f32 %v2576_v15, %v16118_v24  ;;  %v4713_v49 = vmul.f32 %v11034_v44, %v10742_v34  ;;  %v2841_v21 = vadd.f32 %v10752_v31, %v2709_v9  ;;  %v11079_v28 = vld [vmem:[#allocation2 + $0x48] sm:$0xff]  ;;  %v11084_v15 = vld [vmem:[#allocation2 + $0x50] sm:$0xff] }
 0x4d9   : > { %3311 = vst [vmem:[#allocation2 + $0xc9] sm:$0xff] %v2966_v45  ;;  %v5996_v45 = vadd.f32 %v5868_v8, %v5610_v11  ;;  %v2846_v53 = vadd.f32 %v10752_v31, %v2714_v7  ;;  %v4842_v61 = vadd.f32 %v4714_v57, %v4457_v30  ;;  %v5483_v1 = vmul.f32 %v11038_v56, %v10899_v19  ;;  %v8049_v24 = vld [vmem:[%s8143_s27 + $0x2d0] sm:$0xff] }
 0x4da   : > { %v6765_v43 = vadd.f32 %v6637_v25, %v6380_v38  ;;  %v11076_v6 = vadd.f32 %v10752_v31, %v2704_v27  ;;  %v4841_v20 = vadd.f32 %v4713_v49, %v4456_v39  ;;  %v2969_v36 = vmax.f32 %v2841_v21, 0.0  ;;  %2279 = vperm.xlu1 %7931, %v8048_v14   ;;  %v2116_v58 = vpop.permute.xlu1 %2115  ;;  %2411 = vperm.xlu2 %7929, %v8049_v24   ;;  %v16122_v21 = vld [vmem:[#allocation7_spill] sm:$0xff] }
 0x4db   : > { %v6381_v54 = vadd.f32 %v10833_v33, %v5996_v45  ;;  %v2974_v7 = vmax.f32 %v2846_v53, 0.0  ;;  %v5227_v11 = vadd.f32 %v10841_v12, %v4842_v61  ;;  %v5869_v38 = vmul.f32 %v10945_v2, %v11079_v28  ;;  %v8050_v33 = vld [vmem:[%s8143_s27 + $0x1d0] sm:$0xff]  ;;  %v2156_v9 = vpop.permute.xlu2 %2155  ;;  %v16121_v45 = vld [vmem:[#allocation62_spill] sm:$0xff] }
 0x4dc   : > { %v6893_v25 = vmax.f32 %v6765_v43, 0.0  ;;  %v2964_v8 = vmax.f32 %v11076_v6, 0.0  ;;  %v5226_v39 = vadd.f32 %v10961_v22, %v4841_v20  ;;  %2283 = vperm.xlu0 %7930, %v8050_v33   ;;  %v2579_v4 = vmul.f32 %v16056_v17, %v2116_v58  ;;  %3314 = vst [vmem:[#allocation2 + $0xf1] sm:$0xff] %v2969_v36  ;;  %v16123_v61 = vld [vmem:[#allocation25_spill] sm:$0xff] }
 0x4dd   : > { %v6766_v27 = vadd.f32 %v10996_v47, %v6381_v54  ;;  %v2584_v13 = vmul.f32 %v16056_v17, %v2136_v59  ;;  %v5870_v12 = vmul.f32 %v10945_v2, %v11084_v15  ;;  %3319 = vst [vmem:[#allocation2 + $0x129] sm:$0xff] %v2974_v7  ;;  %v2589_v22 = vmul.f32 %v16056_v17, %v2156_v9 }
 0x4de   : > { %3309 = vst [vmem:[#allocation2 + $0xb1] sm:$0xff] %v2964_v8  ;;  %v5611_v30 = vadd.f32 %v5483_v1, %v5226_v39  ;;  %v5612_v49 = vadd.f32 %v10999_v16, %v5227_v11  ;;  %v6639_v47 = vmul.f32 %v10948_v52, %v11088_v5  ;;  %v2707_v43 = vadd.f32 %v2579_v4, %v16121_v45 }
 0x4df   : > { %v6894_v57 = vmax.f32 %v6766_v27, 0.0  ;;  %v2712_v53 = vadd.f32 %v2584_v13, %v16122_v21  ;;  %v3560_v20 = vmul.f32 %v11034_v44, %v10654_v3  ;;  %v2717_v54 = vadd.f32 %v2589_v22, %v16123_v61  ;;  %v8052_v13 = vld [vmem:[%s8143_s27 + $0x3d8] sm:$0xff]  ;;  %v16125_v61 = vld [vmem:[#allocation13_spill] sm:$0xff] }
 0x4e0   : > { %v5997_v14 = vadd.f32 %v5869_v38, %v5611_v30  ;;  %v5998_v7 = vadd.f32 %v5870_v12, %v5612_v49  ;;  %v3561_v16 = vmul.f32 %v11036_v32, %v10654_v3  ;;  %v2839_v58 = vadd.f32 %v10752_v31, %v2707_v43  ;;  %v8053_v12 = vld [vmem:[%s8143_s27 + $0x2e8] sm:$0xff] }
 0x4e1   : > { %v7021_v1 = vpack.c.bf16 %v6894_v57, %v6893_v25  ;;  %v2844_v36 = vadd.f32 %v10752_v31, %v2712_v53  ;;  %v4073_v59 = vadd.f32 %v10964_v23, %v3560_v20  ;;  %v2849_v39 = vadd.f32 %v10752_v31, %v2717_v54  ;;  %v8051_v23 = vld [vmem:[%s8143_s27 + $0x3d0] sm:$0xff]  ;;  %v11135_v57 = vld [vmem:[#allocation2 + $0x60] sm:$0xff]  ;;  %v16124_v53 = vld [vmem:[#allocation68_spill] sm:$0xff] }
 0x4e2   : > { %v6382_v11 = vadd.f32 %v10970_v50, %v5997_v14  ;;  %v6383_v44 = vadd.f32 %v10886_v60, %v5998_v7  ;;  %v4074_v38 = vadd.f32 %v10845_v42, %v3561_v16  ;;  %v2967_v24 = vmax.f32 %v2839_v58, 0.0  ;;  %2539 = vperm.xlu1 %7931, %v8051_v23   ;;  %v2128_v9 = vpop.permute.xlu1 %2127  ;;  %v2148_v60 = vpop.permute.xlu0 %2147  ;;  %2543 = vperm.xlu2 %7929, %v8052_v13   ;;  %v11144_v16 = vld [vmem:[#allocation2 + $0x62] sm:$0xff] }
 0x4e3   : > { %7161 = vmatmul.bf16.vlgmr.msra.gmra.mxu0 %v7021_v1  ;;  %v2972_v32 = vmax.f32 %v2844_v36, 0.0  ;;  %v4330_v25 = vmul.f32 %v11038_v56, %v10700_v62  ;;  %v4715_v33 = vmul.f32 %v11079_v28, %v10742_v34  ;;  %v2977_v27 = vmax.f32 %v2849_v39, 0.0  ;;  %v2168_v22 = vpop.permute.xlu2 %2167  ;;  %v11146_v1 = vld [vmem:[#allocation2 + $0x6a] sm:$0xff]  ;;  %v16126_v36 = vld [vmem:[#allocation31_spill] sm:$0xff] }
 0x4e4   : > { %v6767_v4 = vadd.f32 %v6639_v47, %v6382_v11  ;;  %v6768_v50 = vadd.f32 %v11008_v29, %v6383_v44  ;;  %v4459_v42 = vadd.f32 %v11002_v55, %v4074_v38  ;;  %2423 = vperm.xlu0 %7930, %v8053_v12   ;;  %3312 = vst [vmem:[#allocation2 + $0xd9] sm:$0xff] %v2967_v24  ;;  %v11137_v29 = vld [vmem:[#allocation2 + $0x68] sm:$0xff] }
 0x4e5   : > { %v2582_v56 = vmul.f32 %v16056_v17, %v2128_v9  ;;  %v2587_v30 = vmul.f32 %v16056_v17, %v2148_v60  ;;  %v4458_v49 = vadd.f32 %v4330_v25, %v4073_v59  ;;  %v4716_v47 = vmul.f32 %v11084_v15, %v10742_v34  ;;  %3322 = vst [vmem:[#allocation2 + $0x151] sm:$0xff] %v2977_v27  ;;  %v8054_v60 = vld [vmem:[%s8143_s27 + $0x1d8] sm:$0xff] }
 0x4e6   : > { %v6895_v55 = vmax.f32 %v6767_v4, 0.0  ;;  %v6896_v45 = vmax.f32 %v6768_v50, 0.0  ;;  %v2592_v43 = vmul.f32 %v16056_v17, %v2168_v22  ;;  %v5485_v21 = vmul.f32 %v11088_v5, %v10899_v19  ;;  %3317 = vst [vmem:[#allocation2 + $0x111] sm:$0xff] %v2972_v32 }
 0x4e7   : > { %v2710_v20 = vadd.f32 %v2582_v56, %v16124_v53  ;;  %v2715_v54 = vadd.f32 %v2587_v30, %v16125_v61  ;;  %v4843_v14 = vadd.f32 %v4715_v33, %v4458_v49  ;;  %v4844_v7 = vadd.f32 %v4716_v47, %v4459_v42  ;;  %v8055_v30 = vld [vmem:[%s8143_s27 + $0x2e0] sm:$0xff] }
 0x4e8   : > { %v7022_v58 = vpack.c.bf16 %v6896_v45, %v6895_v55  ;;  %v2720_v59 = vadd.f32 %v2592_v43, %v16126_v36  ;;  %v5871_v39 = vmul.f32 %v10945_v2, %v11135_v57  ;;  %v5872_v11 = vmul.f32 %v10945_v2, %v11137_v29 }
 0x4e9   : > { %v2842_v44 = vadd.f32 %v10752_v31, %v2710_v20  ;;  %v2847_v38 = vadd.f32 %v10752_v31, %v2715_v54  ;;  %v5228_v24 = vadd.f32 %v10983_v10, %v4843_v14  ;;  %v5229_v32 = vadd.f32 %v10890_v46, %v4844_v7  ;;  %v16128_v20 = vld [vmem:[#allocation16_spill] sm:$0xff]  ;;  %v16129_v7 = vld [vmem:[#allocation74_spill] sm:$0xff] }
 0x4ea   : > { %v2852_v25 = vadd.f32 %v10752_v31, %v2720_v59  ;;  %v6641_v33 = vmul.f32 %v10948_v52, %v11144_v16  ;;  %v6642_v23 = vmul.f32 %v10948_v52, %v11146_v1  ;;  %v3562_v27 = vmul.f32 %v11079_v28, %v10654_v3  ;;  %2287 = vperm.xlu1 %7931, %v8054_v60   ;;  %v2140_v42 = vpop.permute.xlu1 %2139  ;;  %v2160_v13 = vpop.permute.xlu0 %2159  ;;  %v8056_v28 = vld [vmem:[%s8143_s27 + $0x1e0] sm:$0xff] }
 0x4eb   : > { %v2970_v4 = vmax.f32 %v2842_v44, 0.0  ;;  %v2975_v50 = vmax.f32 %v2847_v38, 0.0  ;;  %v5613_v9 = vadd.f32 %v5485_v21, %v5228_v24  ;;  %v5614_v10 = vadd.f32 %v11011_v37, %v5229_v32  ;;  %2419 = vperm.xlu2 %7929, %v8055_v30   ;;  %v2180_v49 = vpop.permute.xlu2 %2179  ;;  %v16127_v21 = vld [vmem:[#allocation67_spill] sm:$0xff] }
 0x4ec   : > { %v2980_v46 = vmax.f32 %v2852_v25, 0.0  ;;  %v3563_v12 = vmul.f32 %v11084_v15, %v10654_v3  ;;  %v4075_v56 = vadd.f32 %v10986_v40, %v3562_v27  ;;  %v4332_v22 = vmul.f32 %v11088_v5, %v10700_v62  ;;  %2291 = vperm.xlu0 %7930, %v8056_v28   ;;  %v11195_v25 = vld [vmem:[#allocation2 + $0x80] sm:$0xff] }
 0x4ed   : > { %3315 = vst [vmem:[#allocation2 + $0xf9] sm:$0xff] %v2970_v4  ;;  %v2585_v37 = vmul.f32 %v16056_v17, %v2140_v42  ;;  %v2590_v47 = vmul.f32 %v16056_v17, %v2160_v13  ;;  %v5999_v55 = vadd.f32 %v5871_v39, %v5613_v9  ;;  %v6000_v45 = vadd.f32 %v5872_v11, %v5614_v10  ;;  %v11203_v13 = vld [vmem:[#allocation2 + $0x7a] sm:$0xff] }
 0x4ee   : > { %3325 = vst [vmem:[#allocation2 + $0x171] sm:$0xff] %v2980_v46  ;;  %v2595_v15 = vmul.f32 %v16056_v17, %v2180_v49  ;;  %v4076_v40 = vadd.f32 %v10913_v0, %v3563_v12  ;;  %v4460_v43 = vadd.f32 %v4332_v22, %v4075_v56  ;;  %v4717_v5 = vmul.f32 %v11135_v57, %v10742_v34  ;;  %v8058_v12 = vld [vmem:[%s8143_s27 + $0x3e8] sm:$0xff]  ;;  %v8059_v56 = vld [vmem:[%s8143_s27 + $0x2f8] sm:$0xff] }
 0x4ef   : > { %3320 = vst [vmem:[#allocation2 + $0x139] sm:$0xff] %v2975_v50  ;;  %v2713_v53 = vadd.f32 %v2585_v37, %v16127_v21  ;;  %v2718_v61 = vadd.f32 %v2590_v47, %v16128_v20  ;;  %v6384_v54 = vadd.f32 %v10974_v51, %v5999_v55  ;;  %v6385_v14 = vadd.f32 %v11019_v35, %v6000_v45  ;;  %v16132_v21 = vld [vmem:[#allocation22_spill] sm:$0xff] }
 0x4f0   : > { %v2723_v36 = vadd.f32 %v2595_v15, %v16129_v7  ;;  %v4461_v59 = vadd.f32 %v11022_v63, %v4076_v40  ;;  %v4718_v0 = vmul.f32 %v11137_v29, %v10742_v34  ;;  %v4845_v39 = vadd.f32 %v4717_v5, %v4460_v43  ;;  %v16130_v15 = vld [vmem:[#allocation131_spill] sm:$0xff]  ;;  %v16131_v43 = vld [vmem:[#allocation12_spill] sm:$0xff] }
 0x4f1   : > { %v2845_v11 = vadd.f32 %v10752_v31, %v2713_v53  ;;  %v2850_v44 = vadd.f32 %v10752_v31, %v2718_v61  ;;  %v6769_v38 = vadd.f32 %v6641_v33, %v6384_v54  ;;  %v6770_v24 = vadd.f32 %v6642_v23, %v6385_v14  ;;  %v8057_v33 = vld [vmem:[%s8143_s27 + $0x3e0] sm:$0xff]  ;;  %v16134_v7 = vld [vmem:[#allocation144_spill] sm:$0xff] }
 0x4f2   : > { %v11190_v32 = vadd.f32 %v10752_v31, %v2723_v36  ;;  %v4846_v51 = vadd.f32 %v4718_v0, %v4461_v59  ;;  %v5103_v35 = vmul.f32 %v10772_v26, %v10980_v48  ;;  %v5230_v63 = vadd.f32 %v10990_v18, %v4845_v39  ;;  %2547 = vperm.xlu1 %7931, %v8057_v33   ;;  %v2152_v10 = vpop.permute.xlu1 %2151  ;;  %v2172_v60 = vpop.permute.xlu0 %2171  ;;  %v16133_v54 = vld [vmem:[#allocation11_spill] sm:$0xff] }
 0x4f3   : > { %7166 = vmatmul.bf16.gmra.mxu0 %v7022_v58  ;;  %v2973_v27 = vmax.f32 %v2845_v11, 0.0  ;;  %v2978_v4 = vmax.f32 %v2850_v44, 0.0  ;;  %v6897_v50 = vmax.f32 %v6769_v38, 0.0  ;;  %v6898_v9 = vmax.f32 %v6770_v24, 0.0  ;;  %v11205_v58 = vld [vmem:[#allocation2 + $0x82] sm:$0xff]  ;;  %2551 = vperm.xlu2 %7929, %v8058_v12   ;;  %v2192_v28 = vpop.permute.xlu2 %2191  ;;  %v16135_v38 = vld [vmem:[#allocation137_spill] sm:$0xff] }
 0x4f4   : > { %v2983_v23 = vmax.f32 %v11190_v32, 0.0  ;;  %v5231_v46 = vadd.f32 %v5103_v35, %v4846_v51  ;;  %v5487_v42 = vmul.f32 %v11144_v16, %v10899_v19  ;;  %v5488_v18 = vmul.f32 %v11146_v1, %v10899_v19  ;;  %2431 = vperm.xlu0 %7930, %v8059_v56   ;;  %v16136_v24 = vld [vmem:[#allocation163_spill] sm:$0xff] }
 0x4f5   : > { %3318 = vst [vmem:[#allocation2 + $0x121] sm:$0xff] %v2973_v27  ;;  %v11209_v22 = vpack.c.bf16 %v6898_v9, %v6897_v50  ;;  %v2588_v30 = vmul.f32 %v16056_v17, %v2152_v10  ;;  %v2593_v37 = vmul.f32 %v16056_v17, %v2172_v60  ;;  %v5874_v49 = vmul.f32 %v10945_v2, %v11195_v25 }
 0x4f6   : > { %3328 = vst [vmem:[#allocation2 + $0x1c9] sm:$0xff] %v2983_v23  ;;  %v2598_v47 = vmul.f32 %v16056_v17, %v2192_v28  ;;  %v5615_v55 = vadd.f32 %v5487_v42, %v5230_v63  ;;  %v5616_v45 = vadd.f32 %v5488_v18, %v5231_v46  ;;  %v6259_v40 = vmul.f32 %v16130_v15, %v10967_v41  ;;  %v16137_v63 = vld [vmem:[#allocation127_spill] sm:$0xff]  ;;  %v8062_v28 = vld [vmem:[%s8143_s27 + $0x1f0] sm:$0xff] }
 0x4f7   : > { %3323 = vst [vmem:[#allocation2 + $0x159] sm:$0xff] %v2978_v4  ;;  %v2716_v5 = vadd.f32 %v2588_v30, %v16131_v43  ;;  %v2721_v53 = vadd.f32 %v2593_v37, %v16132_v21  ;;  %v6643_v20 = vmul.f32 %v10948_v52, %v11203_v13  ;;  %v6644_v61 = vmul.f32 %v10948_v52, %v11205_v58  ;;  %v8061_v30 = vld [vmem:[%s8143_s27 + $0x2f0] sm:$0xff] }
 0x4f8   : > { %v2726_v14 = vadd.f32 %v2598_v47, %v16133_v54  ;;  %v6001_v36 = vadd.f32 %v16134_v7, %v5615_v55  ;;  %v6002_v59 = vadd.f32 %v5874_v49, %v5616_v45  ;;  %v3564_v0 = vmul.f32 %v11135_v57, %v10654_v3  ;;  %v11251_v55 = vld [vmem:[#allocation2 + $0x79] sm:$0xff] }
 0x4f9   : > { %v2848_v39 = vadd.f32 %v10752_v31, %v2716_v5  ;;  %v2853_v11 = vadd.f32 %v10752_v31, %v2721_v53  ;;  %v3565_v44 = vmul.f32 %v11137_v29, %v10654_v3  ;;  %v3949_v51 = vmul.f32 %v16136_v24, %v16135_v38  ;;  %v8060_v29 = vld [vmem:[%s8143_s27 + $0x1e8] sm:$0xff]  ;;  %v16138_v5 = vld [vmem:[#allocation145_spill] sm:$0xff]  ;;  %v16139_v53 = vld [vmem:[#allocation15_spill] sm:$0xff] }
 0x4fa   : > { %v2858_v35 = vadd.f32 %v10752_v31, %v2726_v14  ;;  %v6386_v27 = vadd.f32 %v16137_v63, %v6001_v36  ;;  %v6387_v4 = vadd.f32 %v6259_v40, %v6002_v59  ;;  %v3950_v57 = vmul.f32 %v16136_v24, %v10980_v48  ;;  %2295 = vperm.xlu1 %7931, %v8060_v29   ;;  %v2164_v46 = vpop.permute.xlu1 %2163  ;;  %v2184_v42 = vpop.permute.xlu0 %2183  ;;  %v16141_v7 = vld [vmem:[#allocation14_spill] sm:$0xff] }
 0x4fb   : > { %v2976_v50 = vmax.f32 %v2848_v39, 0.0  ;;  %v2981_v9 = vmax.f32 %v2853_v11, 0.0  ;;  %v4077_v33 = vadd.f32 %v3949_v51, %v3564_v0  ;;  %v4334_v10 = vmul.f32 %v11144_v16, %v10700_v62  ;;  %2427 = vperm.xlu2 %7929, %v8061_v30   ;;  %v2204_v37 = vpop.permute.xlu2 %2203  ;;  %v11266_v11 = vld [vmem:[#allocation2 + $0x90] sm:$0xff]  ;;  %v11272_v63 = vld [vmem:[#allocation2 + $0x98] sm:$0xff] }
 0x4fc   : > { %v11243_v60 = vmax.f32 %v2858_v35, 0.0  ;;  %v6771_v18 = vadd.f32 %v6643_v20, %v6386_v27  ;;  %v6772_v12 = vadd.f32 %v6644_v61, %v6387_v4  ;;  %v4078_v56 = vadd.f32 %v3950_v57, %v3565_v44  ;;  %2299 = vperm.xlu0 %7930, %v8062_v28   ;;  %v16140_v61 = vld [vmem:[#allocation28_spill] sm:$0xff] }
 0x4fd   : > { %3321 = vst [vmem:[#allocation2 + $0x141] sm:$0xff] %v2976_v50  ;;  %v2591_v48 = vmul.f32 %v16056_v17, %v2164_v46  ;;  %v2596_v49 = vmul.f32 %v16056_v17, %v2184_v42  ;;  %v4335_v16 = vmul.f32 %v11146_v1, %v10700_v62  ;;  %v4462_v47 = vadd.f32 %v4334_v10, %v4077_v33  ;;  %v11286_v46 = vld [vmem:[#allocation2 + $0x92] sm:$0xff]  ;;  %v11288_v42 = vld [vmem:[#allocation2 + $0x9a] sm:$0xff] }
 0x4fe   : > { %3331 = vst [vmem:[#allocation2 + $0x1e9] sm:$0xff] %v11243_v60  ;;  %v2601_v45 = vmul.f32 %v16056_v17, %v2204_v37  ;;  %v6899_v40 = vmax.f32 %v6771_v18, 0.0  ;;  %v6900_v43 = vmax.f32 %v6772_v12, 0.0  ;;  %v4719_v21 = vmul.f32 %v16138_v5, %v10742_v34  ;;  %v8063_v18 = vld [vmem:[%s8143_s27 + $0x3f0] sm:$0xff] }
 0x4ff   : > { %3326 = vst [vmem:[#allocation2 + $0x181] sm:$0xff] %v2981_v9  ;;  %v2719_v20 = vadd.f32 %v2591_v48, %v16139_v53  ;;  %v2724_v54 = vadd.f32 %v2596_v49, %v16140_v61  ;;  %v4463_v14 = vadd.f32 %v4335_v16, %v4078_v56  ;;  %v4720_v1 = vmul.f32 %v11195_v25, %v10742_v34  ;;  %v11279_v9 = vld [vmem:[#allocation2 + $0x99] sm:$0xff] }
 0x500   : > { %v2729_v36 = vadd.f32 %v2601_v45, %v16141_v7  ;;  %v11262_v59 = vpack.c.bf16 %v6900_v43, %v6899_v40  ;;  %v4847_v0 = vadd.f32 %v4719_v21, %v4462_v47  ;;  %v5104_v39 = vmul.f32 %v10772_v26, %v11251_v55  ;;  %v16142_v48 = vld [vmem:[#allocation170_spill] sm:$0xff] }
 0x501   : > { %v2851_v44 = vadd.f32 %v10752_v31, %v2719_v20  ;;  %v2856_v38 = vadd.f32 %v10752_v31, %v2724_v54  ;;  %v4848_v51 = vadd.f32 %v4720_v1, %v4463_v14  ;;  %v5105_v35 = vmul.f32 %v10772_v26, %v10967_v41  ;;  %v8064_v16 = vld [vmem:[%s8143_s27 + $0x3f8] sm:$0xff]  ;;  %v3823_v14 = vld [vmem:[#allocation2 + $0x81] sm:$0xff]  ;;  %v16144_v1 = vld [vmem:[#allocation21_spill] sm:$0xff] }
 0x502   : > { %v2861_v27 = vadd.f32 %v10752_v31, %v2729_v36  ;;  %v5232_v4 = vadd.f32 %v5104_v39, %v4847_v0  ;;  %v5489_v57 = vmul.f32 %v11203_v13, %v10899_v19  ;;  %v5490_v50 = vmul.f32 %v11205_v58, %v10899_v19  ;;  %2555 = vperm.xlu1 %7931, %v8063_v18   ;;  %v2176_v56 = vpop.permute.xlu1 %2175  ;;  %v2196_v30 = vpop.permute.xlu0 %2195  ;;  %v16145_v36 = vld [vmem:[#allocation39_spill] sm:$0xff] }
 0x503   : > { %7171 = vmatmul.bf16.gmra.mxu0 %v11209_v22  ;;  %v2979_v33 = vmax.f32 %v2851_v44, 0.0  ;;  %v11282_v10 = vmax.f32 %v2856_v38, 0.0  ;;  %v5233_v41 = vadd.f32 %v5105_v35, %v4848_v51  ;;  %v5875_v29 = vmul.f32 %v10945_v2, %v11266_v11  ;;  %2559 = vperm.xlu2 %7929, %v8064_v16   ;;  %v2216_v45 = vpop.permute.xlu2 %2215  ;;  %v16146_v38 = vld [vmem:[#allocation17_spill] sm:$0xff] }
 0x504   : > { %v2989_v12 = vmax.f32 %v2861_v27, 0.0  ;;  %v5617_v28 = vadd.f32 %v5489_v57, %v5232_v4  ;;  %v5876_v22 = vmul.f32 %v10945_v2, %v11272_v63  ;;  %v16143_v37 = vmax.f32 %v16142_v48, 0.0 }
 0x505   : > { %3324 = vst [vmem:[#allocation2 + $0x169] sm:$0xff] %v2979_v33  ;;  %v2594_v47 = vmul.f32 %v16056_v17, %v2176_v56  ;;  %v2599_v40 = vmul.f32 %v16056_v17, %v2196_v30  ;;  %v5618_v43 = vadd.f32 %v5490_v50, %v5233_v41  ;;  %v6261_v21 = vmul.f32 %v16130_v15, %v11279_v9 }
 0x506   : > { %v6260_v49 = vmul.f32 %v16130_v15, %v16143_v37  ;;  %3334 = vst [vmem:[#allocation2 + $0x211] sm:$0xff] %v2989_v12  ;;  %v2604_v53 = vmul.f32 %v16056_v17, %v2216_v45  ;;  %v6003_v20 = vadd.f32 %v5875_v29, %v5617_v28  ;;  %v6645_v61 = vmul.f32 %v10948_v52, %v11286_v46  ;;  %v11325_v28 = vld [vmem:[#allocation2 + $0x91] sm:$0xff] }
 0x507   : > { %v6646_v54 = vmul.f32 %v10948_v52, %v11288_v42  ;;  %3329 = vst [vmem:[#allocation2 + $0x1d1] sm:$0xff] %v11282_v10  ;;  %v2722_v7 = vadd.f32 %v2594_v47, %v16144_v1  ;;  %v2727_v0 = vadd.f32 %v2599_v40, %v16145_v36  ;;  %v6004_v39 = vadd.f32 %v5876_v22, %v5618_v43  ;;  %v8065_v22 = vld [vmem:[%s8143_s27 + $0x1f8] sm:$0xff] }
 0x508   : > { %v3566_v44 = vmul.f32 %v16138_v5, %v10654_v3  ;;  %v2732_v51 = vadd.f32 %v2604_v53, %v16146_v38  ;;  %v6388_v35 = vadd.f32 %v6260_v49, %v6003_v20  ;;  %v3567_v27 = vmul.f32 %v11195_v25, %v10654_v3  ;;  %v16148_v1 = vld [vmem:[#allocation38_spill] sm:$0xff]  ;;  %v16149_v38 = vld [vmem:[#allocation23_spill] sm:$0xff] }
 0x509   : > { %v3951_v4 = vmul.f32 %v11251_v55, %v16136_v24  ;;  %v2854_v57 = vadd.f32 %v10752_v31, %v2722_v7  ;;  %v11318_v50 = vadd.f32 %v10752_v31, %v2727_v0  ;;  %v6389_v33 = vadd.f32 %v6261_v21, %v6004_v39  ;;  %v11345_v39 = vld [vmem:[#allocation2 + $0xa8] sm:$0xff] }
 0x50a   : > { %v3952_v41 = vmul.f32 %v16136_v24, %v3823_v14  ;;  %v2864_v5 = vadd.f32 %v10752_v31, %v2732_v51  ;;  %v6773_v29 = vadd.f32 %v6645_v61, %v6388_v35  ;;  %v4336_v12 = vmul.f32 %v11203_v13, %v10700_v62  ;;  %2303 = vperm.xlu1 %7931, %v8065_v22   ;;  %v2188_v37 = vpop.permute.xlu1 %2187  ;;  %v2208_v49 = vpop.permute.xlu0 %2207 }
 0x50b   : > { %v4079_v18 = vadd.f32 %v3951_v4, %v3566_v44  ;;  %v2982_v56 = vmax.f32 %v2854_v57, 0.0  ;;  %v2987_v25 = vmax.f32 %v11318_v50, 0.0  ;;  %v6774_v30 = vadd.f32 %v6646_v54, %v6389_v33  ;;  %v2228_v45 = vpop.permute.xlu2 %2227  ;;  %v16147_v54 = vld [vmem:[#allocation27_spill] sm:$0xff]  ;;  %v11347_v44 = vld [vmem:[#allocation2 + $0xb0] sm:$0xff] }
 0x50c   : > { %v4080_v55 = vadd.f32 %v3952_v41, %v3567_v27  ;;  %v2992_v48 = vmax.f32 %v2864_v5, 0.0  ;;  %v6901_v16 = vmax.f32 %v6773_v29, 0.0  ;;  %v4337_v31 = vmul.f32 %v11205_v58, %v10700_v62  ;;  %v11354_v57 = vld [vmem:[#allocation2 + $0xa9] sm:$0xff]  ;;  %v11359_v33 = vld [vmem:[%s14845_s2] ss:$0 sm:$0xff] }
 0x50d   : > { %v4464_v47 = vadd.f32 %v4336_v12, %v4079_v18  ;;  %3327 = vst [vmem:[#allocation2 + $0x189] sm:$0xff] %v2982_v56  ;;  %v2597_v13 = vmul.f32 %v16056_v17, %v2188_v37  ;;  %v2602_v40 = vmul.f32 %v16056_v17, %v2208_v49  ;;  %v6902_v43 = vmax.f32 %v6774_v30, 0.0  ;;  %v11365_v12 = vld [vmem:[#allocation2 + $0xaa] sm:$0xff] }
 0x50e   : > { %v4721_v21 = vmul.f32 %v11266_v11, %v10742_v34  ;;  %3337 = vst [vmem:[#allocation2 + $0x231] sm:$0xff] %v2992_v48  ;;  %v2607_v53 = vmul.f32 %v16056_v17, %v2228_v45  ;;  %v4465_v20 = vadd.f32 %v4337_v31, %v4080_v55  ;;  %v4722_v61 = vmul.f32 %v11272_v63, %v10742_v34  ;;  %v11372_v48 = vld [vmem:[#allocation2 + $0xb2] sm:$0xff] }
 0x50f   : > { %v5106_v58 = vmul.f32 %v10772_v26, %v11325_v28  ;;  %3332 = vst [vmem:[#allocation2 + $0x1f9] sm:$0xff] %v2987_v25  ;;  %v2725_v14 = vadd.f32 %v2597_v13, %v16147_v54  ;;  %v2730_v7 = vadd.f32 %v2602_v40, %v16148_v1  ;;  %v11343_v36 = vpack.c.bf16 %v6902_v43, %v6901_v16  ;;  %v4229_v1 = vld [vmem:[#allocation2 + $0x1b2] sm:$0xff] }
 0x510   : > { %v4849_v0 = vadd.f32 %v4721_v21, %v4464_v47  ;;  %v2735_v51 = vadd.f32 %v2607_v53, %v16149_v38  ;;  %v4850_v35 = vadd.f32 %v4722_v61, %v4465_v20  ;;  %v5107_v27 = vmul.f32 %v11279_v9, %v10772_v26  ;;  %v3844_v47 = vld [vmem:[#allocation2 + $0x1b1] sm:$0xff] }
 0x511   : > { %v5491_v4 = vmul.f32 %v11286_v46, %v10899_v19  ;;  %v2857_v41 = vadd.f32 %v11359_v33, %v2725_v14  ;;  %v2862_v5 = vadd.f32 %v11359_v33, %v2730_v7  ;;  %v5492_v18 = vmul.f32 %v11288_v42, %v10899_v19  ;;  %v8067_v7 = vld [vmem:[#allocation2] sm:$0xff] }
 0x512   : > { %v5234_v29 = vadd.f32 %v5106_v58, %v4849_v0  ;;  %v2867_v56 = vadd.f32 %v11359_v33, %v2735_v51  ;;  %v5235_v30 = vadd.f32 %v5107_v27, %v4850_v35  ;;  %v5877_v55 = vmul.f32 %v10945_v2, %v11345_v39  ;;  %v2200_v45 = vpop.permute.xlu1 %2199  ;;  %v2220_v40 = vpop.permute.xlu0 %2219  ;;  %v16150_v51 = vld [vmem:[#allocation35_spill] sm:$0xff]  ;;  %v16151_v27 = vld [vmem:[#allocation37_spill] sm:$0xff] }
 0x513   : > { %v5878_v22 = vmul.f32 %v10945_v2, %v11347_v44  ;;  %7176 = vmatmul.bf16.gmra.mxu0 %v11262_v59  ;;  %v11375_v37 = vmax.f32 %v2857_v41, 0.0  ;;  %v2990_v49 = vmax.f32 %v2862_v5, 0.0  ;;  %v6262_v31 = vmul.f32 %v16130_v15, %v11354_v57  ;;  %v3845_v59 = vld [vmem:[#allocation2 + $0x1b9] sm:$0xff]  ;;  %v2240_v61 = vpop.permute.xlu2 %2239 }
 0x514   : > { %v5619_v16 = vadd.f32 %v5491_v4, %v5234_v29  ;;  %v2995_v13 = vmax.f32 %v2867_v56, 0.0  ;;  %v5620_v43 = vadd.f32 %v5492_v18, %v5235_v30  ;;  %v6263_v21 = vmul.f32 %v16130_v15, %v2964_v8  ;;  %v4230_v29 = vld [vmem:[#allocation2 + $0x1ba] sm:$0xff] }
 0x515   : > { %v6647_v53 = vmul.f32 %v10948_v52, %v11365_v12  ;;  %3330 = vst [vmem:[#allocation2 + $0x1e1] sm:$0xff] %v11375_v37  ;;  %v2600_v20 = vmul.f32 %v16056_v17, %v2200_v45  ;;  %v2605_v58 = vmul.f32 %v16056_v17, %v2220_v40  ;;  %v6648_v14 = vmul.f32 %v10948_v52, %v11372_v48  ;;  %v16152_v18 = vld [vmem:[#allocation30_spill] sm:$0xff] }
 0x516   : > { %v6005_v54 = vadd.f32 %v5877_v55, %v5619_v16  ;;  %3340 = vst [vmem:[#allocation2 + $0x259] sm:$0xff] %v2995_v13  ;;  %v2610_v6 = vmul.f32 %v16056_v17, %v2240_v61  ;;  %v6006_v8 = vadd.f32 %v5878_v22, %v5620_v43  ;;  %v11391_v0 = vmul.f32 %v8067_v7, %v10654_v3  ;;  %v11400_v16 = vld [vmem:[#allocation2 + $0x1c8] sm:$0xff] }
 0x517   : > { %v3973_v38 = vmul.f32 %v16136_v24, %v3844_v47  ;;  %3335 = vst [vmem:[#allocation2 + $0x219] sm:$0xff] %v2990_v49  ;;  %v2728_v35 = vadd.f32 %v2600_v20, %v16150_v51  ;;  %v2733_v4 = vadd.f32 %v2605_v58, %v16151_v27  ;;  %v3974_v5 = vmul.f32 %v16136_v24, %v3845_v59  ;;  %v11415_v51 = vld [vmem:[#allocation2 + $0x1ca] sm:$0xff] }
 0x518   : > { %v6390_v41 = vadd.f32 %v6262_v31, %v6005_v54  ;;  %v2738_v56 = vadd.f32 %v2610_v6, %v16152_v18  ;;  %v6391_v30 = vadd.f32 %v6263_v21, %v6006_v8  ;;  %v4358_v22 = vmul.f32 %v10700_v62, %v4229_v1  ;;  %v11405_v31 = vld [vmem:[#allocation2 + $0x1d0] sm:$0xff] }
 0x519   : > { %v4101_v55 = vadd.f32 %v3973_v38, %v11391_v0  ;;  %v2860_v47 = vadd.f32 %v11359_v33, %v2728_v35  ;;  %v2865_v49 = vadd.f32 %v11359_v33, %v2733_v4  ;;  %v4102_v45 = vadd.f32 %v3974_v5, %v11391_v0  ;;  %v11423_v5 = vld [vmem:[#allocation2 + $0x1d2] sm:$0xff] }
 0x51a   : > { %v6775_v13 = vadd.f32 %v6647_v53, %v6390_v41  ;;  %v2870_v40 = vadd.f32 %v11359_v33, %v2738_v56  ;;  %v6776_v43 = vadd.f32 %v6648_v14, %v6391_v30  ;;  %v4359_v21 = vmul.f32 %v10700_v62, %v4230_v29  ;;  %v2212_v6 = vpop.permute.xlu1 %2211  ;;  %v2232_v53 = vpop.permute.xlu0 %2231 }
 0x51b   : > { %v4486_v59 = vadd.f32 %v4358_v22, %v4101_v55  ;;  %v11409_v20 = vmax.f32 %v2860_v47, 0.0  ;;  %v2993_v61 = vmax.f32 %v2865_v49, 0.0  ;;  %v4743_v54 = vmul.f32 %v10742_v34, %v11400_v16  ;;  %v2312_v35 = vpop.permute.xlu2 %2311  ;;  %v16153_v47 = vld [vmem:[#allocation78_spill] sm:$0xff]  ;;  %v16154_v49 = vld [vmem:[#allocation43_spill] sm:$0xff] }
 0x51c   : > { %v6903_v58 = vmax.f32 %v6775_v13, 0.0  ;;  %v2998_v1 = vmax.f32 %v2870_v40, 0.0  ;;  %v6904_v8 = vmax.f32 %v6776_v43, 0.0  ;;  %v4487_v7 = vadd.f32 %v4359_v21, %v4102_v45  ;;  %v11425_v29 = vld [vmem:[#allocation2 + $0x1e0] sm:$0xff]  ;;  %v11432_v22 = vld [vmem:[#allocation2 + $0x1e8] sm:$0xff] }
 0x51d   : > { %v4744_v38 = vmul.f32 %v10742_v34, %v11405_v31  ;;  %3333 = vst [vmem:[#allocation2 + $0x201] sm:$0xff] %v11409_v20  ;;  %v2603_v14 = vmul.f32 %v16056_v17, %v2212_v6  ;;  %v2608_v27 = vmul.f32 %v16056_v17, %v2232_v53  ;;  %v4871_v4 = vadd.f32 %v4743_v54, %v4486_v59  ;;  %v16155_v40 = vld [vmem:[#allocation51_spill] sm:$0xff] }
 0x51e   : > { %v5128_v41 = vmul.f32 %v10772_v26, %v2983_v23  ;;  %3343 = vst [vmem:[#allocation2 + $0x279] sm:$0xff] %v2998_v1  ;;  %v2628_v18 = vmul.f32 %v16056_v17, %v2312_v35  ;;  %v11428_v56 = vpack.c.bf16 %v6904_v8, %v6903_v58  ;;  %v5129_v55 = vmul.f32 %v10772_v26, %v11282_v10  ;;  %v11443_v54 = vld [vmem:[#allocation2 + $0x1e2] sm:$0xff]  ;;  %v11449_v8 = vld [vmem:[#allocation2 + $0x1ea] sm:$0xff] }
 0x51f   : > { %v4872_v30 = vadd.f32 %v4744_v38, %v4487_v7  ;;  %3338 = vst [vmem:[#allocation2 + $0x241] sm:$0xff] %v2993_v61  ;;  %v2731_v32 = vadd.f32 %v2603_v14, %v16153_v47  ;;  %v2736_v23 = vadd.f32 %v2608_v27, %v16154_v49  ;;  %v5513_v45 = vmul.f32 %v10899_v19, %v11415_v51 }
 0x520   : > { %v5256_v13 = vadd.f32 %v5128_v41, %v4871_v4  ;;  %v2756_v43 = vadd.f32 %v2628_v18, %v16155_v40  ;;  %v5514_v59 = vmul.f32 %v10899_v19, %v11423_v5  ;;  %v5899_v58 = vmul.f32 %v10945_v2, %v11425_v29 }
 0x521   : > { %v5257_v21 = vadd.f32 %v5129_v55, %v4872_v30  ;;  %v2863_v61 = vadd.f32 %v11359_v33, %v2731_v32  ;;  %v2868_v1 = vadd.f32 %v11359_v33, %v2736_v23  ;;  %v5900_v53 = vmul.f32 %v10945_v2, %v11432_v22 }
 0x522   : > { %v5641_v6 = vadd.f32 %v5513_v45, %v5256_v13  ;;  %v2888_v7 = vadd.f32 %v11359_v33, %v2756_v43  ;;  %v6284_v14 = vmul.f32 %v16130_v15, %v11375_v37  ;;  %v6285_v35 = vmul.f32 %v16130_v15, %v11243_v60  ;;  %v2224_v55 = vpop.permute.xlu1 %2223  ;;  %v2244_v47 = vpop.permute.xlu0 %2243 }
 0x523   : > { %v5642_v38 = vadd.f32 %v5514_v59, %v5257_v21  ;;  %7181 = vmatmul.bf16.gmra.mxu0 %v11343_v36  ;;  %v2991_v27 = vmax.f32 %v2863_v61, 0.0  ;;  %v2996_v4 = vmax.f32 %v2868_v1, 0.0  ;;  %v6669_v18 = vmul.f32 %v10948_v52, %v11443_v54  ;;  %v2316_v36 = vpop.permute.xlu2 %2315  ;;  %v16156_v61 = vld [vmem:[#allocation84_spill] sm:$0xff] }
 0x524   : > { %v6027_v41 = vadd.f32 %v5899_v58, %v5641_v6  ;;  %v3016_v30 = vmax.f32 %v2888_v7, 0.0  ;;  %v6670_v49 = vmul.f32 %v10948_v52, %v11449_v8  ;;  %v3568_v23 = vmul.f32 %v11266_v11, %v10654_v3  ;;  %v16157_v6 = vld [vmem:[#allocation34_spill] sm:$0xff] }
 0x525   : > { %v6028_v32 = vadd.f32 %v5900_v53, %v5642_v38  ;;  %3336 = vst [vmem:[#allocation2 + $0x229] sm:$0xff] %v2991_v27  ;;  %v2606_v13 = vmul.f32 %v16056_v17, %v2224_v55  ;;  %v2611_v45 = vmul.f32 %v16056_v17, %v2244_v47  ;;  %v3569_v43 = vmul.f32 %v11272_v63, %v10654_v3  ;;  %v16158_v63 = vld [vmem:[#allocation69_spill] sm:$0xff] }
 0x526   : > { %v6412_v40 = vadd.f32 %v6284_v14, %v6027_v41  ;;  %3361 = vst [vmem:[#allocation2 + $0x381] sm:$0xff] %v3016_v30  ;;  %v2629_v21 = vmul.f32 %v16056_v17, %v2316_v36  ;;  %v3953_v58 = vmul.f32 %v11325_v28, %v16136_v24  ;;  %v3954_v11 = vmul.f32 %v11279_v9, %v16136_v24 }
 0x527   : > { %v6413_v59 = vadd.f32 %v6285_v35, %v6028_v32  ;;  %3341 = vst [vmem:[#allocation2 + $0x261] sm:$0xff] %v2996_v4  ;;  %v2734_v1 = vadd.f32 %v2606_v13, %v16156_v61  ;;  %v2739_v53 = vadd.f32 %v2611_v45, %v16157_v6  ;;  %v4338_v38 = vmul.f32 %v11286_v46, %v10700_v62  ;;  %v11484_v32 = vld [vmem:[#allocation2 + $0xb1] sm:$0xff] }
 0x528   : > { %v6797_v7 = vadd.f32 %v6669_v18, %v6412_v40  ;;  %v2757_v14 = vadd.f32 %v2629_v21, %v16158_v63  ;;  %v4081_v41 = vadd.f32 %v3953_v58, %v3568_v23  ;;  %v4082_v35 = vadd.f32 %v3954_v11, %v3569_v43 }
 0x529   : > { %v6798_v27 = vadd.f32 %v6670_v49, %v6413_v59  ;;  %v2866_v30 = vadd.f32 %v11359_v33, %v2734_v1  ;;  %v2871_v28 = vadd.f32 %v11359_v33, %v2739_v53  ;;  %v4339_v9 = vmul.f32 %v11288_v42, %v10700_v62  ;;  %v11494_v53 = vld [vmem:[#allocation2 + $0xc0] sm:$0xff] }
 0x52a   : > { %v6925_v55 = vmax.f32 %v6797_v7, 0.0  ;;  %v2889_v4 = vadd.f32 %v11359_v33, %v2757_v14  ;;  %v4466_v18 = vadd.f32 %v4338_v38, %v4081_v41  ;;  %v4723_v46 = vmul.f32 %v11345_v39, %v10742_v34  ;;  %v2236_v43 = vpop.permute.xlu1 %2235  ;;  %v2436_v21 = vpop.permute.xlu0 %2435  ;;  %v11496_v7 = vld [vmem:[#allocation2 + $0xc8] sm:$0xff]  ;;  %v16159_v41 = vld [vmem:[#allocation90_spill] sm:$0xff] }
 0x52b   : > { %v6926_v47 = vmax.f32 %v6798_v27, 0.0  ;;  %v2994_v49 = vmax.f32 %v2866_v30, 0.0  ;;  %v2999_v23 = vmax.f32 %v2871_v28, 0.0  ;;  %v4467_v13 = vadd.f32 %v4339_v9, %v4082_v35  ;;  %v2448_v11 = vpop.permute.xlu2 %2447  ;;  %v11501_v27 = vld [vmem:[#allocation2 + $0xc1] sm:$0xff] }
 0x52c   : > { %v4724_v36 = vmul.f32 %v11347_v44, %v10742_v34  ;;  %v3017_v45 = vmax.f32 %v2889_v4, 0.0  ;;  %v4851_v42 = vadd.f32 %v4723_v46, %v4466_v18  ;;  %v5108_v59 = vmul.f32 %v11354_v57, %v10772_v26  ;;  %v16160_v30 = vld [vmem:[#allocation99_spill] sm:$0xff]  ;;  %v11507_v4 = vld [vmem:[#allocation2 + $0xc9] sm:$0xff] }
 0x52d   : > { %v7037_v40 = vpack.c.bf16 %v6926_v47, %v6925_v55  ;;  %3339 = vst [vmem:[#allocation2 + $0x249] sm:$0xff] %v2994_v49  ;;  %v2609_v58 = vmul.f32 %v16056_v17, %v2236_v43  ;;  %v2659_v61 = vmul.f32 %v16056_v17, %v2436_v21  ;;  %v5109_v6 = vmul.f32 %v10772_v26, %v11484_v32  ;;  %v11509_v47 = vld [vmem:[#allocation2 + $0xc2] sm:$0xff]  ;;  %v16161_v18 = vld [vmem:[#allocation105_spill] sm:$0xff] }
 0x52e   : > { %v4852_v1 = vadd.f32 %v4724_v36, %v4467_v13  ;;  %3362 = vst [vmem:[#allocation2 + $0x391] sm:$0xff] %v3017_v45  ;;  %v2662_v38 = vmul.f32 %v16056_v17, %v2448_v11  ;;  %v5236_v63 = vadd.f32 %v5108_v59, %v4851_v42  ;;  %v5493_v14 = vmul.f32 %v11365_v12, %v10899_v19  ;;  %v11516_v36 = vld [vmem:[#allocation2 + $0xca] sm:$0xff] }
 0x52f   : > { %7241 = vmatmul.bf16.vlgmr.msra.gmra.mxu1 %v7037_v40  ;;  %3344 = vst [vmem:[#allocation2 + $0x289] sm:$0xff] %v2999_v23  ;;  %v2737_v35 = vadd.f32 %v2609_v58, %v16159_v41  ;;  %v2787_v28 = vadd.f32 %v2659_v61, %v16160_v30  ;;  %v5494_v9 = vmul.f32 %v11372_v48, %v10899_v19  ;;  %v3846_v61 = vld [vmem:[#allocation2 + $0x1c9] sm:$0xff] }
 0x530   : > { %v5237_v55 = vadd.f32 %v5109_v6, %v4852_v1  ;;  %v2790_v46 = vadd.f32 %v2662_v38, %v16161_v18  ;;  %v5621_v49 = vadd.f32 %v5493_v14, %v5236_v63  ;;  %v5879_v13 = vmul.f32 %v10945_v2, %v11494_v53 }
 0x531   : > { %v5880_v23 = vmul.f32 %v10945_v2, %v11496_v7  ;;  %v2869_v45 = vadd.f32 %v11359_v33, %v2737_v35  ;;  %v2919_v40 = vadd.f32 %v11359_v33, %v2787_v28  ;;  %v6264_v21 = vmul.f32 %v16130_v15, %v11501_v27 }
 0x532   : > { %v5622_v43 = vadd.f32 %v5494_v9, %v5237_v55  ;;  %v2922_v42 = vadd.f32 %v11359_v33, %v2790_v46  ;;  %v6007_v59 = vadd.f32 %v5879_v13, %v5621_v49  ;;  %v6265_v58 = vmul.f32 %v16130_v15, %v11507_v4  ;;  %v2308_v35 = vpop.permute.xlu1 %2307  ;;  %v2320_v30 = vpop.permute.xlu0 %2319 }
 0x533   : > { %v6649_v11 = vmul.f32 %v10948_v52, %v11509_v47  ;;  %7186 = vmatmul.bf16.gmra.mxu0 %v11428_v56  ;;  %v2997_v1 = vmax.f32 %v2869_v45, 0.0  ;;  %v3047_v6 = vmax.f32 %v2919_v40, 0.0  ;;  %v6650_v63 = vmul.f32 %v10948_v52, %v11516_v36  ;;  %v2452_v18 = vpop.permute.xlu2 %2451  ;;  %v16162_v40 = vld [vmem:[#allocation59_spill] sm:$0xff] }
 0x534   : > { %v6008_v38 = vadd.f32 %v5880_v23, %v5622_v43  ;;  %v3050_v14 = vmax.f32 %v2922_v42, 0.0  ;;  %v6392_v41 = vadd.f32 %v6264_v21, %v6007_v59  ;;  %v3590_v28 = vmul.f32 %v11400_v16, %v10654_v3  ;;  %v16163_v21 = vld [vmem:[#allocation65_spill] sm:$0xff] }
 0x535   : > { %v3591_v55 = vmul.f32 %v11405_v31, %v10654_v3  ;;  %3342 = vst [vmem:[#allocation2 + $0x271] sm:$0xff] %v2997_v1  ;;  %v2627_v56 = vmul.f32 %v16056_v17, %v2308_v35  ;;  %v2630_v46 = vmul.f32 %v16056_v17, %v2320_v30  ;;  %v3975_v49 = vmul.f32 %v16136_v24, %v3846_v61  ;;  %v16164_v1 = vld [vmem:[#allocation142_spill] sm:$0xff] }
 0x536   : > { %v6393_v9 = vadd.f32 %v6265_v58, %v6008_v38  ;;  %3395 = vst [vmem:[#allocation2 + $0x549] sm:$0xff] %v3050_v14  ;;  %v6777_v13 = vadd.f32 %v6649_v11, %v6392_v41  ;;  %v2663_v23 = vmul.f32 %v16056_v17, %v2452_v18  ;;  %v3976_v45 = vmul.f32 %v16136_v24, %v11282_v10 }
 0x537   : > { %v4360_v16 = vmul.f32 %v11415_v51, %v10700_v62  ;;  %3392 = vst [vmem:[#allocation2 + $0x529] sm:$0xff] %v3047_v6  ;;  %v2755_v43 = vadd.f32 %v2627_v56, %v16162_v40  ;;  %v2758_v42 = vadd.f32 %v2630_v46, %v16163_v21  ;;  %v4103_v59 = vadd.f32 %v3975_v49, %v3590_v28  ;;  %v11558_v28 = vld [vmem:[#allocation2 + $0x1f8] sm:$0xff] }
 0x538   : > { %v6778_v31 = vadd.f32 %v6650_v63, %v6393_v9  ;;  %v6905_v58 = vmax.f32 %v6777_v13, 0.0  ;;  %v2791_v61 = vadd.f32 %v2663_v23, %v16164_v1  ;;  %v4104_v38 = vadd.f32 %v3976_v45, %v3591_v55  ;;  %v11568_v45 = vld [vmem:[#allocation2 + $0x1fa] sm:$0xff] }
 0x539   : > { %v4361_v11 = vmul.f32 %v11423_v5, %v10700_v62  ;;  %v11548_v10 = vadd.f32 %v11359_v33, %v2755_v43  ;;  %v11551_v51 = vadd.f32 %v11359_v33, %v2758_v42  ;;  %v4488_v6 = vadd.f32 %v4360_v16, %v4103_v59  ;;  %v11560_v5 = vld [vmem:[#allocation2 + $0x200] sm:$0xff] }
 0x53a   : > { %v6906_v14 = vmax.f32 %v6778_v31, 0.0  ;;  %v2923_v63 = vadd.f32 %v11359_v33, %v2791_v61  ;;  %v4745_v35 = vmul.f32 %v11425_v29, %v10742_v34  ;;  %v4746_v30 = vmul.f32 %v11432_v22, %v10742_v34  ;;  %v11570_v16 = vld [vmem:[#allocation2 + $0x202] sm:$0xff]  ;;  %v2440_v31 = vpop.permute.xlu1 %2439  ;;  %v2324_v42 = vpop.permute.xlu0 %2323 }
 0x53b   : > { %v4489_v41 = vadd.f32 %v4361_v11, %v4104_v38  ;;  %v14939_v9 = vmax.f32 %v11548_v10, 0.0  ;;  %v14938_v56 = vmax.f32 %v11551_v51, 0.0  ;;  %v5130_v18 = vmul.f32 %v10772_v26, %v11375_v37  ;;  %v2336_v21 = vpop.permute.xlu2 %2335 }
 0x53c   : > { %v7027_v55 = vpack.c.bf16 %v6906_v14, %v6905_v58  ;;  %v3051_v46 = vmax.f32 %v2923_v63, 0.0  ;;  %v4873_v49 = vadd.f32 %v4745_v35, %v4488_v6  ;;  %v5131_v23 = vmul.f32 %v10772_v26, %v11243_v60  ;;  %v16165_v35 = vld [vmem:[#allocation98_spill] sm:$0xff] }
 0x53d   : > { %v4874_v13 = vadd.f32 %v4746_v30, %v4489_v41  ;;  %3360 = vst [vmem:[#allocation2 + $0x379] sm:$0xff] %v14939_v9  ;;  %v5515_v40 = vmul.f32 %v11443_v54, %v10899_v19  ;;  %v5516_v37 = vmul.f32 %v11449_v8, %v10899_v19  ;;  %v5901_v43 = vmul.f32 %v10945_v2, %v11558_v28 }
 0x53e   : > { %v5902_v60 = vmul.f32 %v10945_v2, %v11560_v5  ;;  %3396 = vst [vmem:[#allocation2 + $0x559] sm:$0xff] %v3051_v46  ;;  %v5258_v59 = vadd.f32 %v5130_v18, %v4873_v49  ;;  %v6286_v1 = vmul.f32 %v16130_v15, %v2987_v25  ;;  %v6287_v61 = vmul.f32 %v16130_v15, %v11409_v20  ;;  %v16166_v18 = vld [vmem:[#allocation63_spill] sm:$0xff] }
 0x53f   : > { %v5259_v58 = vadd.f32 %v5131_v23, %v4874_v13  ;;  %3363 = vst [vmem:[#allocation2 + $0x399] sm:$0xff] %v14938_v56  ;;  %v6671_v38 = vmul.f32 %v10948_v52, %v11568_v45  ;;  %v6672_v11 = vmul.f32 %v10948_v52, %v11570_v16  ;;  %v2660_v14 = vmul.f32 %v16056_v17, %v2440_v31 }
 0x540   : > { %v2634_v6 = vmul.f32 %v16056_v17, %v2336_v21  ;;  %v5643_v63 = vadd.f32 %v5515_v40, %v5258_v59  ;;  %v2631_v25 = vmul.f32 %v16056_v17, %v2324_v42  ;;  %v3570_v41 = vmul.f32 %v11345_v39, %v10654_v3  ;;  %v16167_v21 = vld [vmem:[#allocation57_spill] sm:$0xff] }
 0x541   : > { %v5644_v50 = vadd.f32 %v5516_v37, %v5259_v58  ;;  %v2788_v30 = vadd.f32 %v2660_v14, %v16165_v35  ;;  %v3571_v49 = vmul.f32 %v11347_v44, %v10654_v3  ;;  %v3955_v13 = vmul.f32 %v11354_v57, %v16136_v24  ;;  %v11619_v35 = vld [vmem:[#allocation2 + $0xd8] sm:$0xff] }
 0x542   : > { %v2762_v46 = vadd.f32 %v2634_v6, %v16166_v18  ;;  %v6029_v23 = vadd.f32 %v5901_v43, %v5643_v63  ;;  %v2759_v40 = vadd.f32 %v2631_v25, %v16167_v21  ;;  %v3956_v37 = vmul.f32 %v11484_v32, %v16136_v24  ;;  %v2444_v21 = vpop.permute.xlu1 %2443 }
 0x543   : > { %v6030_v31 = vadd.f32 %v5902_v60, %v5644_v50  ;;  %7191 = vmatmul.bf16.gmra.mxu0 %v7027_v55  ;;  %v11608_v39 = vadd.f32 %v11359_v33, %v2788_v30  ;;  %v4083_v59 = vadd.f32 %v3955_v13, %v3570_v41  ;;  %v4340_v44 = vmul.f32 %v11365_v12, %v10700_v62  ;;  %v11621_v12 = vld [vmem:[#allocation2 + $0xe0] sm:$0xff] }
 0x544   : > { %v2894_v42 = vadd.f32 %v11359_v33, %v2762_v46  ;;  %v6414_v58 = vadd.f32 %v6286_v1, %v6029_v23  ;;  %v2891_v57 = vadd.f32 %v11359_v33, %v2759_v40  ;;  %v4084_v43 = vadd.f32 %v3956_v37, %v3571_v49  ;;  %v11633_v30 = vld [vmem:[#allocation2 + $0xe1] sm:$0xff] }
 0x545   : > { %16168 = vst [vmem:[#allocation173_spill] sm:$0xff] %v11608_v39  ;;  %v6415_v14 = vadd.f32 %v6287_v61, %v6030_v31  ;;  %v14937_v60 = vmax.f32 %v11608_v39, 0.0  ;;  %v4341_v32 = vmul.f32 %v11372_v48, %v10700_v62  ;;  %v4468_v55 = vadd.f32 %v4340_v44, %v4083_v59  ;;  %v11637_v23 = vld [vmem:[#allocation2 + $0xda] sm:$0xff]  ;;  %v11639_v31 = vld [vmem:[#allocation2 + $0xe2] sm:$0xff]  ;;  %v2340_v44 = vpop.permute.xlu2 %2339 }
 0x546   : > { %v3022_v6 = vmax.f32 %v2894_v42, 0.0  ;;  %v6799_v63 = vadd.f32 %v6671_v38, %v6414_v58  ;;  %v3019_v25 = vmax.f32 %v2891_v57, 0.0  ;;  %v4725_v41 = vmul.f32 %v11494_v53, %v10742_v34  ;;  %v2456_v58 = vpop.permute.xlu0 %2455 }
 0x547   : > { %v6800_v50 = vadd.f32 %v6672_v11, %v6415_v14  ;;  %3393 = vst [vmem:[#allocation2 + $0x531] sm:$0xff] %v14937_v60  ;;  %v4469_v1 = vadd.f32 %v4341_v32, %v4084_v43  ;;  %v4726_v61 = vmul.f32 %v11496_v7, %v10742_v34  ;;  %v5110_v48 = vmul.f32 %v11501_v27, %v10772_v26  ;;  %v11631_v11 = vld [vmem:[#allocation2 + $0xd9] sm:$0xff]  ;;  %v3848_v32 = vld [vmem:[#allocation2 + $0x1e1] sm:$0xff] }
 0x548   : > { %v5111_v38 = vmul.f32 %v11507_v4, %v10772_v26  ;;  %v6927_v18 = vmax.f32 %v6799_v63, 0.0  ;;  %3367 = vst [vmem:[#allocation2 + $0x3c9] sm:$0xff] %v3022_v6  ;;  %v4853_v49 = vadd.f32 %v4725_v41, %v4468_v55  ;;  %v5495_v13 = vmul.f32 %v11509_v47, %v10899_v19  ;;  %v3849_v41 = vld [vmem:[#allocation2 + $0x1e9] sm:$0xff] }
 0x549   : > { %v6928_v46 = vmax.f32 %v6800_v50, 0.0  ;;  %3364 = vst [vmem:[#allocation2 + $0x3a9] sm:$0xff] %v3019_v25  ;;  %v4854_v40 = vadd.f32 %v4726_v61, %v4469_v1  ;;  %v5496_v37 = vmul.f32 %v11516_v36, %v10899_v19  ;;  %v5881_v42 = vmul.f32 %v10945_v2, %v11619_v35 }
 0x54a   : > { %v5882_v59 = vmul.f32 %v10945_v2, %v11621_v12  ;;  %v5238_v57 = vadd.f32 %v5110_v48, %v4853_v49  ;;  %v6266_v43 = vmul.f32 %v16130_v15, %v11631_v11  ;;  %v6267_v6 = vmul.f32 %v16130_v15, %v11633_v30 }
 0x54b   : > { %v7038_v14 = vpack.c.bf16 %v6928_v46, %v6927_v18  ;;  %v5239_v55 = vadd.f32 %v5111_v38, %v4854_v40  ;;  %v6651_v63 = vmul.f32 %v10948_v52, %v11637_v23  ;;  %v6652_v50 = vmul.f32 %v10948_v52, %v11639_v31  ;;  %v16169_v38 = vld [vmem:[#allocation77_spill] sm:$0xff] }
 0x54c   : > { %v2661_v25 = vmul.f32 %v16056_v17, %v2444_v21  ;;  %v5623_v1 = vadd.f32 %v5495_v13, %v5238_v57  ;;  %v2635_v61 = vmul.f32 %v16056_v17, %v2340_v44  ;;  %v2664_v48 = vmul.f32 %v16056_v17, %v2456_v58  ;;  %v16170_v21 = vld [vmem:[#allocation114_spill] sm:$0xff] }
 0x54d   : > { %7246 = vmatmul.bf16.gmra.mxu1 %v7038_v14  ;;  %v3592_v18 = vmul.f32 %v11425_v29, %v10654_v3  ;;  %v5624_v46 = vadd.f32 %v5496_v37, %v5239_v55  ;;  %v3593_v40 = vmul.f32 %v11432_v22, %v10654_v3  ;;  %v3977_v60 = vmul.f32 %v16136_v24, %v3848_v32  ;;  %v16171_v14 = vld [vmem:[#allocation83_spill] sm:$0xff] }
 0x54e   : > { %v2789_v49 = vadd.f32 %v2661_v25, %v16169_v38  ;;  %v6009_v56 = vadd.f32 %v5881_v42, %v5623_v1  ;;  %v2763_v9 = vadd.f32 %v2635_v61, %v16170_v21  ;;  %v2792_v13 = vadd.f32 %v2664_v48, %v16171_v14  ;;  %v11674_v25 = vld [vmem:[#allocation2 + $0x1f9] sm:$0xff] }
 0x54f   : > { %v3978_v44 = vmul.f32 %v16136_v24, %v3849_v41  ;;  %v6010_v57 = vadd.f32 %v5882_v59, %v5624_v46  ;;  %v4105_v29 = vadd.f32 %v3977_v60, %v3592_v18  ;;  %v4362_v37 = vmul.f32 %v11443_v54, %v10700_v62  ;;  %v11689_v46 = vld [vmem:[#allocation2 + $0x218] sm:$0xff] }
 0x550   : > { %v11668_v58 = vadd.f32 %v11359_v33, %v2789_v49  ;;  %v6394_v55 = vadd.f32 %v6266_v43, %v6009_v56  ;;  %v2895_v22 = vadd.f32 %v11359_v33, %v2763_v9  ;;  %v2924_v32 = vadd.f32 %v11359_v33, %v2792_v13  ;;  %v11681_v56 = vld [vmem:[#allocation2 + $0x210] sm:$0xff]  ;;  %v11693_v38 = vld [vmem:[#allocation2 + $0x219] sm:$0xff] }
 0x551   : > { %v4106_v42 = vadd.f32 %v3978_v44, %v3593_v40  ;;  %v6395_v1 = vadd.f32 %v6267_v6, %v6010_v57  ;;  %v4363_v59 = vmul.f32 %v11449_v8, %v10700_v62  ;;  %v4490_v41 = vadd.f32 %v4362_v37, %v4105_v29  ;;  %v11699_v14 = vld [vmem:[#allocation2 + $0x212] sm:$0xff]  ;;  %v11701_v13 = vld [vmem:[#allocation2 + $0x21a] sm:$0xff]  ;;  %v2328_v44 = vpop.permute.xlu1 %2327 }
 0x552   : > { %16172 = vst [vmem:[#allocation133_spill] sm:$0xff] %v11668_v58  ;;  %v14940_v61 = vmax.f32 %v11668_v58, 0.0  ;;  %v6779_v48 = vadd.f32 %v6651_v63, %v6394_v55  ;;  %v3023_v60 = vmax.f32 %v2895_v22, 0.0  ;;  %v3052_v18 = vmax.f32 %v2924_v32, 0.0  ;;  %v11691_v63 = vld [vmem:[#allocation2 + $0x211] sm:$0xff]  ;;  %v2472_v22 = vpop.permute.xlu2 %2471  ;;  %v2460_v32 = vpop.permute.xlu0 %2459 }
 0x553   : > { %v4747_v54 = vmul.f32 %v11558_v28, %v10742_v34  ;;  %v6780_v9 = vadd.f32 %v6652_v50, %v6395_v1  ;;  %v4491_v43 = vadd.f32 %v4363_v59, %v4106_v42  ;;  %v4748_v6 = vmul.f32 %v11560_v5, %v10742_v34 }
 0x554   : > { %3394 = vst [vmem:[#allocation2 + $0x541] sm:$0xff] %v14940_v61  ;;  %v5132_v8 = vmul.f32 %v10772_v26, %v11674_v25  ;;  %v6907_v49 = vmax.f32 %v6779_v48, 0.0  ;;  %v5133_v50 = vmul.f32 %v10772_v26, %v11409_v20  ;;  %v5517_v21 = vmul.f32 %v11568_v45, %v10899_v19  ;;  %v16175_v61 = vld [vmem:[#allocation141_spill] sm:$0xff] }
 0x555   : > { %3368 = vst [vmem:[#allocation2 + $0x3d9] sm:$0xff] %v3023_v60  ;;  %v4875_v40 = vadd.f32 %v4747_v54, %v4490_v41  ;;  %v6908_v57 = vmax.f32 %v6780_v9, 0.0  ;;  %v4876_v29 = vadd.f32 %v4748_v6, %v4491_v43  ;;  %v5518_v37 = vmul.f32 %v11570_v16, %v10899_v19 }
 0x556   : > { %3397 = vst [vmem:[#allocation2 + $0x561] sm:$0xff] %v3052_v18  ;;  %v5903_v55 = vmul.f32 %v10945_v2, %v11681_v56  ;;  %v5904_v42 = vmul.f32 %v10945_v2, %v11689_v46  ;;  %v6288_v1 = vmul.f32 %v16130_v15, %v11691_v63  ;;  %v6289_v59 = vmul.f32 %v16130_v15, %v11693_v38 }
 0x557   : > { %v5260_v20 = vadd.f32 %v5132_v8, %v4875_v40  ;;  %v7028_v41 = vpack.c.bf16 %v6908_v57, %v6907_v49  ;;  %v5261_v48 = vadd.f32 %v5133_v50, %v4876_v29  ;;  %v6673_v60 = vmul.f32 %v10948_v52, %v11699_v14  ;;  %v16173_v29 = vld [vmem:[#allocation64_spill] sm:$0xff] }
 0x558   : > { %v6674_v18 = vmul.f32 %v10948_v52, %v11701_v13  ;;  %v2632_v9 = vmul.f32 %v16056_v17, %v2328_v44  ;;  %v2668_v43 = vmul.f32 %v16056_v17, %v2472_v22  ;;  %v2665_v6 = vmul.f32 %v16056_v17, %v2460_v32 }
 0x559   : > { %v5645_v54 = vadd.f32 %v5517_v21, %v5260_v20  ;;  %7196 = vmatmul.bf16.gmra.mxu0 %v7028_v41  ;;  %v5646_v8 = vadd.f32 %v5518_v37, %v5261_v48  ;;  %v3572_v40 = vmul.f32 %v11494_v53, %v10654_v3  ;;  %v3573_v49 = vmul.f32 %v11496_v7, %v10654_v3  ;;  %v16174_v20 = vld [vmem:[#allocation147_spill] sm:$0xff] }
 0x55a   : > { %v3957_v50 = vmul.f32 %v11501_v27, %v16136_v24  ;;  %v2760_v21 = vadd.f32 %v2632_v9, %v16173_v29  ;;  %v2796_v44 = vadd.f32 %v2668_v43, %v16174_v20  ;;  %v2793_v22 = vadd.f32 %v2665_v6, %v16175_v61  ;;  %v11741_v61 = vld [vmem:[%s14848_s5] ss:$0 sm:$0xff] }
 0x55b   : > { %v6031_v57 = vadd.f32 %v5903_v55, %v5645_v54  ;;  %v6032_v58 = vadd.f32 %v5904_v42, %v5646_v8  ;;  %v3958_v37 = vmul.f32 %v11507_v4, %v16136_v24  ;;  %v4342_v53 = vmul.f32 %v11509_v47, %v10700_v62 }
 0x55c   : > { %v4085_v32 = vadd.f32 %v3957_v50, %v3572_v40  ;;  %v11734_v7 = vadd.f32 %v11359_v33, %v2760_v21  ;;  %v2928_v27 = vadd.f32 %v11359_v33, %v2796_v44  ;;  %v2925_v55 = vadd.f32 %v11359_v33, %v2793_v22  ;;  %v11750_v40 = vld [vmem:[#allocation2 + $0xf0] sm:$0xff] }
 0x55d   : > { %v6416_v41 = vadd.f32 %v6288_v1, %v6031_v57  ;;  %v6417_v48 = vadd.f32 %v6289_v59, %v6032_v58  ;;  %v4086_v42 = vadd.f32 %v3958_v37, %v3573_v49  ;;  %v4343_v4 = vmul.f32 %v11516_v36, %v10700_v62  ;;  %16177 = vst [vmem:[#allocation174_spill] sm:$0xff] %v11750_v40  ;;  %v11752_v49 = vld [vmem:[#allocation2 + $0xf8] sm:$0xff] }
 0x55e   : > { %16176 = vst [vmem:[#allocation113_spill] sm:$0xff] %v11734_v7  ;;  %v4470_v54 = vadd.f32 %v4342_v53, %v4085_v32  ;;  %v14942_v1 = vmax.f32 %v11734_v7, 0.0  ;;  %v3056_v9 = vmax.f32 %v2928_v27, 0.0  ;;  %v3053_v43 = vmax.f32 %v2925_v55, 0.0  ;;  %v11754_v50 = vld [vmem:[#allocation2 + $0xf1] sm:$0xff]  ;;  %v11767_v37 = vld [vmem:[#allocation2 + $0xf9] sm:$0xff] }
 0x55f   : > { %v6801_v47 = vadd.f32 %v6673_v60, %v6416_v41  ;;  %v6802_v6 = vadd.f32 %v6674_v18, %v6417_v48  ;;  %v4471_v8 = vadd.f32 %v4343_v4, %v4086_v42  ;;  %v4727_v58 = vmul.f32 %v11619_v35, %v10742_v34  ;;  %16178 = vst [vmem:[#allocation177_spill] sm:$0xff] %v11752_v49  ;;  %v11769_v32 = vld [vmem:[#allocation2 + $0xf2] sm:$0xff]  ;;  %v11771_v53 = vld [vmem:[#allocation2 + $0xfa] sm:$0xff]  ;;  %v2332_v41 = vpop.permute.xlu1 %2331  ;;  %v2476_v4 = vpop.permute.xlu2 %2475 }
 0x560   : > { %v4728_v59 = vmul.f32 %v11621_v12, %v10742_v34  ;;  %16179 = vst [vmem:[#allocation119_spill] sm:$0xff] %v11754_v50  ;;  %v7162_v60 = vpop.f32.mrf.mxu0  ;;  %v5112_v18 = vmul.f32 %v11631_v11, %v10772_v26  ;;  %v5113_v57 = vmul.f32 %v11633_v30, %v10772_v26  ;;  %v5497_v29 = vmul.f32 %v11637_v23, %v10899_v19 }
 0x561   : > { %v6929_v36 = vmax.f32 %v6801_v47, 0.0  ;;  %3365 = vst [vmem:[#allocation2 + $0x3b1] sm:$0xff] %v14942_v1  ;;  %v6930_v21 = vmax.f32 %v6802_v6, 0.0  ;;  %v11765_v20 = vadd.f32 %v11741_v61, %v7162_v60  ;;  %v4855_v44 = vadd.f32 %v4727_v58, %v4470_v54  ;;  %v2344_v54 = vpop.permute.xlu0 %2343  ;;  %v3877_v58 = vld [vmem:[#allocation2 + $0x369] sm:$0xff] }
 0x562   : > { %3401 = vst [vmem:[#allocation2 + $0x591] sm:$0xff] %v3056_v9  ;;  %v4856_v22 = vadd.f32 %v4728_v59, %v4471_v8  ;;  %v5498_v27 = vmul.f32 %v11639_v31, %v10899_v19  ;;  %v5883_v55 = vmul.f32 %v10945_v2, %v11750_v40  ;;  %v5884_v48 = vmul.f32 %v10945_v2, %v11752_v49  ;;  %v4261_v59 = vld [vmem:[#allocation2 + $0x362] sm:$0xff]  ;;  %v16184_v40 = vld [vmem:[#allocation97_spill] sm:$0xff] }
 0x563   : > { %16180 = vst [vmem:[#allocation178_spill] sm:$0xff] %v11767_v37  ;;  %v6268_v42 = vmul.f32 %v16130_v15, %v11754_v50  ;;  %v7039_v47 = vpack.c.bf16 %v6930_v21, %v6929_v36  ;;  %v7482_v9 = vmax.f32 %v11765_v20, 0.0  ;;  %v5240_v6 = vadd.f32 %v5112_v18, %v4855_v44  ;;  %v4262_v20 = vld [vmem:[#allocation2 + $0x36a] sm:$0xff]  ;;  %v16183_v44 = vld [vmem:[#allocation106_spill] sm:$0xff] }
 0x564   : > { %16181 = vst [vmem:[#allocation8_spill] sm:$0xff] %v11769_v32  ;;  %v5241_v8 = vadd.f32 %v5113_v57, %v4856_v22  ;;  %v6269_v60 = vmul.f32 %v16130_v15, %v11767_v37  ;;  %v6653_v1 = vmul.f32 %v10948_v52, %v11769_v32  ;;  %v6654_v7 = vmul.f32 %v10948_v52, %v11771_v53 }
 0x565   : > { %16182 = vst [vmem:[#allocation123_spill] sm:$0xff] %v11771_v53  ;;  %v2633_v39 = vmul.f32 %v16056_v17, %v2332_v41  ;;  %7251 = vmatmul.bf16.gmra.mxu1 %v7039_v47  ;;  %v5625_v36 = vadd.f32 %v5497_v29, %v5240_v6  ;;  %v2669_v18 = vmul.f32 %v16056_v17, %v2476_v4  ;;  %v16185_v47 = vld [vmem:[#allocation112_spill] sm:$0xff] }
 0x566   : > { %3398 = vst [vmem:[#allocation2 + $0x571] sm:$0xff] %v3053_v43  ;;  %v3876_v43 = vld [vmem:[#allocation2 + $0x361] sm:$0xff]  ;;  %v5626_v21 = vadd.f32 %v5498_v27, %v5241_v8  ;;  %v2636_v57 = vmul.f32 %v16056_v17, %v2344_v54  ;;  %v4006_v50 = vmul.f32 %v16136_v24, %v3877_v58  ;;  %v4390_v32 = vmul.f32 %v10700_v62, %v4261_v59 }
 0x567   : > { %v2761_v22 = vadd.f32 %v2633_v39, %v16183_v44  ;;  %v4005_v37 = vmul.f32 %v16136_v24, %v3876_v43  ;;  %v6011_v49 = vadd.f32 %v5883_v55, %v5625_v36  ;;  %v2797_v41 = vadd.f32 %v2669_v18, %v16184_v40  ;;  %v11805_v40 = vld [vmem:[#allocation2 + $0x380] sm:$0xff] }
 0x568   : > { %v6012_v53 = vadd.f32 %v5884_v48, %v5626_v21  ;;  %v2764_v29 = vadd.f32 %v2636_v57, %v16185_v47  ;;  %v7164_v4 = vpop.f32.mrf.mxu0  ;;  %v4134_v6 = vadd.f32 %v4006_v50, %v11391_v0  ;;  %v4391_v39 = vmul.f32 %v10700_v62, %v4262_v20  ;;  %v11803_v48 = vld [vmem:[#allocation2 + $0x378] sm:$0xff]  ;;  %16186 = vst [vmem:[#allocation181_spill] sm:$0xff] %v11805_v40 }
 0x569   : > { %v2893_v27 = vadd.f32 %v11359_v33, %v2761_v22  ;;  %v4133_v54 = vadd.f32 %v4005_v37, %v11391_v0  ;;  %v6396_v8 = vadd.f32 %v6268_v42, %v6011_v49  ;;  %v2929_v58 = vadd.f32 %v11359_v33, %v2797_v41  ;;  %v11808_v37 = vld [vmem:[#allocation2 + $0x381] sm:$0xff]  ;;  %v11821_v22 = vld [vmem:[#allocation2 + $0x390] sm:$0xff] }
 0x56a   : > { %v6397_v43 = vadd.f32 %v6269_v60, %v6012_v53  ;;  %v2896_v55 = vadd.f32 %v11359_v33, %v2764_v29  ;;  %v7165_v36 = vadd.f32 %v11741_v61, %v7164_v4  ;;  %v4519_v18 = vadd.f32 %v4391_v39, %v4134_v6  ;;  %16187 = vst [vmem:[#allocation182_spill] sm:$0xff] %v11808_v37  ;;  %v11810_v0 = vld [vmem:[#allocation2 + $0x37a] sm:$0xff]  ;;  %v11812_v60 = vld [vmem:[#allocation2 + $0x382] sm:$0xff]  ;;  %v11831_v4 = vld [vmem:[#allocation2 + $0x392] sm:$0xff] }
 0x56b   : > { %v3021_v59 = vmax.f32 %v2893_v27, 0.0  ;;  %v4518_v21 = vadd.f32 %v4390_v32, %v4133_v54  ;;  %16188 = vst [vmem:[#allocation122_spill] sm:$0xff] %v11810_v0  ;;  %v6781_v50 = vadd.f32 %v6653_v1, %v6396_v8  ;;  %v3057_v53 = vmax.f32 %v2929_v58, 0.0  ;;  %v11823_v1 = vld [vmem:[#allocation2 + $0x398] sm:$0xff] }
 0x56c   : > { %v6782_v49 = vadd.f32 %v6654_v7, %v6397_v43  ;;  %v3024_v42 = vmax.f32 %v2896_v55, 0.0  ;;  %16189 = vst [vmem:[#allocation183_spill] sm:$0xff] %v11812_v60  ;;  %v7483_v33 = vmax.f32 %v7165_v36, 0.0  ;;  %v4775_v57 = vmul.f32 %v10742_v34, %v11803_v48  ;;  %v11825_v7 = vld [vmem:[#allocation2 + $0x391] sm:$0xff]  ;;  %v11837_v8 = vld [vmem:[#allocation2 + $0x39a] sm:$0xff] }
 0x56d   : > { %3366 = vst [vmem:[#allocation2 + $0x3c1] sm:$0xff] %v3021_v59  ;;  %v4776_v20 = vmul.f32 %v10742_v34, %v11805_v40  ;;  %v16190_v32 = vmax.f32 %v11548_v10, 0.0  ;;  %v6909_v41 = vmax.f32 %v6781_v50, 0.0  ;;  %v5161_v29 = vmul.f32 %v10772_v26, %v11808_v37  ;;  %v3851_v36 = vld [vmem:[#allocation2 + $0x201] sm:$0xff]  ;;  %v16199_v37 = vld [vmem:[#allocation58_spill] sm:$0xff] }
 0x56e   : > { %16191 = vst [vmem:[#allocation138_spill] sm:$0xff] %v11821_v22  ;;  %v6910_v47 = vmax.f32 %v6782_v49, 0.0  ;;  %v5545_v27 = vmul.f32 %v10899_v19, %v11810_v0  ;;  %v11833_v10 = vadd.f32 %v7483_v33, %v7482_v9  ;;  %v4903_v54 = vadd.f32 %v4775_v57, %v4518_v21 }
 0x56f   : > { %v5160_v44 = vmul.f32 %v10772_v26, %v16190_v32  ;;  %16192 = vst [vmem:[#allocation184_spill] sm:$0xff] %v11823_v1  ;;  %v4904_v6 = vadd.f32 %v4776_v20, %v4519_v18  ;;  %v5546_v39 = vmul.f32 %v10899_v19, %v11812_v60  ;;  %v5931_v58 = vmul.f32 %v10945_v2, %v11821_v22 }
 0x570   : > { %16193 = vst [vmem:[#allocation128_spill] sm:$0xff] %v11825_v7  ;;  %v7029_v43 = vpack.c.bf16 %v6910_v47, %v6909_v41  ;;  %v5932_v55 = vmul.f32 %v10945_v2, %v11823_v1  ;;  %v6316_v59 = vmul.f32 %v16130_v15, %v11825_v7  ;;  %v16196_v21 = vmax.f32 %v11551_v51, 0.0 }
 0x571   : > { %3402 = vst [vmem:[#allocation2 + $0x5a1] sm:$0xff] %v3057_v53  ;;  %v5288_v9 = vadd.f32 %v5160_v44, %v4903_v54  ;;  %v5289_v50 = vadd.f32 %v5161_v29, %v4904_v6  ;;  %v6701_v49 = vmul.f32 %v10948_v52, %v11831_v4  ;;  %v6702_v53 = vmul.f32 %v10948_v52, %v11837_v8  ;;  %v11867_v29 = vld [vmem:[#allocation2 + $0x228] sm:$0xff] }
 0x572   : > { %16194 = vst [vmem:[#allocation185_spill] sm:$0xff] %v11831_v4  ;;  %v6317_v18 = vmul.f32 %v16130_v15, %v16196_v21  ;;  %7201 = vmatmul.bf16.gmra.mxu0 %v7029_v43  ;;  %v3595_v33 = vmul.f32 %v11560_v5, %v10654_v3  ;;  %v3979_v57 = vmul.f32 %v11674_v25, %v16136_v24  ;;  %v11875_v43 = vld [vmem:[#allocation2 + $0x231] sm:$0xff] }
 0x573   : > { %3369 = vst [vmem:[#allocation2 + $0x3e1] sm:$0xff] %v3024_v42  ;;  %v3594_v42 = vmul.f32 %v11558_v28, %v10654_v3  ;;  %v5673_v20 = vadd.f32 %v5545_v27, %v5288_v9  ;;  %v5674_v51 = vadd.f32 %v5546_v39, %v5289_v50  ;;  %v3980_v32 = vmul.f32 %v16136_v24, %v3851_v36  ;;  %v11871_v39 = vld [vmem:[#allocation2 + $0x230] sm:$0xff] }
 0x574   : > { %16195 = vst [vmem:[#allocation150_spill] sm:$0xff] %v11837_v8  ;;  %v4364_v44 = vmul.f32 %v11568_v45, %v10700_v62  ;;  %v4365_v47 = vmul.f32 %v11570_v16, %v10700_v62  ;;  %v4749_v28 = vmul.f32 %v11681_v56, %v10742_v34  ;;  %v4750_v5 = vmul.f32 %v11689_v46, %v10742_v34  ;;  %v11873_v45 = vld [vmem:[#allocation2 + $0x229] sm:$0xff] }
 0x575   : > { %v4107_v41 = vadd.f32 %v3979_v57, %v3594_v42  ;;  %v6059_v25 = vadd.f32 %v5931_v58, %v5673_v20  ;;  %v6060_v27 = vadd.f32 %v5932_v55, %v5674_v51  ;;  %v4108_v54 = vadd.f32 %v3980_v32, %v3595_v33  ;;  %v11883_v55 = vld [vmem:[#allocation2 + $0x22a] sm:$0xff]  ;;  %v11887_v57 = vld [vmem:[#allocation2 + $0x232] sm:$0xff]  ;;  %v2464_v20 = vpop.permute.xlu1 %2463  ;;  %v2360_v51 = vpop.permute.xlu2 %2359 }
 0x576   : > { %v5134_v6 = vmul.f32 %v11691_v63, %v10772_v26  ;;  %v5135_v36 = vmul.f32 %v11693_v38, %v10772_v26  ;;  %v5519_v9 = vmul.f32 %v11699_v14, %v10899_v19  ;;  %v5520_v58 = vmul.f32 %v11701_v13, %v10899_v19 }
 0x577   : > { %v4492_v16 = vadd.f32 %v4364_v44, %v4107_v41  ;;  %v6444_v50 = vadd.f32 %v6316_v59, %v6059_v25  ;;  %v6445_v21 = vadd.f32 %v6317_v18, %v6060_v27  ;;  %v4493_v42 = vadd.f32 %v4365_v47, %v4108_v54  ;;  %v2348_v59 = vpop.permute.xlu0 %2347  ;;  %v7167_v54 = vpop.f32.mrf.mxu0 }
 0x578   : > { %v5905_v33 = vmul.f32 %v10945_v2, %v11867_v29  ;;  %v5906_v44 = vmul.f32 %v10945_v2, %v11871_v39  ;;  %v6290_v41 = vmul.f32 %v16130_v15, %v11873_v45  ;;  %v6291_v8 = vmul.f32 %v16130_v15, %v11875_v43 }
 0x579   : > { %v4877_v32 = vadd.f32 %v4749_v28, %v4492_v16  ;;  %v6829_v18 = vadd.f32 %v6701_v49, %v6444_v50  ;;  %v6830_v47 = vadd.f32 %v6702_v53, %v6445_v21  ;;  %v4878_v25 = vadd.f32 %v4750_v5, %v4493_v42  ;;  %v16197_v53 = vld [vmem:[#allocation148_spill] sm:$0xff] }
 0x57a   : > { %v6675_v27 = vmul.f32 %v10948_v52, %v11883_v55  ;;  %v6676_v28 = vmul.f32 %v10948_v52, %v11887_v57  ;;  %v2666_v16 = vmul.f32 %v16056_v17, %v2464_v20  ;;  %v2640_v7 = vmul.f32 %v16056_v17, %v2360_v51  ;;  %v16198_v50 = vld [vmem:[#allocation108_spill] sm:$0xff] }
 0x57b   : > { %v5262_v4 = vadd.f32 %v5134_v6, %v4877_v32  ;;  %v6957_v1 = vmax.f32 %v6829_v18, 0.0  ;;  %v6958_v22 = vmax.f32 %v6830_v47, 0.0  ;;  %v5263_v60 = vadd.f32 %v5135_v36, %v4878_v25  ;;  %v11911_v36 = vld [vmem:[%s14845_s2] ss:$0 sm:$0xff] }
 0x57c   : > { %v2637_v0 = vmul.f32 %v16056_v17, %v2348_v59  ;;  %v2794_v5 = vadd.f32 %v2666_v16, %v16197_v53  ;;  %v2768_v21 = vadd.f32 %v2640_v7, %v16198_v50  ;;  %v7168_v42 = vadd.f32 %v11741_v61, %v7167_v54  ;;  %v11931_v54 = vld [vmem:[#allocation2 + $0x108] sm:$0xff]  ;;  %v16202_v16 = vld [vmem:[#allocation177_spill] sm:$0xff] }
 0x57d   : > { %v5647_v49 = vadd.f32 %v5519_v9, %v5262_v4  ;;  %v7053_v6 = vpack.c.bf16 %v6958_v22, %v6957_v1  ;;  %v5648_v32 = vadd.f32 %v5520_v58, %v5263_v60  ;;  %v3574_v20 = vmul.f32 %v11619_v35, %v10654_v3  ;;  %16201 = vst [vmem:[#allocation186_spill] sm:$0xff] %v11931_v54  ;;  %v11937_v53 = vld [vmem:[#allocation2 + $0x110] sm:$0xff] }
 0x57e   : > { %v2765_v40 = vadd.f32 %v2637_v0, %v16199_v37  ;;  %v2926_v4 = vadd.f32 %v11911_v36, %v2794_v5  ;;  %v2900_v9 = vadd.f32 %v11911_v36, %v2768_v21  ;;  %v7484_v7 = vmax.f32 %v7168_v42, 0.0  ;;  %16204 = vst [vmem:[#allocation134_spill] sm:$0xff] %v11937_v53  ;;  %v11941_v5 = vld [vmem:[#allocation2 + $0x111] sm:$0xff]  ;;  %v16208_v42 = vld [vmem:[#allocation8_spill] sm:$0xff] }
 0x57f   : > { %v6033_v51 = vadd.f32 %v5905_v33, %v5647_v49  ;;  %7321 = vmatmul.bf16.vlgmr.msra.gmra.mxu2 %v7053_v6  ;;  %v6034_v59 = vadd.f32 %v5906_v44, %v5648_v32  ;;  %v3575_v37 = vmul.f32 %v11621_v12, %v10654_v3  ;;  %v3959_v35 = vmul.f32 %v11631_v11, %v16136_v24  ;;  %v16207_v21 = vld [vmem:[#allocation178_spill] sm:$0xff]  ;;  %v11947_v32 = vld [vmem:[#allocation2 + $0x10a] sm:$0xff] }
 0x580   : > { %v2897_v60 = vadd.f32 %v11911_v36, %v2765_v40  ;;  %v3054_v22 = vmax.f32 %v2926_v4, 0.0  ;;  %v3028_v1 = vmax.f32 %v2900_v9, 0.0  ;;  %v11921_v58 = vadd.f32 %v11833_v10, %v7484_v7  ;;  %v16200_v40 = vld [vmem:[#allocation174_spill] sm:$0xff]  ;;  %16206 = vst [vmem:[#allocation188_spill] sm:$0xff] %v11941_v5  ;;  %v16211_v9 = vld [vmem:[#allocation123_spill] sm:$0xff] }
 0x581   : > { %v6418_v0 = vadd.f32 %v6290_v41, %v6033_v51  ;;  %v6419_v33 = vadd.f32 %v6291_v8, %v6034_v59  ;;  %v3960_v47 = vmul.f32 %v11633_v30, %v16136_v24  ;;  %v4087_v44 = vadd.f32 %v3959_v35, %v3574_v20  ;;  %16209 = vst [vmem:[#allocation140_spill] sm:$0xff] %v11947_v32  ;;  %v11949_v20 = vld [vmem:[#allocation2 + $0x112] sm:$0xff] }
 0x582   : > { %v3025_v18 = vmax.f32 %v2897_v60, 0.0  ;;  %3399 = vst [vmem:[#allocation2 + $0x579] sm:$0xff] %v3054_v22  ;;  %v4344_v12 = vmul.f32 %v11637_v23, %v10700_v62  ;;  %v4345_v11 = vmul.f32 %v11639_v31, %v10700_v62  ;;  %v4729_v41 = vmul.f32 %v16200_v40, %v10742_v34  ;;  %v11939_v23 = vld [vmem:[#allocation2 + $0x109] sm:$0xff]  ;;  %v3908_v60 = vld [vmem:[#allocation2 + $0x511] sm:$0xff] }
 0x583   : > { %v6803_v25 = vadd.f32 %v6675_v27, %v6418_v0  ;;  %v6804_v10 = vadd.f32 %v6676_v28, %v6419_v33  ;;  %3373 = vst [vmem:[#allocation2 + $0x411] sm:$0xff] %v3028_v1  ;;  %v4088_v8 = vadd.f32 %v3960_v47, %v3575_v37  ;;  %v4730_v30 = vmul.f32 %v16202_v16, %v10742_v34  ;;  %v16203_v27 = vld [vmem:[#allocation119_spill] sm:$0xff]  ;;  %v4293_v33 = vld [vmem:[#allocation2 + $0x512] sm:$0xff]  ;;  %v11961_v47 = vld [vmem:[#allocation2 + $0x528] sm:$0xff] }
 0x584   : > { %v5114_v49 = vmul.f32 %v16203_v27, %v10772_v26  ;;  %16205 = vst [vmem:[#allocation187_spill] sm:$0xff] %v11939_v23  ;;  %v4472_v50 = vadd.f32 %v4344_v12, %v4087_v44  ;;  %v5115_v28 = vmul.f32 %v16207_v21, %v10772_v26  ;;  %v5499_v6 = vmul.f32 %v16208_v42, %v10899_v19  ;;  %v3909_v37 = vld [vmem:[#allocation2 + $0x519] sm:$0xff]  ;;  %v7169_v42 = vpop.f32.mrf.mxu0 }
 0x585   : > { %v6931_v31 = vmax.f32 %v6803_v25, 0.0  ;;  %3370 = vst [vmem:[#allocation2 + $0x3f1] sm:$0xff] %v3025_v18  ;;  %v6932_v51 = vmax.f32 %v6804_v10, 0.0  ;;  %v4473_v4 = vadd.f32 %v4345_v11, %v4088_v8  ;;  %v5500_v7 = vmul.f32 %v16211_v9, %v10899_v19  ;;  %v4294_v18 = vld [vmem:[#allocation2 + $0x51a] sm:$0xff] }
 0x586   : > { %16210 = vst [vmem:[#allocation189_spill] sm:$0xff] %v11949_v20  ;;  %v5885_v59 = vmul.f32 %v10945_v2, %v11931_v54  ;;  %v4857_v35 = vadd.f32 %v4729_v41, %v4472_v50  ;;  %v5886_v0 = vmul.f32 %v10945_v2, %v11937_v53  ;;  %v6270_v22 = vmul.f32 %v16130_v15, %v11939_v23  ;;  %v11967_v41 = vld [vmem:[#allocation2 + $0x530] sm:$0xff]  ;;  %v8069_v8 = vld [vmem:[#allocation2] sm:$0xff]  ;;  %v11986_v54 = vld [vmem:[#allocation2 + $0x548] sm:$0xff] }
 0x587   : > { %v6271_v1 = vmul.f32 %v16130_v15, %v11941_v5  ;;  %16212 = vst [vmem:[#allocation190_spill] sm:$0xff] %v11961_v47  ;;  %v7040_v44 = vpack.c.bf16 %v6932_v51, %v6931_v31  ;;  %v4858_v25 = vadd.f32 %v4730_v30, %v4473_v4  ;;  %v6655_v12 = vmul.f32 %v10948_v52, %v11947_v32  ;;  %v11972_v53 = vld [vmem:[#allocation2 + $0x529] sm:$0xff]  ;;  %v11984_v32 = vld [vmem:[#allocation2 + $0x540] sm:$0xff] }
 0x588   : > { %v6656_v11 = vmul.f32 %v10948_v52, %v11949_v20  ;;  %16213 = vst [vmem:[#allocation146_spill] sm:$0xff] %v11967_v41  ;;  %v5242_v10 = vadd.f32 %v5114_v49, %v4857_v35  ;;  %v3652_v50 = vmul.f32 %v8069_v8, %v10654_v3  ;;  %v4037_v5 = vmul.f32 %v16136_v24, %v3908_v60  ;;  %v11974_v31 = vld [vmem:[#allocation2 + $0x52a] sm:$0xff]  ;;  %v11980_v35 = vld [vmem:[#allocation2 + $0x532] sm:$0xff] }
 0x589   : > { %v4038_v23 = vmul.f32 %v16136_v24, %v3909_v37  ;;  %16214 = vst [vmem:[#allocation191_spill] sm:$0xff] %v11972_v53  ;;  %7256 = vmatmul.bf16.gmra.mxu1 %v7040_v44  ;;  %v5243_v30 = vadd.f32 %v5115_v28, %v4858_v25  ;;  %v4422_v51 = vmul.f32 %v10700_v62, %v4293_v33 }
 0x58a   : > { %16215 = vst [vmem:[#allocation192_spill] sm:$0xff] %v11974_v31  ;;  %v4423_v4 = vmul.f32 %v10700_v62, %v4294_v18  ;;  %v4807_v49 = vmul.f32 %v10742_v34, %v11961_v47  ;;  %v5627_v8 = vadd.f32 %v5499_v6, %v5242_v10  ;;  %v4165_v20 = vadd.f32 %v4037_v5, %v3652_v50  ;;  %v16219_v18 = vld [vmem:[#allocation173_spill] sm:$0xff]  ;;  %v11999_v47 = vld [vmem:[#allocation2 + $0x542] sm:$0xff] }
 0x58b   : > { %16216 = vst [vmem:[#allocation153_spill] sm:$0xff] %v11980_v35  ;;  %v4166_v60 = vadd.f32 %v4038_v23, %v3652_v50  ;;  %v4808_v37 = vmul.f32 %v10742_v34, %v11967_v41  ;;  %v5628_v28 = vadd.f32 %v5500_v7, %v5243_v30  ;;  %v5192_v33 = vmul.f32 %v10772_v26, %v11972_v53  ;;  %v11995_v5 = vld [vmem:[#allocation2 + $0x549] sm:$0xff]  ;;  %v2468_v30 = vpop.permute.xlu1 %2467 }
 0x58c   : > { %16217 = vst [vmem:[#allocation193_spill] sm:$0xff] %v11984_v32  ;;  %v16220_v44 = vmax.f32 %v16219_v18, 0.0  ;;  %v5577_v6 = vmul.f32 %v10899_v19, %v11974_v31  ;;  %v6013_v23 = vadd.f32 %v5885_v59, %v5627_v8  ;;  %v4550_v10 = vadd.f32 %v4422_v51, %v4165_v20  ;;  %v12001_v7 = vld [vmem:[#allocation2 + $0x54a] sm:$0xff]  ;;  %v2364_v59 = vpop.permute.xlu2 %2363 }
 0x58d   : > { %16218 = vst [vmem:[#allocation29_spill] sm:$0xff] %v11986_v54  ;;  %v4551_v50 = vadd.f32 %v4423_v4, %v4166_v60  ;;  %v5578_v41 = vmul.f32 %v10899_v19, %v11980_v35  ;;  %v6014_v53 = vadd.f32 %v5886_v0, %v5628_v28  ;;  %v5963_v18 = vmul.f32 %v10945_v2, %v11984_v32  ;;  %v16224_v31 = vld [vmem:[#allocation133_spill] sm:$0xff]  ;;  %v2480_v35 = vpop.permute.xlu0 %2479 }
 0x58e   : > { %v5193_v25 = vmul.f32 %v10772_v26, %v16220_v44  ;;  %16221 = vst [vmem:[#allocation162_spill] sm:$0xff] %v11995_v5  ;;  %v5964_v44 = vmul.f32 %v10945_v2, %v11986_v54  ;;  %v16225_v9 = vmax.f32 %v16224_v31, 0.0  ;;  %v6398_v51 = vadd.f32 %v6270_v22, %v6013_v23 }
 0x58f   : > { %16222 = vst [vmem:[#allocation33_spill] sm:$0xff] %v11999_v47  ;;  %v4935_v4 = vadd.f32 %v4807_v49, %v4550_v10  ;;  %v4936_v8 = vadd.f32 %v4808_v37, %v4551_v50  ;;  %v6349_v60 = vmul.f32 %v16130_v15, %v11995_v5  ;;  %v6399_v0 = vadd.f32 %v6271_v1, %v6014_v53  ;;  %v16226_v37 = vld [vmem:[#allocation88_spill] sm:$0xff]  ;;  %v16227_v5 = vld [vmem:[#allocation125_spill] sm:$0xff] }
 0x590   : > { %16223 = vst [vmem:[#allocation143_spill] sm:$0xff] %v12001_v7  ;;  %v6348_v20 = vmul.f32 %v16130_v15, %v16225_v9  ;;  %v6733_v28 = vmul.f32 %v10948_v52, %v11999_v47  ;;  %v6734_v54 = vmul.f32 %v10948_v52, %v12001_v7  ;;  %v2667_v31 = vmul.f32 %v16056_v17, %v2468_v30 }
 0x591   : > { %v6783_v32 = vadd.f32 %v6655_v12, %v6398_v51  ;;  %v5320_v9 = vadd.f32 %v5192_v33, %v4935_v4  ;;  %v5321_v21 = vadd.f32 %v5193_v25, %v4936_v8  ;;  %v2641_v22 = vmul.f32 %v16056_v17, %v2364_v59  ;;  %v16228_v12 = vld [vmem:[#allocation96_spill] sm:$0xff] }
 0x592   : > { %v6784_v49 = vadd.f32 %v6656_v11, %v6399_v0  ;;  %v2795_v23 = vadd.f32 %v2667_v31, %v16226_v37  ;;  %v2670_v10 = vmul.f32 %v16056_v17, %v2480_v35  ;;  %v7170_v53 = vadd.f32 %v11741_v61, %v7169_v42  ;;  %v12049_v0 = vld [vmem:[#allocation2 + $0x248] sm:$0xff] }
 0x593   : > { %v6911_v1 = vmax.f32 %v6783_v32, 0.0  ;;  %v5705_v50 = vadd.f32 %v5577_v6, %v5320_v9  ;;  %v5706_v47 = vadd.f32 %v5578_v41, %v5321_v21  ;;  %v2769_v27 = vadd.f32 %v2641_v22, %v16227_v5  ;;  %v12061_v37 = vld [vmem:[#allocation2 + $0x24a] sm:$0xff] }
 0x594   : > { %v6912_v7 = vmax.f32 %v6784_v49, 0.0  ;;  %v2927_v30 = vadd.f32 %v11911_v36, %v2795_v23  ;;  %v2798_v33 = vadd.f32 %v2670_v10, %v16228_v12  ;;  %v7485_v25 = vmax.f32 %v7170_v53, 0.0  ;;  %v12059_v49 = vld [vmem:[#allocation2 + $0x242] sm:$0xff] }
 0x595   : > { %v6091_v51 = vadd.f32 %v5963_v18, %v5705_v50  ;;  %v6092_v59 = vadd.f32 %v5964_v44, %v5706_v47  ;;  %v2901_v11 = vadd.f32 %v11911_v36, %v2769_v27  ;;  %v3596_v35 = vmul.f32 %v11681_v56, %v10654_v3  ;;  %v3878_v50 = vld [vmem:[#allocation2 + $0x379] sm:$0xff] }
 0x596   : > { %v7030_v4 = vpack.c.bf16 %v6912_v7, %v6911_v1  ;;  %v3055_v42 = vmax.f32 %v2927_v30, 0.0  ;;  %v2930_v32 = vadd.f32 %v11911_v36, %v2798_v33  ;;  %v12029_v21 = vadd.f32 %v11921_v58, %v7485_v25 }
 0x597   : > { %v6476_v41 = vadd.f32 %v6348_v20, %v6091_v51  ;;  %v6477_v6 = vadd.f32 %v6349_v60, %v6092_v59  ;;  %v3029_v5 = vmax.f32 %v2901_v11, 0.0  ;;  %v3597_v8 = vmul.f32 %v11689_v46, %v10654_v3  ;;  %v12043_v20 = vld [vmem:[#allocation2 + $0x240] sm:$0xff] }
 0x598   : > { %7206 = vmatmul.bf16.gmra.mxu0 %v7030_v4  ;;  %3400 = vst [vmem:[#allocation2 + $0x589] sm:$0xff] %v3055_v42  ;;  %v3058_v47 = vmax.f32 %v2930_v32, 0.0  ;;  %v3981_v27 = vmul.f32 %v11691_v63, %v16136_v24  ;;  %v3982_v56 = vmul.f32 %v11693_v38, %v16136_v24  ;;  %v4366_v7 = vmul.f32 %v11699_v14, %v10700_v62  ;;  %v16229_v42 = vld [vmem:[#allocation181_spill] sm:$0xff] }
 0x599   : > { %v6861_v58 = vadd.f32 %v6733_v28, %v6476_v41  ;;  %v6862_v18 = vadd.f32 %v6734_v54, %v6477_v6  ;;  %3374 = vst [vmem:[#allocation2 + $0x421] sm:$0xff] %v3029_v5  ;;  %v4367_v44 = vmul.f32 %v11701_v13, %v10700_v62  ;;  %v4751_v46 = vmul.f32 %v11867_v29, %v10742_v34  ;;  %v12051_v54 = vld [vmem:[#allocation2 + $0x241] sm:$0xff]  ;;  %v12053_v28 = vld [vmem:[#allocation2 + $0x249] sm:$0xff]  ;;  %v16230_v6 = vld [vmem:[#allocation182_spill] sm:$0xff] }
 0x59a   : > { %3403 = vst [vmem:[#allocation2 + $0x5a9] sm:$0xff] %v3058_v47  ;;  %v4109_v60 = vadd.f32 %v3981_v27, %v3596_v35  ;;  %v4110_v63 = vadd.f32 %v3982_v56, %v3597_v8  ;;  %v4752_v38 = vmul.f32 %v11871_v39, %v10742_v34  ;;  %v5136_v14 = vmul.f32 %v11873_v45, %v10772_v26  ;;  %v12084_v8 = vld [vmem:[#allocation2 + $0x399] sm:$0xff] }
 0x59b   : > { %v6989_v13 = vmax.f32 %v6861_v58, 0.0  ;;  %v6990_v31 = vmax.f32 %v6862_v18, 0.0  ;;  %v5137_v9 = vmul.f32 %v11875_v43, %v10772_v26  ;;  %v5521_v22 = vmul.f32 %v11883_v55, %v10899_v19  ;;  %v16231_v56 = vld [vmem:[#allocation122_spill] sm:$0xff]  ;;  %v16232_v58 = vld [vmem:[#allocation183_spill] sm:$0xff] }
 0x59c   : > { %v4494_v23 = vadd.f32 %v4366_v7, %v4109_v60  ;;  %v4495_v10 = vadd.f32 %v4367_v44, %v4110_v63  ;;  %v5522_v53 = vmul.f32 %v11887_v57, %v10899_v19  ;;  %v5907_v1 = vmul.f32 %v10945_v2, %v12043_v20  ;;  %v16234_v63 = vld [vmem:[#allocation184_spill] sm:$0xff] }
 0x59d   : > { %v7069_v30 = vpack.c.bf16 %v6990_v31, %v6989_v13  ;;  %v5908_v12 = vmul.f32 %v10945_v2, %v12049_v0  ;;  %v6292_v33 = vmul.f32 %v16130_v15, %v12051_v54  ;;  %v6293_v25 = vmul.f32 %v16130_v15, %v12053_v28  ;;  %v12094_v13 = vld [vmem:[#allocation2 + $0x3a8] sm:$0xff]  ;;  %v12096_v31 = vld [vmem:[#allocation2 + $0x3b0] sm:$0xff] }
 0x59e   : > { %v4879_v51 = vadd.f32 %v4751_v46, %v4494_v23  ;;  %v4880_v59 = vadd.f32 %v4752_v38, %v4495_v10  ;;  %v6677_v11 = vmul.f32 %v10948_v52, %v12059_v49  ;;  %v6678_v35 = vmul.f32 %v10948_v52, %v12061_v37  ;;  %v16233_v46 = vld [vmem:[#allocation138_spill] sm:$0xff]  ;;  %16235 = vst [vmem:[#allocation151_spill] sm:$0xff] %v12094_v13  ;;  %v16237_v23 = vld [vmem:[#allocation128_spill] sm:$0xff] }
 0x59f   : > { %7401 = vmatmul.bf16.vlgmr.msra.gmra.mxu3 %v7069_v30  ;;  %v3622_v4 = vmul.f32 %v11803_v48, %v10654_v3  ;;  %v3623_v32 = vmul.f32 %v16229_v42, %v10654_v3  ;;  %v4007_v41 = vmul.f32 %v16136_v24, %v3878_v50  ;;  %v4008_v5 = vmul.f32 %v16230_v6, %v16136_v24  ;;  %v12102_v30 = vld [vmem:[#allocation2 + $0x3a9] sm:$0xff] }
 0x5a0   : > { %v5264_v47 = vadd.f32 %v5136_v14, %v4879_v51  ;;  %v5265_v27 = vadd.f32 %v5137_v9, %v4880_v59  ;;  %v4392_v7 = vmul.f32 %v16231_v56, %v10700_v62  ;;  %v4393_v18 = vmul.f32 %v16232_v58, %v10700_v62  ;;  %16236 = vst [vmem:[#allocation110_spill] sm:$0xff] %v12096_v31  ;;  %v12108_v6 = vld [vmem:[#allocation2 + $0x3aa] sm:$0xff]  ;;  %v2352_v56 = vpop.permute.xlu1 %2351 }
 0x5a1   : > { %v4135_v44 = vadd.f32 %v4007_v41, %v3622_v4  ;;  %v4136_v48 = vadd.f32 %v4008_v5, %v3623_v32  ;;  %v4777_v60 = vmul.f32 %v16233_v46, %v10742_v34  ;;  %v4778_v38 = vmul.f32 %v16234_v63, %v10742_v34  ;;  %16238 = vst [vmem:[#allocation165_spill] sm:$0xff] %v12102_v30  ;;  %v16239_v4 = vld [vmem:[#allocation185_spill] sm:$0xff]  ;;  %v16240_v32 = vld [vmem:[#allocation150_spill] sm:$0xff] }
 0x5a2   : > { %v5649_v14 = vadd.f32 %v5521_v22, %v5264_v47  ;;  %v5650_v9 = vadd.f32 %v5522_v53, %v5265_v27  ;;  %v5162_v10 = vmul.f32 %v16237_v23, %v10772_v26  ;;  %v5163_v50 = vmul.f32 %v10772_v26, %v12084_v8  ;;  %16241 = vst [vmem:[#allocation116_spill] sm:$0xff] %v12108_v6  ;;  %v12110_v22 = vld [vmem:[#allocation2 + $0x3b2] sm:$0xff]  ;;  %v2484_v23 = vpop.permute.xlu0 %2483 }
 0x5a3   : > { %v4520_v51 = vadd.f32 %v4392_v7, %v4135_v44  ;;  %v4521_v59 = vadd.f32 %v4393_v18, %v4136_v48  ;;  %v5547_v42 = vmul.f32 %v16239_v4, %v10899_v19  ;;  %v5548_v41 = vmul.f32 %v16240_v32, %v10899_v19  ;;  %16242 = vst [vmem:[#allocation168_spill] sm:$0xff] %v12110_v22  ;;  %v2496_v7 = vpop.permute.xlu2 %2495  ;;  %v16243_v48 = vld [vmem:[#allocation113_spill] sm:$0xff] }
 0x5a4   : > { %v6035_v53 = vadd.f32 %v5907_v1, %v5649_v14  ;;  %v6036_v5 = vadd.f32 %v5908_v12, %v5650_v9  ;;  %v5933_v47 = vmul.f32 %v10945_v2, %v12094_v13  ;;  %v5934_v27 = vmul.f32 %v10945_v2, %v12096_v31  ;;  %v7172_v1 = vpop.f32.mrf.mxu0 }
 0x5a5   : > { %v4905_v58 = vadd.f32 %v4777_v60, %v4520_v51  ;;  %v4906_v18 = vadd.f32 %v4778_v38, %v4521_v59  ;;  %v6318_v44 = vmul.f32 %v16130_v15, %v12102_v30  ;;  %v16244_v46 = vmax.f32 %v16243_v48, 0.0 }
 0x5a6   : > { %v6420_v12 = vadd.f32 %v6292_v33, %v6035_v53  ;;  %v6421_v14 = vadd.f32 %v6293_v25, %v6036_v5  ;;  %v6703_v9 = vmul.f32 %v10948_v52, %v12108_v6  ;;  %v6704_v4 = vmul.f32 %v10948_v52, %v12110_v22  ;;  %v16245_v53 = vld [vmem:[#allocation120_spill] sm:$0xff] }
 0x5a7   : > { %v6319_v63 = vmul.f32 %v16130_v15, %v16244_v46  ;;  %v5290_v32 = vadd.f32 %v5162_v10, %v4905_v58  ;;  %v5291_v60 = vadd.f32 %v5163_v50, %v4906_v18  ;;  %v2638_v38 = vmul.f32 %v16056_v17, %v2352_v56  ;;  %v16246_v6 = vld [vmem:[#allocation104_spill] sm:$0xff] }
 0x5a8   : > { %v2674_v51 = vmul.f32 %v16056_v17, %v2496_v7  ;;  %v6805_v59 = vadd.f32 %v6677_v11, %v6420_v12  ;;  %v6806_v48 = vadd.f32 %v6678_v35, %v6421_v14  ;;  %v2671_v46 = vmul.f32 %v16056_v17, %v2484_v23  ;;  %v16247_v10 = vld [vmem:[#allocation164_spill] sm:$0xff] }
 0x5a9   : > { %v7173_v30 = vadd.f32 %v11741_v61, %v7172_v1  ;;  %v5675_v33 = vadd.f32 %v5547_v42, %v5290_v32  ;;  %v5676_v25 = vadd.f32 %v5548_v41, %v5291_v60  ;;  %v2766_v5 = vadd.f32 %v2638_v38, %v16245_v53 }
 0x5aa   : > { %v2802_v31 = vadd.f32 %v2674_v51, %v16246_v6  ;;  %v6933_v13 = vmax.f32 %v6805_v59, 0.0  ;;  %v6934_v22 = vmax.f32 %v6806_v48, 0.0  ;;  %v2799_v50 = vadd.f32 %v2671_v46, %v16247_v10  ;;  %v16253_v48 = vld [vmem:[#allocation134_spill] sm:$0xff] }
 0x5ab   : > { %v7486_v58 = vmax.f32 %v7173_v30, 0.0  ;;  %v6061_v56 = vadd.f32 %v5933_v47, %v5675_v33  ;;  %v6062_v18 = vadd.f32 %v5934_v27, %v5676_v25  ;;  %v2898_v11 = vadd.f32 %v11911_v36, %v2766_v5  ;;  %v12154_v33 = vld [vmem:[#allocation2 + $0x120] sm:$0xff] }
 0x5ac   : > { %v2934_v35 = vadd.f32 %v11911_v36, %v2802_v31  ;;  %v7041_v7 = vpack.c.bf16 %v6934_v22, %v6933_v13  ;;  %v2931_v23 = vadd.f32 %v11911_v36, %v2799_v50  ;;  %v3576_v41 = vmul.f32 %v16200_v40, %v10654_v3  ;;  %v16248_v31 = vld [vmem:[#allocation119_spill] sm:$0xff]  ;;  %v16249_v22 = vld [vmem:[#allocation178_spill] sm:$0xff]  ;;  %v16250_v40 = vld [vmem:[#allocation8_spill] sm:$0xff]  ;;  %16254 = vst [vmem:[#allocation154_spill] sm:$0xff] %v12154_v33 }
 0x5ad   : > { %v12136_v42 = vadd.f32 %v12029_v21, %v7486_v58  ;;  %v6446_v6 = vadd.f32 %v6318_v44, %v6061_v56  ;;  %v6447_v1 = vadd.f32 %v6319_v63, %v6062_v18  ;;  %v3026_v12 = vmax.f32 %v2898_v11, 0.0  ;;  %v16251_v63 = vld [vmem:[#allocation123_spill] sm:$0xff]  ;;  %v16258_v50 = vld [vmem:[#allocation188_spill] sm:$0xff] }
 0x5ae   : > { %v3062_v14 = vmax.f32 %v2934_v35, 0.0  ;;  %7261 = vmatmul.bf16.gmra.mxu1 %v7041_v7  ;;  %v3059_v30 = vmax.f32 %v2931_v23, 0.0  ;;  %v3577_v47 = vmul.f32 %v16202_v16, %v10654_v3  ;;  %v3961_v13 = vmul.f32 %v16248_v31, %v16136_v24  ;;  %v16252_v16 = vld [vmem:[#allocation186_spill] sm:$0xff]  ;;  %v16257_v5 = vld [vmem:[#allocation187_spill] sm:$0xff]  ;;  %v12164_v56 = vld [vmem:[#allocation2 + $0x129] sm:$0xff] }
 0x5af   : > { %v3962_v27 = vmul.f32 %v16249_v22, %v16136_v24  ;;  %v6831_v21 = vadd.f32 %v6703_v9, %v6446_v6  ;;  %v6832_v32 = vadd.f32 %v6704_v4, %v6447_v1  ;;  %3371 = vst [vmem:[#allocation2 + $0x3f9] sm:$0xff] %v3026_v12  ;;  %v4346_v44 = vmul.f32 %v16250_v40, %v10700_v62  ;;  %v12156_v9 = vld [vmem:[#allocation2 + $0x128] sm:$0xff]  ;;  %v3911_v31 = vld [vmem:[#allocation2 + $0x531] sm:$0xff] }
 0x5b0   : > { %v4347_v60 = vmul.f32 %v16251_v63, %v10700_v62  ;;  %3407 = vst [vmem:[#allocation2 + $0x5d9] sm:$0xff] %v3062_v14  ;;  %v4089_v38 = vadd.f32 %v3961_v13, %v3576_v41  ;;  %v4731_v59 = vmul.f32 %v16252_v16, %v10742_v34  ;;  %v4732_v46 = vmul.f32 %v16253_v48, %v10742_v34  ;;  %v12158_v4 = vld [vmem:[#allocation2 + $0x121] sm:$0xff]  ;;  %v16262_v41 = vld [vmem:[#allocation189_spill] sm:$0xff]  ;;  %v16264_v40 = vld [vmem:[#allocation190_spill] sm:$0xff] }
 0x5b1   : > { %v4090_v51 = vadd.f32 %v3962_v27, %v3577_v47  ;;  %16255 = vst [vmem:[#allocation171_spill] sm:$0xff] %v12156_v9  ;;  %v6959_v25 = vmax.f32 %v6831_v21, 0.0  ;;  %v6960_v53 = vmax.f32 %v6832_v32, 0.0  ;;  %v5116_v10 = vmul.f32 %v16257_v5, %v10772_v26  ;;  %v12166_v18 = vld [vmem:[#allocation2 + $0x122] sm:$0xff]  ;;  %v12172_v1 = vld [vmem:[#allocation2 + $0x12a] sm:$0xff]  ;;  %v16265_v63 = vld [vmem:[#allocation146_spill] sm:$0xff] }
 0x5b2   : > { %16256 = vst [vmem:[#allocation172_spill] sm:$0xff] %v12158_v4  ;;  %v5117_v58 = vmul.f32 %v16258_v50, %v10772_v26  ;;  %v4474_v11 = vadd.f32 %v4346_v44, %v4089_v38  ;;  %v16261_v7 = vld [vmem:[#allocation140_spill] sm:$0xff]  ;;  %v5502_v6 = vmul.f32 %v16262_v41, %v10899_v19  ;;  %v5887_v14 = vmul.f32 %v10945_v2, %v12154_v33  ;;  %v16266_v38 = vld [vmem:[#allocation191_spill] sm:$0xff] }
 0x5b3   : > { %3404 = vst [vmem:[#allocation2 + $0x5b9] sm:$0xff] %v3059_v30  ;;  %v4475_v35 = vadd.f32 %v4347_v60, %v4090_v51  ;;  %v5501_v23 = vmul.f32 %v16261_v7, %v10899_v19  ;;  %v7054_v12 = vpack.c.bf16 %v6960_v53, %v6959_v25  ;;  %v5888_v30 = vmul.f32 %v10945_v2, %v12156_v9  ;;  %v12192_v16 = vld [vmem:[#allocation2 + $0x541] sm:$0xff] }
 0x5b4   : > { %16259 = vst [vmem:[#allocation180_spill] sm:$0xff] %v12164_v56  ;;  %v6272_v47 = vmul.f32 %v16130_v15, %v12158_v4  ;;  %v4859_v13 = vadd.f32 %v4731_v59, %v4474_v11  ;;  %v6273_v27 = vmul.f32 %v16130_v15, %v12164_v56  ;;  %v6657_v21 = vmul.f32 %v10948_v52, %v12166_v18  ;;  %v16268_v25 = vld [vmem:[#allocation192_spill] sm:$0xff] }
 0x5b5   : > { %16260 = vst [vmem:[#allocation9_spill] sm:$0xff] %v12166_v18  ;;  %v4860_v22 = vadd.f32 %v4732_v46, %v4475_v35  ;;  %7326 = vmatmul.bf16.gmra.mxu2 %v7054_v12  ;;  %v6658_v32 = vmul.f32 %v10948_v52, %v12172_v1  ;;  %v3654_v44 = vmul.f32 %v16264_v40, %v10654_v3  ;;  %v16269_v35 = vld [vmem:[#allocation153_spill] sm:$0xff]  ;;  %v12223_v4 = vld [vmem:[#allocation2 + $0x562] sm:$0xff] }
 0x5b6   : > { %16263 = vst [vmem:[#allocation149_spill] sm:$0xff] %v12172_v1  ;;  %v3655_v60 = vmul.f32 %v16265_v63, %v10654_v3  ;;  %v4039_v51 = vmul.f32 %v16266_v38, %v16136_v24  ;;  %v5244_v59 = vadd.f32 %v5116_v10, %v4859_v13  ;;  %v4040_v46 = vmul.f32 %v16136_v24, %v3911_v31  ;;  %v16270_v40 = vld [vmem:[#allocation193_spill] sm:$0xff]  ;;  %v12203_v38 = vld [vmem:[#allocation2 + $0x558] sm:$0xff]  ;;  %v12207_v13 = vld [vmem:[#allocation2 + $0x560] sm:$0xff] }
 0x5b7   : > { %16267 = vst [vmem:[#allocation195_spill] sm:$0xff] %v12192_v16  ;;  %v5245_v48 = vadd.f32 %v5117_v58, %v4860_v22  ;;  %v4424_v53 = vmul.f32 %v16268_v25, %v10700_v62  ;;  %v4425_v12 = vmul.f32 %v16269_v35, %v10700_v62  ;;  %v4809_v1 = vmul.f32 %v16270_v40, %v10742_v34  ;;  %v16271_v63 = vld [vmem:[#allocation29_spill] sm:$0xff]  ;;  %v12209_v22 = vld [vmem:[#allocation2 + $0x559] sm:$0xff] }
 0x5b8   : > { %v4167_v11 = vadd.f32 %v4039_v51, %v3654_v44  ;;  %v4810_v18 = vmul.f32 %v16271_v63, %v10742_v34  ;;  %16272 = vst [vmem:[#allocation194_spill] sm:$0xff] %v12203_v38  ;;  %v5629_v56 = vadd.f32 %v5501_v23, %v5244_v59  ;;  %v4168_v58 = vadd.f32 %v4040_v46, %v3655_v60  ;;  %v12211_v44 = vld [vmem:[#allocation2 + $0x561] sm:$0xff]  ;;  %v16276_v25 = vld [vmem:[#allocation162_spill] sm:$0xff]  ;;  %v16277_v40 = vld [vmem:[#allocation33_spill] sm:$0xff] }
 0x5b9   : > { %v5630_v10 = vadd.f32 %v5502_v6, %v5245_v48  ;;  %v5194_v31 = vmul.f32 %v10772_v26, %v12192_v16  ;;  %16273 = vst [vmem:[#allocation152_spill] sm:$0xff] %v12207_v13  ;;  %v5195_v35 = vmul.f32 %v16276_v25, %v10772_v26  ;;  %v5579_v63 = vmul.f32 %v16277_v40, %v10899_v19  ;;  %v16278_v23 = vld [vmem:[#allocation143_spill] sm:$0xff] }
 0x5ba   : > { %16274 = vst [vmem:[#allocation198_spill] sm:$0xff] %v12209_v22  ;;  %v4552_v51 = vadd.f32 %v4424_v53, %v4167_v11  ;;  %v5580_v6 = vmul.f32 %v16278_v23, %v10899_v19  ;;  %v12219_v60 = vld [vmem:[#allocation2 + $0x55a] sm:$0xff]  ;;  %v6015_v59 = vadd.f32 %v5887_v14, %v5629_v56  ;;  %v4553_v46 = vadd.f32 %v4425_v12, %v4168_v58  ;;  %v2356_v53 = vpop.permute.xlu1 %2355  ;;  %v2500_v11 = vpop.permute.xlu2 %2499 }
 0x5bb   : > { %16275 = vst [vmem:[#allocation197_spill] sm:$0xff] %v12211_v44  ;;  %v6016_v48 = vadd.f32 %v5888_v30, %v5630_v10  ;;  %v5965_v16 = vmul.f32 %v10945_v2, %v12203_v38  ;;  %v5966_v25 = vmul.f32 %v10945_v2, %v12207_v13  ;;  %v6350_v40 = vmul.f32 %v16130_v15, %v12209_v22  ;;  %v2368_v56 = vpop.permute.xlu0 %2367  ;;  %v7174_v58 = vpop.f32.mrf.mxu0 }
 0x5bc   : > { %16279 = vst [vmem:[#allocation196_spill] sm:$0xff] %v12219_v60  ;;  %v4937_v9 = vadd.f32 %v4809_v1, %v4552_v51  ;;  %v6351_v23 = vmul.f32 %v16130_v15, %v12211_v44  ;;  %v6400_v14 = vadd.f32 %v6272_v47, %v6015_v59  ;;  %v4938_v12 = vadd.f32 %v4810_v18, %v4553_v46  ;;  %v16282_v59 = vld [vmem:[#allocation103_spill] sm:$0xff] }
 0x5bd   : > { %16280 = vst [vmem:[#allocation202_spill] sm:$0xff] %v12223_v4  ;;  %v6401_v30 = vadd.f32 %v6273_v27, %v6016_v48  ;;  %v6735_v10 = vmul.f32 %v10948_v52, %v12219_v60  ;;  %v6736_v1 = vmul.f32 %v10948_v52, %v12223_v4  ;;  %v2639_v51 = vmul.f32 %v16056_v17, %v2356_v53  ;;  %v16281_v27 = vld [vmem:[#allocation118_spill] sm:$0xff] }
 0x5be   : > { %v5322_v38 = vadd.f32 %v5194_v31, %v4937_v9  ;;  %v2675_v13 = vmul.f32 %v16056_v17, %v2500_v11  ;;  %v6785_v22 = vadd.f32 %v6657_v21, %v6400_v14  ;;  %v5323_v41 = vadd.f32 %v5195_v35, %v4938_v12  ;;  %v16283_v4 = vld [vmem:[#allocation130_spill] sm:$0xff]  ;;  %v12274_v12 = vld [vmem:[#allocation2 + $0x261] sm:$0xff] }
 0x5bf   : > { %v6786_v33 = vadd.f32 %v6658_v32, %v6401_v30  ;;  %v2642_v44 = vmul.f32 %v16056_v17, %v2368_v56  ;;  %v2767_v18 = vadd.f32 %v2639_v51, %v16281_v27  ;;  %v7175_v46 = vadd.f32 %v11741_v61, %v7174_v58  ;;  %v12282_v51 = vld [vmem:[#allocation2 + $0x262] sm:$0xff]  ;;  %v3496_v27 = vld [vmem:[#allocation2 + $0x398] sm:$0xff] }
 0x5c0   : > { %v5707_v47 = vadd.f32 %v5579_v63, %v5322_v38  ;;  %v2803_v48 = vadd.f32 %v2675_v13, %v16282_v59  ;;  %v6913_v9 = vmax.f32 %v6785_v22, 0.0  ;;  %v5708_v60 = vadd.f32 %v5580_v6, %v5323_v41  ;;  %v12264_v6 = vld [vmem:[#allocation2 + $0x258] sm:$0xff] }
 0x5c1   : > { %v6914_v31 = vmax.f32 %v6786_v33, 0.0  ;;  %v2770_v7 = vadd.f32 %v2642_v44, %v16283_v4  ;;  %v2899_v11 = vadd.f32 %v11911_v36, %v2767_v18  ;;  %v7487_v32 = vmax.f32 %v7175_v46, 0.0 }
 0x5c2   : > { %v6093_v53 = vadd.f32 %v5965_v16, %v5707_v47  ;;  %v2935_v21 = vadd.f32 %v11911_v36, %v2803_v48  ;;  %v6094_v56 = vadd.f32 %v5966_v25, %v5708_v60  ;;  %v3598_v13 = vmul.f32 %v11867_v29, %v10654_v3  ;;  %v12266_v60 = vld [vmem:[#allocation2 + $0x260] sm:$0xff]  ;;  %v3495_v47 = vld [vmem:[#allocation2 + $0x390] sm:$0xff] }
 0x5c3   : > { %v7031_v35 = vpack.c.bf16 %v6914_v31, %v6913_v9  ;;  %v2902_v38 = vadd.f32 %v11911_v36, %v2770_v7  ;;  %v3027_v61 = vmax.f32 %v2899_v11, 0.0  ;;  %v12248_v33 = vadd.f32 %v12136_v42, %v7487_v32  ;;  %v3880_v9 = vld [vmem:[#allocation2 + $0x391] sm:$0xff] }
 0x5c4   : > { %v6478_v63 = vadd.f32 %v6350_v40, %v6093_v53  ;;  %v3063_v22 = vmax.f32 %v2935_v21, 0.0  ;;  %v6479_v4 = vadd.f32 %v6351_v23, %v6094_v56  ;;  %v3599_v16 = vmul.f32 %v11871_v39, %v10654_v3  ;;  %v4265_v31 = vld [vmem:[#allocation2 + $0x392] sm:$0xff] }
 0x5c5   : > { %7211 = vmatmul.bf16.gmra.mxu0 %v7031_v35  ;;  %v3030_v41 = vmax.f32 %v2902_v38, 0.0  ;;  %v3983_v44 = vmul.f32 %v11873_v45, %v16136_v24  ;;  %3372 = vst [vmem:[#allocation2 + $0x409] sm:$0xff] %v3027_v61  ;;  %v3984_v29 = vmul.f32 %v11875_v43, %v16136_v24  ;;  %v4368_v7 = vmul.f32 %v11883_v55, %v10700_v62  ;;  %v12268_v43 = vld [vmem:[#allocation2 + $0x259] sm:$0xff] }
 0x5c6   : > { %v6863_v25 = vadd.f32 %v6735_v10, %v6478_v63  ;;  %v4369_v42 = vmul.f32 %v11887_v57, %v10700_v62  ;;  %v6864_v40 = vadd.f32 %v6736_v1, %v6479_v4  ;;  %3408 = vst [vmem:[#allocation2 + $0x5e9] sm:$0xff] %v3063_v22  ;;  %v4753_v39 = vmul.f32 %v12043_v20, %v10742_v34  ;;  %v12276_v20 = vld [vmem:[#allocation2 + $0x25a] sm:$0xff] }
 0x5c7   : > { %v4111_v23 = vadd.f32 %v3983_v44, %v3598_v13  ;;  %v4754_v45 = vmul.f32 %v12049_v0, %v10742_v34  ;;  %3375 = vst [vmem:[#allocation2 + $0x429] sm:$0xff] %v3030_v41  ;;  %v4112_v55 = vadd.f32 %v3984_v29, %v3599_v16  ;;  %v5138_v57 = vmul.f32 %v12051_v54, %v10772_v26  ;;  %v4266_v35 = vld [vmem:[#allocation2 + $0x39a] sm:$0xff]  ;;  %v12302_v16 = vld [vmem:[#allocation2 + $0x3b1] sm:$0xff] }
 0x5c8   : > { %v6991_v14 = vmax.f32 %v6863_v25, 0.0  ;;  %v5139_v30 = vmul.f32 %v12053_v28, %v10772_v26  ;;  %v6992_v0 = vmax.f32 %v6864_v40, 0.0  ;;  %v5523_v58 = vmul.f32 %v12059_v49, %v10899_v19  ;;  %v16284_v29 = vld [vmem:[#allocation151_spill] sm:$0xff] }
 0x5c9   : > { %v4496_v10 = vadd.f32 %v4368_v7, %v4111_v23  ;;  %v5524_v1 = vmul.f32 %v12061_v37, %v10899_v19  ;;  %v4497_v18 = vadd.f32 %v4369_v42, %v4112_v55  ;;  %v5909_v59 = vmul.f32 %v10945_v2, %v12264_v6  ;;  %v16285_v42 = vld [vmem:[#allocation110_spill] sm:$0xff]  ;;  %v12309_v23 = vld [vmem:[#allocation2 + $0x3c0] sm:$0xff] }
 0x5ca   : > { %v5910_v48 = vmul.f32 %v10945_v2, %v12266_v60  ;;  %v6294_v46 = vmul.f32 %v16130_v15, %v12268_v43  ;;  %v7070_v53 = vpack.c.bf16 %v6992_v0, %v6991_v14  ;;  %v6295_v21 = vmul.f32 %v16130_v15, %v12274_v12  ;;  %16286 = vst [vmem:[#allocation201_spill] sm:$0xff] %v12309_v23  ;;  %v12315_v0 = vld [vmem:[#allocation2 + $0x3c1] sm:$0xff] }
 0x5cb   : > { %v4881_v11 = vadd.f32 %v4753_v39, %v4496_v10  ;;  %v6679_v32 = vmul.f32 %v10948_v52, %v12276_v20  ;;  %v4882_v56 = vadd.f32 %v4754_v45, %v4497_v18  ;;  %v6680_v38 = vmul.f32 %v10948_v52, %v12282_v51  ;;  %16289 = vst [vmem:[#allocation175_spill] sm:$0xff] %v12315_v0 }
 0x5cc   : > { %v3624_v13 = vmul.f32 %v10654_v3, %v3495_v47  ;;  %v3625_v63 = vmul.f32 %v10654_v3, %v3496_v27  ;;  %7406 = vmatmul.bf16.gmra.mxu3 %v7070_v53  ;;  %v4009_v22 = vmul.f32 %v16136_v24, %v3880_v9  ;;  %v4010_v4 = vmul.f32 %v12084_v8, %v16136_v24  ;;  %v16287_v8 = vld [vmem:[#allocation165_spill] sm:$0xff]  ;;  %v16291_v27 = vld [vmem:[#allocation116_spill] sm:$0xff] }
 0x5cd   : > { %v5266_v61 = vadd.f32 %v5138_v57, %v4881_v11  ;;  %v4394_v41 = vmul.f32 %v10700_v62, %v4265_v31  ;;  %v5267_v44 = vadd.f32 %v5139_v30, %v4882_v56  ;;  %v4395_v25 = vmul.f32 %v10700_v62, %v4266_v35  ;;  %v12313_v57 = vld [vmem:[#allocation2 + $0x3c8] sm:$0xff] }
 0x5ce   : > { %v4779_v7 = vmul.f32 %v16284_v29, %v10742_v34  ;;  %v4780_v40 = vmul.f32 %v16285_v42, %v10742_v34  ;;  %v4137_v45 = vadd.f32 %v4009_v22, %v3624_v13  ;;  %v4138_v14 = vadd.f32 %v4010_v4, %v3625_v63  ;;  %16288 = vst [vmem:[#allocation73_spill] sm:$0xff] %v12313_v57  ;;  %v12317_v30 = vld [vmem:[#allocation2 + $0x3c9] sm:$0xff]  ;;  %v2380_v63 = vpop.permute.xlu2 %2379 }
 0x5cf   : > { %v5651_v39 = vadd.f32 %v5523_v58, %v5266_v61  ;;  %v5164_v55 = vmul.f32 %v16287_v8, %v10772_v26  ;;  %16290 = vst [vmem:[#allocation79_spill] sm:$0xff] %v12317_v30  ;;  %v5652_v10 = vadd.f32 %v5524_v1, %v5267_v44  ;;  %v5165_v47 = vmul.f32 %v10772_v26, %v12302_v16  ;;  %v16292_v58 = vld [vmem:[#allocation168_spill] sm:$0xff]  ;;  %v2488_v1 = vpop.permute.xlu1 %2487 }
 0x5d0   : > { %v5549_v18 = vmul.f32 %v16291_v27, %v10899_v19  ;;  %v5550_v9 = vmul.f32 %v16292_v58, %v10899_v19  ;;  %v12325_v31 = vld [vmem:[#allocation2 + $0x3c2] sm:$0xff]  ;;  %v4522_v11 = vadd.f32 %v4394_v41, %v4137_v45  ;;  %v4523_v35 = vadd.f32 %v4395_v25, %v4138_v14  ;;  %v12329_v13 = vld [vmem:[#allocation2 + $0x3ca] sm:$0xff] }
 0x5d1   : > { %v6037_v53 = vadd.f32 %v5909_v59, %v5651_v39  ;;  %v5935_v56 = vmul.f32 %v10945_v2, %v12309_v23  ;;  %v6038_v61 = vadd.f32 %v5910_v48, %v5652_v10  ;;  %v5936_v22 = vmul.f32 %v10945_v2, %v12313_v57  ;;  %v2372_v59 = vpop.permute.xlu0 %2371  ;;  %v7177_v39 = vpop.f32.mrf.mxu0 }
 0x5d2   : > { %v6320_v4 = vmul.f32 %v16130_v15, %v12315_v0  ;;  %v6321_v44 = vmul.f32 %v16130_v15, %v12317_v30  ;;  %v4907_v25 = vadd.f32 %v4779_v7, %v4522_v11  ;;  %v4908_v29 = vadd.f32 %v4780_v40, %v4523_v35  ;;  %v16293_v7 = vld [vmem:[#allocation166_spill] sm:$0xff] }
 0x5d3   : > { %v6422_v41 = vadd.f32 %v6294_v46, %v6037_v53  ;;  %v6705_v42 = vmul.f32 %v10948_v52, %v12325_v31  ;;  %v6423_v45 = vadd.f32 %v6295_v21, %v6038_v61  ;;  %v6706_v48 = vmul.f32 %v10948_v52, %v12329_v13  ;;  %v16294_v53 = vld [vmem:[#allocation136_spill] sm:$0xff]  ;;  %v12349_v21 = vld [vmem:[%s14848_s5] ss:$0 sm:$0xff] }
 0x5d4   : > { %v2672_v14 = vmul.f32 %v16056_v17, %v2488_v1  ;;  %v2645_v10 = vmul.f32 %v16056_v17, %v2380_v63  ;;  %v5292_v57 = vadd.f32 %v5164_v55, %v4907_v25  ;;  %v5293_v23 = vadd.f32 %v5165_v47, %v4908_v29  ;;  %v3449_v1 = vld [vmem:[#allocation2 + $0x108] sm:$0xff]  ;;  %v16295_v55 = vld [vmem:[#allocation54_spill] sm:$0xff]  ;;  %v3450_v29 = vld [vmem:[#allocation2 + $0x110] sm:$0xff] }
 0x5d5   : > { %v6807_v0 = vadd.f32 %v6679_v32, %v6422_v41  ;;  %v2643_v30 = vmul.f32 %v16056_v17, %v2372_v59  ;;  %v6808_v46 = vadd.f32 %v6680_v38, %v6423_v45  ;;  %v7178_v35 = vadd.f32 %v12349_v21, %v7177_v39 }
 0x5d6   : > { %v2800_v40 = vadd.f32 %v2672_v14, %v16293_v7  ;;  %v2773_v11 = vadd.f32 %v2645_v10, %v16294_v53  ;;  %v5677_v63 = vadd.f32 %v5549_v18, %v5292_v57  ;;  %v5678_v32 = vadd.f32 %v5550_v9, %v5293_v23 }
 0x5d7   : > { %v6935_v61 = vmax.f32 %v6807_v0, 0.0  ;;  %v2771_v47 = vadd.f32 %v2643_v30, %v16295_v55  ;;  %v6936_v41 = vmax.f32 %v6808_v46, 0.0  ;;  %v7488_v25 = vmax.f32 %v7178_v35, 0.0 }
 0x5d8   : > { %v2932_v38 = vadd.f32 %v11911_v36, %v2800_v40  ;;  %v2905_v59 = vadd.f32 %v11911_v36, %v2773_v11  ;;  %v6063_v45 = vadd.f32 %v5935_v56, %v5677_v63  ;;  %v6064_v14 = vadd.f32 %v5936_v22, %v5678_v32  ;;  %v16296_v22 = vld [vmem:[#allocation140_spill] sm:$0xff]  ;;  %v16300_v63 = vld [vmem:[#allocation171_spill] sm:$0xff] }
 0x5d9   : > { %v2903_v10 = vadd.f32 %v11911_v36, %v2771_v47  ;;  %v3578_v7 = vmul.f32 %v10654_v3, %v3449_v1  ;;  %v7042_v39 = vpack.c.bf16 %v6936_v41, %v6935_v61  ;;  %v12358_v23 = vadd.f32 %v12248_v33, %v7488_v25  ;;  %v16297_v33 = vld [vmem:[#allocation189_spill] sm:$0xff]  ;;  %v12371_v1 = vld [vmem:[#allocation2 + $0x138] sm:$0xff]  ;;  %v16301_v32 = vld [vmem:[#allocation172_spill] sm:$0xff] }
 0x5da   : > { %v3060_v53 = vmax.f32 %v2932_v38, 0.0  ;;  %v3033_v0 = vmax.f32 %v2905_v59, 0.0  ;;  %v6448_v57 = vadd.f32 %v6320_v4, %v6063_v45  ;;  %v6449_v30 = vadd.f32 %v6321_v44, %v6064_v14  ;;  %v16298_v44 = vld [vmem:[#allocation154_spill] sm:$0xff]  ;;  %16299 = vst [vmem:[#allocation200_spill] sm:$0xff] %v12371_v1  ;;  %v12381_v47 = vld [vmem:[#allocation2 + $0x141] sm:$0xff] }
 0x5db   : > { %v3031_v18 = vmax.f32 %v2903_v10, 0.0  ;;  %v3579_v9 = vmul.f32 %v10654_v3, %v3450_v29  ;;  %7266 = vmatmul.bf16.gmra.mxu1 %v7042_v39  ;;  %v3963_v56 = vmul.f32 %v16257_v5, %v16136_v24  ;;  %v3964_v36 = vmul.f32 %v16258_v50, %v16136_v24  ;;  %16304 = vst [vmem:[#allocation156_spill] sm:$0xff] %v12381_v47  ;;  %v16305_v59 = vld [vmem:[#allocation180_spill] sm:$0xff]  ;;  %v16306_v29 = vld [vmem:[#allocation9_spill] sm:$0xff]  ;;  %v12387_v14 = vld [vmem:[#allocation2 + $0x13a] sm:$0xff] }
 0x5dc   : > { %3405 = vst [vmem:[#allocation2 + $0x5c1] sm:$0xff] %v3060_v53  ;;  %v4348_v46 = vmul.f32 %v16296_v22, %v10700_v62  ;;  %v6833_v40 = vadd.f32 %v6705_v42, %v6448_v57  ;;  %v6834_v11 = vadd.f32 %v6706_v48, %v6449_v30  ;;  %v4349_v4 = vmul.f32 %v16297_v33, %v10700_v62  ;;  %v12377_v42 = vld [vmem:[#allocation2 + $0x140] sm:$0xff]  ;;  %v16309_v53 = vld [vmem:[#allocation149_spill] sm:$0xff] }
 0x5dd   : > { %3378 = vst [vmem:[#allocation2 + $0x451] sm:$0xff] %v3033_v0  ;;  %v4733_v35 = vmul.f32 %v16298_v44, %v10742_v34  ;;  %v4091_v61 = vadd.f32 %v3963_v56, %v3578_v7  ;;  %v4092_v5 = vadd.f32 %v3964_v36, %v3579_v9  ;;  %v4734_v50 = vmul.f32 %v16300_v63, %v10742_v34  ;;  %v12379_v48 = vld [vmem:[#allocation2 + $0x139] sm:$0xff]  ;;  %v12389_v10 = vld [vmem:[#allocation2 + $0x142] sm:$0xff] }
 0x5de   : > { %3376 = vst [vmem:[#allocation2 + $0x439] sm:$0xff] %v3031_v18  ;;  %v5118_v55 = vmul.f32 %v16301_v32, %v10772_v26  ;;  %v6961_v41 = vmax.f32 %v6833_v40, 0.0  ;;  %v6962_v38 = vmax.f32 %v6834_v11, 0.0  ;;  %v5119_v25 = vmul.f32 %v16305_v59, %v10772_v26  ;;  %v3527_v30 = vld [vmem:[#allocation2 + $0x540] sm:$0xff]  ;;  %v3528_v18 = vld [vmem:[#allocation2 + $0x548] sm:$0xff]  ;;  %v16311_v63 = vld [vmem:[#allocation162_spill] sm:$0xff] }
 0x5df   : > { %16302 = vst [vmem:[#allocation199_spill] sm:$0xff] %v12377_v42  ;;  %v5503_v45 = vmul.f32 %v16306_v29, %v10899_v19  ;;  %v4476_v7 = vadd.f32 %v4348_v46, %v4091_v61  ;;  %v4477_v39 = vadd.f32 %v4349_v4, %v4092_v5  ;;  %v5504_v0 = vmul.f32 %v16309_v53, %v10899_v19  ;;  %v16310_v61 = vld [vmem:[#allocation195_spill] sm:$0xff]  ;;  %v2504_v53 = vpop.permute.xlu0 %2503  ;;  %v7179_v29 = vpop.f32.mrf.mxu0 }
 0x5e0   : > { %16303 = vst [vmem:[#allocation157_spill] sm:$0xff] %v12379_v48  ;;  %v5889_v57 = vmul.f32 %v10945_v2, %v12371_v1  ;;  %v7055_v9 = vpack.c.bf16 %v6962_v38, %v6961_v41  ;;  %v5890_v56 = vmul.f32 %v10945_v2, %v12377_v42  ;;  %v6274_v36 = vmul.f32 %v16130_v15, %v12379_v48  ;;  %v12421_v42 = vld [vmem:[#allocation2 + $0x578] sm:$0xff]  ;;  %v3471_v32 = vld [vmem:[#allocation2 + $0x240] sm:$0xff] }
 0x5e1   : > { %16307 = vst [vmem:[#allocation203_spill] sm:$0xff] %v12387_v14  ;;  %v6275_v22 = vmul.f32 %v16130_v15, %v12381_v47  ;;  %v4861_v46 = vadd.f32 %v4733_v35, %v4476_v7  ;;  %v4862_v40 = vadd.f32 %v4734_v50, %v4477_v39  ;;  %v6659_v11 = vmul.f32 %v10948_v52, %v12387_v14  ;;  %v16312_v50 = vld [vmem:[#allocation33_spill] sm:$0xff]  ;;  %v16313_v39 = vld [vmem:[#allocation143_spill] sm:$0xff] }
 0x5e2   : > { %16308 = vst [vmem:[#allocation159_spill] sm:$0xff] %v12389_v10  ;;  %v6660_v33 = vmul.f32 %v10948_v52, %v12389_v10  ;;  %7331 = vmatmul.bf16.gmra.mxu2 %v7055_v9  ;;  %v3656_v4 = vmul.f32 %v10654_v3, %v3527_v30  ;;  %v3657_v44 = vmul.f32 %v10654_v3, %v3528_v18  ;;  %v16314_v30 = vld [vmem:[#allocation194_spill] sm:$0xff]  ;;  %v16315_v18 = vld [vmem:[#allocation152_spill] sm:$0xff] }
 0x5e3   : > { %v4041_v5 = vmul.f32 %v16310_v61, %v16136_v24  ;;  %v4042_v41 = vmul.f32 %v16311_v63, %v16136_v24  ;;  %v5246_v38 = vadd.f32 %v5118_v55, %v4861_v46  ;;  %v5247_v35 = vadd.f32 %v5119_v25, %v4862_v40  ;;  %v12419_v61 = vld [vmem:[#allocation2 + $0x570] sm:$0xff]  ;;  %16317 = vst [vmem:[#allocation26_spill] sm:$0xff] %v12421_v42  ;;  %v16318_v46 = vld [vmem:[#allocation198_spill] sm:$0xff] }
 0x5e4   : > { %v4426_v7 = vmul.f32 %v16312_v50, %v10700_v62  ;;  %v4427_v14 = vmul.f32 %v16313_v39, %v10700_v62  ;;  %v4811_v47 = vmul.f32 %v16314_v30, %v10742_v34  ;;  %v4812_v48 = vmul.f32 %v16315_v18, %v10742_v34  ;;  %16316 = vst [vmem:[#allocation158_spill] sm:$0xff] %v12419_v61  ;;  %v16319_v63 = vld [vmem:[#allocation197_spill] sm:$0xff]  ;;  %v16322_v39 = vld [vmem:[#allocation196_spill] sm:$0xff]  ;;  %v16323_v18 = vld [vmem:[#allocation202_spill] sm:$0xff] }
 0x5e5   : > { %v4169_v10 = vadd.f32 %v4041_v5, %v3656_v4  ;;  %v4170_v9 = vadd.f32 %v4042_v41, %v3657_v44  ;;  %v5631_v55 = vadd.f32 %v5503_v45, %v5246_v38  ;;  %v5632_v25 = vadd.f32 %v5504_v0, %v5247_v35  ;;  %v12427_v4 = vld [vmem:[#allocation2 + $0x571] sm:$0xff]  ;;  %v12429_v44 = vld [vmem:[#allocation2 + $0x579] sm:$0xff] }
 0x5e6   : > { %v5196_v40 = vmul.f32 %v16318_v46, %v10772_v26  ;;  %v5197_v50 = vmul.f32 %v16319_v63, %v10772_v26  ;;  %16320 = vst [vmem:[#allocation6_spill] sm:$0xff] %v12427_v4  ;;  %v5581_v30 = vmul.f32 %v16322_v39, %v10899_v19  ;;  %v5582_v1 = vmul.f32 %v16323_v18, %v10899_v19  ;;  %v12435_v45 = vld [vmem:[#allocation2 + $0x572] sm:$0xff]  ;;  %v12437_v0 = vld [vmem:[#allocation2 + $0x57a] sm:$0xff] }
 0x5e7   : > { %16321 = vst [vmem:[#allocation204_spill] sm:$0xff] %v12429_v44  ;;  %v4554_v5 = vadd.f32 %v4426_v7, %v4169_v10  ;;  %v4555_v41 = vadd.f32 %v4427_v14, %v4170_v9  ;;  %v6017_v38 = vadd.f32 %v5889_v57, %v5631_v55  ;;  %v6018_v35 = vadd.f32 %v5890_v56, %v5632_v25  ;;  %v2492_v10 = vpop.permute.xlu1 %2491  ;;  %v2512_v14 = vpop.permute.xlu2 %2511 }
 0x5e8   : > { %16324 = vst [vmem:[#allocation205_spill] sm:$0xff] %v12435_v45  ;;  %v5967_v63 = vmul.f32 %v10945_v2, %v12419_v61  ;;  %v5968_v46 = vmul.f32 %v10945_v2, %v12421_v42  ;;  %v6352_v39 = vmul.f32 %v16130_v15, %v12427_v4  ;;  %v6353_v18 = vmul.f32 %v16130_v15, %v12429_v44 }
 0x5e9   : > { %16325 = vst [vmem:[#allocation10_spill] sm:$0xff] %v12437_v0  ;;  %v4939_v7 = vadd.f32 %v4811_v47, %v4554_v5  ;;  %v4940_v9 = vadd.f32 %v4812_v48, %v4555_v41  ;;  %v6402_v57 = vadd.f32 %v6274_v36, %v6017_v38  ;;  %v6403_v56 = vadd.f32 %v6275_v22, %v6018_v35  ;;  %v16326_v38 = vld [vmem:[#allocation86_spill] sm:$0xff] }
 0x5ea   : > { %v6737_v55 = vmul.f32 %v10948_v52, %v12435_v45  ;;  %v6738_v25 = vmul.f32 %v10948_v52, %v12437_v0  ;;  %v2673_v48 = vmul.f32 %v16056_v17, %v2492_v10  ;;  %v2678_v47 = vmul.f32 %v16056_v17, %v2512_v14  ;;  %v16327_v45 = vld [vmem:[#allocation117_spill] sm:$0xff] }
 0x5eb   : > { %v5324_v42 = vadd.f32 %v5196_v40, %v4939_v7  ;;  %v5325_v61 = vadd.f32 %v5197_v50, %v4940_v9  ;;  %v6787_v5 = vadd.f32 %v6659_v11, %v6402_v57  ;;  %v6788_v41 = vadd.f32 %v6660_v33, %v6403_v56  ;;  %v16328_v50 = vld [vmem:[#allocation92_spill] sm:$0xff] }
 0x5ec   : > { %v2676_v44 = vmul.f32 %v16056_v17, %v2504_v53  ;;  %v7180_v4 = vadd.f32 %v12349_v21, %v7179_v29  ;;  %v2801_v35 = vadd.f32 %v2673_v48, %v16326_v38  ;;  %v2806_v59 = vadd.f32 %v2678_v47, %v16327_v45  ;;  %v12461_v53 = vld [vmem:[%s14845_s2] ss:$0 sm:$0xff]  ;;  %v3472_v29 = vld [vmem:[#allocation2 + $0x248] sm:$0xff] }
 0x5ed   : > { %v5709_v36 = vadd.f32 %v5581_v30, %v5324_v42  ;;  %v5710_v22 = vadd.f32 %v5582_v1, %v5325_v61  ;;  %v6915_v0 = vmax.f32 %v6787_v5, 0.0  ;;  %v6916_v40 = vmax.f32 %v6788_v41, 0.0  ;;  %v5782_v5 = vld [vmem:[#allocation2 + $0x270] sm:$0xff] }
 0x5ee   : > { %v2804_v7 = vadd.f32 %v2676_v44, %v16328_v50  ;;  %v7489_v10 = vmax.f32 %v7180_v4, 0.0  ;;  %v2933_v42 = vadd.f32 %v12461_v53, %v2801_v35  ;;  %v2938_v1 = vadd.f32 %v12461_v53, %v2806_v59  ;;  %v3497_v50 = vld [vmem:[#allocation2 + $0x3a8] sm:$0xff] }
 0x5ef   : > { %v6095_v9 = vadd.f32 %v5967_v63, %v5709_v36  ;;  %v6096_v14 = vadd.f32 %v5968_v46, %v5710_v22  ;;  %v7032_v11 = vpack.c.bf16 %v6916_v40, %v6915_v0  ;;  %v3600_v4 = vmul.f32 %v10654_v3, %v3471_v32  ;;  %v6168_v36 = vld [vmem:[#allocation2 + $0x279] sm:$0xff] }
 0x5f0   : > { %v2936_v33 = vadd.f32 %v12461_v53, %v2804_v7  ;;  %v12467_v61 = vadd.f32 %v12358_v23, %v7489_v10  ;;  %v3061_v44 = vmax.f32 %v2933_v42, 0.0  ;;  %v3066_v30 = vmax.f32 %v2938_v1, 0.0  ;;  %v6552_v22 = vld [vmem:[#allocation2 + $0x272] sm:$0xff]  ;;  %v6553_v40 = vld [vmem:[#allocation2 + $0x27a] sm:$0xff] }
 0x5f1   : > { %v6480_v63 = vadd.f32 %v6352_v39, %v6095_v9  ;;  %v6481_v46 = vadd.f32 %v6353_v18, %v6096_v14  ;;  %7216 = vmatmul.bf16.gmra.mxu0 %v7032_v11  ;;  %v3601_v57 = vmul.f32 %v10654_v3, %v3472_v29  ;;  %v3985_v59 = vmul.f32 %v12051_v54, %v16136_v24  ;;  %v3498_v7 = vld [vmem:[#allocation2 + $0x3b0] sm:$0xff] }
 0x5f2   : > { %v3064_v45 = vmax.f32 %v2936_v33, 0.0  ;;  %v3986_v0 = vmul.f32 %v12053_v28, %v16136_v24  ;;  %3406 = vst [vmem:[#allocation2 + $0x5d1] sm:$0xff] %v3061_v44  ;;  %v4370_v23 = vmul.f32 %v12059_v49, %v10700_v62  ;;  %v4371_v32 = vmul.f32 %v12061_v37, %v10700_v62  ;;  %v5783_v28 = vld [vmem:[#allocation2 + $0x278] sm:$0xff] }
 0x5f3   : > { %v6865_v56 = vadd.f32 %v6737_v55, %v6480_v63  ;;  %v6866_v48 = vadd.f32 %v6738_v25, %v6481_v46  ;;  %3411 = vst [vmem:[#allocation2 + $0x609] sm:$0xff] %v3066_v30  ;;  %v4113_v39 = vadd.f32 %v3985_v59, %v3600_v4  ;;  %v4755_v47 = vmul.f32 %v12264_v6, %v10742_v34  ;;  %v6167_v55 = vld [vmem:[#allocation2 + $0x271] sm:$0xff] }
 0x5f4   : > { %v4114_v18 = vadd.f32 %v3986_v0, %v3601_v57  ;;  %v4756_v54 = vmul.f32 %v12266_v60, %v10742_v34  ;;  %3409 = vst [vmem:[#allocation2 + $0x5f1] sm:$0xff] %v3064_v45  ;;  %v5140_v49 = vmul.f32 %v12268_v43, %v10772_v26  ;;  %v5141_v37 = vmul.f32 %v12274_v12, %v10772_v26  ;;  %v16329_v57 = vld [vmem:[#allocation201_spill] sm:$0xff] }
 0x5f5   : > { %v6993_v25 = vmax.f32 %v6865_v56, 0.0  ;;  %v6994_v41 = vmax.f32 %v6866_v48, 0.0  ;;  %v4498_v38 = vadd.f32 %v4370_v23, %v4113_v39  ;;  %v5525_v6 = vmul.f32 %v12276_v20, %v10899_v19  ;;  %v16330_v0 = vld [vmem:[#allocation73_spill] sm:$0xff]  ;;  %v12511_v48 = vld [vmem:[#allocation2 + $0x3d8] sm:$0xff] }
 0x5f6   : > { %v4499_v35 = vadd.f32 %v4371_v32, %v4114_v18  ;;  %v5526_v60 = vmul.f32 %v12282_v51, %v10899_v19  ;;  %v5911_v9 = vmul.f32 %v10945_v2, %v5782_v5  ;;  %v5912_v43 = vmul.f32 %v10945_v2, %v5783_v28  ;;  %v12515_v18 = vld [vmem:[#allocation2 + $0x3e0] sm:$0xff] }
 0x5f7   : > { %v7071_v10 = vpack.c.bf16 %v6994_v41, %v6993_v25  ;;  %v6296_v12 = vmul.f32 %v16130_v15, %v6167_v55  ;;  %v4883_v14 = vadd.f32 %v4755_v47, %v4498_v38  ;;  %v6297_v1 = vmul.f32 %v16130_v15, %v6168_v36  ;;  %v12519_v47 = vld [vmem:[#allocation2 + $0x3e1] sm:$0xff]  ;;  %v2376_v38 = vpop.permute.xlu1 %2375 }
 0x5f8   : > { %v4884_v42 = vadd.f32 %v4756_v54, %v4499_v35  ;;  %v6681_v29 = vmul.f32 %v10948_v52, %v6552_v22  ;;  %v6682_v20 = vmul.f32 %v10948_v52, %v6553_v40  ;;  %v3626_v51 = vmul.f32 %v10654_v3, %v3497_v50  ;;  %v16332_v54 = vld [vmem:[#allocation79_spill] sm:$0xff]  ;;  %v2388_v35 = vpop.permute.xlu2 %2387 }
 0x5f9   : > { %7411 = vmatmul.bf16.gmra.mxu3 %v7071_v10  ;;  %v3627_v11 = vmul.f32 %v10654_v3, %v3498_v7  ;;  %v4011_v33 = vmul.f32 %v16287_v8, %v16136_v24  ;;  %v5268_v4 = vadd.f32 %v5140_v49, %v4883_v14  ;;  %v4012_v46 = vmul.f32 %v12302_v16, %v16136_v24  ;;  %v16331_v16 = vld [vmem:[#allocation175_spill] sm:$0xff]  ;;  %v2384_v7 = vpop.permute.xlu0 %2383 }
 0x5fa   : > { %v5269_v63 = vadd.f32 %v5141_v37, %v4884_v42  ;;  %v4396_v44 = vmul.f32 %v16291_v27, %v10700_v62  ;;  %v4397_v45 = vmul.f32 %v16292_v58, %v10700_v62  ;;  %v4781_v59 = vmul.f32 %v16329_v57, %v10742_v34  ;;  %v12517_v27 = vld [vmem:[#allocation2 + $0x3d9] sm:$0xff]  ;;  %v12531_v22 = vld [vmem:[#allocation2 + $0x3e2] sm:$0xff]  ;;  %v7182_v42 = vpop.f32.mrf.mxu0 }
 0x5fb   : > { %v4139_v30 = vadd.f32 %v4011_v33, %v3626_v51  ;;  %v4782_v56 = vmul.f32 %v16330_v0, %v10742_v34  ;;  %v5653_v8 = vadd.f32 %v5525_v6, %v5268_v4  ;;  %v4140_v32 = vadd.f32 %v4012_v46, %v3627_v11  ;;  %v12527_v25 = vld [vmem:[#allocation2 + $0x3da] sm:$0xff] }
 0x5fc   : > { %v5654_v23 = vadd.f32 %v5526_v60, %v5269_v63  ;;  %v5166_v39 = vmul.f32 %v16331_v16, %v10772_v26  ;;  %v5167_v5 = vmul.f32 %v16332_v54, %v10772_v26  ;;  %v5551_v28 = vmul.f32 %v12325_v31, %v10899_v19 }
 0x5fd   : > { %v4524_v58 = vadd.f32 %v4396_v44, %v4139_v30  ;;  %v5552_v55 = vmul.f32 %v12329_v13, %v10899_v19  ;;  %v6039_v41 = vadd.f32 %v5911_v9, %v5653_v8  ;;  %v4525_v37 = vadd.f32 %v4397_v45, %v4140_v32 }
 0x5fe   : > { %v6040_v49 = vadd.f32 %v5912_v43, %v5654_v23  ;;  %v5937_v36 = vmul.f32 %v10945_v2, %v12511_v48  ;;  %v5938_v60 = vmul.f32 %v10945_v2, %v12515_v18  ;;  %v6322_v40 = vmul.f32 %v16130_v15, %v12517_v27  ;;  %v3451_v23 = vld [vmem:[#allocation2 + $0x120] sm:$0xff] }
 0x5ff   : > { %v4909_v6 = vadd.f32 %v4781_v59, %v4524_v58  ;;  %v6323_v50 = vmul.f32 %v16130_v15, %v12519_v47  ;;  %v6424_v10 = vadd.f32 %v6296_v12, %v6039_v41  ;;  %v4910_v43 = vadd.f32 %v4782_v56, %v4525_v37  ;;  %v16334_v59 = vld [vmem:[#allocation71_spill] sm:$0xff]  ;;  %v16335_v41 = vld [vmem:[#allocation60_spill] sm:$0xff] }
 0x600   : > { %v6425_v9 = vadd.f32 %v6297_v1, %v6040_v49  ;;  %v6707_v14 = vmul.f32 %v10948_v52, %v12527_v25  ;;  %v6708_v11 = vmul.f32 %v10948_v52, %v12531_v22  ;;  %v2644_v33 = vmul.f32 %v16056_v17, %v2376_v38  ;;  %v16333_v1 = vld [vmem:[#allocation129_spill] sm:$0xff]  ;;  %v3452_v38 = vld [vmem:[#allocation2 + $0x128] sm:$0xff] }
 0x601   : > { %v5294_v51 = vadd.f32 %v5166_v39, %v4909_v6  ;;  %v2647_v4 = vmul.f32 %v16056_v17, %v2388_v35  ;;  %v6809_v63 = vadd.f32 %v6681_v29, %v6424_v10  ;;  %v5295_v44 = vadd.f32 %v5167_v5, %v4910_v43 }
 0x602   : > { %v6810_v46 = vadd.f32 %v6682_v20, %v6425_v9  ;;  %v2646_v30 = vmul.f32 %v16056_v17, %v2384_v7  ;;  %v2772_v45 = vadd.f32 %v2644_v33, %v16333_v1  ;;  %v7183_v8 = vadd.f32 %v12349_v21, %v7182_v42  ;;  %v16336_v33 = vld [vmem:[#allocation172_spill] sm:$0xff] }
 0x603   : > { %v5679_v12 = vadd.f32 %v5551_v28, %v5294_v51  ;;  %v2775_v56 = vadd.f32 %v2647_v4, %v16334_v59  ;;  %v6937_v32 = vmax.f32 %v6809_v63, 0.0  ;;  %v5680_v58 = vadd.f32 %v5552_v55, %v5295_v44  ;;  %v16340_v1 = vld [vmem:[#allocation200_spill] sm:$0xff]  ;;  %v16341_v59 = vld [vmem:[#allocation199_spill] sm:$0xff] }
 0x604   : > { %v6938_v39 = vmax.f32 %v6810_v46, 0.0  ;;  %v2774_v49 = vadd.f32 %v2646_v30, %v16335_v41  ;;  %v2904_v29 = vadd.f32 %v12461_v53, %v2772_v45  ;;  %v7490_v5 = vmax.f32 %v7183_v8, 0.0  ;;  %v16339_v30 = vld [vmem:[#allocation149_spill] sm:$0xff]  ;;  %v12572_v8 = vld [vmem:[#allocation2 + $0x158] sm:$0xff]  ;;  %v16346_v41 = vld [vmem:[#allocation156_spill] sm:$0xff] }
 0x605   : > { %v6065_v37 = vadd.f32 %v5937_v36, %v5679_v12  ;;  %v2907_v20 = vadd.f32 %v12461_v53, %v2775_v56  ;;  %v6066_v35 = vadd.f32 %v5938_v60, %v5680_v58  ;;  %v3580_v7 = vmul.f32 %v10654_v3, %v3451_v23  ;;  %v16337_v60 = vld [vmem:[#allocation180_spill] sm:$0xff]  ;;  %16343 = vst [vmem:[#allocation3_spill] sm:$0xff] %v12572_v8  ;;  %v12574_v23 = vld [vmem:[#allocation2 + $0x151] sm:$0xff] }
 0x606   : > { %v7043_v28 = vpack.c.bf16 %v6938_v39, %v6937_v32  ;;  %v2906_v6 = vadd.f32 %v12461_v53, %v2774_v49  ;;  %v3032_v9 = vmax.f32 %v2904_v29, 0.0  ;;  %v12555_v55 = vadd.f32 %v12467_v61, %v7490_v5  ;;  %16344 = vst [vmem:[#allocation5_spill] sm:$0xff] %v12574_v23  ;;  %v16345_v58 = vld [vmem:[#allocation157_spill] sm:$0xff] }
 0x607   : > { %v6450_v10 = vadd.f32 %v6322_v40, %v6065_v37  ;;  %v3035_v43 = vmax.f32 %v2907_v20, 0.0  ;;  %v6451_v36 = vadd.f32 %v6323_v50, %v6066_v35  ;;  %v3581_v51 = vmul.f32 %v10654_v3, %v3452_v38  ;;  %v16338_v40 = vld [vmem:[#allocation9_spill] sm:$0xff]  ;;  %v12580_v37 = vld [vmem:[#allocation2 + $0x159] sm:$0xff] }
 0x608   : > { %7271 = vmatmul.bf16.gmra.mxu1 %v7043_v28  ;;  %v3034_v42 = vmax.f32 %v2906_v6, 0.0  ;;  %v3965_v4 = vmul.f32 %v16336_v33, %v16136_v24  ;;  %3377 = vst [vmem:[#allocation2 + $0x441] sm:$0xff] %v3032_v9  ;;  %v3966_v46 = vmul.f32 %v16337_v60, %v16136_v24  ;;  %v4350_v44 = vmul.f32 %v16338_v40, %v10700_v62  ;;  %v12582_v29 = vld [vmem:[#allocation2 + $0x152] sm:$0xff]  ;;  %v16349_v38 = vld [vmem:[#allocation203_spill] sm:$0xff] }
 0x609   : > { %v6835_v63 = vadd.f32 %v6707_v14, %v6450_v10  ;;  %v4351_v61 = vmul.f32 %v16339_v30, %v10700_v62  ;;  %v6836_v12 = vadd.f32 %v6708_v11, %v6451_v36  ;;  %3380 = vst [vmem:[#allocation2 + $0x469] sm:$0xff] %v3035_v43  ;;  %v4735_v45 = vmul.f32 %v16340_v1, %v10742_v34  ;;  %v12570_v14 = vld [vmem:[#allocation2 + $0x150] sm:$0xff]  ;;  %v16350_v35 = vld [vmem:[#allocation159_spill] sm:$0xff]  ;;  %v3529_v10 = vld [vmem:[#allocation2 + $0x558] sm:$0xff] }
 0x60a   : > { %v4093_v50 = vadd.f32 %v3965_v4, %v3580_v7  ;;  %v4736_v56 = vmul.f32 %v16341_v59, %v10742_v34  ;;  %16342 = vst [vmem:[#allocation4_spill] sm:$0xff] %v12570_v14  ;;  %v4094_v39 = vadd.f32 %v3966_v46, %v3581_v51  ;;  %v5120_v11 = vmul.f32 %v16345_v58, %v10772_v26  ;;  %v12588_v7 = vld [vmem:[#allocation2 + $0x15a] sm:$0xff] }
 0x60b   : > { %v6963_v32 = vmax.f32 %v6835_v63, 0.0  ;;  %3379 = vst [vmem:[#allocation2 + $0x459] sm:$0xff] %v3034_v42  ;;  %v5121_v49 = vmul.f32 %v16346_v41, %v10772_v26  ;;  %v6964_v20 = vmax.f32 %v6836_v12, 0.0  ;;  %v5505_v28 = vmul.f32 %v16349_v38, %v10899_v19  ;;  %v3530_v9 = vld [vmem:[#allocation2 + $0x560] sm:$0xff]  ;;  %v16352_v12 = vld [vmem:[#allocation198_spill] sm:$0xff] }
 0x60c   : > { %16347 = vst [vmem:[#allocation44_spill] sm:$0xff] %v12580_v37  ;;  %v4478_v5 = vadd.f32 %v4350_v44, %v4093_v50  ;;  %v5506_v6 = vmul.f32 %v16350_v35, %v10899_v19  ;;  %v4479_v43 = vadd.f32 %v4351_v61, %v4094_v39  ;;  %v5891_v36 = vmul.f32 %v10945_v2, %v12570_v14  ;;  %v16354_v39 = vld [vmem:[#allocation196_spill] sm:$0xff]  ;;  %v12636_v14 = vld [vmem:[#allocation2 + $0x592] sm:$0xff] }
 0x60d   : > { %16348 = vst [vmem:[#allocation36_spill] sm:$0xff] %v12582_v29  ;;  %v5892_v42 = vmul.f32 %v10945_v2, %v12572_v8  ;;  %v6276_v51 = vmul.f32 %v16130_v15, %v12574_v23  ;;  %v7056_v33 = vpack.c.bf16 %v6964_v20, %v6963_v32  ;;  %v6277_v63 = vmul.f32 %v16130_v15, %v12580_v37  ;;  %v12620_v23 = vld [vmem:[#allocation2 + $0x590] sm:$0xff] }
 0x60e   : > { %16351 = vst [vmem:[#allocation50_spill] sm:$0xff] %v12588_v7  ;;  %v4863_v4 = vadd.f32 %v4735_v45, %v4478_v5  ;;  %v6661_v60 = vmul.f32 %v10948_v52, %v12582_v29  ;;  %v4864_v46 = vadd.f32 %v4736_v56, %v4479_v43  ;;  %v6662_v40 = vmul.f32 %v10948_v52, %v12588_v7  ;;  %v16353_v45 = vld [vmem:[#allocation197_spill] sm:$0xff]  ;;  %v16355_v56 = vld [vmem:[#allocation202_spill] sm:$0xff] }
 0x60f   : > { %v3658_v44 = vmul.f32 %v10654_v3, %v3529_v10  ;;  %v3659_v30 = vmul.f32 %v10654_v3, %v3530_v9  ;;  %7336 = vmatmul.bf16.gmra.mxu2 %v7056_v33  ;;  %v4043_v50 = vmul.f32 %v16352_v12, %v16136_v24  ;;  %v4044_v32 = vmul.f32 %v16353_v45, %v16136_v24  ;;  %v16356_v7 = vld [vmem:[#allocation158_spill] sm:$0xff] }
 0x610   : > { %v5248_v61 = vadd.f32 %v5120_v11, %v4863_v4  ;;  %v4428_v20 = vmul.f32 %v16354_v39, %v10700_v62  ;;  %v5249_v5 = vadd.f32 %v5121_v49, %v4864_v46  ;;  %v4429_v43 = vmul.f32 %v16355_v56, %v10700_v62  ;;  %v16357_v9 = vld [vmem:[#allocation26_spill] sm:$0xff]  ;;  %v12616_v11 = vld [vmem:[#allocation2 + $0x588] sm:$0xff]  ;;  %16360 = vst [vmem:[#allocation42_spill] sm:$0xff] %v12620_v23 }
 0x611   : > { %v4813_v10 = vmul.f32 %v16356_v7, %v10742_v34  ;;  %v4814_v33 = vmul.f32 %v16357_v9, %v10742_v34  ;;  %16358 = vst [vmem:[#allocation155_spill] sm:$0xff] %v12616_v11  ;;  %v4171_v12 = vadd.f32 %v4043_v50, %v3658_v44  ;;  %v4172_v29 = vadd.f32 %v4044_v32, %v3659_v30  ;;  %v16359_v45 = vld [vmem:[#allocation6_spill] sm:$0xff]  ;;  %v12622_v49 = vld [vmem:[#allocation2 + $0x589] sm:$0xff] }
 0x612   : > { %v5633_v4 = vadd.f32 %v5505_v28, %v5248_v61  ;;  %v5198_v37 = vmul.f32 %v16359_v45, %v10772_v26  ;;  %16361 = vst [vmem:[#allocation55_spill] sm:$0xff] %v12622_v49  ;;  %v12624_v46 = vld [vmem:[#allocation2 + $0x591] sm:$0xff]  ;;  %v5634_v39 = vadd.f32 %v5506_v6, %v5249_v5  ;;  %v16363_v56 = vld [vmem:[#allocation204_spill] sm:$0xff]  ;;  %v5969_v45 = vmul.f32 %v10945_v2, %v12616_v11  ;;  %v2248_v6 = vpop.permute.xlu1 %2247  ;;  %v2520_v5 = vpop.permute.xlu2 %2519 }
 0x613   : > { %16362 = vst [vmem:[#allocation20_spill] sm:$0xff] %v12624_v46  ;;  %v5199_v7 = vmul.f32 %v16363_v56, %v10772_v26  ;;  %v16364_v9 = vld [vmem:[#allocation205_spill] sm:$0xff]  ;;  %v16365_v28 = vld [vmem:[#allocation10_spill] sm:$0xff]  ;;  %v4556_v50 = vadd.f32 %v4428_v20, %v4171_v12  ;;  %v4557_v32 = vadd.f32 %v4429_v43, %v4172_v29  ;;  %v5970_v56 = vmul.f32 %v10945_v2, %v12620_v23  ;;  %v7184_v12 = vpop.f32.mrf.mxu0 }
 0x614   : > { %v5583_v8 = vmul.f32 %v16364_v9, %v10899_v19  ;;  %v5584_v44 = vmul.f32 %v16365_v28, %v10899_v19  ;;  %v12632_v30 = vld [vmem:[#allocation2 + $0x58a] sm:$0xff]  ;;  %v6019_v61 = vadd.f32 %v5891_v36, %v5633_v4  ;;  %16367 = vst [vmem:[#allocation61_spill] sm:$0xff] %v12636_v14  ;;  %v6020_v35 = vadd.f32 %v5892_v42, %v5634_v39  ;;  %v2252_v36 = vpop.permute.xlu0 %2251 }
 0x615   : > { %16366 = vst [vmem:[#allocation56_spill] sm:$0xff] %v12632_v30  ;;  %v6354_v9 = vmul.f32 %v16130_v15, %v12622_v49  ;;  %v6355_v28 = vmul.f32 %v16130_v15, %v12624_v46  ;;  %v4941_v29 = vadd.f32 %v4813_v10, %v4556_v50  ;;  %v4942_v43 = vadd.f32 %v4814_v33, %v4557_v32  ;;  %v16368_v10 = vld [vmem:[#allocation49_spill] sm:$0xff] }
 0x616   : > { %v6404_v20 = vadd.f32 %v6276_v51, %v6019_v61  ;;  %v6739_v4 = vmul.f32 %v10948_v52, %v12632_v30  ;;  %v6405_v11 = vadd.f32 %v6277_v63, %v6020_v35  ;;  %v6740_v42 = vmul.f32 %v10948_v52, %v12636_v14  ;;  %v16369_v61 = vld [vmem:[#allocation109_spill] sm:$0xff] }
 0x617   : > { %v2612_v39 = vmul.f32 %v16056_v17, %v2248_v6  ;;  %v2680_v23 = vmul.f32 %v16056_v17, %v2520_v5  ;;  %v5326_v38 = vadd.f32 %v5198_v37, %v4941_v29  ;;  %v5327_v41 = vadd.f32 %v5199_v7, %v4942_v43  ;;  %v16370_v14 = vld [vmem:[#allocation85_spill] sm:$0xff]  ;;  %v12690_v43 = vld [vmem:[#allocation2 + $0x3f9] sm:$0xff] }
 0x618   : > { %v6789_v49 = vadd.f32 %v6661_v60, %v6404_v20  ;;  %v2613_v46 = vmul.f32 %v16056_v17, %v2252_v36  ;;  %v6790_v51 = vadd.f32 %v6662_v40, %v6405_v11  ;;  %v7185_v32 = vadd.f32 %v12349_v21, %v7184_v12  ;;  %v12686_v20 = vld [vmem:[#allocation2 + $0x3f8] sm:$0xff] }
 0x619   : > { %v2740_v33 = vadd.f32 %v2612_v39, %v16368_v10  ;;  %v2808_v50 = vadd.f32 %v2680_v23, %v16369_v61  ;;  %v5711_v63 = vadd.f32 %v5583_v8, %v5326_v38  ;;  %v5712_v30 = vadd.f32 %v5584_v44, %v5327_v41  ;;  %v12688_v29 = vld [vmem:[#allocation2 + $0x3f1] sm:$0xff] }
 0x61a   : > { %v6917_v35 = vmax.f32 %v6789_v49, 0.0  ;;  %v2741_v58 = vadd.f32 %v2613_v46, %v16370_v14  ;;  %v6918_v6 = vmax.f32 %v6790_v51, 0.0  ;;  %v7491_v7 = vmax.f32 %v7185_v32, 0.0  ;;  %v12696_v39 = vld [vmem:[#allocation2 + $0x3f2] sm:$0xff]  ;;  %v12698_v51 = vld [vmem:[#allocation2 + $0x3fa] sm:$0xff]  ;;  %v2508_v10 = vpop.permute.xlu1 %2507 }
 0x61b   : > { %v12656_v5 = vadd.f32 %v12461_v53, %v2740_v33  ;;  %v2940_v37 = vadd.f32 %v12461_v53, %v2808_v50  ;;  %v6097_v60 = vadd.f32 %v5969_v45, %v5711_v63  ;;  %v6098_v40 = vadd.f32 %v5970_v56, %v5712_v30  ;;  %v2396_v33 = vpop.permute.xlu2 %2395 }
 0x61c   : > { %v2873_v11 = vadd.f32 %v12461_v53, %v2741_v58  ;;  %v3628_v23 = vmul.f32 %v16329_v57, %v10654_v3  ;;  %v7033_v36 = vpack.c.bf16 %v6918_v6, %v6917_v35  ;;  %v12664_v14 = vadd.f32 %v12555_v55, %v7491_v7  ;;  %v2392_v63 = vpop.permute.xlu0 %2391  ;;  %v7187_v6 = vpop.f32.mrf.mxu0 }
 0x61d   : > { %16371 = vst [vmem:[#allocation19_spill] sm:$0xff] %v12656_v5  ;;  %v15074_v8 = vmax.f32 %v12656_v5, 0.0  ;;  %v3068_v41 = vmax.f32 %v2940_v37, 0.0  ;;  %v6482_v38 = vadd.f32 %v6354_v9, %v6097_v60  ;;  %v6483_v49 = vadd.f32 %v6355_v28, %v6098_v40  ;;  %v12680_v28 = vld [vmem:[#allocation2 + $0x3f0] sm:$0xff] }
 0x61e   : > { %v3001_v46 = vmax.f32 %v2873_v11, 0.0  ;;  %v3629_v44 = vmul.f32 %v16330_v0, %v10654_v3  ;;  %7221 = vmatmul.bf16.gmra.mxu0 %v7033_v36  ;;  %v4013_v57 = vmul.f32 %v16331_v16, %v16136_v24  ;;  %v4014_v58 = vmul.f32 %v16332_v54, %v16136_v24 }
 0x61f   : > { %3345 = vst [vmem:[#allocation2 + $0x291] sm:$0xff] %v15074_v8  ;;  %v4398_v55 = vmul.f32 %v12325_v31, %v10700_v62  ;;  %v6867_v45 = vadd.f32 %v6739_v4, %v6482_v38  ;;  %v6868_v9 = vadd.f32 %v6740_v42, %v6483_v49  ;;  %v4399_v56 = vmul.f32 %v12329_v13, %v10700_v62 }
 0x620   : > { %3413 = vst [vmem:[#allocation2 + $0x621] sm:$0xff] %v3068_v41  ;;  %v4783_v0 = vmul.f32 %v12511_v48, %v10742_v34  ;;  %v4141_v30 = vadd.f32 %v4013_v57, %v3628_v23  ;;  %v4142_v16 = vadd.f32 %v4014_v58, %v3629_v44  ;;  %v4784_v54 = vmul.f32 %v12515_v18, %v10742_v34 }
 0x621   : > { %3346 = vst [vmem:[#allocation2 + $0x2a1] sm:$0xff] %v3001_v46  ;;  %v5168_v31 = vmul.f32 %v12517_v27, %v10772_v26  ;;  %v6995_v13 = vmax.f32 %v6867_v45, 0.0  ;;  %v6996_v4 = vmax.f32 %v6868_v9, 0.0  ;;  %v5169_v12 = vmul.f32 %v12519_v47, %v10772_v26  ;;  %v16372_v9 = vld [vmem:[#allocation169_spill] sm:$0xff] }
 0x622   : > { %v5553_v42 = vmul.f32 %v12527_v25, %v10899_v19  ;;  %v4526_v61 = vadd.f32 %v4398_v55, %v4141_v30  ;;  %v4527_v50 = vadd.f32 %v4399_v56, %v4142_v16  ;;  %v5554_v32 = vmul.f32 %v12531_v22, %v10899_v19  ;;  %v16374_v16 = vld [vmem:[#allocation80_spill] sm:$0xff] }
 0x623   : > { %v5939_v35 = vmul.f32 %v10945_v2, %v12680_v28  ;;  %v7072_v37 = vpack.c.bf16 %v6996_v4, %v6995_v13  ;;  %v5940_v7 = vmul.f32 %v10945_v2, %v12686_v20  ;;  %v6324_v60 = vmul.f32 %v16130_v15, %v12688_v29 }
 0x624   : > { %v6325_v40 = vmul.f32 %v16130_v15, %v12690_v43  ;;  %v4911_v11 = vadd.f32 %v4783_v0, %v4526_v61  ;;  %v4912_v23 = vadd.f32 %v4784_v54, %v4527_v50  ;;  %v6709_v36 = vmul.f32 %v10948_v52, %v12696_v39  ;;  %v16373_v0 = vld [vmem:[#allocation66_spill] sm:$0xff] }
 0x625   : > { %v6710_v41 = vmul.f32 %v10948_v52, %v12698_v51  ;;  %7416 = vmatmul.bf16.gmra.mxu3 %v7072_v37  ;;  %v2677_v38 = vmul.f32 %v16056_v17, %v2508_v10  ;;  %v2649_v49 = vmul.f32 %v16056_v17, %v2396_v33  ;;  %v2648_v46 = vmul.f32 %v16056_v17, %v2392_v63  ;;  %v16375_v33 = vld [vmem:[#allocation157_spill] sm:$0xff] }
 0x626   : > { %v7188_v44 = vadd.f32 %v12349_v21, %v7187_v6  ;;  %v5296_v57 = vadd.f32 %v5168_v31, %v4911_v11  ;;  %v5297_v58 = vadd.f32 %v5169_v12, %v4912_v23  ;;  %v3582_v55 = vmul.f32 %v16340_v1, %v10654_v3  ;;  %v16376_v31 = vld [vmem:[#allocation156_spill] sm:$0xff] }
 0x627   : > { %v3583_v45 = vmul.f32 %v16341_v59, %v10654_v3  ;;  %v2805_v56 = vadd.f32 %v2677_v38, %v16372_v9  ;;  %v2777_v30 = vadd.f32 %v2649_v49, %v16373_v0  ;;  %v2776_v54 = vadd.f32 %v2648_v46, %v16374_v16  ;;  %v16377_v38 = vld [vmem:[#allocation203_spill] sm:$0xff]  ;;  %v16379_v9 = vld [vmem:[#allocation4_spill] sm:$0xff]  ;;  %v16383_v0 = vld [vmem:[#allocation5_spill] sm:$0xff] }
 0x628   : > { %v7492_v13 = vmax.f32 %v7188_v44, 0.0  ;;  %v5681_v4 = vadd.f32 %v5553_v42, %v5296_v57  ;;  %v5682_v10 = vadd.f32 %v5554_v32, %v5297_v58  ;;  %v3967_v21 = vmul.f32 %v16375_v33, %v16136_v24  ;;  %v16378_v57 = vld [vmem:[#allocation159_spill] sm:$0xff]  ;;  %v12751_v16 = vld [vmem:[#allocation2 + $0x169] sm:$0xff] }
 0x629   : > { %v3968_v12 = vmul.f32 %v16376_v31, %v16136_v24  ;;  %v2937_v1 = vadd.f32 %v12461_v53, %v2805_v56  ;;  %v2909_v61 = vadd.f32 %v12461_v53, %v2777_v30  ;;  %v2908_v59 = vadd.f32 %v12461_v53, %v2776_v54  ;;  %16385 = vst [vmem:[#allocation25_spill] sm:$0xff] %v12751_v16  ;;  %v12757_v31 = vld [vmem:[#allocation2 + $0x16a] sm:$0xff] }
 0x62a   : > { %v12733_v50 = vadd.f32 %v12664_v14, %v7492_v13  ;;  %v6067_v63 = vadd.f32 %v5939_v35, %v5681_v4  ;;  %v6068_v6 = vadd.f32 %v5940_v7, %v5682_v10  ;;  %v4095_v37 = vadd.f32 %v3967_v21, %v3582_v55  ;;  %v12741_v14 = vld [vmem:[#allocation2 + $0x168] sm:$0xff]  ;;  %v12743_v35 = vld [vmem:[#allocation2 + $0x170] sm:$0xff]  ;;  %v16382_v55 = vld [vmem:[#allocation3_spill] sm:$0xff]  ;;  %16388 = vst [vmem:[#allocation13_spill] sm:$0xff] %v12757_v31 }
 0x62b   : > { %v4096_v42 = vadd.f32 %v3968_v12, %v3583_v45  ;;  %v3065_v32 = vmax.f32 %v2937_v1, 0.0  ;;  %v3037_v11 = vmax.f32 %v2909_v61, 0.0  ;;  %v3036_v23 = vmax.f32 %v2908_v59, 0.0  ;;  %16380 = vst [vmem:[#allocation62_spill] sm:$0xff] %v12741_v14  ;;  %v16386_v10 = vld [vmem:[#allocation36_spill] sm:$0xff]  ;;  %v12755_v21 = vld [vmem:[#allocation2 + $0x171] sm:$0xff] }
 0x62c   : > { %v4352_v49 = vmul.f32 %v16377_v38, %v10700_v62  ;;  %v6452_v46 = vadd.f32 %v6324_v60, %v6067_v63  ;;  %v6453_v44 = vadd.f32 %v6325_v40, %v6068_v6  ;;  %v4353_v58 = vmul.f32 %v16378_v57, %v10700_v62  ;;  %16381 = vst [vmem:[#allocation7_spill] sm:$0xff] %v12743_v35  ;;  %v16384_v60 = vld [vmem:[#allocation44_spill] sm:$0xff]  ;;  %v12759_v12 = vld [vmem:[#allocation2 + $0x172] sm:$0xff] }
 0x62d   : > { %v4737_v56 = vmul.f32 %v16379_v9, %v10742_v34  ;;  %3410 = vst [vmem:[#allocation2 + $0x601] sm:$0xff] %v3065_v32  ;;  %v4738_v45 = vmul.f32 %v16382_v55, %v10742_v34  ;;  %v5122_v30 = vmul.f32 %v16383_v0, %v10772_v26  ;;  %v5123_v40 = vmul.f32 %v16384_v60, %v10772_v26  ;;  %v16390_v61 = vld [vmem:[#allocation50_spill] sm:$0xff] }
 0x62e   : > { %v4480_v7 = vadd.f32 %v4352_v49, %v4095_v37  ;;  %v6837_v54 = vadd.f32 %v6709_v36, %v6452_v46  ;;  %v6838_v13 = vadd.f32 %v6710_v41, %v6453_v44  ;;  %3382 = vst [vmem:[#allocation2 + $0x481] sm:$0xff] %v3037_v11  ;;  %v4481_v4 = vadd.f32 %v4353_v58, %v4096_v42  ;;  %v16391_v44 = vld [vmem:[#allocation158_spill] sm:$0xff] }
 0x62f   : > { %v5507_v33 = vmul.f32 %v16386_v10, %v10899_v19  ;;  %16387 = vst [vmem:[#allocation68_spill] sm:$0xff] %v12755_v21  ;;  %v5508_v59 = vmul.f32 %v16390_v61, %v10899_v19  ;;  %v5893_v36 = vmul.f32 %v10945_v2, %v12741_v14  ;;  %v5894_v41 = vmul.f32 %v10945_v2, %v12743_v35  ;;  %v16392_v58 = vld [vmem:[#allocation26_spill] sm:$0xff] }
 0x630   : > { %16389 = vst [vmem:[#allocation31_spill] sm:$0xff] %v12759_v12  ;;  %v4865_v1 = vadd.f32 %v4737_v56, %v4480_v7  ;;  %v6965_v63 = vmax.f32 %v6837_v54, 0.0  ;;  %v6966_v6 = vmax.f32 %v6838_v13, 0.0  ;;  %v4866_v37 = vadd.f32 %v4738_v45, %v4481_v4  ;;  %v16393_v45 = vld [vmem:[#allocation6_spill] sm:$0xff]  ;;  %v16394_v54 = vld [vmem:[#allocation204_spill] sm:$0xff]  ;;  %v16395_v4 = vld [vmem:[#allocation205_spill] sm:$0xff] }
 0x631   : > { %3381 = vst [vmem:[#allocation2 + $0x471] sm:$0xff] %v3036_v23  ;;  %v6278_v42 = vmul.f32 %v16130_v15, %v12751_v16  ;;  %v6279_v11 = vmul.f32 %v16130_v15, %v12755_v21  ;;  %v6663_v23 = vmul.f32 %v10948_v52, %v12757_v31  ;;  %v6664_v38 = vmul.f32 %v10948_v52, %v12759_v12  ;;  %v12811_v21 = vld [vmem:[#allocation2 + $0x5aa] sm:$0xff] }
 0x632   : > { %v5250_v32 = vadd.f32 %v5122_v30, %v4865_v1  ;;  %v7057_v49 = vpack.c.bf16 %v6966_v6, %v6965_v63  ;;  %v5251_v46 = vadd.f32 %v5123_v40, %v4866_v37  ;;  %v3660_v57 = vmul.f32 %v16391_v44, %v10654_v3  ;;  %v16396_v40 = vld [vmem:[#allocation10_spill] sm:$0xff]  ;;  %v16397_v6 = vld [vmem:[#allocation155_spill] sm:$0xff]  ;;  %16407 = vst [vmem:[#allocation12_spill] sm:$0xff] %v12811_v21 }
 0x633   : > { %v3661_v56 = vmul.f32 %v16392_v58, %v10654_v3  ;;  %v4045_v30 = vmul.f32 %v16393_v45, %v16136_v24  ;;  %v4046_v13 = vmul.f32 %v16394_v54, %v16136_v24  ;;  %v4430_v1 = vmul.f32 %v16395_v4, %v10700_v62  ;;  %v16398_v44 = vld [vmem:[#allocation42_spill] sm:$0xff]  ;;  %v16400_v54 = vld [vmem:[#allocation55_spill] sm:$0xff]  ;;  %v12795_v4 = vld [vmem:[#allocation2 + $0x5a8] sm:$0xff] }
 0x634   : > { %v5635_v7 = vadd.f32 %v5507_v33, %v5250_v32  ;;  %7341 = vmatmul.bf16.gmra.mxu2 %v7057_v49  ;;  %v5636_v8 = vadd.f32 %v5508_v59, %v5251_v46  ;;  %v4431_v63 = vmul.f32 %v16396_v40, %v10700_v62  ;;  %v4815_v37 = vmul.f32 %v16397_v6, %v10742_v34  ;;  %v12791_v32 = vld [vmem:[#allocation2 + $0x5a0] sm:$0xff]  ;;  %v12799_v49 = vld [vmem:[#allocation2 + $0x5a9] sm:$0xff] }
 0x635   : > { %v4816_v33 = vmul.f32 %v16398_v44, %v10742_v34  ;;  %16399 = vst [vmem:[#allocation67_spill] sm:$0xff] %v12791_v32  ;;  %v4173_v45 = vadd.f32 %v4045_v30, %v3660_v57  ;;  %v4174_v5 = vadd.f32 %v4046_v13, %v3661_v56  ;;  %v5200_v12 = vmul.f32 %v16400_v54, %v10772_v26  ;;  %v12797_v59 = vld [vmem:[#allocation2 + $0x5a1] sm:$0xff] }
 0x636   : > { %v6021_v58 = vadd.f32 %v5893_v36, %v5635_v7  ;;  %16401 = vst [vmem:[#allocation16_spill] sm:$0xff] %v12795_v4  ;;  %v6022_v46 = vadd.f32 %v5894_v41, %v5636_v8  ;;  %v16404_v40 = vld [vmem:[#allocation20_spill] sm:$0xff]  ;;  %v16406_v36 = vld [vmem:[#allocation61_spill] sm:$0xff]  ;;  %v5971_v54 = vmul.f32 %v10945_v2, %v12791_v32  ;;  %v2256_v8 = vpop.permute.xlu1 %2255  ;;  %v2528_v41 = vpop.permute.xlu2 %2527 }
 0x637   : > { %16402 = vst [vmem:[#allocation74_spill] sm:$0xff] %v12797_v59  ;;  %v5201_v6 = vmul.f32 %v16404_v40, %v10772_v26  ;;  %v16405_v44 = vld [vmem:[#allocation56_spill] sm:$0xff]  ;;  %v5586_v57 = vmul.f32 %v16406_v36, %v10899_v19  ;;  %v4558_v30 = vadd.f32 %v4430_v1, %v4173_v45  ;;  %v4559_v13 = vadd.f32 %v4431_v63, %v4174_v5  ;;  %v7189_v45 = vpop.f32.mrf.mxu0 }
 0x638   : > { %16403 = vst [vmem:[#allocation131_spill] sm:$0xff] %v12799_v49  ;;  %v5585_v31 = vmul.f32 %v16405_v44, %v10899_v19  ;;  %v12807_v56 = vld [vmem:[#allocation2 + $0x5a2] sm:$0xff]  ;;  %v6406_v7 = vadd.f32 %v6278_v42, %v6021_v58  ;;  %v6407_v16 = vadd.f32 %v6279_v11, %v6022_v46  ;;  %v5972_v40 = vmul.f32 %v10945_v2, %v12795_v4  ;;  %v2260_v42 = vpop.permute.xlu0 %2259 }
 0x639   : > { %v6356_v44 = vmul.f32 %v16130_v15, %v12797_v59  ;;  %v6357_v36 = vmul.f32 %v16130_v15, %v12799_v49  ;;  %v4943_v5 = vadd.f32 %v4815_v37, %v4558_v30  ;;  %v4944_v63 = vadd.f32 %v4816_v33, %v4559_v13  ;;  %v7242_v59 = vpop.f32.mrf.mxu1  ;;  %v16408_v33 = vld [vmem:[#allocation100_spill] sm:$0xff]  ;;  %v16409_v30 = vld [vmem:[#allocation101_spill] sm:$0xff] }
 0x63a   : > { %v6791_v1 = vadd.f32 %v6663_v23, %v6406_v7  ;;  %v6741_v58 = vmul.f32 %v10948_v52, %v12807_v56  ;;  %v6792_v32 = vadd.f32 %v6664_v38, %v6407_v16  ;;  %v6742_v11 = vmul.f32 %v10948_v52, %v12811_v21  ;;  %v12831_v16 = vld [vmem:[%s14848_s5] ss:$0 sm:$0xff]  ;;  %v16410_v21 = vld [vmem:[#allocation45_spill] sm:$0xff] }
 0x63b   : > { %v2614_v46 = vmul.f32 %v16056_v17, %v2256_v8  ;;  %v2682_v4 = vmul.f32 %v16056_v17, %v2528_v41  ;;  %v5328_v14 = vadd.f32 %v5200_v12, %v4943_v5  ;;  %v5329_v49 = vadd.f32 %v5201_v6, %v4944_v63 }
 0x63c   : > { %v6919_v35 = vmax.f32 %v6791_v1, 0.0  ;;  %v2615_v23 = vmul.f32 %v16056_v17, %v2260_v42  ;;  %v6920_v37 = vmax.f32 %v6792_v32, 0.0  ;;  %v7190_v38 = vadd.f32 %v12831_v16, %v7189_v45  ;;  %v16414_v45 = vld [vmem:[#allocation102_spill] sm:$0xff] }
 0x63d   : > { %v2742_v7 = vadd.f32 %v2614_v46, %v16408_v33  ;;  %v2810_v13 = vadd.f32 %v2682_v4, %v16409_v30  ;;  %v5713_v8 = vadd.f32 %v5585_v31, %v5328_v14  ;;  %v5714_v41 = vadd.f32 %v5586_v57, %v5329_v49  ;;  %v12866_v33 = vld [vmem:[#allocation2 + $0x408] sm:$0xff] }
 0x63e   : > { %v2743_v1 = vadd.f32 %v2615_v23, %v16410_v21  ;;  %v12836_v12 = vadd.f32 %v12831_v16, %v7242_v59  ;;  %v7034_v6 = vpack.c.bf16 %v6920_v37, %v6919_v35  ;;  %v7493_v42 = vmax.f32 %v7190_v38, 0.0  ;;  %v12878_v30 = vld [vmem:[#allocation2 + $0x40a] sm:$0xff] }
 0x63f   : > { %v12839_v32 = vadd.f32 %v12461_v53, %v2742_v7  ;;  %v2942_v4 = vadd.f32 %v12461_v53, %v2810_v13  ;;  %v6099_v5 = vadd.f32 %v5971_v54, %v5713_v8  ;;  %v6100_v63 = vadd.f32 %v5972_v40, %v5714_v41  ;;  %16412 = vst [vmem:[#allocation11_spill] sm:$0xff] %v12878_v30  ;;  %v2516_v13 = vpop.permute.xlu1 %2515 }
 0x640   : > { %v2875_v46 = vadd.f32 %v12461_v53, %v2743_v1  ;;  %7226 = vmatmul.bf16.gmra.mxu0 %v7034_v6  ;;  %v12846_v31 = vadd.f32 %v12733_v50, %v7493_v42  ;;  %v3630_v35 = vmul.f32 %v12511_v48, %v10654_v3  ;;  %v3631_v54 = vmul.f32 %v12515_v18, %v10654_v3  ;;  %v12884_v6 = vld [vmem:[#allocation2 + $0x412] sm:$0xff]  ;;  %v2400_v42 = vpop.permute.xlu0 %2399 }
 0x641   : > { %16411 = vst [vmem:[#allocation22_spill] sm:$0xff] %v12839_v32  ;;  %v15093_v14 = vmax.f32 %v12839_v32, 0.0  ;;  %v3070_v21 = vmax.f32 %v2942_v4, 0.0  ;;  %v6484_v59 = vadd.f32 %v6356_v44, %v6099_v5  ;;  %v6485_v49 = vadd.f32 %v6357_v36, %v6100_v63  ;;  %v2404_v4 = vpop.permute.xlu2 %2403 }
 0x642   : > { %v3003_v57 = vmax.f32 %v2875_v46, 0.0  ;;  %v4015_v40 = vmul.f32 %v12517_v27, %v16136_v24  ;;  %v4016_v23 = vmul.f32 %v12519_v47, %v16136_v24  ;;  %v4400_v50 = vmul.f32 %v12527_v25, %v10700_v62  ;;  %v12868_v27 = vld [vmem:[#allocation2 + $0x410] sm:$0xff]  ;;  %16413 = vst [vmem:[#allocation144_spill] sm:$0xff] %v12884_v6 }
 0x643   : > { %3347 = vst [vmem:[#allocation2 + $0x2a9] sm:$0xff] %v15093_v14  ;;  %v4401_v48 = vmul.f32 %v12531_v22, %v10700_v62  ;;  %v6869_v44 = vadd.f32 %v6741_v58, %v6484_v59  ;;  %v6870_v36 = vadd.f32 %v6742_v11, %v6485_v49  ;;  %v4785_v18 = vmul.f32 %v12680_v28, %v10742_v34  ;;  %v12874_v58 = vld [vmem:[#allocation2 + $0x409] sm:$0xff]  ;;  %v12876_v11 = vld [vmem:[#allocation2 + $0x411] sm:$0xff]  ;;  %v7244_v59 = vpop.f32.mrf.mxu1 }
 0x644   : > { %3415 = vst [vmem:[#allocation2 + $0x639] sm:$0xff] %v3070_v21  ;;  %v4786_v37 = vmul.f32 %v12686_v20, %v10742_v34  ;;  %v4143_v47 = vadd.f32 %v4015_v40, %v3630_v35  ;;  %v4144_v7 = vadd.f32 %v4016_v23, %v3631_v54  ;;  %v5170_v25 = vmul.f32 %v12688_v29, %v10772_v26  ;;  %v7192_v35 = vpop.f32.mrf.mxu0 }
 0x645   : > { %3348 = vst [vmem:[#allocation2 + $0x2b9] sm:$0xff] %v3003_v57  ;;  %v5171_v22 = vmul.f32 %v12690_v43, %v10772_v26  ;;  %v6997_v38 = vmax.f32 %v6869_v44, 0.0  ;;  %v6998_v8 = vmax.f32 %v6870_v36, 0.0  ;;  %v5555_v41 = vmul.f32 %v12696_v39, %v10899_v19 }
 0x646   : > { %v5556_v1 = vmul.f32 %v12698_v51, %v10899_v19  ;;  %v4528_v5 = vadd.f32 %v4400_v50, %v4143_v47  ;;  %v4529_v63 = vadd.f32 %v4401_v48, %v4144_v7  ;;  %v5941_v46 = vmul.f32 %v10945_v2, %v12866_v33 }
 0x647   : > { %v5942_v21 = vmul.f32 %v10945_v2, %v12868_v27  ;;  %v7073_v49 = vpack.c.bf16 %v6998_v8, %v6997_v38  ;;  %v6326_v57 = vmul.f32 %v16130_v15, %v12874_v58  ;;  %v6327_v54 = vmul.f32 %v16130_v15, %v12876_v11 }
 0x648   : > { %v6711_v40 = vmul.f32 %v10948_v52, %v12878_v30  ;;  %v4913_v23 = vadd.f32 %v4785_v18, %v4528_v5  ;;  %v4914_v50 = vadd.f32 %v4786_v37, %v4529_v63  ;;  %v6712_v48 = vmul.f32 %v10948_v52, %v12884_v6  ;;  %v16415_v37 = vld [vmem:[#allocation81_spill] sm:$0xff]  ;;  %v16416_v63 = vld [vmem:[#allocation70_spill] sm:$0xff] }
 0x649   : > { %v2679_v44 = vmul.f32 %v16056_v17, %v2516_v13  ;;  %7421 = vmatmul.bf16.gmra.mxu3 %v7073_v49  ;;  %v2651_v36 = vmul.f32 %v16056_v17, %v2404_v4  ;;  %v2650_v47 = vmul.f32 %v16056_v17, %v2400_v42  ;;  %v7193_v7 = vadd.f32 %v12831_v16, %v7192_v35 }
 0x64a   : > { %v7245_v38 = vadd.f32 %v12831_v16, %v7244_v59  ;;  %v5298_v8 = vadd.f32 %v5170_v25, %v4913_v23  ;;  %v5299_v14 = vadd.f32 %v5171_v22, %v4914_v50  ;;  %v3584_v18 = vmul.f32 %v16379_v9, %v10654_v3 }
 0x64b   : > { %v2807_v32 = vadd.f32 %v2679_v44, %v16414_v45  ;;  %v2779_v5 = vadd.f32 %v2651_v36, %v16415_v37  ;;  %v2778_v13 = vadd.f32 %v2650_v47, %v16416_v63  ;;  %v7494_v49 = vmax.f32 %v7193_v7, 0.0  ;;  %v16419_v36 = vld [vmem:[#allocation7_spill] sm:$0xff]  ;;  %v16420_v47 = vld [vmem:[#allocation25_spill] sm:$0xff] }
 0x64c   : > { %v7515_v6 = vmax.f32 %v7245_v38, 0.0  ;;  %v5683_v4 = vadd.f32 %v5555_v41, %v5298_v8  ;;  %v5684_v30 = vadd.f32 %v5556_v1, %v5299_v14  ;;  %v3585_v35 = vmul.f32 %v16382_v55, %v10654_v3  ;;  %v12942_v37 = vld [vmem:[#allocation2 + $0x189] sm:$0xff] }
 0x64d   : > { %v2939_v42 = vadd.f32 %v12461_v53, %v2807_v32  ;;  %v2911_v25 = vadd.f32 %v12461_v53, %v2779_v5  ;;  %v2910_v45 = vadd.f32 %v12461_v53, %v2778_v13  ;;  %v12914_v22 = vadd.f32 %v12846_v31, %v7494_v49  ;;  %16424 = vst [vmem:[#allocation127_spill] sm:$0xff] %v12942_v37  ;;  %v12944_v5 = vld [vmem:[#allocation2 + $0x182] sm:$0xff]  ;;  %v16426_v13 = vld [vmem:[#allocation13_spill] sm:$0xff] }
 0x64e   : > { %v16417_v9 = vmax.f32 %v12836_v12, 0.0  ;;  %v6069_v23 = vadd.f32 %v5941_v46, %v5683_v4  ;;  %v6070_v50 = vadd.f32 %v5942_v21, %v5684_v30  ;;  %v3969_v32 = vmul.f32 %v16383_v0, %v16136_v24  ;;  %v12928_v30 = vld [vmem:[#allocation2 + $0x180] sm:$0xff]  ;;  %v16418_v0 = vld [vmem:[#allocation62_spill] sm:$0xff]  ;;  %16425 = vst [vmem:[#allocation145_spill] sm:$0xff] %v12944_v5 }
 0x64f   : > { %v3067_v41 = vmax.f32 %v2939_v42, 0.0  ;;  %v3039_v14 = vmax.f32 %v2911_v25, 0.0  ;;  %v3038_v1 = vmax.f32 %v2910_v45, 0.0  ;;  %v3970_v55 = vmul.f32 %v16384_v60, %v16136_v24  ;;  %v16427_v4 = vld [vmem:[#allocation31_spill] sm:$0xff] }
 0x650   : > { %v12918_v59 = vadd.f32 %v7515_v6, %v16417_v9  ;;  %v4354_v53 = vmul.f32 %v16386_v10, %v10700_v62  ;;  %v6454_v31 = vadd.f32 %v6326_v57, %v6069_v23  ;;  %v6455_v44 = vadd.f32 %v6327_v54, %v6070_v50  ;;  %v12936_v57 = vld [vmem:[#allocation2 + $0x188] sm:$0xff]  ;;  %v3474_v50 = vld [vmem:[#allocation2 + $0x260] sm:$0xff] }
 0x651   : > { %3412 = vst [vmem:[#allocation2 + $0x619] sm:$0xff] %v3067_v41  ;;  %v4097_v12 = vadd.f32 %v3969_v32, %v3584_v18  ;;  %v4355_v6 = vmul.f32 %v16390_v61, %v10700_v62  ;;  %v4098_v46 = vadd.f32 %v3970_v55, %v3585_v35  ;;  %v4739_v21 = vmul.f32 %v16418_v0, %v10742_v34  ;;  %v16422_v61 = vld [vmem:[#allocation68_spill] sm:$0xff]  ;;  %v3473_v35 = vld [vmem:[#allocation2 + $0x258] sm:$0xff] }
 0x652   : > { %3384 = vst [vmem:[#allocation2 + $0x499] sm:$0xff] %v3039_v14  ;;  %v4740_v60 = vmul.f32 %v16419_v36, %v10742_v34  ;;  %v5124_v10 = vmul.f32 %v16420_v47, %v10772_v26  ;;  %v6839_v54 = vadd.f32 %v6711_v40, %v6454_v31  ;;  %v6840_v7 = vadd.f32 %v6712_v48, %v6455_v44  ;;  %v12940_v18 = vld [vmem:[#allocation2 + $0x181] sm:$0xff]  ;;  %v12952_v48 = vld [vmem:[#allocation2 + $0x18a] sm:$0xff]  ;;  %v3858_v41 = vld [vmem:[#allocation2 + $0x259] sm:$0xff] }
 0x653   : > { %16421 = vst [vmem:[#allocation137_spill] sm:$0xff] %v12936_v57  ;;  %v4482_v38 = vadd.f32 %v4354_v53, %v4097_v12  ;;  %v5125_v8 = vmul.f32 %v16422_v61, %v10772_v26  ;;  %v4483_v63 = vadd.f32 %v4355_v6, %v4098_v46  ;;  %v5509_v49 = vmul.f32 %v16426_v13, %v10899_v19  ;;  %v3859_v32 = vld [vmem:[#allocation2 + $0x261] sm:$0xff]  ;;  %v12962_v12 = vld [vmem:[#allocation2 + $0x270] sm:$0xff] }
 0x654   : > { %3383 = vst [vmem:[#allocation2 + $0x489] sm:$0xff] %v3038_v1  ;;  %v5510_v42 = vmul.f32 %v16427_v4, %v10899_v19  ;;  %v5895_v40 = vmul.f32 %v10945_v2, %v12928_v30  ;;  %v6967_v25 = vmax.f32 %v6839_v54, 0.0  ;;  %v6968_v45 = vmax.f32 %v6840_v7, 0.0  ;;  %v4243_v31 = vld [vmem:[#allocation2 + $0x25a] sm:$0xff]  ;;  %v4244_v44 = vld [vmem:[#allocation2 + $0x262] sm:$0xff] }
 0x655   : > { %16423 = vst [vmem:[#allocation163_spill] sm:$0xff] %v12940_v18  ;;  %v4867_v9 = vadd.f32 %v4739_v21, %v4482_v38  ;;  %v5896_v23 = vmul.f32 %v10945_v2, %v12936_v57  ;;  %v4868_v14 = vadd.f32 %v4740_v60, %v4483_v63  ;;  %v6280_v1 = vmul.f32 %v16130_v15, %v12940_v18  ;;  %v12967_v54 = vld [vmem:[#allocation2 + $0x278] sm:$0xff]  ;;  %v12988_v57 = vld [vmem:[#allocation2 + $0x290] sm:$0xff] }
 0x656   : > { %16428 = vst [vmem:[#allocation15_spill] sm:$0xff] %v12952_v48  ;;  %v6281_v55 = vmul.f32 %v16130_v15, %v12942_v37  ;;  %v6665_v53 = vmul.f32 %v10948_v52, %v12944_v5  ;;  %v7058_v6 = vpack.c.bf16 %v6968_v45, %v6967_v25  ;;  %v6666_v21 = vmul.f32 %v10948_v52, %v12952_v48  ;;  %v12972_v37 = vld [vmem:[#allocation2 + $0x271] sm:$0xff]  ;;  %v12974_v18 = vld [vmem:[#allocation2 + $0x279] sm:$0xff]  ;;  %v12986_v48 = vld [vmem:[#allocation2 + $0x288] sm:$0xff] }
 0x657   : > { %16429 = vst [vmem:[#allocation28_spill] sm:$0xff] %v12962_v12  ;;  %v5252_v46 = vadd.f32 %v5124_v10, %v4867_v9  ;;  %v3602_v60 = vmul.f32 %v10654_v3, %v3473_v35  ;;  %v5253_v7 = vadd.f32 %v5125_v8, %v4868_v14  ;;  %v3603_v38 = vmul.f32 %v10654_v3, %v3474_v50  ;;  %v12976_v25 = vld [vmem:[#allocation2 + $0x272] sm:$0xff]  ;;  %v12982_v9 = vld [vmem:[#allocation2 + $0x27a] sm:$0xff] }
 0x658   : > { %16430 = vst [vmem:[#allocation14_spill] sm:$0xff] %v12967_v54  ;;  %v3987_v63 = vmul.f32 %v16136_v24, %v3858_v41  ;;  %v3988_v5 = vmul.f32 %v16136_v24, %v3859_v32  ;;  %7346 = vmatmul.bf16.gmra.mxu2 %v7058_v6  ;;  %v4372_v45 = vmul.f32 %v10700_v62, %v4243_v31 }
 0x659   : > { %16431 = vst [vmem:[#allocation170_spill] sm:$0xff] %v12972_v37  ;;  %v5637_v10 = vadd.f32 %v5509_v49, %v5252_v46  ;;  %v4373_v35 = vmul.f32 %v10700_v62, %v4244_v44  ;;  %v4757_v8 = vmul.f32 %v10742_v34, %v12962_v12  ;;  %v5638_v50 = vadd.f32 %v5510_v42, %v5253_v7  ;;  %v12990_v49 = vld [vmem:[#allocation2 + $0x289] sm:$0xff] }
 0x65a   : > { %16432 = vst [vmem:[#allocation21_spill] sm:$0xff] %v12974_v18  ;;  %v4115_v41 = vadd.f32 %v3987_v63, %v3602_v60  ;;  %v4116_v32 = vadd.f32 %v3988_v5, %v3603_v38  ;;  %v4758_v14 = vmul.f32 %v10742_v34, %v12967_v54  ;;  %v5142_v44 = vmul.f32 %v10772_v26, %v12972_v37  ;;  %v13000_v38 = vld [vmem:[#allocation2 + $0x28a] sm:$0xff]  ;;  %v13002_v63 = vld [vmem:[#allocation2 + $0x292] sm:$0xff] }
 0x65b   : > { %16433 = vst [vmem:[#allocation39_spill] sm:$0xff] %v12976_v25  ;;  %v6023_v31 = vadd.f32 %v5895_v40, %v5637_v10  ;;  %v5143_v6 = vmul.f32 %v10772_v26, %v12974_v18  ;;  %v5527_v42 = vmul.f32 %v10899_v19, %v12976_v25  ;;  %v6024_v5 = vadd.f32 %v5896_v23, %v5638_v50  ;;  %v16440_v50 = vld [vmem:[#allocation19_spill] sm:$0xff] }
 0x65c   : > { %16434 = vst [vmem:[#allocation17_spill] sm:$0xff] %v12982_v9  ;;  %v4500_v46 = vadd.f32 %v4372_v45, %v4115_v41  ;;  %v4501_v60 = vadd.f32 %v4373_v35, %v4116_v32  ;;  %v5528_v7 = vmul.f32 %v10899_v19, %v12982_v9  ;;  %v5913_v10 = vmul.f32 %v10945_v2, %v12986_v48 }
 0x65d   : > { %16435 = vst [vmem:[#allocation27_spill] sm:$0xff] %v12986_v48  ;;  %v6408_v40 = vadd.f32 %v6280_v1, %v6023_v31  ;;  %v5914_v18 = vmul.f32 %v10945_v2, %v12988_v57  ;;  %v6298_v25 = vmul.f32 %v16130_v15, %v12990_v49  ;;  %v6409_v23 = vadd.f32 %v6281_v55, %v6024_v5  ;;  %v16442_v48 = vld [vmem:[#allocation155_spill] sm:$0xff]  ;;  %v16443_v55 = vld [vmem:[#allocation42_spill] sm:$0xff] }
 0x65e   : > { %16436 = vst [vmem:[#allocation38_spill] sm:$0xff] %v12988_v57  ;;  %v4885_v45 = vadd.f32 %v4757_v8, %v4500_v46  ;;  %v4886_v35 = vadd.f32 %v4758_v14, %v4501_v60  ;;  %v16441_v41 = vmax.f32 %v16440_v50, 0.0  ;;  %v6683_v1 = vmul.f32 %v10948_v52, %v13000_v38  ;;  %v16444_v5 = vld [vmem:[#allocation55_spill] sm:$0xff] }
 0x65f   : > { %16437 = vst [vmem:[#allocation23_spill] sm:$0xff] %v12990_v49  ;;  %v6793_v9 = vadd.f32 %v6665_v53, %v6408_v40  ;;  %v6684_v31 = vmul.f32 %v10948_v52, %v13002_v63  ;;  %v3662_v57 = vmul.f32 %v16442_v48, %v10654_v3  ;;  %v6794_v37 = vadd.f32 %v6666_v21, %v6409_v23  ;;  %v16445_v53 = vld [vmem:[#allocation20_spill] sm:$0xff]  ;;  %v16447_v48 = vld [vmem:[#allocation61_spill] sm:$0xff]  ;;  %v16448_v23 = vld [vmem:[#allocation67_spill] sm:$0xff] }
 0x660   : > { %16438 = vst [vmem:[#allocation35_spill] sm:$0xff] %v13000_v38  ;;  %v6299_v32 = vmul.f32 %v16130_v15, %v16441_v41  ;;  %v5270_v54 = vadd.f32 %v5142_v44, %v4885_v45  ;;  %v5271_v49 = vadd.f32 %v5143_v6, %v4886_v35  ;;  %v3663_v8 = vmul.f32 %v16443_v55, %v10654_v3  ;;  %v16446_v40 = vld [vmem:[#allocation56_spill] sm:$0xff]  ;;  %v13033_v55 = vld [vmem:[#allocation2 + $0x5b8] sm:$0xff] }
 0x661   : > { %16439 = vst [vmem:[#allocation37_spill] sm:$0xff] %v13002_v63  ;;  %v6921_v14 = vmax.f32 %v6793_v9, 0.0  ;;  %v4047_v46 = vmul.f32 %v16444_v5, %v16136_v24  ;;  %v4048_v60 = vmul.f32 %v16445_v53, %v16136_v24  ;;  %v4432_v50 = vmul.f32 %v16446_v40, %v10700_v62  ;;  %v16449_v45 = vld [vmem:[#allocation16_spill] sm:$0xff] }
 0x662   : > { %v6922_v41 = vmax.f32 %v6794_v37, 0.0  ;;  %v5655_v63 = vadd.f32 %v5527_v42, %v5270_v54  ;;  %v5656_v38 = vadd.f32 %v5528_v7, %v5271_v49  ;;  %v4433_v21 = vmul.f32 %v16447_v48, %v10700_v62  ;;  %v16450_v37 = vld [vmem:[#allocation74_spill] sm:$0xff]  ;;  %v13037_v49 = vld [vmem:[#allocation2 + $0x5c0] sm:$0xff]  ;;  %v2264_v48 = vpop.permute.xlu1 %2263 }
 0x663   : > { %v4175_v44 = vadd.f32 %v4047_v46, %v3662_v57  ;;  %v4176_v6 = vadd.f32 %v4048_v60, %v3663_v8  ;;  %v4817_v9 = vmul.f32 %v16448_v23, %v10742_v34  ;;  %v4818_v35 = vmul.f32 %v16449_v45, %v10742_v34  ;;  %16451 = vst [vmem:[#allocation30_spill] sm:$0xff] %v13037_v49  ;;  %v13039_v42 = vld [vmem:[#allocation2 + $0x5b9] sm:$0xff]  ;;  %v13045_v40 = vld [vmem:[#allocation2 + $0x5c1] sm:$0xff]  ;;  %v2536_v23 = vpop.permute.xlu2 %2535 }
 0x664   : > { %v7035_v5 = vpack.c.bf16 %v6922_v41, %v6921_v14  ;;  %v6041_v53 = vadd.f32 %v5913_v10, %v5655_v63  ;;  %v6042_v12 = vadd.f32 %v5914_v18, %v5656_v38  ;;  %v5202_v54 = vmul.f32 %v16450_v37, %v10772_v26  ;;  %16452 = vst [vmem:[#allocation78_spill] sm:$0xff] %v13039_v42  ;;  %v16453_v8 = vld [vmem:[#allocation131_spill] sm:$0xff]  ;;  %v16456_v63 = vld [vmem:[#allocation12_spill] sm:$0xff] }
 0x665   : > { %v4560_v57 = vadd.f32 %v4432_v50, %v4175_v44  ;;  %v4561_v7 = vadd.f32 %v4433_v21, %v4176_v6  ;;  %v5203_v46 = vmul.f32 %v16453_v8, %v10772_v26  ;;  %v5587_v60 = vmul.f32 %v12807_v56, %v10899_v19  ;;  %16454 = vst [vmem:[#allocation43_spill] sm:$0xff] %v13045_v40  ;;  %v13047_v14 = vld [vmem:[#allocation2 + $0x5ba] sm:$0xff]  ;;  %v13053_v41 = vld [vmem:[#allocation2 + $0x5c2] sm:$0xff] }
 0x666   : > { %16455 = vst [vmem:[#allocation51_spill] sm:$0xff] %v13047_v14  ;;  %7231 = vmatmul.bf16.gmra.mxu0 %v7035_v5  ;;  %v6426_v18 = vadd.f32 %v6298_v25, %v6041_v53  ;;  %v6427_v38 = vadd.f32 %v6299_v32, %v6042_v12  ;;  %v5588_v10 = vmul.f32 %v16456_v63, %v10899_v19  ;;  %v2268_v25 = vpop.permute.xlu0 %2267  ;;  %v7194_v53 = vpop.f32.mrf.mxu0 }
 0x667   : > { %v5973_v50 = vmul.f32 %v10945_v2, %v13033_v55  ;;  %16457 = vst [vmem:[#allocation84_spill] sm:$0xff] %v13053_v41  ;;  %v4945_v21 = vadd.f32 %v4817_v9, %v4560_v57  ;;  %v4946_v44 = vadd.f32 %v4818_v35, %v4561_v7  ;;  %v5974_v56 = vmul.f32 %v10945_v2, %v13037_v49  ;;  %v7247_v7 = vpop.f32.mrf.mxu1 }
 0x668   : > { %v6358_v6 = vmul.f32 %v16130_v15, %v13039_v42  ;;  %v6811_v12 = vadd.f32 %v6683_v1, %v6426_v18  ;;  %v6812_v32 = vadd.f32 %v6684_v31, %v6427_v38  ;;  %v6359_v45 = vmul.f32 %v16130_v15, %v13045_v40  ;;  %v16458_v40 = vld [vmem:[#allocation91_spill] sm:$0xff] }
 0x669   : > { %v6743_v5 = vmul.f32 %v10948_v52, %v13047_v14  ;;  %v5330_v37 = vadd.f32 %v5202_v54, %v4945_v21  ;;  %v5331_v9 = vadd.f32 %v5203_v46, %v4946_v44  ;;  %v6744_v35 = vmul.f32 %v10948_v52, %v13053_v41  ;;  %v16459_v46 = vld [vmem:[#allocation160_spill] sm:$0xff] }
 0x66a   : > { %v2616_v57 = vmul.f32 %v16056_v17, %v2264_v48  ;;  %v6939_v8 = vmax.f32 %v6811_v12, 0.0  ;;  %v6940_v63 = vmax.f32 %v6812_v32, 0.0  ;;  %v2684_v1 = vmul.f32 %v16056_v17, %v2536_v23  ;;  %v16460_v44 = vld [vmem:[#allocation40_spill] sm:$0xff]  ;;  %v13076_v23 = vld [vmem:[%s14845_s2] ss:$0 sm:$0xff] }
 0x66b   : > { %v2617_v31 = vmul.f32 %v16056_v17, %v2268_v25  ;;  %v5715_v18 = vadd.f32 %v5587_v60, %v5330_v37  ;;  %v5716_v38 = vadd.f32 %v5588_v10, %v5331_v9  ;;  %v7195_v14 = vadd.f32 %v12831_v16, %v7194_v53 }
 0x66c   : > { %v2744_v42 = vadd.f32 %v2616_v57, %v16458_v40  ;;  %v7044_v54 = vpack.c.bf16 %v6940_v63, %v6939_v8  ;;  %v2812_v21 = vadd.f32 %v2684_v1, %v16459_v46  ;;  %v7248_v48 = vadd.f32 %v12831_v16, %v7247_v7  ;;  %v13112_v1 = vld [vmem:[#allocation2 + $0x421] sm:$0xff] }
 0x66d   : > { %v2745_v41 = vadd.f32 %v2617_v31, %v16460_v44  ;;  %v6101_v49 = vadd.f32 %v5973_v50, %v5715_v18  ;;  %v6102_v12 = vadd.f32 %v5974_v56, %v5716_v38  ;;  %v7495_v40 = vmax.f32 %v7195_v14, 0.0  ;;  %v2524_v31 = vpop.permute.xlu1 %2523  ;;  %v16462_v18 = vld [vmem:[#allocation11_spill] sm:$0xff]  ;;  %v2412_v44 = vpop.permute.xlu2 %2411 }
 0x66e   : > { %v13079_v60 = vadd.f32 %v13076_v23, %v2744_v42  ;;  %7276 = vmatmul.bf16.gmra.mxu1 %v7044_v54  ;;  %v2944_v10 = vadd.f32 %v13076_v23, %v2812_v21  ;;  %v7516_v32 = vmax.f32 %v7248_v48, 0.0  ;;  %v3632_v53 = vmul.f32 %v12680_v28, %v10654_v3  ;;  %v16463_v54 = vld [vmem:[#allocation144_spill] sm:$0xff]  ;;  %v2408_v48 = vpop.permute.xlu0 %2407 }
 0x66f   : > { %v2877_v25 = vadd.f32 %v13076_v23, %v2745_v41  ;;  %v6486_v50 = vadd.f32 %v6358_v6, %v6101_v49  ;;  %v6487_v56 = vadd.f32 %v6359_v45, %v6102_v12  ;;  %v13087_v9 = vadd.f32 %v12914_v22, %v7495_v40  ;;  %v13108_v45 = vld [vmem:[#allocation2 + $0x420] sm:$0xff]  ;;  %v13126_v21 = vld [vmem:[#allocation2 + $0x42a] sm:$0xff] }
 0x670   : > { %16461 = vst [vmem:[#allocation34_spill] sm:$0xff] %v13079_v60  ;;  %v15128_v37 = vmax.f32 %v13079_v60, 0.0  ;;  %v3072_v57 = vmax.f32 %v2944_v10, 0.0  ;;  %v13090_v14 = vadd.f32 %v12918_v59, %v7516_v32  ;;  %v3633_v7 = vmul.f32 %v12686_v20, %v10654_v3  ;;  %v7249_v32 = vpop.f32.mrf.mxu1 }
 0x671   : > { %v3005_v42 = vmax.f32 %v2877_v25, 0.0  ;;  %v6871_v41 = vadd.f32 %v6743_v5, %v6486_v50  ;;  %v6872_v8 = vadd.f32 %v6744_v35, %v6487_v56  ;;  %v4017_v28 = vmul.f32 %v12688_v29, %v16136_v24  ;;  %v13110_v5 = vld [vmem:[#allocation2 + $0x428] sm:$0xff] }
 0x672   : > { %3349 = vst [vmem:[#allocation2 + $0x2c1] sm:$0xff] %v15128_v37  ;;  %v4018_v22 = vmul.f32 %v12690_v43, %v16136_v24  ;;  %v4402_v49 = vmul.f32 %v12696_v39, %v10700_v62  ;;  %v4403_v59 = vmul.f32 %v12698_v51, %v10700_v62  ;;  %v4787_v20 = vmul.f32 %v12866_v33, %v10742_v34  ;;  %v13114_v39 = vld [vmem:[#allocation2 + $0x429] sm:$0xff] }
 0x673   : > { %3417 = vst [vmem:[#allocation2 + $0x651] sm:$0xff] %v3072_v57  ;;  %v4788_v6 = vmul.f32 %v12868_v27, %v10742_v34  ;;  %v6999_v29 = vmax.f32 %v6871_v41, 0.0  ;;  %v7000_v35 = vmax.f32 %v6872_v8, 0.0  ;;  %v4145_v43 = vadd.f32 %v4017_v28, %v3632_v53  ;;  %v13116_v51 = vld [vmem:[#allocation2 + $0x422] sm:$0xff] }
 0x674   : > { %3350 = vst [vmem:[#allocation2 + $0x2d1] sm:$0xff] %v3005_v42  ;;  %v4146_v63 = vadd.f32 %v4018_v22, %v3633_v7  ;;  %v5172_v33 = vmul.f32 %v12874_v58, %v10772_v26  ;;  %v5173_v27 = vmul.f32 %v12876_v11, %v10772_v26  ;;  %v5557_v38 = vmul.f32 %v16462_v18, %v10899_v19  ;;  %v7197_v58 = vpop.f32.mrf.mxu0  ;;  %v16466_v18 = vld [vmem:[#allocation72_spill] sm:$0xff] }
 0x675   : > { %v5558_v46 = vmul.f32 %v16463_v54, %v10899_v19  ;;  %v7074_v12 = vpack.c.bf16 %v7000_v35, %v6999_v29  ;;  %v4530_v40 = vadd.f32 %v4402_v49, %v4145_v43  ;;  %v5943_v25 = vmul.f32 %v10945_v2, %v13108_v45  ;;  %v16464_v35 = vld [vmem:[#allocation107_spill] sm:$0xff] }
 0x676   : > { %v4531_v10 = vadd.f32 %v4403_v59, %v4146_v63  ;;  %v5944_v11 = vmul.f32 %v10945_v2, %v13110_v5  ;;  %v6328_v53 = vmul.f32 %v16130_v15, %v13112_v1  ;;  %v6329_v50 = vmul.f32 %v16130_v15, %v13114_v39 }
 0x677   : > { %v6713_v56 = vmul.f32 %v10948_v52, %v13116_v51  ;;  %7426 = vmatmul.bf16.gmra.mxu3 %v7074_v12  ;;  %v4915_v57 = vadd.f32 %v4787_v20, %v4530_v40  ;;  %v6714_v7 = vmul.f32 %v10948_v52, %v13126_v21  ;;  %v2681_v41 = vmul.f32 %v16056_v17, %v2524_v31 }
 0x678   : > { %v4916_v42 = vadd.f32 %v4788_v6, %v4531_v10  ;;  %v2653_v8 = vmul.f32 %v16056_v17, %v2412_v44  ;;  %v2652_v28 = vmul.f32 %v16056_v17, %v2408_v48  ;;  %v7198_v22 = vadd.f32 %v12831_v16, %v7197_v58  ;;  %v16465_v6 = vld [vmem:[#allocation76_spill] sm:$0xff] }
 0x679   : > { %v7250_v49 = vadd.f32 %v12831_v16, %v7249_v32  ;;  %v5300_v59 = vadd.f32 %v5172_v33, %v4915_v57  ;;  %v2809_v43 = vadd.f32 %v2681_v41, %v16464_v35  ;;  %v3586_v20 = vmul.f32 %v16418_v0, %v10654_v3  ;;  %v16469_v35 = vld [vmem:[#allocation127_spill] sm:$0xff] }
 0x67a   : > { %v5301_v29 = vadd.f32 %v5173_v27, %v4916_v42  ;;  %v2781_v63 = vadd.f32 %v2653_v8, %v16465_v6  ;;  %v2780_v54 = vadd.f32 %v2652_v28, %v16466_v18  ;;  %v7496_v31 = vmax.f32 %v7198_v22, 0.0  ;;  %v6539_v6 = vld [vmem:[#allocation2 + $0x1a2] sm:$0xff] }
 0x67b   : > { %v7517_v12 = vmax.f32 %v7250_v49, 0.0  ;;  %v5685_v44 = vadd.f32 %v5557_v38, %v5300_v59  ;;  %v2941_v48 = vadd.f32 %v13076_v23, %v2809_v43  ;;  %v3587_v10 = vmul.f32 %v16419_v36, %v10654_v3 }
 0x67c   : > { %v5686_v40 = vadd.f32 %v5558_v46, %v5301_v29  ;;  %v2913_v33 = vadd.f32 %v13076_v23, %v2781_v63  ;;  %v2912_v27 = vadd.f32 %v13076_v23, %v2780_v54  ;;  %v13156_v58 = vadd.f32 %v13087_v9, %v7496_v31  ;;  %v6153_v29 = vld [vmem:[#allocation2 + $0x199] sm:$0xff] }
 0x67d   : > { %v13159_v0 = vadd.f32 %v13090_v14, %v7517_v12  ;;  %v6071_v32 = vadd.f32 %v5943_v25, %v5685_v44  ;;  %v3069_v42 = vmax.f32 %v2941_v48, 0.0  ;;  %v3971_v38 = vmul.f32 %v16420_v47, %v16136_v24  ;;  %v16471_v54 = vld [vmem:[#allocation15_spill] sm:$0xff] }
 0x67e   : > { %v6072_v57 = vadd.f32 %v5944_v11, %v5686_v40  ;;  %v3041_v46 = vmax.f32 %v2913_v33, 0.0  ;;  %v3040_v41 = vmax.f32 %v2912_v27, 0.0  ;;  %v3972_v36 = vmul.f32 %v16422_v61, %v16136_v24  ;;  %v16467_v11 = vld [vmem:[#allocation137_spill] sm:$0xff]  ;;  %v16468_v61 = vld [vmem:[#allocation163_spill] sm:$0xff] }
 0x67f   : > { %v4356_v8 = vmul.f32 %v16426_v13, %v10700_v62  ;;  %v6456_v28 = vadd.f32 %v6328_v53, %v6071_v32  ;;  %3414 = vst [vmem:[#allocation2 + $0x631] sm:$0xff] %v3069_v42  ;;  %v4099_v22 = vadd.f32 %v3971_v38, %v3586_v20  ;;  %v4357_v14 = vmul.f32 %v16427_v4, %v10700_v62  ;;  %v6154_v4 = vld [vmem:[#allocation2 + $0x1a1] sm:$0xff] }
 0x680   : > { %v6457_v9 = vadd.f32 %v6329_v50, %v6072_v57  ;;  %3386 = vst [vmem:[#allocation2 + $0x4b1] sm:$0xff] %v3041_v46  ;;  %v4100_v25 = vadd.f32 %v3972_v36, %v3587_v10  ;;  %v4741_v47 = vmul.f32 %v12928_v30, %v10742_v34  ;;  %v4742_v49 = vmul.f32 %v16467_v11, %v10742_v34  ;;  %v6538_v20 = vld [vmem:[#allocation2 + $0x19a] sm:$0xff]  ;;  %v16470_v30 = vld [vmem:[#allocation145_spill] sm:$0xff]  ;;  %v16472_v38 = vld [vmem:[#allocation28_spill] sm:$0xff] }
 0x681   : > { %v5126_v59 = vmul.f32 %v16468_v61, %v10772_v26  ;;  %v6841_v13 = vadd.f32 %v6713_v56, %v6456_v28  ;;  %3385 = vst [vmem:[#allocation2 + $0x4a1] sm:$0xff] %v3040_v41  ;;  %v4484_v50 = vadd.f32 %v4356_v8, %v4099_v22  ;;  %v5127_v43 = vmul.f32 %v16469_v35, %v10772_v26  ;;  %v8074_v12 = vld [vmem:[#allocation2] sm:$0xff]  ;;  %v16473_v41 = vld [vmem:[#allocation14_spill] sm:$0xff]  ;;  %v16475_v22 = vld [vmem:[#allocation21_spill] sm:$0xff] }
 0x682   : > { %v6842_v53 = vadd.f32 %v6714_v7, %v6457_v9  ;;  %v4485_v63 = vadd.f32 %v4357_v14, %v4100_v25  ;;  %v5511_v18 = vmul.f32 %v16470_v30, %v10899_v19  ;;  %v5512_v31 = vmul.f32 %v16471_v54, %v10899_v19  ;;  %v16474_v28 = vld [vmem:[#allocation170_spill] sm:$0xff]  ;;  %v16476_v25 = vld [vmem:[#allocation39_spill] sm:$0xff]  ;;  %v16477_v61 = vld [vmem:[#allocation17_spill] sm:$0xff] }
 0x683   : > { %v5897_v44 = vmul.f32 %v8074_v12, %v10945_v2  ;;  %v6969_v56 = vmax.f32 %v6841_v13, 0.0  ;;  %v4869_v40 = vadd.f32 %v4741_v47, %v4484_v50  ;;  %v6282_v48 = vmul.f32 %v16130_v15, %v6153_v29  ;;  %v13196_v11 = vld [vmem:[#allocation2 + $0x291] sm:$0xff]  ;;  %v16478_v29 = vld [vmem:[#allocation27_spill] sm:$0xff]  ;;  %v13208_v30 = vld [vmem:[#allocation2 + $0x2a8] sm:$0xff] }
 0x684   : > { %v6970_v7 = vmax.f32 %v6842_v53, 0.0  ;;  %v4870_v10 = vadd.f32 %v4742_v49, %v4485_v63  ;;  %v6283_v33 = vmul.f32 %v16130_v15, %v6154_v4  ;;  %v6667_v27 = vmul.f32 %v10948_v52, %v6538_v20  ;;  %v16479_v53 = vld [vmem:[#allocation38_spill] sm:$0xff]  ;;  %v13204_v35 = vld [vmem:[#allocation2 + $0x2a0] sm:$0xff]  ;;  %16481 = vst [vmem:[#allocation69_spill] sm:$0xff] %v13208_v30 }
 0x685   : > { %v6668_v32 = vmul.f32 %v10948_v52, %v6539_v6  ;;  %v5254_v42 = vadd.f32 %v5126_v59, %v4869_v40  ;;  %v3604_v46 = vmul.f32 %v16472_v38, %v10654_v3  ;;  %v3605_v36 = vmul.f32 %v16473_v41, %v10654_v3  ;;  %v16480_v6 = vld [vmem:[#allocation23_spill] sm:$0xff]  ;;  %v16484_v40 = vld [vmem:[#allocation37_spill] sm:$0xff] }
 0x686   : > { %v7059_v57 = vpack.c.bf16 %v6970_v7, %v6969_v56  ;;  %v5255_v8 = vadd.f32 %v5127_v43, %v4870_v10  ;;  %v3989_v9 = vmul.f32 %v16474_v28, %v16136_v24  ;;  %v3990_v14 = vmul.f32 %v16475_v22, %v16136_v24  ;;  %v16483_v56 = vld [vmem:[#allocation35_spill] sm:$0xff]  ;;  %v13222_v41 = vld [vmem:[#allocation2 + $0x2aa] sm:$0xff] }
 0x687   : > { %v4374_v47 = vmul.f32 %v16476_v25, %v10700_v62  ;;  %v5639_v49 = vadd.f32 %v5511_v18, %v5254_v42  ;;  %v4375_v59 = vmul.f32 %v16477_v61, %v10700_v62  ;;  %v4759_v13 = vmul.f32 %v16478_v29, %v10742_v34  ;;  %v13210_v18 = vld [vmem:[#allocation2 + $0x2a1] sm:$0xff]  ;;  %16486 = vst [vmem:[#allocation105_spill] sm:$0xff] %v13222_v41 }
 0x688   : > { %7351 = vmatmul.bf16.gmra.mxu2 %v7059_v57  ;;  %v4760_v50 = vmul.f32 %v16479_v53, %v10742_v34  ;;  %v5640_v43 = vadd.f32 %v5512_v31, %v5255_v8  ;;  %v4117_v4 = vadd.f32 %v3989_v9, %v3604_v46  ;;  %v4118_v20 = vadd.f32 %v3990_v14, %v3605_v36  ;;  %v13218_v31 = vld [vmem:[#allocation2 + $0x2a2] sm:$0xff]  ;;  %v16487_v14 = vld [vmem:[#allocation22_spill] sm:$0xff] }
 0x689   : > { %v5144_v63 = vmul.f32 %v16480_v6, %v10772_v26  ;;  %16482 = vst [vmem:[#allocation90_spill] sm:$0xff] %v13210_v18  ;;  %v6025_v54 = vadd.f32 %v5897_v44, %v5639_v49  ;;  %v5145_v12 = vmul.f32 %v10772_v26, %v13196_v11  ;;  %v5529_v7 = vmul.f32 %v16483_v56, %v10899_v19  ;;  %v3535_v36 = vld [vmem:[#allocation2 + $0x5a0] sm:$0xff]  ;;  %v3536_v8 = vld [vmem:[#allocation2 + $0x5a8] sm:$0xff] }
 0x68a   : > { %v5530_v10 = vmul.f32 %v16484_v40, %v10899_v19  ;;  %16485 = vst [vmem:[#allocation99_spill] sm:$0xff] %v13218_v31  ;;  %v6026_v57 = vadd.f32 %v5897_v44, %v5640_v43  ;;  %v4502_v42 = vadd.f32 %v4374_v47, %v4117_v4  ;;  %v4503_v38 = vadd.f32 %v4375_v59, %v4118_v20  ;;  %v3920_v47 = vld [vmem:[#allocation2 + $0x5a1] sm:$0xff]  ;;  %v3921_v4 = vld [vmem:[#allocation2 + $0x5a9] sm:$0xff] }
 0x68b   : > { %v5915_v46 = vmul.f32 %v10945_v2, %v13204_v35  ;;  %v6410_v28 = vadd.f32 %v6282_v48, %v6025_v54  ;;  %v5916_v9 = vmul.f32 %v10945_v2, %v13208_v30  ;;  %v6300_v22 = vmul.f32 %v16130_v15, %v13210_v18  ;;  %v4305_v20 = vld [vmem:[#allocation2 + $0x5a2] sm:$0xff]  ;;  %v4306_v48 = vld [vmem:[#allocation2 + $0x5aa] sm:$0xff] }
 0x68c   : > { %v16488_v25 = vmax.f32 %v16487_v14, 0.0  ;;  %v6411_v49 = vadd.f32 %v6283_v33, %v6026_v57  ;;  %v4887_v61 = vadd.f32 %v4759_v13, %v4502_v42  ;;  %v4888_v59 = vadd.f32 %v4760_v50, %v4503_v38 }
 0x68d   : > { %v6685_v43 = vmul.f32 %v10948_v52, %v13218_v31  ;;  %v6795_v54 = vadd.f32 %v6667_v27, %v6410_v28  ;;  %v6686_v37 = vmul.f32 %v10948_v52, %v13222_v41  ;;  %v3664_v60 = vmul.f32 %v10654_v3, %v3535_v36 }
 0x68e   : > { %v6301_v44 = vmul.f32 %v16130_v15, %v16488_v25  ;;  %v3665_v14 = vmul.f32 %v10654_v3, %v3536_v8  ;;  %v6796_v18 = vadd.f32 %v6668_v32, %v6411_v49  ;;  %v5272_v25 = vadd.f32 %v5144_v63, %v4887_v61  ;;  %v16489_v32 = vld [vmem:[#allocation30_spill] sm:$0xff] }
 0x68f   : > { %v5273_v30 = vadd.f32 %v5145_v12, %v4888_v59  ;;  %v4049_v33 = vmul.f32 %v16136_v24, %v3920_v47  ;;  %v6923_v13 = vmax.f32 %v6795_v54, 0.0  ;;  %v4050_v50 = vmul.f32 %v16136_v24, %v3921_v4  ;;  %v16490_v12 = vld [vmem:[#allocation78_spill] sm:$0xff]  ;;  %v13247_v47 = vld [vmem:[#allocation2 + $0x5d0] sm:$0xff] }
 0x690   : > { %v4434_v57 = vmul.f32 %v10700_v62, %v4305_v20  ;;  %v4435_v42 = vmul.f32 %v10700_v62, %v4306_v48  ;;  %v6924_v27 = vmax.f32 %v6796_v18, 0.0  ;;  %v5657_v38 = vadd.f32 %v5529_v7, %v5272_v25  ;;  %16491 = vst [vmem:[#allocation59_spill] sm:$0xff] %v13247_v47  ;;  %v13249_v18 = vld [vmem:[#allocation2 + $0x5d8] sm:$0xff]  ;;  %v16496_v48 = vld [vmem:[#allocation51_spill] sm:$0xff] }
 0x691   : > { %v5658_v28 = vadd.f32 %v5530_v10, %v5273_v30  ;;  %v4177_v41 = vadd.f32 %v4049_v33, %v3664_v60  ;;  %v4178_v31 = vadd.f32 %v4050_v50, %v3665_v14  ;;  %v4819_v36 = vmul.f32 %v13033_v55, %v10742_v34  ;;  %16492 = vst [vmem:[#allocation65_spill] sm:$0xff] %v13249_v18  ;;  %v13251_v30 = vld [vmem:[#allocation2 + $0x5d1] sm:$0xff]  ;;  %v13253_v60 = vld [vmem:[#allocation2 + $0x5d9] sm:$0xff]  ;;  %v16497_v14 = vld [vmem:[#allocation84_spill] sm:$0xff] }
 0x692   : > { %v4820_v63 = vmul.f32 %v16489_v32, %v10742_v34  ;;  %v5204_v8 = vmul.f32 %v16490_v12, %v10772_v26  ;;  %v7036_v49 = vpack.c.bf16 %v6924_v27, %v6923_v13  ;;  %v6043_v61 = vadd.f32 %v5915_v46, %v5657_v38  ;;  %16493 = vst [vmem:[#allocation142_spill] sm:$0xff] %v13251_v30  ;;  %v16495_v10 = vld [vmem:[#allocation43_spill] sm:$0xff]  ;;  %v13261_v33 = vld [vmem:[#allocation2 + $0x5d2] sm:$0xff] }
 0x693   : > { %v6044_v59 = vadd.f32 %v5916_v9, %v5658_v28  ;;  %v4562_v4 = vadd.f32 %v4434_v57, %v4177_v41  ;;  %16494 = vst [vmem:[#allocation98_spill] sm:$0xff] %v13253_v60  ;;  %v4563_v7 = vadd.f32 %v4435_v42, %v4178_v31  ;;  %v5205_v20 = vmul.f32 %v16495_v10, %v10772_v26  ;;  %v13265_v50 = vld [vmem:[#allocation2 + $0x5da] sm:$0xff]  ;;  %v2272_v31 = vpop.permute.xlu1 %2271  ;;  %v2544_v57 = vpop.permute.xlu2 %2543 }
 0x694   : > { %v5589_v54 = vmul.f32 %v16496_v48, %v10899_v19  ;;  %v5590_v25 = vmul.f32 %v16497_v14, %v10899_v19  ;;  %16498 = vst [vmem:[#allocation63_spill] sm:$0xff] %v13261_v33  ;;  %7236 = vmatmul.bf16.gmra.mxu0 %v7036_v49  ;;  %v6428_v46 = vadd.f32 %v6300_v22, %v6043_v61  ;;  %v2276_v22 = vpop.permute.xlu0 %2275  ;;  %v16502_v48 = vld [vmem:[#allocation95_spill] sm:$0xff] }
 0x695   : > { %v6429_v41 = vadd.f32 %v6301_v44, %v6044_v59  ;;  %v4947_v9 = vadd.f32 %v4819_v36, %v4562_v4  ;;  %v5975_v13 = vmul.f32 %v10945_v2, %v13247_v47  ;;  %16499 = vst [vmem:[#allocation57_spill] sm:$0xff] %v13265_v50  ;;  %v4948_v42 = vadd.f32 %v4820_v63, %v4563_v7  ;;  %v7199_v59 = vpop.f32.mrf.mxu0 }
 0x696   : > { %v5976_v27 = vmul.f32 %v10945_v2, %v13249_v18  ;;  %v6360_v38 = vmul.f32 %v16130_v15, %v13251_v30  ;;  %v6361_v28 = vmul.f32 %v16130_v15, %v13253_v60  ;;  %v6813_v44 = vadd.f32 %v6685_v43, %v6428_v46  ;;  %v7252_v30 = vpop.f32.mrf.mxu1 }
 0x697   : > { %v6814_v36 = vadd.f32 %v6686_v37, %v6429_v41  ;;  %v5332_v49 = vadd.f32 %v5204_v8, %v4947_v9  ;;  %v6745_v61 = vmul.f32 %v10948_v52, %v13261_v33  ;;  %v5333_v4 = vadd.f32 %v5205_v20, %v4948_v42  ;;  %v16500_v8 = vld [vmem:[#allocation48_spill] sm:$0xff]  ;;  %v16501_v41 = vld [vmem:[#allocation115_spill] sm:$0xff] }
 0x698   : > { %v6746_v63 = vmul.f32 %v10948_v52, %v13265_v50  ;;  %v2618_v7 = vmul.f32 %v16056_v17, %v2272_v31  ;;  %v2686_v18 = vmul.f32 %v16056_v17, %v2544_v57  ;;  %v6941_v47 = vmax.f32 %v6813_v44, 0.0  ;;  %v3505_v42 = vld [vmem:[#allocation2 + $0x408] sm:$0xff] }
 0x699   : > { %v6942_v14 = vmax.f32 %v6814_v36, 0.0  ;;  %v5717_v60 = vadd.f32 %v5589_v54, %v5332_v49  ;;  %v2619_v43 = vmul.f32 %v16056_v17, %v2276_v22  ;;  %v5718_v37 = vadd.f32 %v5590_v25, %v5333_v4  ;;  %v3506_v22 = vld [vmem:[#allocation2 + $0x410] sm:$0xff] }
 0x69a   : > { %v2746_v46 = vadd.f32 %v2618_v7, %v16500_v8  ;;  %v2814_v9 = vadd.f32 %v2686_v18, %v16501_v41  ;;  %v7200_v20 = vadd.f32 %v12831_v16, %v7199_v59  ;;  %v7253_v57 = vadd.f32 %v12831_v16, %v7252_v30  ;;  %v4276_v59 = vld [vmem:[#allocation2 + $0x412] sm:$0xff]  ;;  %v13311_v8 = vld [vmem:[#allocation2 + $0x440] sm:$0xff] }
 0x69b   : > { %v7045_v33 = vpack.c.bf16 %v6942_v14, %v6941_v47  ;;  %v6103_v50 = vadd.f32 %v5975_v13, %v5717_v60  ;;  %v2747_v31 = vadd.f32 %v2619_v43, %v16502_v48  ;;  %v6104_v10 = vadd.f32 %v5976_v27, %v5718_v37  ;;  %v3890_v60 = vld [vmem:[#allocation2 + $0x409] sm:$0xff]  ;;  %v3891_v14 = vld [vmem:[#allocation2 + $0x411] sm:$0xff]  ;;  %16504 = vst [vmem:[#allocation114_spill] sm:$0xff] %v13311_v8 }
 0x69c   : > { %v13286_v44 = vadd.f32 %v13076_v23, %v2746_v46  ;;  %v2946_v54 = vadd.f32 %v13076_v23, %v2814_v9  ;;  %v7497_v25 = vmax.f32 %v7200_v20, 0.0  ;;  %v7518_v49 = vmax.f32 %v7253_v57, 0.0  ;;  %v4275_v48 = vld [vmem:[#allocation2 + $0x40a] sm:$0xff]  ;;  %v13313_v46 = vld [vmem:[#allocation2 + $0x439] sm:$0xff] }
 0x69d   : > { %7281 = vmatmul.bf16.gmra.mxu1 %v7045_v33  ;;  %v6488_v36 = vadd.f32 %v6360_v38, %v6103_v50  ;;  %v2879_v18 = vadd.f32 %v13076_v23, %v2747_v31  ;;  %v3634_v47 = vmul.f32 %v10654_v3, %v3505_v42  ;;  %v6489_v13 = vadd.f32 %v6361_v28, %v6104_v10  ;;  %v13317_v31 = vld [vmem:[#allocation2 + $0x441] sm:$0xff] }
 0x69e   : > { %16503 = vst [vmem:[#allocation77_spill] sm:$0xff] %v13286_v44  ;;  %v15150_v16 = vmax.f32 %v13286_v44, 0.0  ;;  %v3074_v30 = vmax.f32 %v2946_v54, 0.0  ;;  %v13293_v27 = vadd.f32 %v13156_v58, %v7497_v25  ;;  %v13296_v33 = vadd.f32 %v13159_v0, %v7518_v49  ;;  %v13304_v58 = vld [vmem:[#allocation2 + $0x438] sm:$0xff]  ;;  %v13321_v54 = vld [vmem:[#allocation2 + $0x442] sm:$0xff]  ;;  %v2532_v25 = vpop.permute.xlu1 %2531 }
 0x69f   : > { %v6873_v4 = vadd.f32 %v6745_v61, %v6488_v36  ;;  %v3007_v7 = vmax.f32 %v2879_v18, 0.0  ;;  %v3635_v50 = vmul.f32 %v10654_v3, %v3506_v22  ;;  %v6874_v38 = vadd.f32 %v6746_v63, %v6489_v13  ;;  %16505 = vst [vmem:[#allocation83_spill] sm:$0xff] %v13313_v46  ;;  %v13319_v57 = vld [vmem:[#allocation2 + $0x43a] sm:$0xff] }
 0x6a0   : > { %3351 = vst [vmem:[#allocation2 + $0x2d9] sm:$0xff] %v15150_v16  ;;  %v4019_v10 = vmul.f32 %v16136_v24, %v3890_v60  ;;  %v4020_v28 = vmul.f32 %v16136_v24, %v3891_v14  ;;  %v4404_v43 = vmul.f32 %v10700_v62, %v4275_v48  ;;  %v4405_v61 = vmul.f32 %v10700_v62, %v4276_v59  ;;  %v2416_v60 = vpop.permute.xlu0 %2415  ;;  %v7202_v59 = vpop.f32.mrf.mxu0  ;;  %v16511_v44 = vld [vmem:[#allocation87_spill] sm:$0xff] }
 0x6a1   : > { %v7001_v37 = vmax.f32 %v6873_v4, 0.0  ;;  %3419 = vst [vmem:[#allocation2 + $0x669] sm:$0xff] %v3074_v30  ;;  %v4789_v0 = vmul.f32 %v13108_v45, %v10742_v34  ;;  %v4790_v63 = vmul.f32 %v13110_v5, %v10742_v34  ;;  %v7002_v41 = vmax.f32 %v6874_v38, 0.0  ;;  %v7254_v4 = vpop.f32.mrf.mxu1 }
 0x6a2   : > { %3352 = vst [vmem:[#allocation2 + $0x2e9] sm:$0xff] %v3007_v7  ;;  %v4147_v9 = vadd.f32 %v4019_v10, %v3634_v47  ;;  %v4148_v20 = vadd.f32 %v4020_v28, %v3635_v50  ;;  %v5174_v42 = vmul.f32 %v13112_v1, %v10772_v26  ;;  %v5175_v22 = vmul.f32 %v13114_v39, %v10772_v26  ;;  %v2420_v47 = vpop.permute.xlu2 %2419 }
 0x6a3   : > { %16506 = vst [vmem:[#allocation64_spill] sm:$0xff] %v13317_v31  ;;  %v5559_v36 = vmul.f32 %v13116_v51, %v10899_v19  ;;  %v5560_v18 = vmul.f32 %v13126_v21, %v10899_v19  ;;  %v5945_v49 = vmul.f32 %v10945_v2, %v13304_v58  ;;  %v7075_v14 = vpack.c.bf16 %v7002_v41, %v7001_v37 }
 0x6a4   : > { %16507 = vst [vmem:[#allocation147_spill] sm:$0xff] %v13319_v57  ;;  %v4532_v48 = vadd.f32 %v4404_v43, %v4147_v9  ;;  %v4533_v13 = vadd.f32 %v4405_v61, %v4148_v20  ;;  %v5946_v30 = vmul.f32 %v10945_v2, %v13311_v8  ;;  %v6330_v7 = vmul.f32 %v16130_v15, %v13313_v46  ;;  %v13347_v9 = vld [vmem:[%s14848_s5] ss:$0 sm:$0xff] }
 0x6a5   : > { %16508 = vst [vmem:[#allocation141_spill] sm:$0xff] %v13321_v54  ;;  %v6331_v50 = vmul.f32 %v16130_v15, %v13317_v31  ;;  %v6715_v38 = vmul.f32 %v10948_v52, %v13319_v57  ;;  %v6716_v10 = vmul.f32 %v10948_v52, %v13321_v54  ;;  %7431 = vmatmul.bf16.gmra.mxu3 %v7075_v14 }
 0x6a6   : > { %v4917_v28 = vadd.f32 %v4789_v0, %v4532_v48  ;;  %v4918_v43 = vadd.f32 %v4790_v63, %v4533_v13  ;;  %v2683_v37 = vmul.f32 %v16056_v17, %v2532_v25  ;;  %v2655_v61 = vmul.f32 %v16056_v17, %v2420_v47  ;;  %v16509_v48 = vld [vmem:[#allocation126_spill] sm:$0xff]  ;;  %v16510_v13 = vld [vmem:[#allocation75_spill] sm:$0xff] }
 0x6a7   : > { %v2654_v41 = vmul.f32 %v16056_v17, %v2416_v60  ;;  %v7203_v20 = vadd.f32 %v13347_v9, %v7202_v59  ;;  %v7255_v16 = vadd.f32 %v13347_v9, %v7254_v4  ;;  %v3606_v14 = vmul.f32 %v16478_v29, %v10654_v3 }
 0x6a8   : > { %v5302_v0 = vadd.f32 %v5174_v42, %v4917_v28  ;;  %v5303_v63 = vadd.f32 %v5175_v22, %v4918_v43  ;;  %v2811_v25 = vadd.f32 %v2683_v37, %v16509_v48  ;;  %v2783_v47 = vadd.f32 %v2655_v61, %v16510_v13  ;;  %v16517_v13 = vld [vmem:[#allocation105_spill] sm:$0xff] }
 0x6a9   : > { %v2782_v60 = vadd.f32 %v2654_v41, %v16511_v44  ;;  %v7498_v54 = vmax.f32 %v7203_v20, 0.0  ;;  %v7519_v57 = vmax.f32 %v7255_v16, 0.0  ;;  %v3607_v31 = vmul.f32 %v16479_v53, %v10654_v3 }
 0x6aa   : > { %v5687_v46 = vadd.f32 %v5559_v36, %v5302_v0  ;;  %v5688_v59 = vadd.f32 %v5560_v18, %v5303_v63  ;;  %v2943_v4 = vadd.f32 %v13076_v23, %v2811_v25  ;;  %v2915_v8 = vadd.f32 %v13076_v23, %v2783_v47  ;;  %v16515_v0 = vld [vmem:[#allocation99_spill] sm:$0xff] }
 0x6ab   : > { %v2914_v29 = vadd.f32 %v13076_v23, %v2782_v60  ;;  %v13362_v42 = vadd.f32 %v13293_v27, %v7498_v54  ;;  %v13365_v22 = vadd.f32 %v13296_v33, %v7519_v57  ;;  %v3991_v44 = vmul.f32 %v16480_v6, %v16136_v24  ;;  %v13373_v27 = vld [vmem:[#allocation2 + $0x2a9] sm:$0xff]  ;;  %v13393_v63 = vld [vmem:[#allocation2 + $0x2ba] sm:$0xff] }
 0x6ac   : > { %v6073_v16 = vadd.f32 %v5945_v49, %v5687_v46  ;;  %v6074_v28 = vadd.f32 %v5946_v30, %v5688_v59  ;;  %v3071_v53 = vmax.f32 %v2943_v4, 0.0  ;;  %v3043_v36 = vmax.f32 %v2915_v8, 0.0  ;;  %v13379_v8 = vld [vmem:[#allocation2 + $0x2b8] sm:$0xff]  ;;  %v16512_v49 = vld [vmem:[#allocation69_spill] sm:$0xff]  ;;  %16516 = vst [vmem:[#allocation97_spill] sm:$0xff] %v13393_v63  ;;  %v13399_v59 = vld [vmem:[#allocation2 + $0x2c2] sm:$0xff] }
 0x6ad   : > { %v3042_v18 = vmax.f32 %v2914_v29, 0.0  ;;  %v3992_v43 = vmul.f32 %v13196_v11, %v16136_v24  ;;  %v4119_v37 = vadd.f32 %v3991_v44, %v3606_v14  ;;  %v4376_v61 = vmul.f32 %v16483_v56, %v10700_v62  ;;  %v16513_v56 = vld [vmem:[#allocation90_spill] sm:$0xff]  ;;  %16518 = vst [vmem:[#allocation112_spill] sm:$0xff] %v13399_v59 }
 0x6ae   : > { %v6458_v54 = vadd.f32 %v6330_v7, %v6073_v16  ;;  %v6459_v33 = vadd.f32 %v6331_v50, %v6074_v28  ;;  %3416 = vst [vmem:[#allocation2 + $0x649] sm:$0xff] %v3071_v53  ;;  %v4377_v6 = vmul.f32 %v16484_v40, %v10700_v62  ;;  %v4761_v46 = vmul.f32 %v13204_v35, %v10742_v34  ;;  %v13385_v7 = vld [vmem:[#allocation2 + $0x2c0] sm:$0xff]  ;;  %v16519_v28 = vld [vmem:[#allocation34_spill] sm:$0xff] }
 0x6af   : > { %3388 = vst [vmem:[#allocation2 + $0x4c9] sm:$0xff] %v3043_v36  ;;  %v4120_v57 = vadd.f32 %v3992_v43, %v3607_v31  ;;  %v4504_v11 = vadd.f32 %v4376_v61, %v4119_v37  ;;  %v4762_v30 = vmul.f32 %v16512_v49, %v10742_v34  ;;  %v5146_v41 = vmul.f32 %v16513_v56, %v10772_v26  ;;  %v13387_v50 = vld [vmem:[#allocation2 + $0x2b9] sm:$0xff] }
 0x6b0   : > { %16514 = vst [vmem:[#allocation106_spill] sm:$0xff] %v13387_v50  ;;  %v6843_v20 = vadd.f32 %v6715_v38, %v6458_v54  ;;  %v6844_v40 = vadd.f32 %v6716_v10, %v6459_v33  ;;  %v5147_v14 = vmul.f32 %v10772_v26, %v13373_v27  ;;  %v5531_v31 = vmul.f32 %v16515_v0, %v10899_v19 }
 0x6b1   : > { %3387 = vst [vmem:[#allocation2 + $0x4b9] sm:$0xff] %v3042_v18  ;;  %v4505_v48 = vadd.f32 %v4377_v6, %v4120_v57  ;;  %v4889_v25 = vadd.f32 %v4761_v46, %v4504_v11  ;;  %v5532_v47 = vmul.f32 %v16517_v13, %v10899_v19  ;;  %v5917_v60 = vmul.f32 %v10945_v2, %v13379_v8  ;;  %v16521_v57 = vld [vmem:[#allocation43_spill] sm:$0xff] }
 0x6b2   : > { %v6971_v38 = vmax.f32 %v6843_v20, 0.0  ;;  %v6972_v10 = vmax.f32 %v6844_v40, 0.0  ;;  %v5918_v4 = vmul.f32 %v10945_v2, %v13385_v7  ;;  %v6302_v29 = vmul.f32 %v16130_v15, %v13387_v50  ;;  %v16523_v20 = vld [vmem:[#allocation84_spill] sm:$0xff] }
 0x6b3   : > { %v4890_v44 = vadd.f32 %v4762_v30, %v4505_v48  ;;  %v5274_v16 = vadd.f32 %v5146_v41, %v4889_v25  ;;  %v16520_v53 = vmax.f32 %v16519_v28, 0.0  ;;  %v6687_v18 = vmul.f32 %v10948_v52, %v13393_v63  ;;  %v16522_v30 = vld [vmem:[#allocation51_spill] sm:$0xff]  ;;  %v13434_v28 = vld [vmem:[#allocation2 + $0x5f1] sm:$0xff] }
 0x6b4   : > { %v7060_v43 = vpack.c.bf16 %v6972_v10, %v6971_v38  ;;  %v6688_v37 = vmul.f32 %v10948_v52, %v13399_v59  ;;  %v3666_v61 = vmul.f32 %v13033_v55, %v10654_v3  ;;  %v3667_v54 = vmul.f32 %v16489_v32, %v10654_v3  ;;  %v16524_v55 = vld [vmem:[#allocation59_spill] sm:$0xff]  ;;  %v16525_v32 = vld [vmem:[#allocation65_spill] sm:$0xff]  ;;  %16529 = vst [vmem:[#allocation174_spill] sm:$0xff] %v13434_v28  ;;  %v2552_v59 = vpop.permute.xlu2 %2551 }
 0x6b5   : > { %v6303_v36 = vmul.f32 %v16130_v15, %v16520_v53  ;;  %v5275_v33 = vadd.f32 %v5147_v14, %v4890_v44  ;;  %v5659_v6 = vadd.f32 %v5531_v31, %v5274_v16  ;;  %v4051_v46 = vmul.f32 %v16490_v12, %v16136_v24  ;;  %v13428_v31 = vld [vmem:[#allocation2 + $0x5e8] sm:$0xff]  ;;  %v13430_v44 = vld [vmem:[#allocation2 + $0x5f0] sm:$0xff]  ;;  %v16530_v53 = vld [vmem:[#allocation142_spill] sm:$0xff] }
 0x6b6   : > { %v4052_v11 = vmul.f32 %v16521_v57, %v16136_v24  ;;  %7356 = vmatmul.bf16.gmra.mxu2 %v7060_v43  ;;  %v4436_v41 = vmul.f32 %v16522_v30, %v10700_v62  ;;  %v4437_v40 = vmul.f32 %v16523_v20, %v10700_v62  ;;  %v4821_v48 = vmul.f32 %v16524_v55, %v10742_v34  ;;  %v13432_v16 = vld [vmem:[#allocation2 + $0x5e9] sm:$0xff]  ;;  %v16531_v57 = vld [vmem:[#allocation98_spill] sm:$0xff]  ;;  %v16532_v20 = vld [vmem:[#allocation63_spill] sm:$0xff]  ;;  %v2280_v55 = vpop.permute.xlu1 %2279 }
 0x6b7   : > { %v4822_v14 = vmul.f32 %v16525_v32, %v10742_v34  ;;  %16526 = vst [vmem:[#allocation148_spill] sm:$0xff] %v13428_v31  ;;  %v5660_v25 = vadd.f32 %v5532_v47, %v5275_v33  ;;  %v6045_v12 = vadd.f32 %v5917_v60, %v5659_v6  ;;  %v4179_v38 = vadd.f32 %v4051_v46, %v3666_v61  ;;  %v16533_v47 = vld [vmem:[#allocation57_spill] sm:$0xff] }
 0x6b8   : > { %v4180_v10 = vadd.f32 %v4052_v11, %v3667_v54  ;;  %16527 = vst [vmem:[#allocation108_spill] sm:$0xff] %v13430_v44  ;;  %v5206_v43 = vmul.f32 %v16530_v53, %v10772_v26  ;;  %v5207_v30 = vmul.f32 %v16531_v57, %v10772_v26  ;;  %v5591_v32 = vmul.f32 %v16532_v20, %v10899_v19  ;;  %v13444_v46 = vld [vmem:[#allocation2 + $0x5ea] sm:$0xff]  ;;  %v13446_v11 = vld [vmem:[#allocation2 + $0x5f2] sm:$0xff] }
 0x6b9   : > { %16528 = vst [vmem:[#allocation58_spill] sm:$0xff] %v13432_v16  ;;  %v5592_v60 = vmul.f32 %v16533_v47, %v10899_v19  ;;  %v6046_v61 = vadd.f32 %v5918_v4, %v5660_v25  ;;  %v6430_v54 = vadd.f32 %v6302_v29, %v6045_v12  ;;  %v4564_v33 = vadd.f32 %v4436_v41, %v4179_v38  ;;  %v2284_v12 = vpop.permute.xlu0 %2283  ;;  %v7204_v38 = vpop.f32.mrf.mxu0 }
 0x6ba   : > { %v4565_v6 = vadd.f32 %v4437_v40, %v4180_v10  ;;  %16534 = vst [vmem:[#allocation177_spill] sm:$0xff] %v13444_v46  ;;  %v5977_v53 = vmul.f32 %v10945_v2, %v13428_v31  ;;  %v5978_v57 = vmul.f32 %v10945_v2, %v13430_v44  ;;  %v6362_v20 = vmul.f32 %v16130_v15, %v13432_v16  ;;  %v7257_v16 = vpop.f32.mrf.mxu1 }
 0x6bb   : > { %16535 = vst [vmem:[#allocation173_spill] sm:$0xff] %v13446_v11  ;;  %v6363_v4 = vmul.f32 %v16130_v15, %v13434_v28  ;;  %v6431_v29 = vadd.f32 %v6303_v36, %v6046_v61  ;;  %v6815_v41 = vadd.f32 %v6687_v18, %v6430_v54  ;;  %v4949_v40 = vadd.f32 %v4821_v48, %v4564_v33  ;;  %v16536_v18 = vld [vmem:[#allocation47_spill] sm:$0xff] }
 0x6bc   : > { %v4950_v25 = vadd.f32 %v4822_v14, %v4565_v6  ;;  %v6747_v10 = vmul.f32 %v10948_v52, %v13444_v46  ;;  %v6748_v31 = vmul.f32 %v10948_v52, %v13446_v11  ;;  %v2620_v44 = vmul.f32 %v16056_v17, %v2280_v55  ;;  %v16537_v14 = vld [vmem:[#allocation111_spill] sm:$0xff] }
 0x6bd   : > { %v2688_v47 = vmul.f32 %v16056_v17, %v2552_v59  ;;  %v6816_v63 = vadd.f32 %v6688_v37, %v6431_v29  ;;  %v6943_v50 = vmax.f32 %v6815_v41, 0.0  ;;  %v5334_v28 = vadd.f32 %v5206_v43, %v4949_v40  ;;  %v16539_v43 = vld [vmem:[#allocation46_spill] sm:$0xff] }
 0x6be   : > { %v5335_v36 = vadd.f32 %v5207_v30, %v4950_v25  ;;  %v2748_v48 = vadd.f32 %v2620_v44, %v16536_v18  ;;  %v2621_v54 = vmul.f32 %v16056_v17, %v2284_v12  ;;  %v7205_v33 = vadd.f32 %v13347_v9, %v7204_v38  ;;  %v13498_v18 = vld [vmem:[#allocation2 + $0x450] sm:$0xff] }
 0x6bf   : > { %v2816_v61 = vadd.f32 %v2688_v47, %v16537_v14  ;;  %v6944_v6 = vmax.f32 %v6816_v63, 0.0  ;;  %v5719_v46 = vadd.f32 %v5591_v32, %v5334_v28  ;;  %v7258_v55 = vadd.f32 %v13347_v9, %v7257_v16 }
 0x6c0   : > { %v5720_v11 = vadd.f32 %v5592_v60, %v5335_v36  ;;  %v13468_v59 = vadd.f32 %v13076_v23, %v2748_v48  ;;  %v2749_v30 = vadd.f32 %v2621_v54, %v16539_v43  ;;  %v7499_v29 = vmax.f32 %v7205_v33, 0.0  ;;  %v16544_v48 = vld [vmem:[#allocation24_spill] sm:$0xff]  ;;  %v13508_v54 = vld [vmem:[#allocation2 + $0x458] sm:$0xff] }
 0x6c1   : > { %v2948_v37 = vadd.f32 %v13076_v23, %v2816_v61  ;;  %v7046_v44 = vpack.c.bf16 %v6944_v6, %v6943_v50  ;;  %v6105_v41 = vadd.f32 %v5977_v53, %v5719_v46  ;;  %v7520_v40 = vmax.f32 %v7258_v55, 0.0  ;;  %v13510_v33 = vld [vmem:[#allocation2 + $0x451] sm:$0xff] }
 0x6c2   : > { %16538 = vst [vmem:[#allocation133_spill] sm:$0xff] %v13468_v59  ;;  %v6106_v47 = vadd.f32 %v5978_v57, %v5720_v11  ;;  %v15180_v25 = vmax.f32 %v13468_v59, 0.0  ;;  %v2881_v63 = vadd.f32 %v13076_v23, %v2749_v30  ;;  %v13475_v32 = vadd.f32 %v13362_v42, %v7499_v29  ;;  %v16547_v30 = vld [vmem:[#allocation64_spill] sm:$0xff] }
 0x6c3   : > { %v3076_v12 = vmax.f32 %v2948_v37, 0.0  ;;  %7286 = vmatmul.bf16.gmra.mxu1 %v7046_v44  ;;  %v6490_v16 = vadd.f32 %v6362_v20, %v6105_v41  ;;  %v13478_v60 = vadd.f32 %v13365_v22, %v7520_v40  ;;  %v3636_v50 = vmul.f32 %v13108_v45, %v10654_v3  ;;  %v16546_v37 = vld [vmem:[#allocation83_spill] sm:$0xff]  ;;  %v13518_v41 = vld [vmem:[#allocation2 + $0x452] sm:$0xff]  ;;  %v2428_v40 = vpop.permute.xlu2 %2427 }
 0x6c4   : > { %v6491_v28 = vadd.f32 %v6363_v4, %v6106_v47  ;;  %3353 = vst [vmem:[#allocation2 + $0x2f1] sm:$0xff] %v15180_v25  ;;  %v3009_v53 = vmax.f32 %v2881_v63, 0.0  ;;  %v3637_v57 = vmul.f32 %v13110_v5, %v10654_v3  ;;  %v4021_v42 = vmul.f32 %v13112_v1, %v16136_v24  ;;  %v16540_v1 = vld [vmem:[#allocation114_spill] sm:$0xff]  ;;  %v2540_v47 = vpop.permute.xlu1 %2539  ;;  %v16549_v63 = vld [vmem:[#allocation147_spill] sm:$0xff] }
 0x6c5   : > { %v4022_v20 = vmul.f32 %v13114_v39, %v16136_v24  ;;  %v6875_v46 = vadd.f32 %v6747_v10, %v6490_v16  ;;  %3421 = vst [vmem:[#allocation2 + $0x681] sm:$0xff] %v3076_v12  ;;  %v4406_v22 = vmul.f32 %v13116_v51, %v10700_v62  ;;  %v4407_v45 = vmul.f32 %v13126_v21, %v10700_v62  ;;  %v16541_v39 = vld [vmem:[#allocation18_spill] sm:$0xff]  ;;  %v16545_v51 = vld [vmem:[#allocation139_spill] sm:$0xff] }
 0x6c6   : > { %v6876_v11 = vadd.f32 %v6748_v31, %v6491_v28  ;;  %3354 = vst [vmem:[#allocation2 + $0x301] sm:$0xff] %v3009_v53  ;;  %v4149_v4 = vadd.f32 %v4021_v42, %v3636_v50  ;;  %v4791_v5 = vmul.f32 %v13304_v58, %v10742_v34  ;;  %v4792_v36 = vmul.f32 %v16540_v1, %v10742_v34  ;;  %v16542_v31 = vld [vmem:[#allocation121_spill] sm:$0xff]  ;;  %v13516_v44 = vld [vmem:[#allocation2 + $0x459] sm:$0xff]  ;;  %v7207_v42 = vpop.f32.mrf.mxu0 }
 0x6c7   : > { %v4150_v38 = vadd.f32 %v4022_v20, %v3637_v57  ;;  %v13502_v10 = vadd.f32 %v16542_v31, %v16541_v39  ;;  %v13506_v14 = vadd.f32 %v16545_v51, %v16544_v48  ;;  %v7003_v21 = vmax.f32 %v6875_v46, 0.0  ;;  %16548 = vst [vmem:[#allocation125_spill] sm:$0xff] %v13518_v41  ;;  %v16550_v28 = vld [vmem:[#allocation141_spill] sm:$0xff]  ;;  %v2424_v57 = vpop.permute.xlu0 %2423 }
 0x6c8   : > { %v7004_v61 = vmax.f32 %v6876_v11, 0.0  ;;  %v4534_v6 = vadd.f32 %v4406_v22, %v4149_v4  ;;  %v5176_v43 = vmul.f32 %v16546_v37, %v10772_v26  ;;  %v5177_v29 = vmul.f32 %v16547_v30, %v10772_v26  ;;  %v7259_v4 = vpop.f32.mrf.mxu1 }
 0x6c9   : > { %16543 = vst [vmem:[#allocation88_spill] sm:$0xff] %v13502_v10  ;;  %v4535_v55 = vadd.f32 %v4407_v45, %v4150_v38  ;;  %v5561_v16 = vmul.f32 %v16549_v63, %v10899_v19  ;;  %v5562_v50 = vmul.f32 %v16550_v28, %v10899_v19  ;;  %v5947_v53 = vmul.f32 %v10945_v2, %v13498_v18  ;;  %v7322_v45 = vpop.f32.mrf.mxu2 }
 0x6ca   : > { %v7076_v12 = vpack.c.bf16 %v7004_v61, %v7003_v21  ;;  %v4919_v20 = vadd.f32 %v4791_v5, %v4534_v6  ;;  %v5948_v11 = vmul.f32 %v10945_v2, %v13508_v54  ;;  %v6332_v22 = vmul.f32 %v16130_v15, %v13510_v33  ;;  %v16551_v6 = vld [vmem:[#allocation167_spill] sm:$0xff] }
 0x6cb   : > { %v4920_v46 = vadd.f32 %v4792_v36, %v4535_v55  ;;  %v6333_v38 = vmul.f32 %v16130_v15, %v13516_v44  ;;  %v6717_v39 = vmul.f32 %v10948_v52, %v13518_v41  ;;  %v2685_v31 = vmul.f32 %v16056_v17, %v2540_v47  ;;  %v13544_v47 = vld [vmem:[#allocation2 + $0x45a] sm:$0xff] }
 0x6cc   : > { %7436 = vmatmul.bf16.gmra.mxu3 %v7076_v12  ;;  %v2657_v5 = vmul.f32 %v16056_v17, %v2428_v40  ;;  %v5304_v36 = vadd.f32 %v5176_v43, %v4919_v20  ;;  %v2656_v51 = vmul.f32 %v16056_v17, %v2424_v57  ;;  %v7208_v21 = vadd.f32 %v13347_v9, %v7207_v42  ;;  %v16552_v12 = vld [vmem:[#allocation89_spill] sm:$0xff] }
 0x6cd   : > { %v5305_v48 = vadd.f32 %v5177_v29, %v4920_v46  ;;  %v13539_v61 = vadd.f32 %v13347_v9, %v7322_v45  ;;  %v2813_v55 = vadd.f32 %v2685_v31, %v16551_v6  ;;  %v7260_v59 = vadd.f32 %v13347_v9, %v7259_v4  ;;  %v16553_v40 = vld [vmem:[#allocation93_spill] sm:$0xff] }
 0x6ce   : > { %v2785_v25 = vadd.f32 %v2657_v5, %v16552_v12  ;;  %v5689_v10 = vadd.f32 %v5561_v16, %v5304_v36  ;;  %v2784_v43 = vadd.f32 %v2656_v51, %v16553_v40  ;;  %v7500_v29 = vmax.f32 %v7208_v21, 0.0 }
 0x6cf   : > { %v5690_v41 = vadd.f32 %v5562_v50, %v5305_v48  ;;  %v2945_v57 = vadd.f32 %v13076_v23, %v2813_v55  ;;  %v7521_v20 = vmax.f32 %v7260_v59, 0.0  ;;  %v3608_v46 = vmul.f32 %v13204_v35, %v10654_v3  ;;  %v13583_v55 = vld [vmem:[#allocation2 + $0x2d1] sm:$0xff] }
 0x6d0   : > { %v2917_v42 = vadd.f32 %v13076_v23, %v2785_v25  ;;  %v6075_v45 = vadd.f32 %v5947_v53, %v5689_v10  ;;  %v2916_v5 = vadd.f32 %v13076_v23, %v2784_v43  ;;  %v13553_v16 = vadd.f32 %v13475_v32, %v7500_v29  ;;  %v13569_v53 = vld [vmem:[#allocation2 + $0x2c1] sm:$0xff]  ;;  %16557 = vst [vmem:[#allocation182_spill] sm:$0xff] %v13583_v55 }
 0x6d1   : > { %v6076_v31 = vadd.f32 %v5948_v11, %v5690_v41  ;;  %v6718_v50 = vmul.f32 %v10948_v52, %v13544_v47  ;;  %v3073_v4 = vmax.f32 %v2945_v57, 0.0  ;;  %v3609_v48 = vmul.f32 %v16512_v49, %v10654_v3  ;;  %v16558_v57 = vld [vmem:[#allocation97_spill] sm:$0xff] }
 0x6d2   : > { %v3045_v36 = vmax.f32 %v2917_v42, 0.0  ;;  %v6460_v25 = vadd.f32 %v6332_v22, %v6075_v45  ;;  %v3044_v51 = vmax.f32 %v2916_v5, 0.0  ;;  %v3993_v35 = vmul.f32 %v16513_v56, %v16136_v24 }
 0x6d3   : > { %v6461_v59 = vadd.f32 %v6333_v38, %v6076_v31  ;;  %3418 = vst [vmem:[#allocation2 + $0x661] sm:$0xff] %v3073_v4  ;;  %v13563_v23 = vadd.f32 %v13478_v60, %v7521_v20  ;;  %v3994_v32 = vmul.f32 %v13373_v27, %v16136_v24  ;;  %v4378_v41 = vmul.f32 %v16515_v0, %v10700_v62  ;;  %v13573_v38 = vld [vmem:[#allocation2 + $0x2d0] sm:$0xff]  ;;  %v16555_v0 = vld [vmem:[#allocation106_spill] sm:$0xff]  ;;  %v16559_v20 = vld [vmem:[#allocation112_spill] sm:$0xff] }
 0x6d4   : > { %v6845_v49 = vadd.f32 %v6717_v39, %v6460_v25  ;;  %3390 = vst [vmem:[#allocation2 + $0x4e1] sm:$0xff] %v3045_v36  ;;  %v4121_v22 = vadd.f32 %v3993_v35, %v3608_v46  ;;  %v4379_v56 = vmul.f32 %v16517_v13, %v10700_v62  ;;  %v4763_v21 = vmul.f32 %v13379_v8, %v10742_v34  ;;  %v13581_v39 = vld [vmem:[#allocation2 + $0x2d8] sm:$0xff] }
 0x6d5   : > { %v6846_v11 = vadd.f32 %v6718_v50, %v6461_v59  ;;  %16554 = vst [vmem:[#allocation96_spill] sm:$0xff] %v13573_v38  ;;  %v4122_v60 = vadd.f32 %v3994_v32, %v3609_v48  ;;  %v4764_v27 = vmul.f32 %v13385_v7, %v10742_v34  ;;  %v5148_v6 = vmul.f32 %v16555_v0, %v10772_v26  ;;  %v13593_v31 = vld [vmem:[#allocation2 + $0x2d2] sm:$0xff]  ;;  %v13599_v48 = vld [vmem:[#allocation2 + $0x2da] sm:$0xff] }
 0x6d6   : > { %3389 = vst [vmem:[#allocation2 + $0x4d1] sm:$0xff] %v3044_v51  ;;  %v6973_v12 = vmax.f32 %v6845_v49, 0.0  ;;  %v4506_v13 = vadd.f32 %v4378_v41, %v4121_v22  ;;  %v5149_v43 = vmul.f32 %v10772_v26, %v13569_v53  ;;  %v5533_v42 = vmul.f32 %v16558_v57, %v10899_v19  ;;  %v16562_v59 = vld [vmem:[#allocation77_spill] sm:$0xff]  ;;  %v16564_v32 = vld [vmem:[#allocation59_spill] sm:$0xff] }
 0x6d7   : > { %16556 = vst [vmem:[#allocation181_spill] sm:$0xff] %v13581_v39  ;;  %v6974_v40 = vmax.f32 %v6846_v11, 0.0  ;;  %v4507_v29 = vadd.f32 %v4379_v56, %v4122_v60  ;;  %v5534_v46 = vmul.f32 %v16559_v20, %v10899_v19  ;;  %v5919_v45 = vmul.f32 %v10945_v2, %v13573_v38  ;;  %v16565_v49 = vld [vmem:[#allocation65_spill] sm:$0xff]  ;;  %v16566_v60 = vld [vmem:[#allocation142_spill] sm:$0xff] }
 0x6d8   : > { %16560 = vst [vmem:[#allocation122_spill] sm:$0xff] %v13593_v31  ;;  %v4891_v50 = vadd.f32 %v4763_v21, %v4506_v13  ;;  %v5920_v4 = vmul.f32 %v10945_v2, %v13581_v39  ;;  %v6304_v36 = vmul.f32 %v16130_v15, %v13583_v55  ;;  %v16563_v51 = vmax.f32 %v16562_v59, 0.0  ;;  %v16575_v55 = vld [vmem:[#allocation174_spill] sm:$0xff] }
 0x6d9   : > { %v7061_v5 = vpack.c.bf16 %v6974_v40, %v6973_v12  ;;  %16561 = vst [vmem:[#allocation183_spill] sm:$0xff] %v13599_v48  ;;  %v4892_v25 = vadd.f32 %v4764_v27, %v4507_v29  ;;  %v3668_v41 = vmul.f32 %v16564_v32, %v10654_v3  ;;  %v3669_v11 = vmul.f32 %v16565_v49, %v10654_v3  ;;  %v16567_v27 = vld [vmem:[#allocation98_spill] sm:$0xff]  ;;  %v16568_v29 = vld [vmem:[#allocation63_spill] sm:$0xff]  ;;  %v16570_v49 = vld [vmem:[#allocation148_spill] sm:$0xff] }
 0x6da   : > { %v6305_v35 = vmul.f32 %v16130_v15, %v16563_v51  ;;  %v5276_v22 = vadd.f32 %v5148_v6, %v4891_v50  ;;  %v6689_v56 = vmul.f32 %v10948_v52, %v13593_v31  ;;  %v4053_v21 = vmul.f32 %v16566_v60, %v16136_v24  ;;  %v16569_v51 = vld [vmem:[#allocation57_spill] sm:$0xff]  ;;  %v13622_v60 = vld [vmem:[#allocation2 + $0x600] sm:$0xff]  ;;  %v13624_v31 = vld [vmem:[#allocation2 + $0x608] sm:$0xff] }
 0x6db   : > { %7361 = vmatmul.bf16.gmra.mxu2 %v7061_v5  ;;  %v4054_v12 = vmul.f32 %v16567_v27, %v16136_v24  ;;  %v5277_v40 = vadd.f32 %v5149_v43, %v4892_v25  ;;  %v6690_v13 = vmul.f32 %v10948_v52, %v13599_v48  ;;  %v4438_v59 = vmul.f32 %v16568_v29, %v10700_v62  ;;  %v16573_v25 = vld [vmem:[#allocation108_spill] sm:$0xff]  ;;  %v16574_v48 = vld [vmem:[#allocation58_spill] sm:$0xff] }
 0x6dc   : > { %v4439_v5 = vmul.f32 %v16569_v51, %v10700_v62  ;;  %v5661_v6 = vadd.f32 %v5533_v42, %v5276_v22  ;;  %v4181_v50 = vadd.f32 %v4053_v21, %v3668_v41  ;;  %v4823_v10 = vmul.f32 %v16570_v49, %v10742_v34  ;;  %16571 = vst [vmem:[#allocation138_spill] sm:$0xff] %v13622_v60  ;;  %v13632_v42 = vld [vmem:[#allocation2 + $0x601] sm:$0xff]  ;;  %v16577_v21 = vld [vmem:[#allocation177_spill] sm:$0xff] }
 0x6dd   : > { %v4182_v32 = vadd.f32 %v4054_v12, %v3669_v11  ;;  %16572 = vst [vmem:[#allocation184_spill] sm:$0xff] %v13624_v31  ;;  %v5662_v43 = vadd.f32 %v5534_v46, %v5277_v40  ;;  %v4824_v27 = vmul.f32 %v16573_v25, %v10742_v34  ;;  %v5208_v29 = vmul.f32 %v16574_v48, %v10772_v26  ;;  %v13636_v49 = vld [vmem:[#allocation2 + $0x609] sm:$0xff]  ;;  %v7324_v46 = vpop.f32.mrf.mxu2  ;;  %v2288_v40 = vpop.permute.xlu1 %2287 }
 0x6de   : > { %v5209_v51 = vmul.f32 %v16575_v55, %v10772_v26  ;;  %16576 = vst [vmem:[#allocation128_spill] sm:$0xff] %v13632_v42  ;;  %v6047_v41 = vadd.f32 %v5919_v45, %v5661_v6  ;;  %v4566_v11 = vadd.f32 %v4438_v59, %v4181_v50  ;;  %v5593_v12 = vmul.f32 %v16577_v21, %v10899_v19  ;;  %v16579_v25 = vld [vmem:[#allocation173_spill] sm:$0xff]  ;;  %v2560_v45 = vpop.permute.xlu2 %2559 }
 0x6df   : > { %v4567_v22 = vadd.f32 %v4439_v5, %v4182_v32  ;;  %16578 = vst [vmem:[#allocation185_spill] sm:$0xff] %v13636_v49  ;;  %v6048_v38 = vadd.f32 %v5920_v4, %v5662_v43  ;;  %v5594_v39 = vmul.f32 %v16579_v25, %v10899_v19  ;;  %v5979_v48 = vmul.f32 %v10945_v2, %v13622_v60  ;;  %v13646_v32 = vld [vmem:[#allocation2 + $0x602] sm:$0xff]  ;;  %v13648_v21 = vld [vmem:[#allocation2 + $0x60a] sm:$0xff] }
 0x6e0   : > { %v5980_v55 = vmul.f32 %v10945_v2, %v13624_v31  ;;  %v6432_v59 = vadd.f32 %v6304_v36, %v6047_v41  ;;  %v4951_v5 = vadd.f32 %v4823_v10, %v4566_v11  ;;  %v6364_v50 = vmul.f32 %v16130_v15, %v13632_v42  ;;  %16580 = vst [vmem:[#allocation150_spill] sm:$0xff] %v13646_v32 }
 0x6e1   : > { %v4952_v6 = vadd.f32 %v4824_v27, %v4567_v22  ;;  %16581 = vst [vmem:[#allocation113_spill] sm:$0xff] %v13648_v21  ;;  %v6433_v4 = vadd.f32 %v6305_v35, %v6048_v38  ;;  %v6365_v43 = vmul.f32 %v16130_v15, %v13636_v49  ;;  %v7325_v60 = vadd.f32 %v13347_v9, %v7324_v46  ;;  %v7402_v27 = vpop.f32.mrf.mxu3  ;;  %v16582_v35 = vld [vmem:[#allocation94_spill] sm:$0xff]  ;;  %v2292_v49 = vpop.permute.xlu0 %2291 }
 0x6e2   : > { %v2622_v25 = vmul.f32 %v16056_v17, %v2288_v40  ;;  %v6817_v31 = vadd.f32 %v6689_v56, %v6432_v59  ;;  %v5336_v20 = vadd.f32 %v5208_v29, %v4951_v5  ;;  %v2690_v10 = vmul.f32 %v16056_v17, %v2560_v45  ;;  %v7209_v29 = vpop.f32.mrf.mxu0 }
 0x6e3   : > { %v5337_v36 = vadd.f32 %v5209_v51, %v4952_v6  ;;  %v6818_v41 = vadd.f32 %v6690_v13, %v6433_v4  ;;  %v6749_v11 = vmul.f32 %v10948_v52, %v13646_v32  ;;  %v6750_v38 = vmul.f32 %v10948_v52, %v13648_v21  ;;  %v7262_v51 = vpop.f32.mrf.mxu1  ;;  %v13664_v13 = vld [vmem:[%s14845_s2] ss:$0 sm:$0xff] }
 0x6e4   : > { %v2750_v22 = vadd.f32 %v2622_v25, %v16582_v35  ;;  %v5721_v42 = vadd.f32 %v5593_v12, %v5336_v20  ;;  %v7547_v57 = vmax.f32 %v7325_v60, 0.0  ;;  %v2818_v56 = vadd.f32 %v2690_v10, %v13506_v14 }
 0x6e5   : > { %v5722_v46 = vadd.f32 %v5594_v39, %v5337_v36  ;;  %v6945_v40 = vmax.f32 %v6817_v31, 0.0  ;;  %v6946_v45 = vmax.f32 %v6818_v41, 0.0  ;;  %v13670_v25 = vadd.f32 %v13347_v9, %v7402_v27  ;;  %v16584_v41 = vld [vmem:[#allocation53_spill] sm:$0xff] }
 0x6e6   : > { %v13667_v59 = vadd.f32 %v13664_v13, %v2750_v22  ;;  %v6107_v20 = vadd.f32 %v5979_v48, %v5721_v42  ;;  %v2950_v60 = vadd.f32 %v13664_v13, %v2818_v56  ;;  %v2623_v14 = vmul.f32 %v16056_v17, %v2292_v49 }
 0x6e7   : > { %v6108_v39 = vadd.f32 %v5980_v55, %v5722_v46  ;;  %v7047_v12 = vpack.c.bf16 %v6946_v45, %v6945_v40  ;;  %v7210_v5 = vadd.f32 %v13347_v9, %v7209_v29  ;;  %v7263_v6 = vadd.f32 %v13347_v9, %v7262_v51 }
 0x6e8   : > { %16583 = vst [vmem:[#allocation120_spill] sm:$0xff] %v13667_v59  ;;  %v15202_v31 = vmax.f32 %v13667_v59, 0.0  ;;  %v6492_v4 = vadd.f32 %v6364_v50, %v6107_v20  ;;  %v3078_v10 = vmax.f32 %v2950_v60, 0.0  ;;  %v2751_v35 = vadd.f32 %v2623_v14, %v16584_v41  ;;  %v13703_v20 = vld [vmem:[#allocation2 + $0x468] sm:$0xff]  ;;  %v13713_v14 = vld [vmem:[#allocation2 + $0x471] sm:$0xff] }
 0x6e9   : > { %v6493_v36 = vadd.f32 %v6365_v43, %v6108_v39  ;;  %7291 = vmatmul.bf16.gmra.mxu1 %v7047_v12  ;;  %v7501_v55 = vmax.f32 %v7210_v5, 0.0  ;;  %v7522_v48 = vmax.f32 %v7263_v6, 0.0  ;;  %v3638_v49 = vmul.f32 %v13304_v58, %v10654_v3  ;;  %v13707_v39 = vld [vmem:[#allocation2 + $0x469] sm:$0xff]  ;;  %v2548_v12 = vpop.permute.xlu1 %2547  ;;  %v7327_v5 = vpop.f32.mrf.mxu2 }
 0x6ea   : > { %3355 = vst [vmem:[#allocation2 + $0x309] sm:$0xff] %v15202_v31  ;;  %v3639_v42 = vmul.f32 %v16540_v1, %v10654_v3  ;;  %v6877_v27 = vadd.f32 %v6749_v11, %v6492_v4  ;;  %v2883_v50 = vadd.f32 %v13664_v13, %v2751_v35  ;;  %v4023_v43 = vmul.f32 %v16546_v37, %v16136_v24  ;;  %v7404_v35 = vpop.f32.mrf.mxu3 }
 0x6eb   : > { %v6878_v22 = vadd.f32 %v6750_v38, %v6493_v36  ;;  %3423 = vst [vmem:[#allocation2 + $0x699] sm:$0xff] %v3078_v10  ;;  %v13688_v46 = vadd.f32 %v13553_v16, %v7501_v55  ;;  %v13691_v56 = vadd.f32 %v13563_v23, %v7522_v48  ;;  %v4024_v58 = vmul.f32 %v16547_v30, %v16136_v24  ;;  %v13705_v30 = vld [vmem:[#allocation2 + $0x470] sm:$0xff]  ;;  %v2432_v55 = vpop.permute.xlu0 %2431 }
 0x6ec   : > { %v4408_v1 = vmul.f32 %v16549_v63, %v10700_v62  ;;  %v7005_v11 = vmax.f32 %v6877_v27, 0.0  ;;  %v3011_v29 = vmax.f32 %v2883_v50, 0.0  ;;  %v4151_v51 = vadd.f32 %v4023_v43, %v3638_v49  ;;  %v16587_v36 = vld [vmem:[#allocation125_spill] sm:$0xff]  ;;  %v7264_v50 = vpop.f32.mrf.mxu1 }
 0x6ed   : > { %v7006_v38 = vmax.f32 %v6878_v22, 0.0  ;;  %v16585_v40 = vmax.f32 %v13539_v61, 0.0  ;;  %v4152_v37 = vadd.f32 %v4024_v58, %v3639_v42  ;;  %v4409_v16 = vmul.f32 %v16550_v28, %v10700_v62  ;;  %v13715_v28 = vld [vmem:[#allocation2 + $0x46a] sm:$0xff]  ;;  %v7212_v22 = vpop.f32.mrf.mxu0 }
 0x6ee   : > { %v4793_v23 = vmul.f32 %v13498_v18, %v10742_v34  ;;  %3356 = vst [vmem:[#allocation2 + $0x319] sm:$0xff] %v3011_v29  ;;  %v4536_v60 = vadd.f32 %v4408_v1, %v4151_v51  ;;  %v4794_v61 = vmul.f32 %v13508_v54, %v10742_v34  ;;  %v5179_v4 = vmul.f32 %v13516_v44, %v10772_v26  ;;  %v13731_v1 = vld [vmem:[#allocation2 + $0x472] sm:$0xff] }
 0x6ef   : > { %v7684_v45 = vadd.f32 %v7547_v57, %v16585_v40  ;;  %v7077_v63 = vpack.c.bf16 %v7006_v38, %v7005_v11  ;;  %v5178_v57 = vmul.f32 %v13510_v33, %v10772_v26  ;;  %16586 = vst [vmem:[#allocation104_spill] sm:$0xff] %v13715_v28  ;;  %v4537_v6 = vadd.f32 %v4409_v16, %v4152_v37 }
 0x6f0   : > { %v5563_v10 = vmul.f32 %v16587_v36, %v10899_v19  ;;  %v5564_v41 = vmul.f32 %v13544_v47, %v10899_v19  ;;  %v4921_v48 = vadd.f32 %v4793_v23, %v4536_v60  ;;  %v5949_v49 = vmul.f32 %v10945_v2, %v13703_v20  ;;  %v16588_v23 = vld [vmem:[#allocation88_spill] sm:$0xff] }
 0x6f1   : > { %7441 = vmatmul.bf16.gmra.mxu3 %v7077_v63  ;;  %v5950_v42 = vmul.f32 %v10945_v2, %v13705_v30  ;;  %v6334_v27 = vmul.f32 %v16130_v15, %v13707_v39  ;;  %v4922_v43 = vadd.f32 %v4794_v61, %v4537_v6  ;;  %v6335_v58 = vmul.f32 %v16130_v15, %v13713_v14 }
 0x6f2   : > { %v6719_v11 = vmul.f32 %v10948_v52, %v13715_v28  ;;  %v2687_v38 = vmul.f32 %v16056_v17, %v2548_v12  ;;  %v5306_v29 = vadd.f32 %v5178_v57, %v4921_v48  ;;  %v7328_v51 = vadd.f32 %v13347_v9, %v7327_v5  ;;  %v16589_v12 = vld [vmem:[#allocation135_spill] sm:$0xff] }
 0x6f3   : > { %v7405_v40 = vadd.f32 %v13347_v9, %v7404_v35  ;;  %v2658_v37 = vmul.f32 %v16056_v17, %v2432_v55  ;;  %v5307_v16 = vadd.f32 %v5179_v4, %v4922_v43  ;;  %v7213_v60 = vadd.f32 %v13347_v9, %v7212_v22 }
 0x6f4   : > { %v2815_v63 = vadd.f32 %v2687_v38, %v16588_v23  ;;  %v7265_v61 = vadd.f32 %v13347_v9, %v7264_v50  ;;  %v5691_v6 = vadd.f32 %v5563_v10, %v5306_v29  ;;  %v6720_v31 = vmul.f32 %v10948_v52, %v13731_v1  ;;  %v13772_v23 = vld [vmem:[#allocation2 + $0x2d9] sm:$0xff] }
 0x6f5   : > { %v7548_v59 = vmax.f32 %v7328_v51, 0.0  ;;  %v2786_v57 = vadd.f32 %v2658_v37, %v16589_v12  ;;  %v5692_v48 = vadd.f32 %v5564_v41, %v5307_v16  ;;  %v7502_v35 = vmax.f32 %v7213_v60, 0.0  ;;  %v13778_v12 = vld [vmem:[#allocation2 + $0x2f0] sm:$0xff] }
 0x6f6   : > { %v2947_v5 = vadd.f32 %v13664_v13, %v2815_v63  ;;  %v7523_v28 = vmax.f32 %v7265_v61, 0.0  ;;  %v6077_v55 = vadd.f32 %v5949_v49, %v5691_v6  ;;  %v7579_v43 = vmax.f32 %v7405_v40, 0.0  ;;  %v13776_v6 = vld [vmem:[#allocation2 + $0x2e8] sm:$0xff]  ;;  %16597 = vst [vmem:[#allocation178_spill] sm:$0xff] %v13778_v12 }
 0x6f7   : > { %v13746_v4 = vadd.f32 %v7684_v45, %v7548_v59  ;;  %v2918_v22 = vadd.f32 %v13664_v13, %v2786_v57  ;;  %v6078_v38 = vadd.f32 %v5950_v42, %v5692_v48  ;;  %v13750_v10 = vadd.f32 %v13688_v46, %v7502_v35  ;;  %v16591_v42 = vld [vmem:[#allocation97_spill] sm:$0xff]  ;;  %16596 = vst [vmem:[#allocation119_spill] sm:$0xff] %v13776_v6 }
 0x6f8   : > { %v3075_v50 = vmax.f32 %v2947_v5, 0.0  ;;  %v13753_v29 = vadd.f32 %v13691_v56, %v7523_v28  ;;  %v6462_v51 = vadd.f32 %v6334_v27, %v6077_v55  ;;  %v3610_v37 = vmul.f32 %v13379_v8, %v10654_v3  ;;  %v16592_v28 = vld [vmem:[#allocation124_spill] sm:$0xff]  ;;  %v16599_v5 = vld [vmem:[#allocation182_spill] sm:$0xff] }
 0x6f9   : > { %16590 = vst [vmem:[#allocation164_spill] sm:$0xff] %v13750_v10  ;;  %v3046_v41 = vmax.f32 %v2918_v22, 0.0  ;;  %v3611_v59 = vmul.f32 %v13385_v7, %v10654_v3  ;;  %v6463_v45 = vadd.f32 %v6335_v58, %v6078_v38  ;;  %v3995_v49 = vmul.f32 %v16555_v0, %v16136_v24  ;;  %v16593_v27 = vld [vmem:[#allocation52_spill] sm:$0xff] }
 0x6fa   : > { %3420 = vst [vmem:[#allocation2 + $0x679] sm:$0xff] %v3075_v50  ;;  %v3996_v46 = vmul.f32 %v13569_v53, %v16136_v24  ;;  %v4380_v56 = vmul.f32 %v16591_v42, %v10700_v62  ;;  %v13767_v40 = vadd.f32 %v16593_v27, %v16592_v28  ;;  %v7578_v8 = vmax.f32 %v13670_v25, 0.0  ;;  %v16594_v7 = vld [vmem:[#allocation112_spill] sm:$0xff]  ;;  %v16595_v53 = vld [vmem:[#allocation181_spill] sm:$0xff] }
 0x6fb   : > { %v6847_v16 = vadd.f32 %v6719_v11, %v6462_v51  ;;  %3391 = vst [vmem:[#allocation2 + $0x4e9] sm:$0xff] %v3046_v41  ;;  %v4381_v58 = vmul.f32 %v16594_v7, %v10700_v62  ;;  %v6848_v0 = vadd.f32 %v6720_v31, %v6463_v45  ;;  %v4123_v63 = vadd.f32 %v3995_v49, %v3610_v37  ;;  %v16598_v25 = vld [vmem:[#allocation96_spill] sm:$0xff]  ;;  %v16601_v51 = vld [vmem:[#allocation122_spill] sm:$0xff] }
 0x6fc   : > { %v4124_v60 = vadd.f32 %v3996_v46, %v3611_v59  ;;  %v4766_v61 = vmul.f32 %v16595_v53, %v10742_v34  ;;  %v13780_v48 = vadd.f32 %v7579_v43, %v7578_v8  ;;  %v4765_v11 = vmul.f32 %v16598_v25, %v10742_v34  ;;  %v13786_v55 = vld [vmem:[#allocation2 + $0x2e9] sm:$0xff]  ;;  %v16602_v43 = vld [vmem:[#allocation183_spill] sm:$0xff] }
 0x6fd   : > { %v6975_v57 = vmax.f32 %v6847_v16, 0.0  ;;  %v5150_v35 = vmul.f32 %v16599_v5, %v10772_v26  ;;  %16600 = vst [vmem:[#allocation8_spill] sm:$0xff] %v13786_v55  ;;  %v6976_v31 = vmax.f32 %v6848_v0, 0.0  ;;  %v4508_v22 = vadd.f32 %v4380_v56, %v4123_v63  ;;  %v13800_v28 = vld [vmem:[#allocation2 + $0x2ea] sm:$0xff]  ;;  %v16607_v63 = vld [vmem:[#allocation174_spill] sm:$0xff] }
 0x6fe   : > { %v4509_v38 = vadd.f32 %v4381_v58, %v4124_v60  ;;  %v5151_v50 = vmul.f32 %v10772_v26, %v13772_v23  ;;  %v5535_v41 = vmul.f32 %v16601_v51, %v10899_v19  ;;  %v5536_v37 = vmul.f32 %v16602_v43, %v10899_v19  ;;  %16603 = vst [vmem:[#allocation123_spill] sm:$0xff] %v13800_v28  ;;  %v16604_v27 = vld [vmem:[#allocation148_spill] sm:$0xff]  ;;  %v16606_v58 = vld [vmem:[#allocation58_spill] sm:$0xff] }
 0x6ff   : > { %v5921_v59 = vmul.f32 %v10945_v2, %v13776_v6  ;;  %v5922_v45 = vmul.f32 %v10945_v2, %v13778_v12  ;;  %v7062_v49 = vpack.c.bf16 %v6976_v31, %v6975_v57  ;;  %v4893_v46 = vadd.f32 %v4765_v11, %v4508_v22  ;;  %v16605_v16 = vld [vmem:[#allocation108_spill] sm:$0xff]  ;;  %v13810_v11 = vld [vmem:[#allocation2 + $0x2f2] sm:$0xff] }
 0x700   : > { %v4894_v42 = vadd.f32 %v4766_v61, %v4509_v38  ;;  %v6306_v56 = vmul.f32 %v16130_v15, %v13786_v55  ;;  %v3670_v8 = vmul.f32 %v16604_v27, %v10654_v3  ;;  %v3671_v7 = vmul.f32 %v16605_v16, %v10654_v3  ;;  %16608 = vst [vmem:[#allocation186_spill] sm:$0xff] %v13810_v11  ;;  %v16609_v31 = vld [vmem:[#allocation177_spill] sm:$0xff]  ;;  %v16611_v16 = vld [vmem:[#allocation138_spill] sm:$0xff] }
 0x701   : > { %v4055_v0 = vmul.f32 %v16606_v58, %v16136_v24  ;;  %v4056_v60 = vmul.f32 %v16607_v63, %v16136_v24  ;;  %7366 = vmatmul.bf16.gmra.mxu2 %v7062_v49  ;;  %v5278_v57 = vadd.f32 %v5150_v35, %v4893_v46  ;;  %v4440_v22 = vmul.f32 %v16609_v31, %v10700_v62  ;;  %v16610_v38 = vld [vmem:[#allocation173_spill] sm:$0xff]  ;;  %v16612_v58 = vld [vmem:[#allocation184_spill] sm:$0xff]  ;;  %v13825_v31 = vld [vmem:[#allocation2 + $0x618] sm:$0xff] }
 0x702   : > { %v5279_v61 = vadd.f32 %v5151_v50, %v4894_v42  ;;  %v4441_v27 = vmul.f32 %v16610_v38, %v10700_v62  ;;  %v4825_v6 = vmul.f32 %v16611_v16, %v10742_v34  ;;  %v4826_v12 = vmul.f32 %v16612_v58, %v10742_v34  ;;  %v16613_v35 = vld [vmem:[#allocation133_spill] sm:$0xff]  ;;  %16615 = vst [vmem:[#allocation134_spill] sm:$0xff] %v13825_v31  ;;  %v13831_v58 = vld [vmem:[#allocation2 + $0x620] sm:$0xff] }
 0x703   : > { %v4183_v10 = vadd.f32 %v4055_v0, %v3670_v8  ;;  %v4184_v55 = vadd.f32 %v4056_v60, %v3671_v7  ;;  %v5663_v63 = vadd.f32 %v5535_v41, %v5278_v57  ;;  %v16614_v50 = vmax.f32 %v16613_v35, 0.0  ;;  %v16616_v60 = vld [vmem:[#allocation128_spill] sm:$0xff]  ;;  %16617 = vst [vmem:[#allocation187_spill] sm:$0xff] %v13831_v58  ;;  %v13833_v41 = vld [vmem:[#allocation2 + $0x619] sm:$0xff] }
 0x704   : > { %v5664_v49 = vadd.f32 %v5536_v37, %v5279_v61  ;;  %v6691_v42 = vmul.f32 %v10948_v52, %v13800_v28  ;;  %v6692_v8 = vmul.f32 %v10948_v52, %v13810_v11  ;;  %v5210_v38 = vmul.f32 %v16616_v60, %v10772_v26  ;;  %16618 = vst [vmem:[#allocation188_spill] sm:$0xff] %v13833_v41  ;;  %v16619_v61 = vld [vmem:[#allocation185_spill] sm:$0xff]  ;;  %v13839_v16 = vld [vmem:[#allocation2 + $0x621] sm:$0xff]  ;;  %v2296_v11 = vpop.permute.xlu1 %2295  ;;  %v7407_v60 = vpop.f32.mrf.mxu3 }
 0x705   : > { %v6307_v46 = vmul.f32 %v16130_v15, %v16614_v50  ;;  %v4568_v7 = vadd.f32 %v4440_v22, %v4183_v10  ;;  %v4569_v0 = vadd.f32 %v4441_v27, %v4184_v55  ;;  %v6049_v37 = vadd.f32 %v5921_v59, %v5663_v63  ;;  %16620 = vst [vmem:[#allocation190_spill] sm:$0xff] %v13839_v16  ;;  %v2300_v59 = vpop.permute.xlu0 %2299  ;;  %v13854_v28 = vld [vmem:[#allocation2 + $0x622] sm:$0xff] }
 0x706   : > { %v6050_v57 = vadd.f32 %v5922_v45, %v5664_v49  ;;  %v5211_v35 = vmul.f32 %v16619_v61, %v10772_v26  ;;  %v5595_v50 = vmul.f32 %v13646_v32, %v10899_v19  ;;  %v5596_v22 = vmul.f32 %v13648_v21, %v10899_v19  ;;  %v13849_v61 = vld [vmem:[#allocation2 + $0x61a] sm:$0xff]  ;;  %16622 = vst [vmem:[#allocation191_spill] sm:$0xff] %v13854_v28 }
 0x707   : > { %v4953_v10 = vadd.f32 %v4825_v6, %v4568_v7  ;;  %v4954_v55 = vadd.f32 %v4826_v12, %v4569_v0  ;;  %v5981_v27 = vmul.f32 %v10945_v2, %v13825_v31  ;;  %v6434_v45 = vadd.f32 %v6306_v56, %v6049_v37  ;;  %16621 = vst [vmem:[#allocation146_spill] sm:$0xff] %v13849_v61 }
 0x708   : > { %v6435_v63 = vadd.f32 %v6307_v46, %v6050_v57  ;;  %v5982_v49 = vmul.f32 %v10945_v2, %v13831_v58  ;;  %v6366_v32 = vmul.f32 %v16130_v15, %v13833_v41  ;;  %v6367_v7 = vmul.f32 %v16130_v15, %v13839_v16 }
 0x709   : > { %v5338_v6 = vadd.f32 %v5210_v38, %v4953_v10  ;;  %v5339_v12 = vadd.f32 %v5211_v35, %v4954_v55  ;;  %v2624_v0 = vmul.f32 %v16056_v17, %v2296_v11  ;;  %v6819_v21 = vadd.f32 %v6691_v42, %v6434_v45  ;;  %v7329_v35 = vpop.f32.mrf.mxu2  ;;  %v16623_v11 = vld [vmem:[#allocation41_spill] sm:$0xff] }
 0x70a   : > { %v6820_v31 = vadd.f32 %v6692_v8, %v6435_v63  ;;  %v7408_v56 = vadd.f32 %v13347_v9, %v7407_v60  ;;  %v2625_v46 = vmul.f32 %v16056_v17, %v2300_v59  ;;  %v6751_v41 = vmul.f32 %v10948_v52, %v13849_v61  ;;  %v7267_v8 = vpop.f32.mrf.mxu1 }
 0x70b   : > { %v5723_v37 = vadd.f32 %v5595_v50, %v5338_v6  ;;  %v5724_v57 = vadd.f32 %v5596_v22, %v5339_v12  ;;  %v2752_v38 = vadd.f32 %v2624_v0, %v13767_v40  ;;  %v6947_v10 = vmax.f32 %v6819_v21, 0.0  ;;  %v16625_v0 = vld [vmem:[#allocation132_spill] sm:$0xff] }
 0x70c   : > { %v6948_v55 = vmax.f32 %v6820_v31, 0.0  ;;  %v7580_v16 = vmax.f32 %v7408_v56, 0.0  ;;  %v2753_v42 = vadd.f32 %v2625_v46, %v16623_v11  ;;  %v6752_v60 = vmul.f32 %v10948_v52, %v13854_v28  ;;  %v16626_v56 = vld [vmem:[#allocation179_spill] sm:$0xff] }
 0x70d   : > { %v6109_v45 = vadd.f32 %v5981_v27, %v5723_v37  ;;  %v6110_v63 = vadd.f32 %v5982_v49, %v5724_v57  ;;  %v13865_v50 = vadd.f32 %v13664_v13, %v2752_v38  ;;  %v7330_v59 = vadd.f32 %v13347_v9, %v7329_v35  ;;  %v13876_v27 = vld [vmem:[%s14848_s5] ss:$0 sm:$0xff]  ;;  %v16627_v38 = vld [vmem:[#allocation82_spill] sm:$0xff]  ;;  %v16628_v35 = vld [vmem:[#allocation176_spill] sm:$0xff] }
 0x70e   : > { %v7048_v22 = vpack.c.bf16 %v6948_v55, %v6947_v10  ;;  %v13869_v40 = vadd.f32 %v13780_v48, %v7580_v16  ;;  %v2885_v21 = vadd.f32 %v13664_v13, %v2753_v42  ;;  %v7268_v49 = vadd.f32 %v13876_v27, %v7267_v8 }
 0x70f   : > { %16624 = vst [vmem:[#allocation192_spill] sm:$0xff] %v13865_v50  ;;  %v6494_v31 = vadd.f32 %v6366_v32, %v6109_v45  ;;  %v6495_v6 = vadd.f32 %v6367_v7, %v6110_v63  ;;  %v15224_v12 = vmax.f32 %v13865_v50, 0.0  ;;  %v13881_v46 = vmul.f32 %v16626_v56, %v16625_v0  ;;  %v16629_v45 = vld [vmem:[#allocation32_spill] sm:$0xff] }
 0x710   : > { %7296 = vmatmul.bf16.gmra.mxu1 %v7048_v22  ;;  %v3013_v9 = vmax.f32 %v2885_v21, 0.0  ;;  %v3640_v48 = vmul.f32 %v13498_v18, %v10654_v3  ;;  %v3641_v32 = vmul.f32 %v13508_v54, %v10654_v3  ;;  %v7524_v37 = vmax.f32 %v7268_v49, 0.0 }
 0x711   : > { %v6879_v16 = vadd.f32 %v6751_v41, %v6494_v31  ;;  %v6880_v7 = vadd.f32 %v6752_v60, %v6495_v6  ;;  %3357 = vst [vmem:[#allocation2 + $0x321] sm:$0xff] %v15224_v12  ;;  %v4025_v57 = vmul.f32 %v13510_v33, %v16136_v24  ;;  %v1920_v10 = vmul.f32 %v16628_v35, %v16627_v38  ;;  %v2556_v6 = vpop.permute.xlu1 %2555  ;;  %v7332_v49 = vpop.f32.mrf.mxu2  ;;  %v16644_v12 = vld [vmem:[#allocation150_spill] sm:$0xff] }
 0x712   : > { %v7549_v55 = vmax.f32 %v7330_v59, 0.0  ;;  %3358 = vst [vmem:[#allocation2 + $0x331] sm:$0xff] %v3013_v9  ;;  %v4026_v18 = vmul.f32 %v13516_v44, %v16136_v24  ;;  %v4410_v54 = vmul.f32 %v16587_v36, %v10700_v62  ;;  %v7656_v42 = vadd.f32 %v13753_v29, %v7524_v37  ;;  %v16630_v59 = vld [vmem:[#allocation161_spill] sm:$0xff]  ;;  %v13908_v29 = vld [vmem:[#allocation2 + $0x480] sm:$0xff] }
 0x713   : > { %v7007_v41 = vmax.f32 %v6879_v16, 0.0  ;;  %v7008_v11 = vmax.f32 %v6880_v7, 0.0  ;;  %v4153_v8 = vadd.f32 %v4025_v57, %v3640_v48  ;;  %v1151_v63 = vmul.f32 %v16626_v56, %v16629_v45  ;;  %v13913_v48 = vld [vmem:[#allocation2 + $0x488] sm:$0xff]  ;;  %v7269_v16 = vpop.f32.mrf.mxu1 }
 0x714   : > { %v4154_v33 = vadd.f32 %v4026_v18, %v3641_v32  ;;  %v4411_v60 = vmul.f32 %v13544_v47, %v10700_v62  ;;  %v4796_v22 = vmul.f32 %v13705_v30, %v10742_v34  ;;  %v1857_v44 = vmul.f32 %v16628_v35, %v16630_v59  ;;  %v13915_v32 = vld [vmem:[#allocation2 + $0x481] sm:$0xff]  ;;  %v13923_v35 = vld [vmem:[#allocation2 + $0x489] sm:$0xff] }
 0x715   : > { %v7078_v21 = vpack.c.bf16 %v7008_v11, %v7007_v41  ;;  %v4538_v36 = vadd.f32 %v4410_v54, %v4153_v8  ;;  %v4795_v31 = vmul.f32 %v13703_v20, %v10742_v34  ;;  %v2048_v0 = vadd.f32 %v1920_v10, %v1151_v63  ;;  %v16631_v57 = vld [vmem:[#allocation104_spill] sm:$0xff]  ;;  %v7409_v41 = vpop.f32.mrf.mxu3 }
 0x716   : > { %v7686_v56 = vadd.f32 %v13746_v4, %v7549_v55  ;;  %v4539_v9 = vadd.f32 %v4411_v60, %v4154_v33  ;;  %v5180_v47 = vmul.f32 %v13707_v39, %v10772_v26  ;;  %v5181_v37 = vmul.f32 %v13713_v14, %v10772_v26  ;;  %v13938_v59 = vld [vmem:[#allocation2 + $0x48a] sm:$0xff] }
 0x717   : > { %7446 = vmatmul.bf16.gmra.mxu3 %v7078_v21  ;;  %v4923_v7 = vadd.f32 %v4795_v31, %v4538_v36  ;;  %v5565_v38 = vmul.f32 %v16631_v57, %v10899_v19  ;;  %v5566_v4 = vmul.f32 %v13731_v1, %v10899_v19  ;;  %v5951_v55 = vmul.f32 %v10945_v2, %v13908_v29 }
 0x718   : > { %v4924_v10 = vadd.f32 %v4796_v22, %v4539_v9  ;;  %v2689_v18 = vmul.f32 %v16056_v17, %v2556_v6  ;;  %v7333_v54 = vadd.f32 %v13876_v27, %v7332_v49  ;;  %v5952_v8 = vmul.f32 %v10945_v2, %v13913_v48  ;;  %v13936_v22 = vld [vmem:[#allocation2 + $0x482] sm:$0xff] }
 0x719   : > { %v5308_v11 = vadd.f32 %v5180_v47, %v4923_v7  ;;  %v6336_v45 = vmul.f32 %v16130_v15, %v13915_v32  ;;  %v7270_v63 = vadd.f32 %v13876_v27, %v7269_v16  ;;  %v6337_v60 = vmul.f32 %v16130_v15, %v13923_v35 }
 0x71a   : > { %v5309_v33 = vadd.f32 %v5181_v37, %v4924_v10  ;;  %v2817_v21 = vadd.f32 %v2689_v18, %v2048_v0  ;;  %v7550_v36 = vmax.f32 %v7333_v54, 0.0  ;;  %v7410_v6 = vadd.f32 %v13876_v27, %v7409_v41 }
 0x71b   : > { %v5693_v31 = vadd.f32 %v5565_v38, %v5308_v11  ;;  %v7525_v49 = vmax.f32 %v7270_v63, 0.0  ;;  %v3612_v9 = vmul.f32 %v16598_v25, %v10654_v3  ;;  %v3613_v37 = vmul.f32 %v16595_v53, %v10654_v3 }
 0x71c   : > { %v5694_v47 = vadd.f32 %v5566_v4, %v5309_v33  ;;  %v2949_v16 = vadd.f32 %v13664_v13, %v2817_v21  ;;  %v13944_v7 = vadd.f32 %v7686_v56, %v7550_v36  ;;  %v6721_v0 = vmul.f32 %v10948_v52, %v13936_v22  ;;  %v13964_v36 = vld [vmem:[#allocation2 + $0x2f1] sm:$0xff] }
 0x71d   : > { %v6079_v10 = vadd.f32 %v5951_v55, %v5693_v31  ;;  %v6722_v38 = vmul.f32 %v10948_v52, %v13938_v59  ;;  %v13952_v18 = vadd.f32 %v7656_v42, %v7525_v49  ;;  %v3997_v25 = vmul.f32 %v16599_v5, %v16136_v24 }
 0x71e   : > { %v6080_v54 = vadd.f32 %v5952_v8, %v5694_v47  ;;  %v3077_v41 = vmax.f32 %v2949_v16, 0.0  ;;  %v3998_v56 = vmul.f32 %v13772_v23, %v16136_v24  ;;  %v7581_v11 = vmax.f32 %v7410_v6, 0.0  ;;  %v16632_v8 = vld [vmem:[#allocation178_spill] sm:$0xff] }
 0x71f   : > { %v6464_v4 = vadd.f32 %v6336_v45, %v6079_v10  ;;  %v4382_v53 = vmul.f32 %v16601_v51, %v10700_v62  ;;  %v4383_v55 = vmul.f32 %v16602_v43, %v10700_v62  ;;  %v4125_v42 = vadd.f32 %v3997_v25, %v3612_v9  ;;  %v16633_v51 = vld [vmem:[#allocation119_spill] sm:$0xff]  ;;  %v13971_v43 = vld [vmem:[#allocation2 + $0x308] sm:$0xff] }
 0x720   : > { %v6465_v63 = vadd.f32 %v6337_v60, %v6080_v54  ;;  %3422 = vst [vmem:[#allocation2 + $0x691] sm:$0xff] %v3077_v41  ;;  %v4126_v33 = vadd.f32 %v3998_v56, %v3613_v37  ;;  %v4768_v21 = vmul.f32 %v16632_v8, %v10742_v34  ;;  %v13967_v5 = vadd.f32 %v1857_v44, %v13881_v46  ;;  %v16635_v9 = vld [vmem:[#allocation8_spill] sm:$0xff]  ;;  %v16636_v46 = vld [vmem:[#allocation123_spill] sm:$0xff] }
 0x721   : > { %v6849_v23 = vadd.f32 %v6721_v0, %v6464_v4  ;;  %v4510_v31 = vadd.f32 %v4382_v53, %v4125_v42  ;;  %v4767_v49 = vmul.f32 %v16633_v51, %v10742_v34  ;;  %16634 = vst [vmem:[#allocation153_spill] sm:$0xff] %v13971_v43  ;;  %v13974_v60 = vadd.f32 %v13869_v40, %v7581_v11  ;;  %v13982_v54 = vld [vmem:[#allocation2 + $0x300] sm:$0xff]  ;;  %v16639_v40 = vld [vmem:[#allocation186_spill] sm:$0xff]  ;;  %v16641_v53 = vld [vmem:[#allocation184_spill] sm:$0xff] }
 0x722   : > { %v6850_v45 = vadd.f32 %v6722_v38, %v6465_v63  ;;  %v4511_v6 = vadd.f32 %v4383_v55, %v4126_v33  ;;  %v5152_v47 = vmul.f32 %v16635_v9, %v10772_v26  ;;  %v5153_v16 = vmul.f32 %v10772_v26, %v13964_v36  ;;  %16637 = vst [vmem:[#allocation193_spill] sm:$0xff] %v13982_v54  ;;  %v13984_v41 = vld [vmem:[#allocation2 + $0x301] sm:$0xff]  ;;  %v16640_v4 = vld [vmem:[#allocation138_spill] sm:$0xff] }
 0x723   : > { %v5537_v44 = vmul.f32 %v16636_v46, %v10899_v19  ;;  %v6977_v37 = vmax.f32 %v6849_v23, 0.0  ;;  %v4895_v0 = vadd.f32 %v4767_v49, %v4510_v31  ;;  %16638 = vst [vmem:[#allocation29_spill] sm:$0xff] %v13984_v41  ;;  %v5538_v25 = vmul.f32 %v16639_v40, %v10899_v19  ;;  %v16643_v49 = vld [vmem:[#allocation185_spill] sm:$0xff] }
 0x724   : > { %v6978_v10 = vmax.f32 %v6850_v45, 0.0  ;;  %v4896_v38 = vadd.f32 %v4768_v21, %v4511_v6  ;;  %v5924_v56 = vmul.f32 %v10945_v2, %v13971_v43  ;;  %v3672_v11 = vmul.f32 %v16640_v4, %v10654_v3  ;;  %v16642_v21 = vld [vmem:[#allocation128_spill] sm:$0xff]  ;;  %v16648_v43 = vld [vmem:[#allocation113_spill] sm:$0xff] }
 0x725   : > { %v3673_v55 = vmul.f32 %v16641_v53, %v10654_v3  ;;  %v5280_v42 = vadd.f32 %v5152_v47, %v4895_v0  ;;  %v4057_v23 = vmul.f32 %v16642_v21, %v16136_v24  ;;  %v5923_v45 = vmul.f32 %v10945_v2, %v13982_v54  ;;  %v14000_v6 = vld [vmem:[#allocation2 + $0x302] sm:$0xff]  ;;  %v16645_v0 = vld [vmem:[#allocation134_spill] sm:$0xff] }
 0x726   : > { %v7063_v63 = vpack.c.bf16 %v6978_v10, %v6977_v37  ;;  %v5281_v33 = vadd.f32 %v5153_v16, %v4896_v38  ;;  %v6308_v31 = vmul.f32 %v16130_v15, %v13984_v41  ;;  %v4058_v4 = vmul.f32 %v16643_v49, %v16136_v24  ;;  %v14006_v37 = vld [vmem:[#allocation2 + $0x30a] sm:$0xff] }
 0x727   : > { %v4442_v53 = vmul.f32 %v16644_v12, %v10700_v62  ;;  %v5665_v47 = vadd.f32 %v5537_v44, %v5280_v42  ;;  %v4185_v10 = vadd.f32 %v4057_v23, %v3672_v11  ;;  %v4827_v38 = vmul.f32 %v16645_v0, %v10742_v34  ;;  %v16646_v21 = vld [vmem:[#allocation120_spill] sm:$0xff]  ;;  %v14019_v42 = vld [vmem:[#allocation2 + $0x630] sm:$0xff] }
 0x728   : > { %7371 = vmatmul.bf16.gmra.mxu2 %v7063_v63  ;;  %v5666_v16 = vadd.f32 %v5538_v25, %v5281_v33  ;;  %v16647_v50 = vmax.f32 %v16646_v21, 0.0  ;;  %v4186_v54 = vadd.f32 %v4058_v4, %v3673_v55  ;;  %v4443_v49 = vmul.f32 %v16648_v43, %v10700_v62  ;;  %16649 = vst [vmem:[#allocation118_spill] sm:$0xff] %v14019_v42  ;;  %v2304_v33 = vpop.permute.xlu1 %2303  ;;  %v16650_v55 = vld [vmem:[#allocation188_spill] sm:$0xff]  ;;  %v16651_v43 = vld [vmem:[#allocation190_spill] sm:$0xff] }
 0x729   : > { %v4828_v12 = vmul.f32 %v13831_v58, %v10742_v34  ;;  %v6051_v63 = vadd.f32 %v5923_v45, %v5665_v47  ;;  %v6693_v25 = vmul.f32 %v10948_v52, %v14000_v6  ;;  %v4570_v11 = vadd.f32 %v4442_v53, %v4185_v10  ;;  %v14027_v58 = vld [vmem:[#allocation2 + $0x638] sm:$0xff]  ;;  %v7412_v10 = vpop.f32.mrf.mxu3 }
 0x72a   : > { %v6309_v41 = vmul.f32 %v16130_v15, %v16647_v50  ;;  %v6052_v44 = vadd.f32 %v5924_v56, %v5666_v16  ;;  %v6694_v23 = vmul.f32 %v10948_v52, %v14006_v37  ;;  %v4571_v50 = vadd.f32 %v4443_v49, %v4186_v54  ;;  %16652 = vst [vmem:[#allocation103_spill] sm:$0xff] %v14027_v58  ;;  %v14031_v16 = vld [vmem:[#allocation2 + $0x631] sm:$0xff] }
 0x72b   : > { %v5212_v4 = vmul.f32 %v16650_v55, %v10772_v26  ;;  %v5213_v21 = vmul.f32 %v16651_v43, %v10772_v26  ;;  %v6436_v56 = vadd.f32 %v6308_v31, %v6051_v63  ;;  %v4955_v47 = vadd.f32 %v4827_v38, %v4570_v11  ;;  %16653 = vst [vmem:[#allocation130_spill] sm:$0xff] %v14031_v16  ;;  %v14037_v55 = vld [vmem:[#allocation2 + $0x639] sm:$0xff] }
 0x72c   : > { %v6437_v45 = vadd.f32 %v6309_v41, %v6052_v44  ;;  %v5597_v53 = vmul.f32 %v13849_v61, %v10899_v19  ;;  %v4956_v0 = vadd.f32 %v4828_v12, %v4571_v50  ;;  %v5598_v54 = vmul.f32 %v13854_v28, %v10899_v19  ;;  %v14042_v44 = vld [vmem:[#allocation2 + $0x632] sm:$0xff]  ;;  %v14046_v50 = vld [vmem:[#allocation2 + $0x63a] sm:$0xff]  ;;  %v7334_v28 = vpop.f32.mrf.mxu2 }
 0x72d   : > { %v5983_v49 = vmul.f32 %v10945_v2, %v14019_v42  ;;  %v2626_v43 = vmul.f32 %v16056_v17, %v2304_v33  ;;  %v6821_v31 = vadd.f32 %v6693_v25, %v6436_v56  ;;  %v5340_v38 = vadd.f32 %v5212_v4, %v4955_v47  ;;  %16654 = vst [vmem:[#allocation151_spill] sm:$0xff] %v14042_v44  ;;  %v7272_v17 = vpop.f32.mrf.mxu1 }
 0x72e   : > { %v6822_v41 = vadd.f32 %v6694_v23, %v6437_v45  ;;  %v5984_v63 = vmul.f32 %v10945_v2, %v14027_v58  ;;  %v5341_v11 = vadd.f32 %v5213_v21, %v4956_v0  ;;  %v6368_v12 = vmul.f32 %v16130_v15, %v14031_v16  ;;  %16655 = vst [vmem:[#allocation110_spill] sm:$0xff] %v14046_v50 }
 0x72f   : > { %v2754_v42 = vadd.f32 %v2626_v43, %v13967_v5  ;;  %v7413_v61 = vadd.f32 %v13876_v27, %v7412_v10  ;;  %v6949_v25 = vmax.f32 %v6821_v31, 0.0  ;;  %v5725_v23 = vadd.f32 %v5597_v53, %v5340_v38 }
 0x730   : > { %v6950_v33 = vmax.f32 %v6822_v41, 0.0  ;;  %v6369_v4 = vmul.f32 %v16130_v15, %v14037_v55  ;;  %v5726_v56 = vadd.f32 %v5598_v54, %v5341_v11  ;;  %v6753_v0 = vmul.f32 %v10948_v52, %v14042_v44 }
 0x731   : > { %v2886_v21 = vadd.f32 %v13664_v13, %v2754_v42  ;;  %v7582_v45 = vmax.f32 %v7413_v61, 0.0  ;;  %v6111_v16 = vadd.f32 %v5983_v49, %v5725_v23  ;;  %v6754_v5 = vmul.f32 %v10948_v52, %v14046_v50 }
 0x732   : > { %v7049_v47 = vpack.c.bf16 %v6950_v33, %v6949_v25  ;;  %v7273_v43 = vadd.f32 %v13876_v27, %v7272_v17  ;;  %v6112_v10 = vadd.f32 %v5984_v63, %v5726_v56  ;;  %v7335_v53 = vadd.f32 %v13876_v27, %v7334_v28 }
 0x733   : > { %v14058_v31 = vmax.f32 %v2886_v21, 0.0  ;;  %v14062_v54 = vadd.f32 %v13974_v60, %v7582_v45  ;;  %v6496_v41 = vadd.f32 %v6368_v12, %v6111_v16  ;;  %v3642_v13 = vmul.f32 %v13703_v20, %v10654_v3 }
 0x734   : > { %7301 = vmatmul.bf16.gmra.mxu1 %v7049_v47  ;;  %v7526_v38 = vmax.f32 %v7273_v43, 0.0  ;;  %v3643_v61 = vmul.f32 %v13705_v30, %v10654_v3  ;;  %v6497_v42 = vadd.f32 %v6369_v4, %v6112_v10  ;;  %v4027_v49 = vmul.f32 %v13707_v39, %v16136_v24  ;;  %v14082_v4 = vld [vmem:[#allocation2 + $0x498] sm:$0xff] }
 0x735   : > { %16656 = vst [vmem:[#allocation165_spill] sm:$0xff] %v14058_v31  ;;  %v4028_v28 = vmul.f32 %v13713_v14, %v16136_v24  ;;  %v4412_v60 = vmul.f32 %v16631_v57, %v10700_v62  ;;  %v6881_v16 = vadd.f32 %v6753_v0, %v6496_v41  ;;  %v4413_v20 = vmul.f32 %v13731_v1, %v10700_v62  ;;  %v14088_v0 = vld [vmem:[#allocation2 + $0x4a0] sm:$0xff]  ;;  %v7274_v21 = vpop.f32.mrf.mxu1 }
 0x736   : > { %3359 = vst [vmem:[#allocation2 + $0x339] sm:$0xff] %v14058_v31  ;;  %v7658_v63 = vadd.f32 %v13952_v18, %v7526_v38  ;;  %v6882_v11 = vadd.f32 %v6754_v5, %v6497_v42  ;;  %v4155_v30 = vadd.f32 %v4027_v49, %v3642_v13  ;;  %v4798_v17 = vmul.f32 %v13913_v48, %v10742_v34  ;;  %v7337_v18 = vpop.f32.mrf.mxu2  ;;  %v14092_v10 = vld [vmem:[#allocation2 + $0x499] sm:$0xff] }
 0x737   : > { %v4156_v12 = vadd.f32 %v4028_v28, %v3643_v61  ;;  %v7009_v25 = vmax.f32 %v6881_v16, 0.0  ;;  %v7551_v39 = vmax.f32 %v7335_v53, 0.0  ;;  %v4797_v57 = vmul.f32 %v13908_v29, %v10742_v34  ;;  %v14102_v28 = vld [vmem:[#allocation2 + $0x4a1] sm:$0xff] }
 0x738   : > { %v7010_v33 = vmax.f32 %v6882_v11, 0.0  ;;  %v4540_v23 = vadd.f32 %v4412_v60, %v4155_v30  ;;  %v5182_v1 = vmul.f32 %v13915_v32, %v10772_v26  ;;  %v5183_v56 = vmul.f32 %v13923_v35, %v10772_v26  ;;  %v7414_v60 = vpop.f32.mrf.mxu3 }
 0x739   : > { %v4541_v14 = vadd.f32 %v4413_v20, %v4156_v12  ;;  %v5567_v43 = vmul.f32 %v13936_v22, %v10899_v19  ;;  %v7688_v53 = vadd.f32 %v13944_v7, %v7551_v39  ;;  %v5568_v41 = vmul.f32 %v13938_v59, %v10899_v19  ;;  %v14107_v20 = vld [vmem:[#allocation2 + $0x49a] sm:$0xff] }
 0x73a   : > { %v7079_v45 = vpack.c.bf16 %v7010_v33, %v7009_v25  ;;  %v4925_v47 = vadd.f32 %v4797_v57, %v4540_v23  ;;  %v5953_v38 = vmul.f32 %v10945_v2, %v14082_v4  ;;  %v7338_v13 = vadd.f32 %v13876_v27, %v7337_v18 }
 0x73b   : > { %v4926_v5 = vadd.f32 %v4798_v17, %v4541_v14  ;;  %v5954_v49 = vmul.f32 %v10945_v2, %v14088_v0  ;;  %v7275_v16 = vadd.f32 %v13876_v27, %v7274_v21  ;;  %v6338_v7 = vmul.f32 %v16130_v15, %v14092_v10  ;;  %v14117_v14 = vld [vmem:[#allocation2 + $0x4a2] sm:$0xff] }
 0x73c   : > { %7451 = vmatmul.bf16.gmra.mxu3 %v7079_v45  ;;  %v5310_v61 = vadd.f32 %v5182_v1, %v4925_v47  ;;  %v7552_v11 = vmax.f32 %v7338_v13, 0.0  ;;  %v3614_v30 = vmul.f32 %v16633_v51, %v10654_v3  ;;  %v3615_v12 = vmul.f32 %v16632_v8, %v10654_v3 }
 0x73d   : > { %v5311_v42 = vadd.f32 %v5183_v56, %v4926_v5  ;;  %v7527_v39 = vmax.f32 %v7275_v16, 0.0  ;;  %v3999_v33 = vmul.f32 %v16635_v9, %v16136_v24  ;;  %v6339_v23 = vmul.f32 %v16130_v15, %v14102_v28  ;;  %v14142_v16 = vld [vmem:[#allocation2 + $0x320] sm:$0xff] }
 0x73e   : > { %v5695_v17 = vadd.f32 %v5567_v43, %v5310_v61  ;;  %v14119_v57 = vadd.f32 %v7688_v53, %v7552_v11  ;;  %v7415_v18 = vadd.f32 %v13876_v27, %v7414_v60  ;;  %v4000_v51 = vmul.f32 %v13964_v36, %v16136_v24  ;;  %v14132_v43 = vld [vmem:[#allocation2 + $0x309] sm:$0xff] }
 0x73f   : > { %v5696_v25 = vadd.f32 %v5568_v41, %v5311_v42  ;;  %v6723_v56 = vmul.f32 %v10948_v52, %v14107_v20  ;;  %v14126_v21 = vadd.f32 %v7658_v63, %v7527_v39  ;;  %v4127_v9 = vadd.f32 %v3999_v33, %v3614_v30 }
 0x740   : > { %v6081_v1 = vadd.f32 %v5953_v38, %v5695_v17  ;;  %v4128_v45 = vadd.f32 %v4000_v51, %v3615_v12  ;;  %v4384_v47 = vmul.f32 %v16636_v46, %v10700_v62  ;;  %v4385_v5 = vmul.f32 %v16639_v40, %v10700_v62  ;;  %v16658_v38 = vld [vmem:[#allocation153_spill] sm:$0xff]  ;;  %v14140_v46 = vld [vmem:[#allocation2 + $0x318] sm:$0xff] }
 0x741   : > { %v6082_v8 = vadd.f32 %v5954_v49, %v5696_v25  ;;  %16657 = vst [vmem:[#allocation116_spill] sm:$0xff] %v14126_v21  ;;  %v6724_v36 = vmul.f32 %v10948_v52, %v14117_v14  ;;  %v4770_v13 = vmul.f32 %v16658_v38, %v10742_v34  ;;  %v7583_v63 = vmax.f32 %v7415_v18, 0.0  ;;  %v16659_v49 = vld [vmem:[#allocation193_spill] sm:$0xff]  ;;  %v14148_v17 = vld [vmem:[#allocation2 + $0x319] sm:$0xff] }
 0x742   : > { %v6466_v53 = vadd.f32 %v6338_v7, %v6081_v1  ;;  %v4512_v61 = vadd.f32 %v4384_v47, %v4127_v9  ;;  %v4513_v42 = vadd.f32 %v4385_v5, %v4128_v45  ;;  %v4769_v60 = vmul.f32 %v16659_v49, %v10742_v34  ;;  %v16660_v7 = vld [vmem:[#allocation29_spill] sm:$0xff]  ;;  %v16661_v47 = vld [vmem:[#allocation134_spill] sm:$0xff] }
 0x743   : > { %v6467_v41 = vadd.f32 %v6339_v23, %v6082_v8  ;;  %v5154_v30 = vmul.f32 %v16660_v7, %v10772_v26  ;;  %v5155_v12 = vmul.f32 %v10772_v26, %v14132_v43  ;;  %v5539_v33 = vmul.f32 %v14000_v6, %v10899_v19 }
 0x744   : > { %v6851_v40 = vadd.f32 %v6723_v56, %v6466_v53  ;;  %v4897_v25 = vadd.f32 %v4769_v60, %v4512_v61  ;;  %v4898_v39 = vadd.f32 %v4770_v13, %v4513_v42  ;;  %v5540_v23 = vmul.f32 %v14006_v37, %v10899_v19  ;;  %v16663_v61 = vld [vmem:[#allocation188_spill] sm:$0xff]  ;;  %v16664_v60 = vld [vmem:[#allocation190_spill] sm:$0xff] }
 0x745   : > { %v6852_v11 = vadd.f32 %v6724_v36, %v6467_v41  ;;  %v5925_v1 = vmul.f32 %v10945_v2, %v14140_v46  ;;  %v5926_v8 = vmul.f32 %v10945_v2, %v14142_v16  ;;  %v6310_v45 = vmul.f32 %v16130_v15, %v14148_v17  ;;  %v14162_v41 = vld [vmem:[#allocation2 + $0x31a] sm:$0xff] }
 0x746   : > { %v6979_v18 = vmax.f32 %v6851_v40, 0.0  ;;  %v5282_v56 = vadd.f32 %v5154_v30, %v4897_v25  ;;  %v5283_v9 = vadd.f32 %v5155_v12, %v4898_v39  ;;  %v3674_v5 = vmul.f32 %v16661_v47, %v10654_v3  ;;  %v16662_v36 = vld [vmem:[#allocation187_spill] sm:$0xff]  ;;  %v16665_v12 = vld [vmem:[#allocation146_spill] sm:$0xff] }
 0x747   : > { %v6980_v51 = vmax.f32 %v6852_v11, 0.0  ;;  %v3675_v13 = vmul.f32 %v16662_v36, %v10654_v3  ;;  %v4059_v42 = vmul.f32 %v16663_v61, %v16136_v24  ;;  %v4060_v40 = vmul.f32 %v16664_v60, %v16136_v24  ;;  %v16666_v39 = vld [vmem:[#allocation191_spill] sm:$0xff]  ;;  %v16667_v36 = vld [vmem:[#allocation118_spill] sm:$0xff] }
 0x748   : > { %v5667_v11 = vadd.f32 %v5539_v33, %v5282_v56  ;;  %v5668_v30 = vadd.f32 %v5540_v23, %v5283_v9  ;;  %v4444_v25 = vmul.f32 %v16665_v12, %v10700_v62  ;;  %v4445_v47 = vmul.f32 %v16666_v39, %v10700_v62  ;;  %v16668_v23 = vld [vmem:[#allocation192_spill] sm:$0xff] }
 0x749   : > { %v7064_v53 = vpack.c.bf16 %v6980_v51, %v6979_v18  ;;  %v14174_v18 = vld [vmem:[#allocation2 + $0x322] sm:$0xff]  ;;  %v4187_v51 = vadd.f32 %v4059_v42, %v3674_v5  ;;  %v4188_v21 = vadd.f32 %v4060_v40, %v3675_v13  ;;  %v4829_v31 = vmul.f32 %v16667_v36, %v10742_v34 }
 0x74a   : > { %v4830_v61 = vmul.f32 %v14027_v58, %v10742_v34  ;;  %v6053_v60 = vadd.f32 %v5925_v1, %v5667_v11  ;;  %v6054_v33 = vadd.f32 %v5926_v8, %v5668_v30  ;;  %v16669_v56 = vmax.f32 %v16668_v23, 0.0  ;;  %v14186_v13 = vld [vmem:[#allocation2 + $0x648] sm:$0xff]  ;;  %v16671_v1 = vld [vmem:[#allocation130_spill] sm:$0xff]  ;;  %v14192_v11 = vld [vmem:[#allocation2 + $0x650] sm:$0xff]  ;;  %v7417_v30 = vpop.f32.mrf.mxu3 }
 0x74b   : > { %7376 = vmatmul.bf16.gmra.mxu2 %v7064_v53  ;;  %v6695_v12 = vmul.f32 %v10948_v52, %v14162_v41  ;;  %v7725_v53 = vadd.f32 %v14062_v54, %v7583_v63  ;;  %v4572_v39 = vadd.f32 %v4444_v25, %v4187_v51  ;;  %v4573_v5 = vadd.f32 %v4445_v47, %v4188_v21  ;;  %v14198_v63 = vld [vmem:[#allocation2 + $0x649] sm:$0xff] }
 0x74c   : > { %v6311_v9 = vmul.f32 %v16130_v15, %v16669_v56  ;;  %16670 = vst [vmem:[#allocation168_spill] sm:$0xff] %v14186_v13  ;;  %v6438_v42 = vadd.f32 %v6310_v45, %v6053_v60  ;;  %v6696_v58 = vmul.f32 %v10948_v52, %v14174_v18  ;;  %v5214_v8 = vmul.f32 %v16671_v1, %v10772_v26  ;;  %v7339_v60 = vpop.f32.mrf.mxu2 }
 0x74d   : > { %16672 = vst [vmem:[#allocation166_spill] sm:$0xff] %v14192_v11  ;;  %v4957_v23 = vadd.f32 %v4829_v31, %v4572_v39  ;;  %v4958_v56 = vadd.f32 %v4830_v61, %v4573_v5  ;;  %v5215_v54 = vmul.f32 %v14037_v55, %v10772_v26  ;;  %v5599_v21 = vmul.f32 %v14042_v44, %v10899_v19 }
 0x74e   : > { %v6439_v40 = vadd.f32 %v6311_v9, %v6054_v33  ;;  %16673 = vst [vmem:[#allocation136_spill] sm:$0xff] %v14198_v63  ;;  %v6823_v45 = vadd.f32 %v6695_v12, %v6438_v42  ;;  %v5600_v47 = vmul.f32 %v14046_v50, %v10899_v19  ;;  %v5985_v51 = vmul.f32 %v10945_v2, %v14186_v13  ;;  %v14206_v9 = vld [vmem:[#allocation2 + $0x651] sm:$0xff] }
 0x74f   : > { %v5342_v33 = vadd.f32 %v5214_v8, %v4957_v23  ;;  %v5343_v31 = vadd.f32 %v5215_v54, %v4958_v56  ;;  %v5986_v61 = vmul.f32 %v10945_v2, %v14192_v11  ;;  %16674 = vst [vmem:[#allocation54_spill] sm:$0xff] %v14206_v9  ;;  %v7418_v39 = vadd.f32 %v13876_v27, %v7417_v30  ;;  %v14211_v12 = vld [vmem:[#allocation2 + $0x64a] sm:$0xff]  ;;  %v14215_v23 = vld [vmem:[#allocation2 + $0x652] sm:$0xff] }
 0x750   : > { %v6824_v25 = vadd.f32 %v6696_v58, %v6439_v40  ;;  %v6951_v5 = vmax.f32 %v6823_v45, 0.0  ;;  %v6370_v58 = vmul.f32 %v16130_v15, %v14198_v63  ;;  %v3644_v42 = vmul.f32 %v13908_v29, %v10654_v3 }
 0x751   : > { %v5727_v40 = vadd.f32 %v5599_v21, %v5342_v33  ;;  %v5728_v8 = vadd.f32 %v5600_v47, %v5343_v31  ;;  %v7340_v56 = vadd.f32 %v13876_v27, %v7339_v60  ;;  %v7584_v54 = vmax.f32 %v7418_v39, 0.0 }
 0x752   : > { %v6952_v44 = vmax.f32 %v6824_v25, 0.0  ;;  %v6371_v30 = vmul.f32 %v16130_v15, %v14206_v9  ;;  %v3645_v45 = vmul.f32 %v13913_v48, %v10654_v3  ;;  %v4029_v25 = vmul.f32 %v13915_v32, %v16136_v24 }
 0x753   : > { %v6113_v63 = vadd.f32 %v5985_v51, %v5727_v40  ;;  %v6114_v50 = vadd.f32 %v5986_v61, %v5728_v8  ;;  %v6755_v29 = vmul.f32 %v10948_v52, %v14211_v12  ;;  %v14226_v21 = vadd.f32 %v7725_v53, %v7584_v54 }
 0x754   : > { %v7050_v11 = vpack.c.bf16 %v6952_v44, %v6951_v5  ;;  %v6756_v44 = vmul.f32 %v10948_v52, %v14215_v23  ;;  %v4030_v47 = vmul.f32 %v13923_v35, %v16136_v24  ;;  %v4157_v60 = vadd.f32 %v4029_v25, %v3644_v42 }
 0x755   : > { %v4414_v48 = vmul.f32 %v13936_v22, %v10700_v62  ;;  %v6498_v33 = vadd.f32 %v6370_v58, %v6113_v63  ;;  %v6499_v32 = vadd.f32 %v6371_v30, %v6114_v50  ;;  %v7553_v51 = vmax.f32 %v7340_v56, 0.0  ;;  %v14244_v63 = vld [vmem:[#allocation2 + $0x4b0] sm:$0xff]  ;;  %v14246_v56 = vld [vmem:[#allocation2 + $0x4b8] sm:$0xff] }
 0x756   : > { %7306 = vmatmul.bf16.gmra.mxu1 %v7050_v11  ;;  %v4415_v31 = vmul.f32 %v13938_v59, %v10700_v62  ;;  %v4158_v61 = vadd.f32 %v4030_v47, %v3645_v45  ;;  %v4799_v11 = vmul.f32 %v14082_v4, %v10742_v34  ;;  %v4800_v39 = vmul.f32 %v14088_v0, %v10742_v34  ;;  %v7342_v59 = vpop.f32.mrf.mxu2 }
 0x757   : > { %v4542_v53 = vadd.f32 %v4414_v48, %v4157_v60  ;;  %v6883_v5 = vadd.f32 %v6755_v29, %v6498_v33  ;;  %v6884_v35 = vadd.f32 %v6756_v44, %v6499_v32  ;;  %v5184_v22 = vmul.f32 %v14092_v10, %v10772_v26  ;;  %v14251_v29 = vld [vmem:[#allocation2 + $0x4b1] sm:$0xff] }
 0x758   : > { %v4543_v42 = vadd.f32 %v4415_v31, %v4158_v61  ;;  %v5569_v50 = vmul.f32 %v14107_v20, %v10899_v19  ;;  %v7690_v54 = vadd.f32 %v14119_v57, %v7553_v51  ;;  %v5185_v45 = vmul.f32 %v14102_v28, %v10772_v26  ;;  %v14257_v48 = vld [vmem:[#allocation2 + $0x4b2] sm:$0xff] }
 0x759   : > { %v4927_v40 = vadd.f32 %v4799_v11, %v4542_v53  ;;  %v7011_v58 = vmax.f32 %v6883_v5, 0.0  ;;  %v7012_v8 = vmax.f32 %v6884_v35, 0.0  ;;  %v5570_v47 = vmul.f32 %v14117_v14, %v10899_v19  ;;  %v14262_v31 = vld [vmem:[#allocation2 + $0x4b9] sm:$0xff] }
 0x75a   : > { %v4928_v30 = vadd.f32 %v4800_v39, %v4543_v42  ;;  %v5955_v60 = vmul.f32 %v10945_v2, %v14244_v63  ;;  %v7343_v33 = vadd.f32 %v13876_v27, %v7342_v59  ;;  %v5956_v51 = vmul.f32 %v10945_v2, %v14246_v56  ;;  %v7419_v39 = vpop.f32.mrf.mxu3  ;;  %v14278_v59 = vld [vmem:[#allocation2 + $0x4ba] sm:$0xff] }
 0x75b   : > { %v5312_v25 = vadd.f32 %v5184_v22, %v4927_v40  ;;  %v7080_v44 = vpack.c.bf16 %v7012_v8, %v7011_v58  ;;  %v3616_v61 = vmul.f32 %v16659_v49, %v10654_v3  ;;  %v6340_v53 = vmul.f32 %v16130_v15, %v14251_v29 }
 0x75c   : > { %v5313_v32 = vadd.f32 %v5185_v45, %v4928_v30  ;;  %v7554_v11 = vmax.f32 %v7343_v33, 0.0  ;;  %v3617_v5 = vmul.f32 %v16658_v38, %v10654_v3  ;;  %v4001_v35 = vmul.f32 %v16660_v7, %v16136_v24 }
 0x75d   : > { %v5697_v57 = vadd.f32 %v5569_v50, %v5312_v25  ;;  %7456 = vmatmul.bf16.gmra.mxu3 %v7080_v44  ;;  %v6725_v22 = vmul.f32 %v10948_v52, %v14257_v48  ;;  %v4002_v49 = vmul.f32 %v14132_v43, %v16136_v24  ;;  %v6341_v50 = vmul.f32 %v16130_v15, %v14262_v31 }
 0x75e   : > { %v5698_v42 = vadd.f32 %v5570_v47, %v5313_v32  ;;  %v14280_v58 = vadd.f32 %v7690_v54, %v7554_v11  ;;  %v4129_v8 = vadd.f32 %v4001_v35, %v3616_v61  ;;  %v4386_v38 = vmul.f32 %v14000_v6, %v10700_v62  ;;  %v14301_v11 = vld [vmem:[#allocation2 + $0x338] sm:$0xff] }
 0x75f   : > { %v6083_v40 = vadd.f32 %v5955_v60, %v5697_v57  ;;  %v7420_v45 = vadd.f32 %v13876_v27, %v7419_v39  ;;  %v4130_v25 = vadd.f32 %v4002_v49, %v3617_v5  ;;  %v4387_v44 = vmul.f32 %v14006_v37, %v10700_v62  ;;  %v14291_v60 = vld [vmem:[#allocation2 + $0x321] sm:$0xff]  ;;  %v14295_v57 = vld [vmem:[#allocation2 + $0x330] sm:$0xff] }
 0x760   : > { %v6084_v7 = vadd.f32 %v5956_v51, %v5698_v42  ;;  %v4514_v43 = vadd.f32 %v4386_v38, %v4129_v8  ;;  %v4771_v47 = vmul.f32 %v14140_v46, %v10742_v34  ;;  %v4772_v54 = vmul.f32 %v14142_v16, %v10742_v34  ;;  %v14303_v39 = vld [vmem:[#allocation2 + $0x331] sm:$0xff] }
 0x761   : > { %v6468_v30 = vadd.f32 %v6340_v53, %v6083_v40  ;;  %v6726_v6 = vmul.f32 %v10948_v52, %v14278_v59  ;;  %v4515_v51 = vadd.f32 %v4387_v44, %v4130_v25  ;;  %v5156_v37 = vmul.f32 %v14148_v17, %v10772_v26  ;;  %v14311_v38 = vld [vmem:[#allocation2 + $0x332] sm:$0xff] }
 0x762   : > { %v6469_v33 = vadd.f32 %v6341_v50, %v6084_v7  ;;  %v4899_v61 = vadd.f32 %v4771_v47, %v4514_v43  ;;  %v5541_v53 = vmul.f32 %v14162_v41, %v10899_v19  ;;  %v7585_v35 = vmax.f32 %v7420_v45, 0.0  ;;  %16675 = vst [vmem:[#allocation140_spill] sm:$0xff] %v14311_v38  ;;  %v16676_v47 = vld [vmem:[#allocation103_spill] sm:$0xff] }
 0x763   : > { %v6853_v32 = vadd.f32 %v6725_v22, %v6468_v30  ;;  %v5157_v42 = vmul.f32 %v10772_v26, %v14291_v60  ;;  %v5542_v40 = vmul.f32 %v14174_v18, %v10899_v19  ;;  %v4900_v49 = vadd.f32 %v4772_v54, %v4515_v51 }
 0x764   : > { %v6854_v5 = vadd.f32 %v6726_v6, %v6469_v33  ;;  %v5284_v50 = vadd.f32 %v5156_v37, %v4899_v61  ;;  %v5927_v8 = vmul.f32 %v10945_v2, %v14295_v57  ;;  %v5928_v30 = vmul.f32 %v10945_v2, %v14301_v11  ;;  %v16677_v61 = vld [vmem:[#allocation151_spill] sm:$0xff] }
 0x765   : > { %v6981_v22 = vmax.f32 %v6853_v32, 0.0  ;;  %v6312_v45 = vmul.f32 %v16130_v15, %v14303_v39  ;;  %v3676_v25 = vmul.f32 %v16667_v36, %v10654_v3  ;;  %v5285_v44 = vadd.f32 %v5157_v42, %v4900_v49  ;;  %v14329_v42 = vld [vmem:[#allocation2 + $0x33a] sm:$0xff] }
 0x766   : > { %v6982_v7 = vmax.f32 %v6854_v5, 0.0  ;;  %v5669_v43 = vadd.f32 %v5541_v53, %v5284_v50  ;;  %v3677_v54 = vmul.f32 %v16676_v47, %v10654_v3  ;;  %v4061_v33 = vmul.f32 %v16671_v1, %v16136_v24  ;;  %v16678_v50 = vld [vmem:[#allocation110_spill] sm:$0xff] }
 0x767   : > { %v6697_v32 = vmul.f32 %v10948_v52, %v14311_v38  ;;  %v4062_v51 = vmul.f32 %v14037_v55, %v16136_v24  ;;  %v4446_v37 = vmul.f32 %v16677_v61, %v10700_v62  ;;  %v5670_v5 = vadd.f32 %v5542_v40, %v5285_v44  ;;  %v16679_v55 = vld [vmem:[#allocation166_spill] sm:$0xff]  ;;  %v16680_v61 = vld [vmem:[#allocation165_spill] sm:$0xff] }
 0x768   : > { %v7065_v6 = vpack.c.bf16 %v6982_v7, %v6981_v22  ;;  %v6055_v36 = vadd.f32 %v5927_v8, %v5669_v43  ;;  %v4189_v53 = vadd.f32 %v4061_v33, %v3676_v25  ;;  %v4831_v49 = vmul.f32 %v14186_v13, %v10742_v34  ;;  %v14340_v25 = vld [vmem:[#allocation2 + $0x660] sm:$0xff]  ;;  %v14342_v43 = vld [vmem:[#allocation2 + $0x668] sm:$0xff] }
 0x769   : > { %v7727_v1 = vadd.f32 %v14226_v21, %v7585_v35  ;;  %v4190_v22 = vadd.f32 %v4062_v51, %v3677_v54  ;;  %v4447_v7 = vmul.f32 %v16678_v50, %v10700_v62  ;;  %v4832_v47 = vmul.f32 %v16679_v55, %v10742_v34  ;;  %16681 = vst [vmem:[#allocation189_spill] sm:$0xff] %v14340_v25  ;;  %v16682_v54 = vld [vmem:[#allocation136_spill] sm:$0xff]  ;;  %v7344_v51 = vpop.f32.mrf.mxu2 }
 0x76a   : > { %7381 = vmatmul.bf16.gmra.mxu2 %v7065_v6  ;;  %v6056_v38 = vadd.f32 %v5928_v30, %v5670_v5  ;;  %v6313_v40 = vmul.f32 %v16130_v15, %v16680_v61  ;;  %v6440_v8 = vadd.f32 %v6312_v45, %v6055_v36  ;;  %v4574_v44 = vadd.f32 %v4446_v37, %v4189_v53  ;;  %v14350_v30 = vld [vmem:[#allocation2 + $0x661] sm:$0xff]  ;;  %v7422_v53 = vpop.f32.mrf.mxu3  ;;  %v14360_v13 = vld [vmem:[#allocation2 + $0x669] sm:$0xff] }
 0x76b   : > { %v6698_v21 = vmul.f32 %v10948_v52, %v14329_v42  ;;  %v4575_v35 = vadd.f32 %v4447_v7, %v4190_v22  ;;  %v5216_v33 = vmul.f32 %v16682_v54, %v10772_v26  ;;  %v5217_v6 = vmul.f32 %v14206_v9, %v10772_v26 }
 0x76c   : > { %v6441_v5 = vadd.f32 %v6313_v40, %v6056_v38  ;;  %v6825_v45 = vadd.f32 %v6697_v32, %v6440_v8  ;;  %v4959_v37 = vadd.f32 %v4831_v49, %v4574_v44  ;;  %v5601_v36 = vmul.f32 %v14211_v12, %v10899_v19 }
 0x76d   : > { %v4960_v50 = vadd.f32 %v4832_v47, %v4575_v35  ;;  %v5602_v22 = vmul.f32 %v14215_v23, %v10899_v19  ;;  %v5987_v7 = vmul.f32 %v10945_v2, %v14340_v25  ;;  %v5988_v9 = vmul.f32 %v10945_v2, %v14342_v43  ;;  %v14368_v25 = vld [vmem:[#allocation2 + $0x662] sm:$0xff] }
 0x76e   : > { %v6826_v54 = vadd.f32 %v6698_v21, %v6441_v5  ;;  %v5344_v55 = vadd.f32 %v5216_v33, %v4959_v37  ;;  %v6372_v38 = vmul.f32 %v16130_v15, %v14350_v30  ;;  %v7345_v32 = vadd.f32 %v13876_v27, %v7344_v51 }
 0x76f   : > { %v6953_v49 = vmax.f32 %v6825_v45, 0.0  ;;  %v5345_v47 = vadd.f32 %v5217_v6, %v4960_v50  ;;  %v7423_v40 = vadd.f32 %v13876_v27, %v7422_v53  ;;  %v3646_v8 = vmul.f32 %v14082_v4, %v10654_v3  ;;  %v14376_v53 = vld [vmem:[#allocation2 + $0x66a] sm:$0xff] }
 0x770   : > { %v6954_v44 = vmax.f32 %v6826_v54, 0.0  ;;  %v5729_v35 = vadd.f32 %v5601_v36, %v5344_v55  ;;  %v7555_v21 = vmax.f32 %v7345_v32, 0.0  ;;  %v3647_v33 = vmul.f32 %v14088_v0, %v10654_v3 }
 0x771   : > { %v5730_v5 = vadd.f32 %v5602_v22, %v5345_v47  ;;  %v6373_v37 = vmul.f32 %v16130_v15, %v14360_v13  ;;  %v7586_v51 = vmax.f32 %v7423_v40, 0.0  ;;  %v4031_v6 = vmul.f32 %v14092_v10, %v16136_v24  ;;  %v14393_v40 = vld [vmem:[#allocation2 + $0x4c8] sm:$0xff] }
 0x772   : > { %v7051_v27 = vpack.c.bf16 %v6954_v44, %v6953_v49  ;;  %v6115_v45 = vadd.f32 %v5987_v7, %v5729_v35  ;;  %v7692_v4 = vadd.f32 %v14280_v58, %v7555_v21  ;;  %v4032_v55 = vmul.f32 %v14102_v28, %v16136_v24  ;;  %v14401_v35 = vld [vmem:[#allocation2 + $0x4c9] sm:$0xff]  ;;  %v7347_v21 = vpop.f32.mrf.mxu2 }
 0x773   : > { %v6116_v54 = vadd.f32 %v5988_v9, %v5730_v5  ;;  %v6757_v0 = vmul.f32 %v10948_v52, %v14368_v25  ;;  %v7728_v36 = vadd.f32 %v7727_v1, %v7586_v51  ;;  %v4159_v50 = vadd.f32 %v4031_v6, %v3646_v8  ;;  %v14395_v8 = vld [vmem:[#allocation2 + $0x4d0] sm:$0xff] }
 0x774   : > { %7311 = vmatmul.bf16.gmra.mxu1 %v7051_v27  ;;  %v6500_v22 = vadd.f32 %v6372_v38, %v6115_v45  ;;  %v4160_v32 = vadd.f32 %v4032_v55, %v3647_v33  ;;  %v4416_v10 = vmul.f32 %v14107_v20, %v10700_v62  ;;  %v4417_v7 = vmul.f32 %v14117_v14, %v10700_v62  ;;  %v14405_v6 = vld [vmem:[#allocation2 + $0x4d1] sm:$0xff]  ;;  %v7424_v27 = vpop.f32.mrf.mxu3  ;;  %v7277_v45 = vpop.f32.mrf.mxu1 }
 0x775   : > { %v6501_v49 = vadd.f32 %v6373_v37, %v6116_v54  ;;  %v6758_v58 = vmul.f32 %v10948_v52, %v14376_v53  ;;  %v4802_v28 = vmul.f32 %v14246_v56, %v10742_v34  ;;  %v4801_v38 = vmul.f32 %v14244_v63, %v10742_v34  ;;  %16683 = vst [vmem:[#allocation154_spill] sm:$0xff] %v14405_v6 }
 0x776   : > { %v6885_v9 = vadd.f32 %v6757_v0, %v6500_v22  ;;  %v4544_v47 = vadd.f32 %v4416_v10, %v4159_v50  ;;  %v4545_v1 = vadd.f32 %v4417_v7, %v4160_v32  ;;  %v5186_v14 = vmul.f32 %v14251_v29, %v10772_v26  ;;  %v14415_v7 = vld [vmem:[#allocation2 + $0x4ca] sm:$0xff] }
 0x777   : > { %v6886_v20 = vadd.f32 %v6758_v58, %v6501_v49  ;;  %v5187_v44 = vmul.f32 %v14262_v31, %v10772_v26  ;;  %v5571_v51 = vmul.f32 %v14257_v48, %v10899_v19  ;;  %v5572_v54 = vmul.f32 %v14278_v59, %v10899_v19  ;;  %v14420_v49 = vld [vmem:[%s14848_s5] ss:$0 sm:$0xff] }
 0x778   : > { %v7013_v33 = vmax.f32 %v6885_v9, 0.0  ;;  %v4929_v5 = vadd.f32 %v4801_v38, %v4544_v47  ;;  %v4930_v37 = vadd.f32 %v4802_v28, %v4545_v1  ;;  %v5957_v0 = vmul.f32 %v10945_v2, %v14393_v40 }
 0x779   : > { %v7014_v55 = vmax.f32 %v6886_v20, 0.0  ;;  %v5958_v50 = vmul.f32 %v10945_v2, %v14395_v8  ;;  %v6342_v10 = vmul.f32 %v16130_v15, %v14401_v35  ;;  %v7348_v58 = vadd.f32 %v14420_v49, %v7347_v21 }
 0x77a   : > { %v5314_v22 = vadd.f32 %v5186_v14, %v4929_v5  ;;  %v5315_v32 = vadd.f32 %v5187_v44, %v4930_v37  ;;  %v6343_v9 = vmul.f32 %v16130_v15, %v14405_v6  ;;  %v7425_v47 = vadd.f32 %v14420_v49, %v7424_v27  ;;  %v14427_v14 = vld [vmem:[#allocation2 + $0x4d2] sm:$0xff] }
 0x77b   : > { %v7081_v28 = vpack.c.bf16 %v7014_v55, %v7013_v33  ;;  %v7278_v1 = vadd.f32 %v14420_v49, %v7277_v45  ;;  %v7556_v44 = vmax.f32 %v7348_v58, 0.0  ;;  %v3618_v5 = vmul.f32 %v14140_v46, %v10654_v3 }
 0x77c   : > { %v5699_v38 = vadd.f32 %v5571_v51, %v5314_v22  ;;  %v5700_v20 = vadd.f32 %v5572_v54, %v5315_v32  ;;  %v6727_v21 = vmul.f32 %v10948_v52, %v14415_v7  ;;  %v7587_v33 = vmax.f32 %v7425_v47, 0.0  ;;  %v16684_v22 = vld [vmem:[#allocation116_spill] sm:$0xff] }
 0x77d   : > { %7461 = vmatmul.bf16.gmra.mxu3 %v7081_v28  ;;  %v7528_v37 = vmax.f32 %v7278_v1, 0.0  ;;  %v3619_v55 = vmul.f32 %v14142_v16, %v10654_v3  ;;  %v14435_v45 = vadd.f32 %v7692_v4, %v7556_v44  ;;  %v4003_v51 = vmul.f32 %v14148_v17, %v16136_v24 }
 0x77e   : > { %v6085_v27 = vadd.f32 %v5957_v0, %v5699_v38  ;;  %v6086_v6 = vadd.f32 %v5958_v50, %v5700_v20  ;;  %v6728_v54 = vmul.f32 %v10948_v52, %v14427_v14  ;;  %v14441_v46 = vadd.f32 %v7728_v36, %v7587_v33 }
 0x77f   : > { %v14444_v32 = vadd.f32 %v16684_v22, %v7528_v37  ;;  %v4004_v58 = vmul.f32 %v14291_v60, %v16136_v24  ;;  %v4131_v0 = vadd.f32 %v4003_v51, %v3618_v5  ;;  %v4388_v4 = vmul.f32 %v14162_v41, %v10700_v62  ;;  %v6185_v60 = vld [vmem:[#allocation2 + $0x349] sm:$0xff] }
 0x780   : > { %v6470_v28 = vadd.f32 %v6342_v10, %v6085_v27  ;;  %v6471_v16 = vadd.f32 %v6343_v9, %v6086_v6  ;;  %v4389_v17 = vmul.f32 %v14174_v18, %v10700_v62  ;;  %v4774_v36 = vmul.f32 %v14301_v11, %v10742_v34  ;;  %v6186_v9 = vld [vmem:[#allocation2 + $0x351] sm:$0xff]  ;;  %v16685_v11 = vld [vmem:[#allocation140_spill] sm:$0xff] }
 0x781   : > { %v4132_v50 = vadd.f32 %v4004_v58, %v3619_v55  ;;  %v4516_v38 = vadd.f32 %v4388_v4, %v4131_v0  ;;  %v4773_v20 = vmul.f32 %v14295_v57, %v10742_v34  ;;  %v5158_v6 = vmul.f32 %v14303_v39, %v10772_v26  ;;  %v8079_v57 = vld [vmem:[#allocation2] sm:$0xff]  ;;  %v16687_v0 = vld [vmem:[#allocation166_spill] sm:$0xff] }
 0x782   : > { %v6855_v47 = vadd.f32 %v6727_v21, %v6470_v28  ;;  %v6856_v1 = vadd.f32 %v6728_v54, %v6471_v16  ;;  %v5159_v41 = vmul.f32 %v10772_v26, %v16680_v61  ;;  %v5543_v21 = vmul.f32 %v16685_v11, %v10899_v19  ;;  %v16686_v54 = vld [vmem:[#allocation168_spill] sm:$0xff]  ;;  %v6571_v16 = vld [vmem:[#allocation2 + $0x352] sm:$0xff] }
 0x783   : > { %v4517_v10 = vadd.f32 %v4389_v17, %v4132_v50  ;;  %v4901_v5 = vadd.f32 %v4773_v20, %v4516_v38  ;;  %v5544_v37 = vmul.f32 %v14329_v42, %v10899_v19  ;;  %v14465_v55 = vmul.f32 %v8079_v57, %v10945_v2  ;;  %v6570_v28 = vld [vmem:[#allocation2 + $0x34a] sm:$0xff]  ;;  %v16689_v17 = vld [vmem:[#allocation54_spill] sm:$0xff] }
 0x784   : > { %v6983_v44 = vmax.f32 %v6855_v47, 0.0  ;;  %v6984_v18 = vmax.f32 %v6856_v1, 0.0  ;;  %v6314_v39 = vmul.f32 %v16130_v15, %v6185_v60  ;;  %v6315_v61 = vmul.f32 %v16130_v15, %v6186_v9  ;;  %v16688_v42 = vld [vmem:[#allocation136_spill] sm:$0xff]  ;;  %v16690_v20 = vld [vmem:[#allocation189_spill] sm:$0xff]  ;;  %v14488_v11 = vld [vmem:[#allocation2 + $0x678] sm:$0xff] }
 0x785   : > { %v4902_v33 = vadd.f32 %v4774_v36, %v4517_v10  ;;  %v5286_v51 = vadd.f32 %v5158_v6, %v4901_v5  ;;  %v3678_v22 = vmul.f32 %v16686_v54, %v10654_v3  ;;  %v3679_v4 = vmul.f32 %v16687_v0, %v10654_v3  ;;  %v7279_v54 = vpop.f32.mrf.mxu1 }
 0x786   : > { %v7066_v27 = vpack.c.bf16 %v6984_v18, %v6983_v44  ;;  %v4063_v50 = vmul.f32 %v16688_v42, %v16136_v24  ;;  %v4064_v36 = vmul.f32 %v16689_v17, %v16136_v24  ;;  %v4448_v1 = vmul.f32 %v14211_v12, %v10700_v62  ;;  %v7349_v12 = vpop.f32.mrf.mxu2  ;;  %v14505_v17 = vld [vmem:[#allocation2 + $0x681] sm:$0xff] }
 0x787   : > { %v5287_v58 = vadd.f32 %v5159_v41, %v4902_v33  ;;  %v5671_v47 = vadd.f32 %v5543_v21, %v5286_v51  ;;  %v4449_v38 = vmul.f32 %v14215_v23, %v10700_v62  ;;  %v4833_v60 = vmul.f32 %v16690_v20, %v10742_v34  ;;  %v7427_v21 = vpop.f32.mrf.mxu3  ;;  %v14495_v51 = vld [vmem:[#allocation2 + $0x679] sm:$0xff] }
 0x788   : > { %7386 = vmatmul.bf16.gmra.mxu2 %v7066_v27  ;;  %v4191_v6 = vadd.f32 %v4063_v50, %v3678_v22  ;;  %v4192_v41 = vadd.f32 %v4064_v36, %v3679_v4  ;;  %v4834_v9 = vmul.f32 %v14342_v43, %v10742_v34  ;;  %v6699_v18 = vmul.f32 %v10948_v52, %v6570_v28  ;;  %v14493_v27 = vld [vmem:[#allocation2 + $0x680] sm:$0xff] }
 0x789   : > { %v5672_v10 = vadd.f32 %v5544_v37, %v5287_v58  ;;  %v6057_v44 = vadd.f32 %v14465_v55, %v5671_v47  ;;  %v6700_v5 = vmul.f32 %v10948_v52, %v6571_v16  ;;  %v5218_v37 = vmul.f32 %v14350_v30, %v10772_v26 }
 0x78a   : > { %v4576_v33 = vadd.f32 %v4448_v1, %v4191_v6  ;;  %v4577_v57 = vadd.f32 %v4449_v38, %v4192_v41  ;;  %v5219_v58 = vmul.f32 %v14360_v13, %v10772_v26  ;;  %v5603_v28 = vmul.f32 %v14368_v25, %v10899_v19 }
 0x78b   : > { %v6058_v23 = vadd.f32 %v14465_v55, %v5672_v10  ;;  %v6442_v22 = vadd.f32 %v6314_v39, %v6057_v44  ;;  %v5604_v16 = vmul.f32 %v14376_v53, %v10899_v19  ;;  %v5989_v50 = vmul.f32 %v10945_v2, %v14488_v11 }
 0x78c   : > { %v4961_v4 = vadd.f32 %v4833_v60, %v4576_v33  ;;  %v4962_v42 = vadd.f32 %v4834_v9, %v4577_v57  ;;  %v5990_v39 = vmul.f32 %v10945_v2, %v14493_v27  ;;  %v6374_v47 = vmul.f32 %v16130_v15, %v14495_v51 }
 0x78d   : > { %v6443_v0 = vadd.f32 %v6315_v61, %v6058_v23  ;;  %v6827_v36 = vadd.f32 %v6699_v18, %v6442_v22  ;;  %v7350_v1 = vadd.f32 %v14420_v49, %v7349_v12  ;;  %v14512_v61 = vld [vmem:[#allocation2 + $0x67a] sm:$0xff]  ;;  %v7428_v60 = vadd.f32 %v14420_v49, %v7427_v21  ;;  %v14518_v22 = vld [vmem:[#allocation2 + $0x682] sm:$0xff] }
 0x78e   : > { %v5346_v10 = vadd.f32 %v5218_v37, %v4961_v4  ;;  %v5347_v6 = vadd.f32 %v5219_v58, %v4962_v42  ;;  %v6375_v9 = vmul.f32 %v16130_v15, %v14505_v17  ;;  %v7280_v18 = vadd.f32 %v14420_v49, %v7279_v54 }
 0x78f   : > { %v6828_v38 = vadd.f32 %v6700_v5, %v6443_v0  ;;  %v6955_v41 = vmax.f32 %v6827_v36, 0.0  ;;  %v7557_v44 = vmax.f32 %v7350_v1, 0.0  ;;  %v7588_v12 = vmax.f32 %v7428_v60, 0.0  ;;  %v7352_v1 = vpop.f32.mrf.mxu2 }
 0x790   : > { %v5731_v33 = vadd.f32 %v5603_v28, %v5346_v10  ;;  %v5732_v57 = vadd.f32 %v5604_v16, %v5347_v6  ;;  %v6759_v5 = vmul.f32 %v10948_v52, %v14512_v61  ;;  %v7529_v21 = vmax.f32 %v7280_v18, 0.0  ;;  %v7282_v10 = vpop.f32.mrf.mxu1 }
 0x791   : > { %v6956_v23 = vmax.f32 %v6828_v38, 0.0  ;;  %v14523_v37 = vadd.f32 %v14435_v45, %v7557_v44  ;;  %v3648_v58 = vmul.f32 %v14244_v63, %v10654_v3  ;;  %v7730_v54 = vadd.f32 %v14441_v46, %v7588_v12  ;;  %v7429_v38 = vpop.f32.mrf.mxu3  ;;  %v16691_v12 = vld [vmem:[#allocation154_spill] sm:$0xff] }
 0x792   : > { %v6117_v4 = vadd.f32 %v5989_v50, %v5731_v33  ;;  %v6118_v42 = vadd.f32 %v5990_v39, %v5732_v57  ;;  %v6760_v28 = vmul.f32 %v10948_v52, %v14518_v22  ;;  %v14531_v16 = vadd.f32 %v14444_v32, %v7529_v21  ;;  %v14553_v33 = vld [vmem:[#allocation2 + $0x4e1] sm:$0xff] }
 0x793   : > { %v7052_v0 = vpack.c.bf16 %v6956_v23, %v6955_v41  ;;  %v3649_v36 = vmul.f32 %v14246_v56, %v10654_v3  ;;  %v4033_v45 = vmul.f32 %v14251_v29, %v16136_v24  ;;  %v4034_v46 = vmul.f32 %v14262_v31, %v16136_v24  ;;  %v14549_v31 = vld [vmem:[#allocation2 + $0x4e8] sm:$0xff] }
 0x794   : > { %v6502_v63 = vadd.f32 %v6374_v47, %v6117_v4  ;;  %v6503_v50 = vadd.f32 %v6375_v9, %v6118_v42  ;;  %v4418_v39 = vmul.f32 %v14257_v48, %v10700_v62  ;;  %v4419_v6 = vmul.f32 %v14278_v59, %v10700_v62  ;;  %v14547_v9 = vld [vmem:[#allocation2 + $0x4e0] sm:$0xff] }
 0x795   : > { %7316 = vmatmul.bf16.gmra.mxu1 %v7052_v0  ;;  %v4161_v32 = vadd.f32 %v4033_v45, %v3648_v58  ;;  %v4162_v41 = vadd.f32 %v4034_v46, %v3649_v36  ;;  %v4804_v29 = vmul.f32 %v14395_v8, %v10742_v34  ;;  %v4803_v47 = vmul.f32 %v14393_v40, %v10742_v34  ;;  %v14565_v36 = vld [vmem:[#allocation2 + $0x4e9] sm:$0xff] }
 0x796   : > { %v6887_v56 = vadd.f32 %v6759_v5, %v6502_v63  ;;  %v6888_v60 = vadd.f32 %v6760_v28, %v6503_v50  ;;  %v5188_v59 = vmul.f32 %v14401_v35, %v10772_v26  ;;  %v5189_v5 = vmul.f32 %v16691_v12, %v10772_v26 }
 0x797   : > { %v4546_v44 = vadd.f32 %v4418_v39, %v4161_v32  ;;  %v4547_v23 = vadd.f32 %v4419_v6, %v4162_v41  ;;  %v5573_v21 = vmul.f32 %v14415_v7, %v10899_v19  ;;  %v5574_v58 = vmul.f32 %v14427_v14, %v10899_v19  ;;  %v14571_v32 = vld [vmem:[#allocation2 + $0x4e2] sm:$0xff] }
 0x798   : > { %v7015_v48 = vmax.f32 %v6887_v56, 0.0  ;;  %v7016_v18 = vmax.f32 %v6888_v60, 0.0  ;;  %v5959_v42 = vmul.f32 %v10945_v2, %v14547_v9  ;;  %v5960_v28 = vmul.f32 %v10945_v2, %v14549_v31 }
 0x799   : > { %v4931_v57 = vadd.f32 %v4803_v47, %v4546_v44  ;;  %v4932_v4 = vadd.f32 %v4804_v29, %v4547_v23  ;;  %v6344_v63 = vmul.f32 %v16130_v15, %v14553_v33  ;;  %v7353_v50 = vadd.f32 %v14420_v49, %v7352_v1  ;;  %v7354_v47 = vpop.f32.mrf.mxu2 }
 0x79a   : > { %v7082_v0 = vpack.c.bf16 %v7016_v18, %v7015_v48  ;;  %v7430_v46 = vadd.f32 %v14420_v49, %v7429_v38  ;;  %v7283_v6 = vadd.f32 %v14420_v49, %v7282_v10  ;;  %v3680_v56 = vmul.f32 %v16690_v20, %v10654_v3  ;;  %v7432_v38 = vpop.f32.mrf.mxu3  ;;  %v7284_v20 = vpop.f32.mrf.mxu1 }
 0x79b   : > { %v5316_v45 = vadd.f32 %v5188_v59, %v4931_v57  ;;  %v5317_v39 = vadd.f32 %v5189_v5, %v4932_v4  ;;  %v3681_v60 = vmul.f32 %v14342_v43, %v10654_v3  ;;  %v6345_v29 = vmul.f32 %v16130_v15, %v14565_v36  ;;  %v14584_v57 = vld [vmem:[#allocation2 + $0x4ea] sm:$0xff] }
 0x79c   : > { %7466 = vmatmul.bf16.gmra.mxu3 %v7082_v0  ;;  %v7558_v44 = vmax.f32 %v7353_v50, 0.0  ;;  %v7589_v1 = vmax.f32 %v7430_v46, 0.0  ;;  %v7530_v18 = vmax.f32 %v7283_v6, 0.0  ;;  %v4065_v23 = vmul.f32 %v14350_v30, %v16136_v24  ;;  %v14589_v0 = vpop.f32.mrf.mxu0 }
 0x79d   : > { %v5701_v41 = vadd.f32 %v5573_v21, %v5316_v45  ;;  %v5702_v48 = vadd.f32 %v5574_v58, %v5317_v39  ;;  %v4066_v10 = vmul.f32 %v14360_v13, %v16136_v24  ;;  %v6729_v43 = vmul.f32 %v10948_v52, %v14571_v32 }
 0x79e   : > { %v7695_v5 = vadd.f32 %v14523_v37, %v7558_v44  ;;  %v7731_v21 = vadd.f32 %v7730_v54, %v7589_v1  ;;  %v7662_v4 = vadd.f32 %v14531_v16, %v7530_v18  ;;  %v4193_v45 = vadd.f32 %v4065_v23, %v3680_v56  ;;  %v14604_v56 = vld [vmem:[#allocation2 + $0x698] sm:$0xff] }
 0x79f   : > { %v6087_v59 = vadd.f32 %v5959_v42, %v5701_v41  ;;  %v6088_v58 = vadd.f32 %v5960_v28, %v5702_v48  ;;  %v4194_v30 = vadd.f32 %v4066_v10, %v3681_v60  ;;  %v4450_v13 = vmul.f32 %v14368_v25, %v10700_v62  ;;  %v14614_v48 = vld [vmem:[#allocation2 + $0x691] sm:$0xff] }
 0x7a0   : > { %v4451_v42 = vmul.f32 %v14376_v53, %v10700_v62  ;;  %v4835_v46 = vmul.f32 %v14488_v11, %v10742_v34  ;;  %v6730_v37 = vmul.f32 %v10948_v52, %v14584_v57  ;;  %v4836_v54 = vmul.f32 %v14493_v27, %v10742_v34 }
 0x7a1   : > { %v6472_v50 = vadd.f32 %v6344_v63, %v6087_v59  ;;  %v6473_v39 = vadd.f32 %v6345_v29, %v6088_v58  ;;  %v4578_v28 = vadd.f32 %v4450_v13, %v4193_v45  ;;  %v14602_v63 = vld [vmem:[#allocation2 + $0x690] sm:$0xff]  ;;  %v5220_v53 = vmul.f32 %v14495_v51, %v10772_v26  ;;  %v14620_v45 = vld [vmem:[#allocation2 + $0x699] sm:$0xff] }
 0x7a2   : > { %v4579_v6 = vadd.f32 %v4451_v42, %v4194_v30  ;;  %v5221_v60 = vmul.f32 %v14505_v17, %v10772_v26  ;;  %v5605_v44 = vmul.f32 %v14512_v61, %v10899_v19  ;;  %v5606_v1 = vmul.f32 %v14518_v22, %v10899_v19  ;;  %v14622_v30 = vld [vmem:[#allocation2 + $0x692] sm:$0xff]  ;;  %v7357_v42 = vpop.f32.mrf.mxu2 }
 0x7a3   : > { %v6857_v16 = vadd.f32 %v6729_v43, %v6472_v50  ;;  %v6858_v25 = vadd.f32 %v6730_v37, %v6473_v39  ;;  %v4963_v41 = vadd.f32 %v4835_v46, %v4578_v28  ;;  %v5991_v10 = vmul.f32 %v10945_v2, %v14602_v63  ;;  %v7434_v46 = vpop.f32.mrf.mxu3 }
 0x7a4   : > { %v4964_v29 = vadd.f32 %v4836_v54, %v4579_v6  ;;  %v5992_v59 = vmul.f32 %v10945_v2, %v14604_v56  ;;  %v7355_v50 = vadd.f32 %v14420_v49, %v7354_v47  ;;  %v7433_v13 = vadd.f32 %v14420_v49, %v7432_v38  ;;  %v14629_v6 = vld [vmem:[#allocation2 + $0x69a] sm:$0xff] }
 0x7a5   : > { %v6985_v18 = vmax.f32 %v6857_v16, 0.0  ;;  %v6986_v23 = vmax.f32 %v6858_v25, 0.0  ;;  %v5348_v43 = vadd.f32 %v5220_v53, %v4963_v41  ;;  %v6376_v37 = vmul.f32 %v16130_v15, %v14614_v48  ;;  %v7287_v16 = vpop.f32.mrf.mxu1 }
 0x7a6   : > { %v5349_v58 = vadd.f32 %v5221_v60, %v4964_v29  ;;  %v7285_v54 = vadd.f32 %v14420_v49, %v7284_v20  ;;  %v7559_v25 = vmax.f32 %v7355_v50, 0.0  ;;  %v7590_v53 = vmax.f32 %v7433_v13, 0.0  ;;  %v14631_v60 = vpop.f32.mrf.mxu0 }
 0x7a7   : > { %v7067_v39 = vpack.c.bf16 %v6986_v23, %v6985_v18  ;;  %v5733_v2 = vadd.f32 %v5605_v44, %v5348_v43  ;;  %v6377_v47 = vmul.f32 %v16130_v15, %v14620_v45  ;;  %v6761_v38 = vmul.f32 %v10948_v52, %v14622_v30 }
 0x7a8   : > { %v5734_v28 = vadd.f32 %v5606_v1, %v5349_v58  ;;  %v7531_v41 = vmax.f32 %v7285_v54, 0.0  ;;  %v3650_v20 = vmul.f32 %v14393_v40, %v10654_v3  ;;  %v7696_v1 = vadd.f32 %v7695_v5, %v7559_v25 }
 0x7a9   : > { %7391 = vmatmul.bf16.gmra.mxu2 %v7067_v39  ;;  %v6119_v29 = vadd.f32 %v5991_v10, %v5733_v2  ;;  %v7732_v18 = vadd.f32 %v7731_v21, %v7590_v53  ;;  %v6762_v23 = vmul.f32 %v10948_v52, %v14629_v6  ;;  %v3651_v58 = vmul.f32 %v14395_v8, %v10654_v3 }
 0x7aa   : > { %v6120_v44 = vadd.f32 %v5992_v59, %v5734_v28  ;;  %v7663_v43 = vadd.f32 %v7662_v4, %v7531_v41  ;;  %v4035_v50 = vmul.f32 %v14401_v35, %v16136_v24  ;;  %v4036_v54 = vmul.f32 %v16691_v12, %v16136_v24  ;;  %v14655_v12 = vpop.f32.mrf.mxu2  ;;  %v6217_v41 = vld [vmem:[#allocation2 + $0x4f9] sm:$0xff] }
 0x7ab   : > { %v6504_v13 = vadd.f32 %v6376_v37, %v6119_v29  ;;  %v4420_v40 = vmul.f32 %v14415_v7, %v10700_v62  ;;  %v4421_v4 = vmul.f32 %v14427_v14, %v10700_v62  ;;  %v4805_v8 = vmul.f32 %v14547_v9, %v10742_v34  ;;  %v14657_v25 = vpop.f32.mrf.mxu3 }
 0x7ac   : > { %v6505_v39 = vadd.f32 %v6377_v47, %v6120_v44  ;;  %v4163_v5 = vadd.f32 %v4035_v50, %v3650_v20  ;;  %v4164_v59 = vadd.f32 %v4036_v54, %v3651_v58  ;;  %v4806_v35 = vmul.f32 %v14549_v31, %v10742_v34 }
 0x7ad   : > { %v6889_v21 = vadd.f32 %v6761_v38, %v6504_v13  ;;  %v5190_v47 = vmul.f32 %v14553_v33, %v10772_v26  ;;  %v5575_v14 = vmul.f32 %v14571_v32, %v10899_v19  ;;  %v14663_v38 = vpop.f32.mrf.mxu1  ;;  %v5191_v29 = vmul.f32 %v14565_v36, %v10772_v26  ;;  %v6602_v33 = vld [vmem:[#allocation2 + $0x4fa] sm:$0xff] }
 0x7ae   : > { %v6890_v10 = vadd.f32 %v6762_v23, %v6505_v39  ;;  %v4548_v2 = vadd.f32 %v4420_v40, %v4163_v5  ;;  %v4549_v7 = vadd.f32 %v4421_v4, %v4164_v59  ;;  %v14665_v20 = vpop.f32.mrf.mxu0  ;;  %v6218_v23 = vld [vmem:[#allocation2 + $0x501] sm:$0xff]  ;;  %v5576_v58 = vmul.f32 %v14584_v57, %v10899_v19 }
 0x7af   : > { %v7017_v37 = vmax.f32 %v6889_v21, 0.0  ;;  %v7358_v50 = vadd.f32 %v14420_v49, %v7357_v42  ;;  %v6346_v39 = vmul.f32 %v16130_v15, %v6217_v41  ;;  %v7435_v54 = vadd.f32 %v14420_v49, %v7434_v46  ;;  %v6603_v5 = vld [vmem:[#allocation2 + $0x502] sm:$0xff] }
 0x7b0   : > { %v7018_v28 = vmax.f32 %v6890_v10, 0.0  ;;  %v4933_v53 = vadd.f32 %v4805_v8, %v4548_v2  ;;  %v4934_v31 = vadd.f32 %v4806_v35, %v4549_v7  ;;  %v6347_v40 = vmul.f32 %v16130_v15, %v6218_v23 }
 0x7b1   : > { %v7560_v21 = vmax.f32 %v7358_v50, 0.0  ;;  %v7288_v36 = vadd.f32 %v14420_v49, %v7287_v16  ;;  %v6731_v57 = vmul.f32 %v10948_v52, %v6602_v33  ;;  %v7591_v4 = vmax.f32 %v7435_v54, 0.0 }
 0x7b2   : > { %v7083_v9 = vpack.c.bf16 %v7018_v28, %v7017_v37  ;;  %v5318_v44 = vadd.f32 %v5190_v47, %v4933_v53  ;;  %v5319_v32 = vadd.f32 %v5191_v29, %v4934_v31  ;;  %v3682_v8 = vmul.f32 %v14488_v11, %v10654_v3  ;;  %v7362_v35 = vpop.f32.mrf.mxu2 }
 0x7b3   : > { %v7697_v2 = vadd.f32 %v7696_v1, %v7560_v21  ;;  %v7532_v42 = vmax.f32 %v7288_v36, 0.0  ;;  %v3683_v46 = vmul.f32 %v14493_v27, %v10654_v3  ;;  %v7439_v37 = vpop.f32.mrf.mxu3  ;;  %v6732_v16 = vmul.f32 %v10948_v52, %v6603_v5 }
 0x7b4   : > { %7471 = vmatmul.bf16.gmra.mxu3 %v7083_v9  ;;  %v5703_v13 = vadd.f32 %v5575_v14, %v5318_v44  ;;  %v5704_v10 = vadd.f32 %v5576_v58, %v5319_v32  ;;  %v7733_v53 = vadd.f32 %v7732_v18, %v7591_v4  ;;  %v4067_v1 = vmul.f32 %v14495_v51, %v16136_v24  ;;  %v6249_v18 = vld [vmem:[#allocation2 + $0x6a9] sm:$0xff] }
 0x7b5   : > { %v7292_v47 = vpop.f32.mrf.mxu1  ;;  %v7664_v14 = vadd.f32 %v7663_v43, %v7532_v42  ;;  %v4068_v9 = vmul.f32 %v14505_v17, %v16136_v24  ;;  %v4452_v11 = vmul.f32 %v14512_v61, %v10700_v62  ;;  %v4453_v41 = vmul.f32 %v14518_v22, %v10700_v62  ;;  %v6250_v17 = vld [vmem:[#allocation2 + $0x6b1] sm:$0xff] }
 0x7b6   : > { %v6089_v59 = vadd.f32 %v14465_v55, %v5703_v13  ;;  %v6090_v28 = vadd.f32 %v14465_v55, %v5704_v10  ;;  %v4837_v31 = vmul.f32 %v14602_v63, %v10742_v34  ;;  %v4195_v29 = vadd.f32 %v4067_v1, %v3682_v8  ;;  %v6634_v44 = vld [vmem:[#allocation2 + $0x6aa] sm:$0xff]  ;;  %v6635_v61 = vld [vmem:[#allocation2 + $0x6b2] sm:$0xff]  ;;  %v14698_v23 = vpop.f32.mrf.mxu0 }
 0x7b7   : > { %v4196_v43 = vadd.f32 %v4068_v9, %v3683_v46  ;;  %v4838_v51 = vmul.f32 %v14604_v56, %v10742_v34  ;;  %v5222_v24 = vmul.f32 %v14614_v48, %v10772_v26  ;;  %v5223_v62 = vmul.f32 %v14620_v45, %v10772_v26 }
 0x7b8   : > { %v6474_v7 = vadd.f32 %v6346_v39, %v6089_v59  ;;  %v6475_v3 = vadd.f32 %v6347_v40, %v6090_v28  ;;  %v5607_v22 = vmul.f32 %v14622_v30, %v10899_v19  ;;  %v4580_v63 = vadd.f32 %v4452_v11, %v4195_v29 }
 0x7b9   : > { %v4581_v50 = vadd.f32 %v4453_v41, %v4196_v43  ;;  %v5608_v34 = vmul.f32 %v14629_v6, %v10899_v19  ;;  %v6378_v56 = vmul.f32 %v16130_v15, %v6249_v18  ;;  %v6379_v32 = vmul.f32 %v16130_v15, %v6250_v17 }
 0x7ba   : > { %v6859_v27 = vadd.f32 %v6731_v57, %v6474_v7  ;;  %v6860_v58 = vadd.f32 %v6732_v16, %v6475_v3  ;;  %v6763_v13 = vmul.f32 %v10948_v52, %v6634_v44  ;;  %v6764_v39 = vmul.f32 %v10948_v52, %v6635_v61  ;;  %v7364_v30 = vpop.f32.mrf.mxu2 }
 0x7bb   : > { %v4965_v54 = vadd.f32 %v4837_v31, %v4580_v63  ;;  %v4966_v40 = vadd.f32 %v4838_v51, %v4581_v50  ;;  %v7360_v26 = vadd.f32 %v14420_v49, %v14655_v12  ;;  %v7438_v45 = vadd.f32 %v14420_v49, %v14657_v25  ;;  %v7442_v5 = vpop.f32.mrf.mxu3 }
 0x7bc   : > { %v6987_v33 = vmax.f32 %v6859_v27, 0.0  ;;  %v6988_v48 = vmax.f32 %v6860_v58, 0.0  ;;  %v7290_v6 = vadd.f32 %v14420_v49, %v14663_v38  ;;  %v7363_v15 = vadd.f32 %v14420_v49, %v7362_v35 }
 0x7bd   : > { %v7440_v21 = vadd.f32 %v14420_v49, %v7439_v37  ;;  %v14718_v36 = vpop.f32.mrf.mxu1  ;;  %v5350_v52 = vadd.f32 %v5222_v24, %v4965_v54  ;;  %v5351_v10 = vadd.f32 %v5223_v62, %v4966_v40  ;;  %v7561_v59 = vmax.f32 %v7360_v26, 0.0 }
 0x7be   : > { %v7068_v19 = vpack.c.bf16 %v6988_v48, %v6987_v33  ;;  %v7592_v57 = vmax.f32 %v7438_v45, 0.0  ;;  %v7533_v12 = vmax.f32 %v7290_v6, 0.0  ;;  %v7562_v4 = vmax.f32 %v7363_v15, 0.0  ;;  %v14725_v27 = vpop.f32.mrf.mxu0 }
 0x7bf   : > { %v7593_v25 = vmax.f32 %v7440_v21, 0.0  ;;  %v7293_v42 = vadd.f32 %v14420_v49, %v7292_v47  ;;  %v5735_v8 = vadd.f32 %v5607_v22, %v5350_v52  ;;  %v5736_v46 = vadd.f32 %v5608_v34, %v5351_v10 }
 0x7c0   : > { %7396 = vmatmul.bf16.gmra.mxu2 %v7068_v19  ;;  %v7698_v28 = vadd.f32 %v7697_v2, %v7561_v59  ;;  %v7734_v38 = vadd.f32 %v7733_v53, %v7592_v57  ;;  %v7665_v7 = vadd.f32 %v7664_v14, %v7533_v12  ;;  %v7365_v37 = vadd.f32 %v14420_v49, %v7364_v30 }
 0x7c1   : > { %v7534_v35 = vmax.f32 %v7293_v42, 0.0  ;;  %v7443_v16 = vadd.f32 %v14420_v49, %v7442_v5  ;;  %v6121_v1 = vadd.f32 %v14465_v55, %v5735_v8  ;;  %v6122_v9 = vadd.f32 %v14465_v55, %v5736_v46 }
 0x7c2   : > { %v7699_v11 = vadd.f32 %v7698_v28, %v7562_v4  ;;  %v7735_v3 = vadd.f32 %v7734_v38, %v7593_v25  ;;  %v7563_v47 = vmax.f32 %v7365_v37, 0.0  ;;  %v7367_v14 = vpop.f32.mrf.mxu2 }
 0x7c3   : > { %v14727_v41 = vadd.f32 %v7665_v7, %v7534_v35  ;;  %v7594_v31 = vmax.f32 %v7443_v16, 0.0  ;;  %v6506_v2 = vadd.f32 %v6378_v56, %v6121_v1  ;;  %v6507_v53 = vadd.f32 %v6379_v32, %v6122_v9  ;;  %v7444_v18 = vpop.f32.mrf.mxu3 }
 0x7c4   : > { %v7700_v29 = vadd.f32 %v7699_v11, %v7563_v47  ;;  %v7368_v51 = vadd.f32 %v14420_v49, %v7367_v14  ;;  %v7445_v44 = vadd.f32 %v14420_v49, %v7444_v18  ;;  %v7215_v35 = vadd.f32 %v14420_v49, %v14589_v0 }
 0x7c5   : > { %v7736_v43 = vadd.f32 %v7735_v3, %v7594_v31  ;;  %v14730_v24 = vpop.f32.mrf.mxu1  ;;  %v6891_v17 = vadd.f32 %v6763_v13, %v6506_v2  ;;  %v6892_v55 = vadd.f32 %v6764_v39, %v6507_v53  ;;  %v7218_v16 = vadd.f32 %v14420_v49, %v14631_v60  ;;  %v16692_v2 = vld [vmem:[#allocation164_spill] sm:$0xff] }
 0x7c6   : > { %v7564_v61 = vmax.f32 %v7368_v51, 0.0  ;;  %v7595_v62 = vmax.f32 %v7445_v44, 0.0  ;;  %v7227_v40 = vpop.f32.mrf.mxu0  ;;  %v7503_v1 = vmax.f32 %v7215_v35, 0.0  ;;  %v7220_v9 = vadd.f32 %v14420_v49, %v14665_v20 }
 0x7c7   : > { %v7019_v58 = vmax.f32 %v6891_v17, 0.0  ;;  %v7020_v33 = vmax.f32 %v6892_v55, 0.0  ;;  %v7504_v3 = vmax.f32 %v7218_v16, 0.0  ;;  %v7223_v47 = vadd.f32 %v14420_v49, %v14698_v23 }
 0x7c8   : > { %v7701_v22 = vadd.f32 %v7700_v29, %v7564_v61  ;;  %v7737_v50 = vadd.f32 %v7736_v43, %v7595_v62  ;;  %v7630_v53 = vadd.f32 %v16692_v2, %v7503_v1  ;;  %v7505_v14 = vmax.f32 %v7220_v9, 0.0 }
 0x7c9   : > { %v7084_v63 = vpack.c.bf16 %v7020_v33, %v7019_v58  ;;  %v7225_v0 = vadd.f32 %v14420_v49, %v14725_v27  ;;  %v7506_v29 = vmax.f32 %v7223_v47, 0.0  ;;  %v7228_v43 = vadd.f32 %v14420_v49, %v7227_v40 }
 0x7ca   : > { %v7369_v34 = vpop.f32.mrf.mxu2  ;;  %v7631_v60 = vadd.f32 %v7630_v53, %v7504_v3  ;;  %v7295_v33 = vadd.f32 %v14420_v49, %v14718_v36  ;;  %v8093_v1 = vmov 256.0  }
 0x7cb   : > { %7476 = vmatmul.bf16.gmra.mxu3 %v7084_v63  ;;  %v7447_v56 = vpop.f32.mrf.mxu3  ;;  %v7370_v48 = vadd.f32 %v14420_v49, %v7369_v34  ;;  %v7507_v17 = vmax.f32 %v7225_v0, 0.0  ;;  %v7508_v23 = vmax.f32 %v7228_v43, 0.0  ;;  %v7298_v63 = vadd.f32 %v14420_v49, %v14730_v24 }
 0x7cc   : > { %v7448_v32 = vadd.f32 %v14420_v49, %v7447_v56  ;;  %v7632_v51 = vadd.f32 %v7631_v60, %v7505_v14  ;;  %v7535_v40 = vmax.f32 %v7295_v33, 0.0  ;;  %7934 = vrcp.f32 %v8093_v1 }
 0x7cd   : > { %v7299_v54 = vpop.f32.mrf.mxu1  ;;  %v7565_v13 = vmax.f32 %v7370_v48, 0.0 }
 0x7ce   : > { %v7596_v39 = vmax.f32 %v7448_v32, 0.0  ;;  %v7229_v10 = vpop.f32.mrf.mxu0  ;;  %v7633_v44 = vadd.f32 %v7632_v51, %v7506_v29 }
 0x7cf   : > { %v7702_v26 = vadd.f32 %v7701_v22, %v7565_v13  ;;  %v7230_v55 = vadd.f32 %v14420_v49, %v7229_v10  ;;  %v7300_v13 = vadd.f32 %v14420_v49, %v7299_v54 }
 0x7d0   : > { %v7738_v45 = vadd.f32 %v7737_v50, %v7596_v39  ;;  %v7634_v27 = vadd.f32 %v7633_v44, %v7507_v17 }
 0x7d1   : > { %v7509_v62 = vmax.f32 %v7230_v55, 0.0 }
 0x7d2   : > { %v7372_v30 = vpop.f32.mrf.mxu2  ;;  %v7635_v34 = vadd.f32 %v7634_v27, %v7508_v23 }
 0x7d3   : > { %v7449_v5 = vpop.f32.mrf.mxu3  ;;  %v7373_v19 = vadd.f32 %v14420_v49, %v7372_v30  ;;  %v7536_v30 = vmax.f32 %v7298_v63, 0.0 }
 0x7d4   : > { %v7450_v6 = vadd.f32 %v14420_v49, %v7449_v5  ;;  %v7636_v39 = vadd.f32 %v7635_v34, %v7509_v62 }
 0x7d5   : > { %v7302_v15 = vpop.f32.mrf.mxu1  ;;  %v7566_v21 = vmax.f32 %v7373_v19, 0.0 }
 0x7d6   : > { %v7597_v52 = vmax.f32 %v7450_v6, 0.0  ;;  %v7232_v46 = vpop.f32.mrf.mxu0  ;;  %v7303_v5 = vadd.f32 %v14420_v49, %v7302_v15  ;;  %v7667_v6 = vadd.f32 %v14727_v41, %v7535_v40 }
 0x7d7   : > { %v14737_v59 = vadd.f32 %v7702_v26, %v7566_v21  ;;  %v7233_v61 = vadd.f32 %v14420_v49, %v7232_v46  ;;  %v7537_v21 = vmax.f32 %v7300_v13, 0.0 }
 0x7d8   : > { %v7739_v57 = vadd.f32 %v7738_v45, %v7597_v52  ;;  %v7668_v54 = vadd.f32 %v7667_v6, %v7536_v30 }
 0x7d9   : > { %v7510_v56 = vmax.f32 %v7233_v61, 0.0 }
 0x7da   : > { %v14742_v38 = vpop.f32.mrf.mxu2 }
 0x7db   : > { %v7452_v12 = vpop.f32.mrf.mxu3  ;;  %v7637_v19 = vadd.f32 %v7636_v39, %v7510_v56 }
 0x7dc   : > { %v7453_v4 = vadd.f32 %v14420_v49, %v7452_v12 }
 0x7dd   : > { %v7304_v25 = vpop.f32.mrf.mxu1 }
 0x7de   : > { %v7598_v42 = vmax.f32 %v7453_v4, 0.0  ;;  %v7234_v7 = vpop.f32.mrf.mxu0  ;;  %v7305_v52 = vadd.f32 %v14420_v49, %v7304_v25  ;;  %v7538_v4 = vmax.f32 %v7303_v5, 0.0 }
 0x7df   : > { %v7235_v22 = vadd.f32 %v14420_v49, %v7234_v7  ;;  %v7669_v7 = vadd.f32 %v7668_v54, %v7537_v21 }
 0x7e0   : > { %v14740_v8 = vadd.f32 %v7739_v57, %v7598_v42  ;;  %v7539_v35 = vmax.f32 %v7305_v52, 0.0 }
 0x7e1   : > { %v7511_v26 = vmax.f32 %v7235_v22, 0.0  ;;  %v7670_v9 = vadd.f32 %v7669_v7, %v7538_v4 }
 0x7e2   : > { %v14750_v11 = vpop.f32.mrf.mxu2 }
 0x7e3   : > { %v14754_v31 = vpop.f32.mrf.mxu3  ;;  %v7638_v10 = vadd.f32 %v7637_v19, %v7511_v26  ;;  %v7671_v2 = vadd.f32 %v7670_v9, %v7539_v35 }
 0x7e5   : > { %v7307_v28 = vpop.f32.mrf.mxu1 }
 0x7e6   : > { %v7237_v18 = vpop.f32.mrf.mxu0  ;;  %v7308_v42 = vadd.f32 %v14420_v49, %v7307_v28 }
 0x7e7   : > { %v7238_v32 = vadd.f32 %v14420_v49, %v7237_v18 }
 0x7e8   : > { %v7540_v25 = vmax.f32 %v7308_v42, 0.0 }
 0x7e9   : > { %v7512_v24 = vmax.f32 %v7238_v32, 0.0 }
 0x7ea   : > { %v14762_v58 = vpop.f32.mrf.mxu2  ;;  %v7672_v0 = vadd.f32 %v7671_v2, %v7540_v25 }
 0x7eb   : > { %v14769_v50 = vpop.f32.mrf.mxu3  ;;  %v7639_v46 = vadd.f32 %v7638_v10, %v7512_v24 }
 0x7ed   : > { %v7309_v37 = vpop.f32.mrf.mxu1 }
 0x7ee   : > { %v7239_v48 = vpop.f32.mrf.mxu0  ;;  %v7310_v15 = vadd.f32 %v14420_v49, %v7309_v37  ;;  %v7935_v37 = vpop.eup %7934 }
 0x7ef   : > { %v7240_v45 = vadd.f32 %v14420_v49, %v7239_v48  ;;  %vm7763_vm0 = vweird.f32 %v7935_v37 }
 0x7f0   : > { %v7541_v53 = vmax.f32 %v7310_v15, 0.0 }
 0x7f1   : > { %v7513_v12 = vmax.f32 %v7240_v45, 0.0 }
 0x7f2   : > { %v14777_v57 = vpop.f32.mrf.mxu2  ;;  %v7673_v43 = vadd.f32 %v7672_v0, %v7541_v53 }
 0x7f3   : > { %v14781_v16 = vpop.f32.mrf.mxu3  ;;  %v7640_v41 = vadd.f32 %v7639_v46, %v7513_v12  ;;  %v14798_v46 = vld [vmem:[%s14848_s5] ss:$0 sm:$0xff] }
 0x7f4   : > { %v7375_v7 = vadd.f32 %v14798_v46, %v14742_v38  ;;  %v7378_v35 = vadd.f32 %v14798_v46, %v14750_v11  ;;  %v7380_v1 = vadd.f32 %v14798_v46, %v14762_v58  ;;  %v7383_v25 = vadd.f32 %v14798_v46, %v14777_v57 }
 0x7f5   : > { %v7312_v20 = vpop.f32.mrf.mxu1  ;;  %v7641_v28 = vrot.slane %v7640_v41, 4  ;;  %v7455_v58 = vadd.f32 %v14798_v46, %v14754_v31 }
 0x7f6   : > { %v7313_v3 = vadd.f32 %v14420_v49, %v7312_v20  ;;  %v7759_v20 = vmul.f32 256.0, %v7935_v37  ;;  %v7567_v15 = vmax.f32 %v7375_v7, 0.0  ;;  %v7568_v9 = vmax.f32 %v7378_v35, 0.0 }
 0x7f7   : > { %v7642_v17 = vadd.f32 %v7641_v28, %v7640_v41  ;;  %v7570_v38 = vmax.f32 %v7383_v25, 0.0 }
 0x7f8   : > { %v7542_v18 = vmax.f32 %v7313_v3, 0.0  ;;  %v7760_v34 = vsub.f32 1.0, %v7759_v20  ;;  %v7704_v3 = vadd.f32 %v14737_v59, %v7567_v15  ;;  %v7458_v59 = vadd.f32 %v14798_v46, %v14769_v50 }
 0x7f9   : > { %v7643_v62 = vrot.slane %v7642_v17, 2 }
 0x7fa   : > { %v7384_v29 = vpop.f32.mrf.mxu2  ;;  %v7674_v55 = vadd.f32 %v7673_v43, %v7542_v18  ;;  %v7761_v13 = vmul.f32 %v7935_v37, %v7760_v34 }
 0x7fb   : > { %v7644_v32 = vadd.f32 %v7643_v62, %v7642_v17  ;;  %v7385_v2 = vadd.f32 %v14798_v46, %v7384_v29 }
 0x7fc   : > { %v7762_v30 = vadd.f32 %v7935_v37, %v7761_v13 }
 0x7fd   : > { %v7314_v36 = vpop.f32.mrf.mxu1  ;;  %v7571_v0 = vmax.f32 %v7385_v2, 0.0 }
 0x7fe   : > { %v7315_v14 = vadd.f32 %v14420_v49, %v7314_v36  ;;  %v7645_v36 = vrot.slane %v7644_v32, 1  ;;  %v14789_v6 = vsel %vm7763_vm0, %v7935_v37, %v7762_v30 }
 0x800   : > { %v7543_v51 = vmax.f32 %v7315_v14, 0.0  ;;  %v14786_v44 = vpop.f32.mrf.mxu3  ;;  %v7646_v19 = vadd.f32 %v7645_v36, %v7644_v32  ;;  %v7705_v14 = vadd.f32 %v7704_v3, %v7568_v9 }
 0x801   : > { %v7463_v62 = vadd.f32 %v14798_v46, %v14786_v44 }
 0x802   : > { %v7675_v33 = vadd.f32 %v7674_v55, %v7543_v51  ;;  %v7765_v52 = vmul.f32 %v14789_v6, %v7646_v19  ;;  %v7599_v55 = vmax.f32 %v7455_v58, 0.0 }
 0x808   : > { %v7464_v39 = vpop.f32.mrf.mxu3 }
 0x80b   : > { %v7387_v48 = vpop.f32.mrf.mxu2 }
 0x80c   : > { %v7388_v28 = vadd.f32 %v14798_v46, %v7387_v48 }
 0x80e   : > { %v7572_v37 = vmax.f32 %v7388_v28, 0.0 }
 0x812   : > { %v7317_v47 = vpop.f32.mrf.mxu1 }
 0x813   : > { %v7318_v60 = vadd.f32 %v14420_v49, %v7317_v47  ;;  %v7569_v47 = vmax.f32 %v7380_v1, 0.0 }
 0x815   : > { %v7544_v23 = vmax.f32 %v7318_v60, 0.0  ;;  %v7706_v11 = vadd.f32 %v7705_v14, %v7569_v47 }
 0x817   : > { %v7676_v22 = vadd.f32 %v7675_v33, %v7544_v23  ;;  %v7707_v60 = vadd.f32 %v7706_v11, %v7570_v38  ;;  %v7460_v23 = vadd.f32 %v14798_v46, %v14781_v16  ;;  %v7602_v16 = vmax.f32 %v7463_v62, 0.0 }
 0x819   : > { %v7708_v43 = vadd.f32 %v7707_v60, %v7571_v0  ;;  %v7601_v34 = vmax.f32 %v7460_v23, 0.0 }
 0x81a   : > { %v7319_v61 = vpop.f32.mrf.mxu1 }
 0x81b   : > { %v7320_v27 = vadd.f32 %v14420_v49, %v7319_v61  ;;  %v7389_v49 = vpop.f32.mrf.mxu2  ;;  %v7709_v20 = vadd.f32 %v7708_v43, %v7572_v37 }
 0x81c   : > { %v7390_v18 = vadd.f32 %v14798_v46, %v7389_v49 }
 0x81d   : > { %v7545_v63 = vmax.f32 %v7320_v27, 0.0  ;;  %v7600_v27 = vmax.f32 %v7458_v59, 0.0 }
 0x81e   : > { %v7573_v51 = vmax.f32 %v7390_v18, 0.0 }
 0x81f   : > { %v7677_v56 = vadd.f32 %v7676_v22, %v7545_v63  ;;  %v7467_v10 = vpop.f32.mrf.mxu3  ;;  %v7741_v63 = vadd.f32 %v14740_v8, %v7599_v55 }
 0x820   : > { %v7710_v22 = vadd.f32 %v7709_v20, %v7573_v51  ;;  %v7468_v13 = vadd.f32 %v14798_v46, %v7467_v10 }
 0x821   : > { %v7678_v40 = vrot.slane %v7677_v56, 4 }
 0x822   : > { %v7604_v49 = vmax.f32 %v7468_v13, 0.0 }
 0x823   : > { %v7679_v26 = vadd.f32 %v7678_v40, %v7677_v56  ;;  %v7465_v56 = vadd.f32 %v14798_v46, %v7464_v39  ;;  %v7742_v40 = vadd.f32 %v7741_v63, %v7600_v27 }
 0x825   : > { %v7680_v45 = vrot.slane %v7679_v26, 2  ;;  %v7743_v30 = vadd.f32 %v7742_v40, %v7601_v34 }
 0x827   : > { %v7681_v5 = vadd.f32 %v7680_v45, %v7679_v26  ;;  %v7469_v42 = vpop.f32.mrf.mxu3  ;;  %v7744_v8 = vadd.f32 %v7743_v30, %v7602_v16 }
 0x828   : > { %v7470_v44 = vadd.f32 %v14798_v46, %v7469_v42 }
 0x829   : > { %v7682_v24 = vrot.slane %v7681_v5, 1 }
 0x82b   : > { %v7683_v21 = vadd.f32 %v7682_v24, %v7681_v5  ;;  %v7603_v5 = vmax.f32 %v7465_v56, 0.0 }
 0x82c   : > { %v7392_v4 = vpop.f32.mrf.mxu2 }
 0x82d   : > { %v7766_v12 = vmul.f32 %v14789_v6, %v7683_v21  ;;  %v7393_v57 = vadd.f32 %v14798_v46, %v7392_v4  ;;  %v7605_v4 = vmax.f32 %v7470_v44, 0.0 }
 0x82f   : > { %v14793_v54 = vsel %vm7773_vm1, %v7766_v12, %v7765_v52  ;;  %v7574_v61 = vmax.f32 %v7393_v57, 0.0  ;;  %v7745_v12 = vadd.f32 %v7744_v8, %v7603_v5 }
 0x831   : > { %v7711_v48 = vadd.f32 %v7710_v22, %v7574_v61  ;;  %v7746_v35 = vadd.f32 %v7745_v12, %v7604_v49 }
 0x833   : > { %v7747_v9 = vadd.f32 %v7746_v35, %v7605_v4 }
 0x834   : > { %v7394_v41 = vpop.f32.mrf.mxu2 }
 0x835   : > { %v7395_v17 = vadd.f32 %v14798_v46, %v7394_v41 }
 0x837   : > { %v7472_v53 = vpop.f32.mrf.mxu3  ;;  %v7575_v50 = vmax.f32 %v7395_v17, 0.0 }
 0x838   : > { %v7473_v39 = vadd.f32 %v14798_v46, %v7472_v53 }
 0x839   : > { %v7712_v36 = vadd.f32 %v7711_v48, %v7575_v50 }
 0x83a   : > { %v7606_v15 = vmax.f32 %v7473_v39, 0.0 }
 0x83c   : > { %v7748_v3 = vadd.f32 %v7747_v9, %v7606_v15 }
 0x83f   : > { %v7474_v33 = vpop.f32.mrf.mxu3 }
 0x840   : > { %v7475_v10 = vadd.f32 %v14798_v46, %v7474_v33 }
 0x842   : > { %v7607_v42 = vmax.f32 %v7475_v10, 0.0 }
 0x843   : > { %v7397_v29 = vpop.f32.mrf.mxu2 }
 0x844   : > { %v7398_v31 = vadd.f32 %v14798_v46, %v7397_v29  ;;  %v7749_v14 = vadd.f32 %v7748_v3, %v7607_v42 }
 0x846   : > { %v7576_v32 = vmax.f32 %v7398_v31, 0.0 }
 0x848   : > { %v7713_v19 = vadd.f32 %v7712_v36, %v7576_v32 }
 0x84b   : > { %v7399_v26 = vpop.f32.mrf.mxu2 }
 0x84c   : > { %v7400_v45 = vadd.f32 %v14798_v46, %v7399_v26 }
 0x84e   : > { %v7577_v24 = vmax.f32 %v7400_v45, 0.0  ;;  %v7477_v52 = vpop.f32.mrf.mxu3 }
 0x84f   : > { %v7478_v1 = vadd.f32 %v14798_v46, %v7477_v52 }
 0x850   : > { %v7714_v21 = vadd.f32 %v7713_v19, %v7577_v24 }
 0x851   : > { %v7608_v47 = vmax.f32 %v7478_v1, 0.0 }
 0x852   : > { %v7715_v7 = vrot.slane %v7714_v21, 4 }
 0x853   : > { %v7750_v11 = vadd.f32 %v7749_v14, %v7608_v47 }
 0x854   : > { %v7716_v41 = vadd.f32 %v7715_v7, %v7714_v21 }
 0x856   : > { %v7717_v25 = vrot.slane %v7716_v41, 2  ;;  %v7479_v53 = vpop.f32.mrf.mxu3 }
 0x857   : > { %v7480_v38 = vadd.f32 %v14798_v46, %v7479_v53 }
 0x858   : > { %v7718_v2 = vadd.f32 %v7717_v25, %v7716_v41 }
 0x859   : > { %v7609_v0 = vmax.f32 %v7480_v38, 0.0 }
 0x85a   : > { %v7719_v28 = vrot.slane %v7718_v2, 1 }
 0x85b   : > { %v7751_v58 = vadd.f32 %v7750_v11, %v7609_v0 }
 0x85c   : > { %v7720_v18 = vadd.f32 %v7719_v28, %v7718_v2 }
 0x85d   : > { %v7752_v37 = vrot.slane %v7751_v58, 4 }
 0x85e   : > { %v7767_v60 = vmul.f32 %v14789_v6, %v7720_v18 }
 0x85f   : > { %v7753_v59 = vadd.f32 %v7752_v37, %v7751_v58 }
 0x860   : > { %v7776_v57 = vsel %vm7775_vm2, %v7767_v60, %v14793_v54 }
 0x861   : > { %v7754_v29 = vrot.slane %v7753_v59, 2 }
 0x863   : > { %v7755_v43 = vadd.f32 %v7754_v29, %v7753_v59 }
 0x865   : > { %v7756_v51 = vrot.slane %v7755_v43, 1 }
 0x867   : > { %v7757_v17 = vadd.f32 %v7756_v51, %v7755_v43 }
 0x869   : > { %v7768_v46 = vmul.f32 %v14789_v6, %v7757_v17 }
 0x86b   : > { %v7778_v55 = vsel %vm7777_vm3, %v7768_v46, %v7776_v57 }
 0x86c   : > { %7780 = vst [vmem:[%s254_s15] sm:$0xf] %v7778_v55 }
 0x86d PF: > { %s16_s21 = sadd.s32 1, %s8087_s21  }
 0x86e   : > { %p13_p5 = scmp.ge.s32.totalorder %s16_s21, 4  }
 0x870   :  { %15 = sbr.rel (!%p13_p5) target bundleno = 1 (0x1), region = 76 }

</bundles_post_ra>
